<compile_context>
chip_gen: v5e
topology: v5e:2x2
jax: 0.10.0
libtpu: 0.0.40
codegen_flags: <defaults>
</compile_context>

<pallas_src>
import functools
import math

import jax
import jax.numpy as jnp
from jax.experimental import pallas as pl
from jax.experimental.pallas import tpu as pltpu


def _round_up(x, m):
    return ((x + m - 1) // m) * m


def _choose_chunk_t(T, b_pad, target_rows=512):
    """Largest divisor of T whose row-chunk (chunk_t * b_pad) fits target_rows."""
    best = 1
    for ct in range(1, T + 1):
        if T % ct == 0 and ct * b_pad <= target_rows:
            best = ct
    return best


# ---------------------------------------------------------------------------
# In-kernel helpers
# ---------------------------------------------------------------------------
def _sigmoid(x):
    # sigmoid(x) == 0.5 * (tanh(x/2) + 1): single EUP op instead of exp + recip.
    return 0.5 * jnp.tanh(0.5 * x) + 0.5


def _lstm_cell(gates, c_prev, h_pad):
    """gates: (Bp, 4*Hp) f32, gate blocks are lane-aligned (Hp % 128 == 0)."""
    i_g = _sigmoid(gates[:, 0 * h_pad:1 * h_pad])
    f_g = _sigmoid(gates[:, 1 * h_pad:2 * h_pad])
    g_g = jnp.tanh(gates[:, 2 * h_pad:3 * h_pad])
    o_g = _sigmoid(gates[:, 3 * h_pad:4 * h_pad])
    c_new = f_g * c_prev + i_g * g_g
    h_new = o_g * jnp.tanh(c_new)
    return h_new, c_new


# ---------------------------------------------------------------------------
# Pallas kernels (one grid step == one time-chunk; h/c persist in scratch)
# ---------------------------------------------------------------------------
def lstm_seq_kernel(x_ref, wih_ref, whh_ref, b_ref, out_ref,
                    h_scr, c_scr, gin_scr, *, unroll):
    """One LSTM layer, one time-chunk per grid step, emits hidden seq (bf16)."""
    b_pad, h_pad = h_scr.shape
    chunk_rows = x_ref.shape[0]
    chunk_t = chunk_rows // b_pad

    @pl.when(pl.program_id(0) == 0)
    def _():
        h_scr[...] = jnp.zeros_like(h_scr)
        c_scr[...] = jnp.zeros_like(c_scr)

    # Hoisted input projection for this chunk: one big MXU GEMM, bias folded in.
    gin_scr[...] = (
        jnp.dot(x_ref[...], wih_ref[...], preferred_element_type=jnp.float32)
        + b_ref[...]
    )

    def step(t, carry):
        row = pl.multiple_of(t * b_pad, b_pad)
        gates = gin_scr[pl.ds(row, b_pad), :] + jnp.dot(
            h_scr[...].astype(jnp.bfloat16), whh_ref[...],
            preferred_element_type=jnp.float32)
        h_new, c_new = _lstm_cell(gates, c_scr[...], h_pad)
        h_scr[...] = h_new
        c_scr[...] = c_new
        out_ref[pl.ds(row, b_pad), :] = h_new.astype(out_ref.dtype)
        return carry

    jax.lax.fori_loop(0, chunk_t, step, 0, unroll=unroll)


def lstm_last_fc_kernel(x_ref, wih_ref, whh_ref, b_ref, wfc_ref, bfc_ref,
                        out_ref, h_scr, c_scr, gin_scr, *, unroll):
    """Final LSTM layer with Linear(hidden, 1) fused; no per-step HBM writeback."""
    b_pad, h_pad = h_scr.shape
    chunk_rows = x_ref.shape[0]
    chunk_t = chunk_rows // b_pad

    @pl.when(pl.program_id(0) == 0)
    def _():
        h_scr[...] = jnp.zeros_like(h_scr)
        c_scr[...] = jnp.zeros_like(c_scr)

    gin_scr[...] = (
        jnp.dot(x_ref[...], wih_ref[...], preferred_element_type=jnp.float32)
        + b_ref[...]
    )

    def step(t, carry):
        row = pl.multiple_of(t * b_pad, b_pad)
        gates = gin_scr[pl.ds(row, b_pad), :] + jnp.dot(
            h_scr[...].astype(jnp.bfloat16), whh_ref[...],
            preferred_element_type=jnp.float32)
        h_new, c_new = _lstm_cell(gates, c_scr[...], h_pad)
        h_scr[...] = h_new
        c_scr[...] = c_new
        return carry

    jax.lax.fori_loop(0, chunk_t, step, 0, unroll=unroll)

    @pl.when(pl.program_id(0) == pl.num_programs(0) - 1)
    def _():
        out_ref[...] = (
            jnp.dot(h_scr[...].astype(jnp.bfloat16), wfc_ref[...],
                    preferred_element_type=jnp.float32)
            + bfc_ref[...]
        )


# ---------------------------------------------------------------------------
# Wrappers
# ---------------------------------------------------------------------------
def _vmem_limit(nbytes):
    # Size the scoped VMEM limit to the footprint (with slack); cap for v7x (64 MiB).
    return int(min(48 << 20, max(16 << 20, 2 * nbytes)))


def run_lstm_layer_seq(seq, wih_t, whh_t, bias, b_pad, chunk_t):
    tb, f_in = seq.shape
    h_pad = whh_t.shape[0]
    g4 = 4 * h_pad
    chunk_rows = chunk_t * b_pad
    n_chunks = tb // chunk_rows

    vmem = (2 * chunk_rows * f_in * 2          # x chunk (bf16, double-buffered)
            + 2 * chunk_rows * h_pad * 2       # out chunk (bf16, double-buffered)
            + 2 * (f_in + h_pad) * g4 * 2      # weights (bf16)
            + 2 * g4 * 4                       # bias (f32)
            + chunk_rows * g4 * 4              # gin scratch (f32)
            + 2 * b_pad * h_pad * 4)           # h/c carries (f32)

    return pl.pallas_call(
        functools.partial(lstm_seq_kernel, unroll=min(8, chunk_t)),
        out_shape=jax.ShapeDtypeStruct((tb, h_pad), jnp.bfloat16),
        grid=(n_chunks,),
        in_specs=[
            pl.BlockSpec((chunk_rows, f_in), lambda c: (c, 0)),
            pl.BlockSpec((f_in, g4), lambda c: (0, 0)),
            pl.BlockSpec((h_pad, g4), lambda c: (0, 0)),
            pl.BlockSpec((1, g4), lambda c: (0, 0)),
        ],
        out_specs=pl.BlockSpec((chunk_rows, h_pad), lambda c: (c, 0)),
        scratch_shapes=[
            pltpu.VMEM((b_pad, h_pad), jnp.float32),      # h carry
            pltpu.VMEM((b_pad, h_pad), jnp.float32),      # c carry
            pltpu.VMEM((chunk_rows, g4), jnp.float32),    # chunk input gates
        ],
        compiler_params=pltpu.CompilerParams(
            dimension_semantics=("arbitrary",),
            vmem_limit_bytes=_vmem_limit(vmem)),
    )(seq, wih_t, whh_t, bias)


def run_lstm_layer_last_fc(seq, wih_t, whh_t, bias, wfc, bfc, b_pad, chunk_t):
    tb, f_in = seq.shape
    h_pad = whh_t.shape[0]
    g4 = 4 * h_pad
    out_pad = wfc.shape[1]
    chunk_rows = chunk_t * b_pad
    n_chunks = tb // chunk_rows

    vmem = (2 * chunk_rows * f_in * 2
            + 2 * (f_in + h_pad) * g4 * 2
            + 2 * g4 * 4
            + 2 * h_pad * out_pad * 2 + 2 * out_pad * 4   # fc weights
            + 2 * b_pad * out_pad * 4                     # fc output
            + chunk_rows * g4 * 4
            + 2 * b_pad * h_pad * 4)

    return pl.pallas_call(
        functools.partial(lstm_last_fc_kernel, unroll=min(8, chunk_t)),
        out_shape=jax.ShapeDtypeStruct((b_pad, out_pad), jnp.float32),
        grid=(n_chunks,),
        in_specs=[
            pl.BlockSpec((chunk_rows, f_in), lambda c: (c, 0)),
            pl.BlockSpec((f_in, g4), lambda c: (0, 0)),
            pl.BlockSpec((h_pad, g4), lambda c: (0, 0)),
            pl.BlockSpec((1, g4), lambda c: (0, 0)),
            pl.BlockSpec((h_pad, out_pad), lambda c: (0, 0)),
            pl.BlockSpec((1, out_pad), lambda c: (0, 0)),
        ],
        out_specs=pl.BlockSpec((b_pad, out_pad), lambda c: (0, 0)),
        scratch_shapes=[
            pltpu.VMEM((b_pad, h_pad), jnp.float32),      # h carry
            pltpu.VMEM((b_pad, h_pad), jnp.float32),      # c carry
            pltpu.VMEM((chunk_rows, g4), jnp.float32),    # chunk input gates
        ],
        compiler_params=pltpu.CompilerParams(
            dimension_semantics=("arbitrary",),
            vmem_limit_bytes=_vmem_limit(vmem)),
    )(seq, wih_t, whh_t, bias, wfc, bfc)


@jax.jit
def lstm_forward(x, params):
    """x: (B, T, F) float32 -> (B, 1) float32, matching the PyTorch module."""
    B, T, F = x.shape
    # Batch padded to a multiple of 16 so bf16 chunk stores are packed-row aligned.
    b_pad = max(16, _round_up(B, 16))
    chunk_t = _choose_chunk_t(T, b_pad)

    seq = jnp.transpose(x, (1, 0, 2))                        # (T, B, F)
    seq = jnp.pad(seq, ((0, 0), (0, b_pad - B), (0, 0)))     # (T, Bp, F)
    seq = seq.reshape(T * b_pad, F).astype(jnp.bfloat16)     # time-major rows, bf16

    layers = params["layers"]
    for (wih_t, whh_t, bias) in layers[:-1]:
        seq = run_lstm_layer_seq(seq, wih_t, whh_t, bias, b_pad, chunk_t)

    wih_t, whh_t, bias = layers[-1]
    out_pad = run_lstm_layer_last_fc(
        seq, wih_t, whh_t, bias, params["fc_w_t"], params["fc_b"], b_pad, chunk_t)
    return out_pad[:B, :1]


# ---------------------------------------------------------------------------
# Parameter init (PyTorch default: U(-1/sqrt(H), 1/sqrt(H))), then zero-pad to
# lane-aligned (Hp multiple of 128) gate blocks, cast MXU weights to bf16.
# Returns (packed_params_for_kernel, raw_params_for_reference).
# ---------------------------------------------------------------------------
def init_params(key, input_size, hidden_size, num_layers):
    k = 1.0 / math.sqrt(hidden_size)
    H = hidden_size
    Hp = _round_up(hidden_size, 128)
    OUT_PAD = 128

    layers, raw_layers = [], []
    in_orig, in_pad = input_size, input_size   # first layer input is not padded
    for _ in range(num_layers):
        key, k1, k2, k3, k4 = jax.random.split(key, 5)
        w_ih = jax.random.uniform(k1, (4 * H, in_orig), jnp.float32, -k, k)
        w_hh = jax.random.uniform(k2, (4 * H, H), jnp.float32, -k, k)
        b_ih = jax.random.uniform(k3, (4 * H,), jnp.float32, -k, k)
        b_hh = jax.random.uniform(k4, (4 * H,), jnp.float32, -k, k)
        b = b_ih + b_hh
        raw_layers.append((w_ih, w_hh, b))

        w_ih_p = jnp.zeros((4 * Hp, in_pad), jnp.float32)
        w_hh_p = jnp.zeros((4 * Hp, Hp), jnp.float32)
        b_p = jnp.zeros((4 * Hp,), jnp.float32)
        for g in range(4):                     # [i, f, g, o] gate blocks
            w_ih_p = w_ih_p.at[g * Hp:g * Hp + H, :in_orig].set(
                w_ih[g * H:(g + 1) * H])
            w_hh_p = w_hh_p.at[g * Hp:g * Hp + H, :H].set(
                w_hh[g * H:(g + 1) * H])
            b_p = b_p.at[g * Hp:g * Hp + H].set(b[g * H:(g + 1) * H])

        layers.append((
            w_ih_p.T.astype(jnp.bfloat16),     # (in_pad, 4*Hp)
            w_hh_p.T.astype(jnp.bfloat16),     # (Hp, 4*Hp)
            b_p.reshape(1, 4 * Hp),            # f32, folded b_ih + b_hh
        ))
        in_orig, in_pad = H, Hp

    key, k5, k6 = jax.random.split(key, 3)
    w_fc = jax.random.uniform(k5, (1, H), jnp.float32, -k, k)
    b_fc = jax.random.uniform(k6, (1,), jnp.float32, -k, k)
    w_fc_p = jnp.zeros((Hp, OUT_PAD), jnp.float32).at[:H, 0].set(w_fc[0])
    b_fc_p = jnp.zeros((1, OUT_PAD), jnp.float32).at[0, 0].set(b_fc[0])

    packed = {"layers": layers,
              "fc_w_t": w_fc_p.astype(jnp.bfloat16),
              "fc_b": b_fc_p}
    raw = {"layers": raw_layers, "fc_w": w_fc, "fc_b": b_fc}
    return packed, raw


# Pure-JAX f32 reference (matches PyTorch nn.LSTM + Linear forward).
def lstm_reference(x, raw):
    B, T, _ = x.shape
    h_seq = x
    for (w_ih, w_hh, b) in raw["layers"]:
        H = w_hh.shape[1]
        h = jnp.zeros((B, H), jnp.float32)
        c = jnp.zeros((B, H), jnp.float32)
        outs = []
        for t in range(T):
            g = h_seq[:, t, :] @ w_ih.T + h @ w_hh.T + b
            i_g = jax.nn.sigmoid(g[:, 0 * H:1 * H])
            f_g = jax.nn.sigmoid(g[:, 1 * H:2 * H])
            g_g = jnp.tanh(g[:, 2 * H:3 * H])
            o_g = jax.nn.sigmoid(g[:, 3 * H:4 * H])
            c = f_g * c + i_g * g_g
            h = o_g * jnp.tanh(c)
            outs.append(h)
        h_seq = jnp.stack(outs, axis=1)
    return h_seq[:, -1, :] @ raw["fc_w"].T + raw["fc_b"]


# ---------------------------------------------------------------------------
if __name__ == "__main__":
    input_size = 4
    hidden_size = 32
    num_stacked_layers = 2
    B, T = 2, 8

    key = jax.random.PRNGKey(0)
    key, xkey = jax.random.split(key)
    x = jax.random.normal(xkey, (B, T, input_size), dtype=jnp.float32)

    params, raw = init_params(key, input_size, hidden_size, num_stacked_layers)

    out = lstm_forward(x, params)
    out = jax.block_until_ready(out)
    assert out.shape == (B, 1) and out.dtype == jnp.float32

    ref = lstm_reference(x, raw)
    assert jnp.allclose(out, ref, rtol=5e-2, atol=5e-2), (out, ref)

    print("KERNEL_OK")
</pallas_src>

<mosaic_0001>
module attributes {stable_mosaic.version = 11 : i64} {
  func.func @lstm_seq_kernel(%arg0: i32, %arg1: memref<128x4xbf16, #tpu.memory_space<vmem>>, %arg2: memref<4x512xbf16, #tpu.memory_space<vmem>>, %arg3: memref<128x512xbf16, #tpu.memory_space<vmem>>, %arg4: memref<1x512xf32, #tpu.memory_space<vmem>>, %arg5: memref<128x128xbf16, #tpu.memory_space<vmem>>, %arg6: memref<16x128xf32, #tpu.memory_space<vmem>>, %arg7: memref<16x128xf32, #tpu.memory_space<vmem>>, %arg8: memref<128x512xf32, #tpu.memory_space<vmem>>) attributes {dimension_semantics = [#tpu.dimension_semantics<arbitrary>], iteration_bounds = array<i64: 1>, scalar_prefetch = 0 : i64, scratch_operands = 3 : i64, tpu.core_type = #tpu.core_type<tc>, window_params = [{transform_indices = @transform_0, window_bounds = array<i64: 128, 4>}, {pipeline_mode = #tpu.pipeline_mode<synchronous>, transform_indices = @transform_1, window_bounds = array<i64: 4, 512>}, {pipeline_mode = #tpu.pipeline_mode<synchronous>, transform_indices = @transform_2, window_bounds = array<i64: 128, 512>}, {pipeline_mode = #tpu.pipeline_mode<synchronous>, transform_indices = @transform_3, window_bounds = array<i64: 1, 512>}, {transform_indices = @transform_4, window_bounds = array<i64: 128, 128>}]} {
    %c0_i32 = arith.constant 0 : i32
    %0 = arith.cmpi eq, %arg0, %c0_i32 : i32
    %1 = arith.extui %0 : i1 to i32
    %c0_i32_0 = arith.constant 0 : i32
    %2 = arith.cmpi ne, %1, %c0_i32_0 : i32
    scf.if %2 {
      %cst_192 = arith.constant 0.000000e+00 : f32
      %378 = vector.broadcast %cst_192 : f32 to vector<16x128xf32>
      %c0_193 = arith.constant 0 : index
      %c0_194 = arith.constant 0 : index
      %379 = vector.load %arg6[%c0_193, %c0_194] : memref<16x128xf32, #tpu.memory_space<vmem>>, vector<16x128xf32>
      tpu.vector_store %arg6[%c0_193, %c0_194], %378 {strides = array<i32>} : memref<16x128xf32, #tpu.memory_space<vmem>>, vector<16x128xf32>,
      %cst_195 = arith.constant 0.000000e+00 : f32
      %380 = vector.broadcast %cst_195 : f32 to vector<16x128xf32>
      %c0_196 = arith.constant 0 : index
      %c0_197 = arith.constant 0 : index
      %381 = vector.load %arg7[%c0_196, %c0_197] : memref<16x128xf32, #tpu.memory_space<vmem>>, vector<16x128xf32>
      tpu.vector_store %arg7[%c0_196, %c0_197], %380 {strides = array<i32>} : memref<16x128xf32, #tpu.memory_space<vmem>>, vector<16x128xf32>,
    } else {
    }
    %c0 = arith.constant 0 : index
    %c0_1 = arith.constant 0 : index
    %3 = vector.load %arg1[%c0, %c0_1] : memref<128x4xbf16, #tpu.memory_space<vmem>>, vector<128x4xbf16>
    %c0_2 = arith.constant 0 : index
    %c0_3 = arith.constant 0 : index
    %4 = vector.load %arg2[%c0_2, %c0_3] : memref<4x512xbf16, #tpu.memory_space<vmem>>, vector<4x512xbf16>
    %cst = arith.constant dense<0.000000e+00> : vector<128x512xf32>
    %5 = tpu.matmul %3, %4, %cst {dimension_numbers = #tpu.dot_dimension_numbers<[1], [0], [0], [1], [0, 0, 1, 1], [], []>} : vector<128x4xbf16>, vector<4x512xbf16>, vector<128x512xf32> -> vector<128x512xf32>
    %c0_4 = arith.constant 0 : index
    %c0_5 = arith.constant 0 : index
    %6 = vector.load %arg4[%c0_4, %c0_5] : memref<1x512xf32, #tpu.memory_space<vmem>>, vector<1x512xf32>
    %7 = vector.broadcast %6 : vector<1x512xf32> to vector<128x512xf32>
    %8 = arith.addf %5, %7 : vector<128x512xf32>
    %c0_6 = arith.constant 0 : index
    %c0_7 = arith.constant 0 : index
    %9 = vector.load %arg8[%c0_6, %c0_7] : memref<128x512xf32, #tpu.memory_space<vmem>>, vector<128x512xf32>
    tpu.vector_store %arg8[%c0_6, %c0_7], %8 {strides = array<i32>} : memref<128x512xf32, #tpu.memory_space<vmem>>, vector<128x512xf32>,
    %c0_i32_8 = arith.constant 0 : i32
    %c16_i32 = arith.constant 16 : i32
    %10 = arith.muli %c0_i32_8, %c16_i32 : i32
    %11 = tpu.assume_multiple %10, 16 : i32
    %12 = arith.index_cast %11 : i32 to index
    %c0_9 = arith.constant 0 : index
    %13 = vector.load %arg8[%12, %c0_9] : memref<128x512xf32, #tpu.memory_space<vmem>>, vector<16x512xf32>
    %c0_10 = arith.constant 0 : index
    %c0_11 = arith.constant 0 : index
    %14 = vector.load %arg6[%c0_10, %c0_11] : memref<16x128xf32, #tpu.memory_space<vmem>>, vector<16x128xf32>
    %15 = arith.truncf %14 : vector<16x128xf32> to vector<16x128xbf16>
    %c0_12 = arith.constant 0 : index
    %c0_13 = arith.constant 0 : index
    %16 = vector.load %arg3[%c0_12, %c0_13] : memref<128x512xbf16, #tpu.memory_space<vmem>>, vector<128x512xbf16>
    %cst_14 = arith.constant dense<0.000000e+00> : vector<16x512xf32>
    %17 = tpu.matmul %15, %16, %cst_14 {dimension_numbers = #tpu.dot_dimension_numbers<[1], [0], [0], [1], [0, 0, 1, 1], [], []>} : vector<16x128xbf16>, vector<128x512xbf16>, vector<16x512xf32> -> vector<16x512xf32>
    %18 = arith.addf %13, %17 : vector<16x512xf32>
    %c0_15 = arith.constant 0 : index
    %c0_16 = arith.constant 0 : index
    %19 = vector.load %arg7[%c0_15, %c0_16] : memref<16x128xf32, #tpu.memory_space<vmem>>, vector<16x128xf32>
    %20 = vector.extract_strided_slice %18 {offsets = [0, 0], sizes = [16, 128], strides = [1, 1]} : vector<16x512xf32> to vector<16x128xf32>
    %cst_17 = arith.constant 5.000000e-01 : f32
    %21 = vector.broadcast %cst_17 : f32 to vector<16x128xf32>
    %22 = arith.mulf %21, %20 : vector<16x128xf32>
    %23 = math.tanh %22 : vector<16x128xf32>
    %cst_18 = arith.constant 5.000000e-01 : f32
    %24 = vector.broadcast %cst_18 : f32 to vector<16x128xf32>
    %25 = arith.mulf %24, %23 : vector<16x128xf32>
    %cst_19 = arith.constant 5.000000e-01 : f32
    %26 = vector.broadcast %cst_19 : f32 to vector<16x128xf32>
    %27 = arith.addf %25, %26 : vector<16x128xf32>
    %28 = vector.extract_strided_slice %18 {offsets = [0, 128], sizes = [16, 128], strides = [1, 1]} : vector<16x512xf32> to vector<16x128xf32>
    %cst_20 = arith.constant 5.000000e-01 : f32
    %29 = vector.broadcast %cst_20 : f32 to vector<16x128xf32>
    %30 = arith.mulf %29, %28 : vector<16x128xf32>
    %31 = math.tanh %30 : vector<16x128xf32>
    %cst_21 = arith.constant 5.000000e-01 : f32
    %32 = vector.broadcast %cst_21 : f32 to vector<16x128xf32>
    %33 = arith.mulf %32, %31 : vector<16x128xf32>
    %cst_22 = arith.constant 5.000000e-01 : f32
    %34 = vector.broadcast %cst_22 : f32 to vector<16x128xf32>
    %35 = arith.addf %33, %34 : vector<16x128xf32>
    %36 = vector.extract_strided_slice %18 {offsets = [0, 256], sizes = [16, 128], strides = [1, 1]} : vector<16x512xf32> to vector<16x128xf32>
    %37 = math.tanh %36 : vector<16x128xf32>
    %38 = vector.extract_strided_slice %18 {offsets = [0, 384], sizes = [16, 128], strides = [1, 1]} : vector<16x512xf32> to vector<16x128xf32>
    %cst_23 = arith.constant 5.000000e-01 : f32
    %39 = vector.broadcast %cst_23 : f32 to vector<16x128xf32>
    %40 = arith.mulf %39, %38 : vector<16x128xf32>
    %41 = math.tanh %40 : vector<16x128xf32>
    %cst_24 = arith.constant 5.000000e-01 : f32
    %42 = vector.broadcast %cst_24 : f32 to vector<16x128xf32>
    %43 = arith.mulf %42, %41 : vector<16x128xf32>
    %cst_25 = arith.constant 5.000000e-01 : f32
    %44 = vector.broadcast %cst_25 : f32 to vector<16x128xf32>
    %45 = arith.addf %43, %44 : vector<16x128xf32>
    %46 = arith.mulf %35, %19 : vector<16x128xf32>
    %47 = arith.mulf %27, %37 : vector<16x128xf32>
    %48 = arith.addf %46, %47 : vector<16x128xf32>
    %49 = math.tanh %48 : vector<16x128xf32>
    %50 = arith.mulf %45, %49 : vector<16x128xf32>
    %c0_26 = arith.constant 0 : index
    %c0_27 = arith.constant 0 : index
    %51 = vector.load %arg6[%c0_26, %c0_27] : memref<16x128xf32, #tpu.memory_space<vmem>>, vector<16x128xf32>
    tpu.vector_store %arg6[%c0_26, %c0_27], %50 {strides = array<i32>} : memref<16x128xf32, #tpu.memory_space<vmem>>, vector<16x128xf32>,
    %c0_28 = arith.constant 0 : index
    %c0_29 = arith.constant 0 : index
    %52 = vector.load %arg7[%c0_28, %c0_29] : memref<16x128xf32, #tpu.memory_space<vmem>>, vector<16x128xf32>
    tpu.vector_store %arg7[%c0_28, %c0_29], %48 {strides = array<i32>} : memref<16x128xf32, #tpu.memory_space<vmem>>, vector<16x128xf32>,
    %53 = arith.truncf %50 : vector<16x128xf32> to vector<16x128xbf16>
    %54 = arith.index_cast %11 : i32 to index
    %c0_30 = arith.constant 0 : index
    %55 = vector.load %arg5[%54, %c0_30] : memref<128x128xbf16, #tpu.memory_space<vmem>>, vector<16x128xbf16>
    tpu.vector_store %arg5[%54, %c0_30], %53 {strides = array<i32>} : memref<128x128xbf16, #tpu.memory_space<vmem>>, vector<16x128xbf16>,
    %c1_i32 = arith.constant 1 : i32
    %c16_i32_31 = arith.constant 16 : i32
    %56 = arith.muli %c1_i32, %c16_i32_31 : i32
    %57 = tpu.assume_multiple %56, 16 : i32
    %58 = arith.index_cast %57 : i32 to index
    %c0_32 = arith.constant 0 : index
    %59 = vector.load %arg8[%58, %c0_32] : memref<128x512xf32, #tpu.memory_space<vmem>>, vector<16x512xf32>
    %c0_33 = arith.constant 0 : index
    %c0_34 = arith.constant 0 : index
    %60 = vector.load %arg6[%c0_33, %c0_34] : memref<16x128xf32, #tpu.memory_space<vmem>>, vector<16x128xf32>
    %61 = arith.truncf %60 : vector<16x128xf32> to vector<16x128xbf16>
    %c0_35 = arith.constant 0 : index
    %c0_36 = arith.constant 0 : index
    %62 = vector.load %arg3[%c0_35, %c0_36] : memref<128x512xbf16, #tpu.memory_space<vmem>>, vector<128x512xbf16>
    %cst_37 = arith.constant dense<0.000000e+00> : vector<16x512xf32>
    %63 = tpu.matmul %61, %62, %cst_37 {dimension_numbers = #tpu.dot_dimension_numbers<[1], [0], [0], [1], [0, 0, 1, 1], [], []>} : vector<16x128xbf16>, vector<128x512xbf16>, vector<16x512xf32> -> vector<16x512xf32>
    %64 = arith.addf %59, %63 : vector<16x512xf32>
    %c0_38 = arith.constant 0 : index
    %c0_39 = arith.constant 0 : index
    %65 = vector.load %arg7[%c0_38, %c0_39] : memref<16x128xf32, #tpu.memory_space<vmem>>, vector<16x128xf32>
    %66 = vector.extract_strided_slice %64 {offsets = [0, 0], sizes = [16, 128], strides = [1, 1]} : vector<16x512xf32> to vector<16x128xf32>
    %cst_40 = arith.constant 5.000000e-01 : f32
    %67 = vector.broadcast %cst_40 : f32 to vector<16x128xf32>
    %68 = arith.mulf %67, %66 : vector<16x128xf32>
    %69 = math.tanh %68 : vector<16x128xf32>
    %cst_41 = arith.constant 5.000000e-01 : f32
    %70 = vector.broadcast %cst_41 : f32 to vector<16x128xf32>
    %71 = arith.mulf %70, %69 : vector<16x128xf32>
    %cst_42 = arith.constant 5.000000e-01 : f32
    %72 = vector.broadcast %cst_42 : f32 to vector<16x128xf32>
    %73 = arith.addf %71, %72 : vector<16x128xf32>
    %74 = vector.extract_strided_slice %64 {offsets = [0, 128], sizes = [16, 128], strides = [1, 1]} : vector<16x512xf32> to vector<16x128xf32>
    %cst_43 = arith.constant 5.000000e-01 : f32
    %75 = vector.broadcast %cst_43 : f32 to vector<16x128xf32>
    %76 = arith.mulf %75, %74 : vector<16x128xf32>
    %77 = math.tanh %76 : vector<16x128xf32>
    %cst_44 = arith.constant 5.000000e-01 : f32
    %78 = vector.broadcast %cst_44 : f32 to vector<16x128xf32>
    %79 = arith.mulf %78, %77 : vector<16x128xf32>
    %cst_45 = arith.constant 5.000000e-01 : f32
    %80 = vector.broadcast %cst_45 : f32 to vector<16x128xf32>
    %81 = arith.addf %79, %80 : vector<16x128xf32>
    %82 = vector.extract_strided_slice %64 {offsets = [0, 256], sizes = [16, 128], strides = [1, 1]} : vector<16x512xf32> to vector<16x128xf32>
    %83 = math.tanh %82 : vector<16x128xf32>
    %84 = vector.extract_strided_slice %64 {offsets = [0, 384], sizes = [16, 128], strides = [1, 1]} : vector<16x512xf32> to vector<16x128xf32>
    %cst_46 = arith.constant 5.000000e-01 : f32
    %85 = vector.broadcast %cst_46 : f32 to vector<16x128xf32>
    %86 = arith.mulf %85, %84 : vector<16x128xf32>
    %87 = math.tanh %86 : vector<16x128xf32>
    %cst_47 = arith.constant 5.000000e-01 : f32
    %88 = vector.broadcast %cst_47 : f32 to vector<16x128xf32>
    %89 = arith.mulf %88, %87 : vector<16x128xf32>
    %cst_48 = arith.constant 5.000000e-01 : f32
    %90 = vector.broadcast %cst_48 : f32 to vector<16x128xf32>
    %91 = arith.addf %89, %90 : vector<16x128xf32>
    %92 = arith.mulf %81, %65 : vector<16x128xf32>
    %93 = arith.mulf %73, %83 : vector<16x128xf32>
    %94 = arith.addf %92, %93 : vector<16x128xf32>
    %95 = math.tanh %94 : vector<16x128xf32>
    %96 = arith.mulf %91, %95 : vector<16x128xf32>
    %c0_49 = arith.constant 0 : index
    %c0_50 = arith.constant 0 : index
    %97 = vector.load %arg6[%c0_49, %c0_50] : memref<16x128xf32, #tpu.memory_space<vmem>>, vector<16x128xf32>
    tpu.vector_store %arg6[%c0_49, %c0_50], %96 {strides = array<i32>} : memref<16x128xf32, #tpu.memory_space<vmem>>, vector<16x128xf32>,
    %c0_51 = arith.constant 0 : index
    %c0_52 = arith.constant 0 : index
    %98 = vector.load %arg7[%c0_51, %c0_52] : memref<16x128xf32, #tpu.memory_space<vmem>>, vector<16x128xf32>
    tpu.vector_store %arg7[%c0_51, %c0_52], %94 {strides = array<i32>} : memref<16x128xf32, #tpu.memory_space<vmem>>, vector<16x128xf32>,
    %99 = arith.truncf %96 : vector<16x128xf32> to vector<16x128xbf16>
    %100 = arith.index_cast %57 : i32 to index
    %c0_53 = arith.constant 0 : index
    %101 = vector.load %arg5[%100, %c0_53] : memref<128x128xbf16, #tpu.memory_space<vmem>>, vector<16x128xbf16>
    tpu.vector_store %arg5[%100, %c0_53], %99 {strides = array<i32>} : memref<128x128xbf16, #tpu.memory_space<vmem>>, vector<16x128xbf16>,
    %c2_i32 = arith.constant 2 : i32
    %c16_i32_54 = arith.constant 16 : i32
    %102 = arith.muli %c2_i32, %c16_i32_54 : i32
    %103 = tpu.assume_multiple %102, 16 : i32
    %104 = arith.index_cast %103 : i32 to index
    %c0_55 = arith.constant 0 : index
    %105 = vector.load %arg8[%104, %c0_55] : memref<128x512xf32, #tpu.memory_space<vmem>>, vector<16x512xf32>
    %c0_56 = arith.constant 0 : index
    %c0_57 = arith.constant 0 : index
    %106 = vector.load %arg6[%c0_56, %c0_57] : memref<16x128xf32, #tpu.memory_space<vmem>>, vector<16x128xf32>
    %107 = arith.truncf %106 : vector<16x128xf32> to vector<16x128xbf16>
    %c0_58 = arith.constant 0 : index
    %c0_59 = arith.constant 0 : index
    %108 = vector.load %arg3[%c0_58, %c0_59] : memref<128x512xbf16, #tpu.memory_space<vmem>>, vector<128x512xbf16>
    %cst_60 = arith.constant dense<0.000000e+00> : vector<16x512xf32>
    %109 = tpu.matmul %107, %108, %cst_60 {dimension_numbers = #tpu.dot_dimension_numbers<[1], [0], [0], [1], [0, 0, 1, 1], [], []>} : vector<16x128xbf16>, vector<128x512xbf16>, vector<16x512xf32> -> vector<16x512xf32>
    %110 = arith.addf %105, %109 : vector<16x512xf32>
    %c0_61 = arith.constant 0 : index
    %c0_62 = arith.constant 0 : index
    %111 = vector.load %arg7[%c0_61, %c0_62] : memref<16x128xf32, #tpu.memory_space<vmem>>, vector<16x128xf32>
    %112 = vector.extract_strided_slice %110 {offsets = [0, 0], sizes = [16, 128], strides = [1, 1]} : vector<16x512xf32> to vector<16x128xf32>
    %cst_63 = arith.constant 5.000000e-01 : f32
    %113 = vector.broadcast %cst_63 : f32 to vector<16x128xf32>
    %114 = arith.mulf %113, %112 : vector<16x128xf32>
    %115 = math.tanh %114 : vector<16x128xf32>
    %cst_64 = arith.constant 5.000000e-01 : f32
    %116 = vector.broadcast %cst_64 : f32 to vector<16x128xf32>
    %117 = arith.mulf %116, %115 : vector<16x128xf32>
    %cst_65 = arith.constant 5.000000e-01 : f32
    %118 = vector.broadcast %cst_65 : f32 to vector<16x128xf32>
    %119 = arith.addf %117, %118 : vector<16x128xf32>
    %120 = vector.extract_strided_slice %110 {offsets = [0, 128], sizes = [16, 128], strides = [1, 1]} : vector<16x512xf32> to vector<16x128xf32>
    %cst_66 = arith.constant 5.000000e-01 : f32
    %121 = vector.broadcast %cst_66 : f32 to vector<16x128xf32>
    %122 = arith.mulf %121, %120 : vector<16x128xf32>
    %123 = math.tanh %122 : vector<16x128xf32>
    %cst_67 = arith.constant 5.000000e-01 : f32
    %124 = vector.broadcast %cst_67 : f32 to vector<16x128xf32>
    %125 = arith.mulf %124, %123 : vector<16x128xf32>
    %cst_68 = arith.constant 5.000000e-01 : f32
    %126 = vector.broadcast %cst_68 : f32 to vector<16x128xf32>
    %127 = arith.addf %125, %126 : vector<16x128xf32>
    %128 = vector.extract_strided_slice %110 {offsets = [0, 256], sizes = [16, 128], strides = [1, 1]} : vector<16x512xf32> to vector<16x128xf32>
    %129 = math.tanh %128 : vector<16x128xf32>
    %130 = vector.extract_strided_slice %110 {offsets = [0, 384], sizes = [16, 128], strides = [1, 1]} : vector<16x512xf32> to vector<16x128xf32>
    %cst_69 = arith.constant 5.000000e-01 : f32
    %131 = vector.broadcast %cst_69 : f32 to vector<16x128xf32>
    %132 = arith.mulf %131, %130 : vector<16x128xf32>
    %133 = math.tanh %132 : vector<16x128xf32>
    %cst_70 = arith.constant 5.000000e-01 : f32
    %134 = vector.broadcast %cst_70 : f32 to vector<16x128xf32>
    %135 = arith.mulf %134, %133 : vector<16x128xf32>
    %cst_71 = arith.constant 5.000000e-01 : f32
    %136 = vector.broadcast %cst_71 : f32 to vector<16x128xf32>
    %137 = arith.addf %135, %136 : vector<16x128xf32>
    %138 = arith.mulf %127, %111 : vector<16x128xf32>
    %139 = arith.mulf %119, %129 : vector<16x128xf32>
    %140 = arith.addf %138, %139 : vector<16x128xf32>
    %141 = math.tanh %140 : vector<16x128xf32>
    %142 = arith.mulf %137, %141 : vector<16x128xf32>
    %c0_72 = arith.constant 0 : index
    %c0_73 = arith.constant 0 : index
    %143 = vector.load %arg6[%c0_72, %c0_73] : memref<16x128xf32, #tpu.memory_space<vmem>>, vector<16x128xf32>
    tpu.vector_store %arg6[%c0_72, %c0_73], %142 {strides = array<i32>} : memref<16x128xf32, #tpu.memory_space<vmem>>, vector<16x128xf32>,
    %c0_74 = arith.constant 0 : index
    %c0_75 = arith.constant 0 : index
    %144 = vector.load %arg7[%c0_74, %c0_75] : memref<16x128xf32, #tpu.memory_space<vmem>>, vector<16x128xf32>
    tpu.vector_store %arg7[%c0_74, %c0_75], %140 {strides = array<i32>} : memref<16x128xf32, #tpu.memory_space<vmem>>, vector<16x128xf32>,
    %145 = arith.truncf %142 : vector<16x128xf32> to vector<16x128xbf16>
    %146 = arith.index_cast %103 : i32 to index
    %c0_76 = arith.constant 0 : index
    %147 = vector.load %arg5[%146, %c0_76] : memref<128x128xbf16, #tpu.memory_space<vmem>>, vector<16x128xbf16>
    tpu.vector_store %arg5[%146, %c0_76], %145 {strides = array<i32>} : memref<128x128xbf16, #tpu.memory_space<vmem>>, vector<16x128xbf16>,
    %c3_i32 = arith.constant 3 : i32
    %c16_i32_77 = arith.constant 16 : i32
    %148 = arith.muli %c3_i32, %c16_i32_77 : i32
    %149 = tpu.assume_multiple %148, 16 : i32
    %150 = arith.index_cast %149 : i32 to index
    %c0_78 = arith.constant 0 : index
    %151 = vector.load %arg8[%150, %c0_78] : memref<128x512xf32, #tpu.memory_space<vmem>>, vector<16x512xf32>
    %c0_79 = arith.constant 0 : index
    %c0_80 = arith.constant 0 : index
    %152 = vector.load %arg6[%c0_79, %c0_80] : memref<16x128xf32, #tpu.memory_space<vmem>>, vector<16x128xf32>
    %153 = arith.truncf %152 : vector<16x128xf32> to vector<16x128xbf16>
    %c0_81 = arith.constant 0 : index
    %c0_82 = arith.constant 0 : index
    %154 = vector.load %arg3[%c0_81, %c0_82] : memref<128x512xbf16, #tpu.memory_space<vmem>>, vector<128x512xbf16>
    %cst_83 = arith.constant dense<0.000000e+00> : vector<16x512xf32>
    %155 = tpu.matmul %153, %154, %cst_83 {dimension_numbers = #tpu.dot_dimension_numbers<[1], [0], [0], [1], [0, 0, 1, 1], [], []>} : vector<16x128xbf16>, vector<128x512xbf16>, vector<16x512xf32> -> vector<16x512xf32>
    %156 = arith.addf %151, %155 : vector<16x512xf32>
    %c0_84 = arith.constant 0 : index
    %c0_85 = arith.constant 0 : index
    %157 = vector.load %arg7[%c0_84, %c0_85] : memref<16x128xf32, #tpu.memory_space<vmem>>, vector<16x128xf32>
    %158 = vector.extract_strided_slice %156 {offsets = [0, 0], sizes = [16, 128], strides = [1, 1]} : vector<16x512xf32> to vector<16x128xf32>
    %cst_86 = arith.constant 5.000000e-01 : f32
    %159 = vector.broadcast %cst_86 : f32 to vector<16x128xf32>
    %160 = arith.mulf %159, %158 : vector<16x128xf32>
    %161 = math.tanh %160 : vector<16x128xf32>
    %cst_87 = arith.constant 5.000000e-01 : f32
    %162 = vector.broadcast %cst_87 : f32 to vector<16x128xf32>
    %163 = arith.mulf %162, %161 : vector<16x128xf32>
    %cst_88 = arith.constant 5.000000e-01 : f32
    %164 = vector.broadcast %cst_88 : f32 to vector<16x128xf32>
    %165 = arith.addf %163, %164 : vector<16x128xf32>
    %166 = vector.extract_strided_slice %156 {offsets = [0, 128], sizes = [16, 128], strides = [1, 1]} : vector<16x512xf32> to vector<16x128xf32>
    %cst_89 = arith.constant 5.000000e-01 : f32
    %167 = vector.broadcast %cst_89 : f32 to vector<16x128xf32>
    %168 = arith.mulf %167, %166 : vector<16x128xf32>
    %169 = math.tanh %168 : vector<16x128xf32>
    %cst_90 = arith.constant 5.000000e-01 : f32
    %170 = vector.broadcast %cst_90 : f32 to vector<16x128xf32>
    %171 = arith.mulf %170, %169 : vector<16x128xf32>
    %cst_91 = arith.constant 5.000000e-01 : f32
    %172 = vector.broadcast %cst_91 : f32 to vector<16x128xf32>
    %173 = arith.addf %171, %172 : vector<16x128xf32>
    %174 = vector.extract_strided_slice %156 {offsets = [0, 256], sizes = [16, 128], strides = [1, 1]} : vector<16x512xf32> to vector<16x128xf32>
    %175 = math.tanh %174 : vector<16x128xf32>
    %176 = vector.extract_strided_slice %156 {offsets = [0, 384], sizes = [16, 128], strides = [1, 1]} : vector<16x512xf32> to vector<16x128xf32>
    %cst_92 = arith.constant 5.000000e-01 : f32
    %177 = vector.broadcast %cst_92 : f32 to vector<16x128xf32>
    %178 = arith.mulf %177, %176 : vector<16x128xf32>
    %179 = math.tanh %178 : vector<16x128xf32>
    %cst_93 = arith.constant 5.000000e-01 : f32
    %180 = vector.broadcast %cst_93 : f32 to vector<16x128xf32>
    %181 = arith.mulf %180, %179 : vector<16x128xf32>
    %cst_94 = arith.constant 5.000000e-01 : f32
    %182 = vector.broadcast %cst_94 : f32 to vector<16x128xf32>
    %183 = arith.addf %181, %182 : vector<16x128xf32>
    %184 = arith.mulf %173, %157 : vector<16x128xf32>
    %185 = arith.mulf %165, %175 : vector<16x128xf32>
    %186 = arith.addf %184, %185 : vector<16x128xf32>
    %187 = math.tanh %186 : vector<16x128xf32>
    %188 = arith.mulf %183, %187 : vector<16x128xf32>
    %c0_95 = arith.constant 0 : index
    %c0_96 = arith.constant 0 : index
    %189 = vector.load %arg6[%c0_95, %c0_96] : memref<16x128xf32, #tpu.memory_space<vmem>>, vector<16x128xf32>
    tpu.vector_store %arg6[%c0_95, %c0_96], %188 {strides = array<i32>} : memref<16x128xf32, #tpu.memory_space<vmem>>, vector<16x128xf32>,
    %c0_97 = arith.constant 0 : index
    %c0_98 = arith.constant 0 : index
    %190 = vector.load %arg7[%c0_97, %c0_98] : memref<16x128xf32, #tpu.memory_space<vmem>>, vector<16x128xf32>
    tpu.vector_store %arg7[%c0_97, %c0_98], %186 {strides = array<i32>} : memref<16x128xf32, #tpu.memory_space<vmem>>, vector<16x128xf32>,
    %191 = arith.truncf %188 : vector<16x128xf32> to vector<16x128xbf16>
    %192 = arith.index_cast %149 : i32 to index
    %c0_99 = arith.constant 0 : index
    %193 = vector.load %arg5[%192, %c0_99] : memref<128x128xbf16, #tpu.memory_space<vmem>>, vector<16x128xbf16>
    tpu.vector_store %arg5[%192, %c0_99], %191 {strides = array<i32>} : memref<128x128xbf16, #tpu.memory_space<vmem>>, vector<16x128xbf16>,
    %c4_i32 = arith.constant 4 : i32
    %c16_i32_100 = arith.constant 16 : i32
    %194 = arith.muli %c4_i32, %c16_i32_100 : i32
    %195 = tpu.assume_multiple %194, 16 : i32
    %196 = arith.index_cast %195 : i32 to index
    %c0_101 = arith.constant 0 : index
    %197 = vector.load %arg8[%196, %c0_101] : memref<128x512xf32, #tpu.memory_space<vmem>>, vector<16x512xf32>
    %c0_102 = arith.constant 0 : index
    %c0_103 = arith.constant 0 : index
    %198 = vector.load %arg6[%c0_102, %c0_103] : memref<16x128xf32, #tpu.memory_space<vmem>>, vector<16x128xf32>
    %199 = arith.truncf %198 : vector<16x128xf32> to vector<16x128xbf16>
    %c0_104 = arith.constant 0 : index
    %c0_105 = arith.constant 0 : index
    %200 = vector.load %arg3[%c0_104, %c0_105] : memref<128x512xbf16, #tpu.memory_space<vmem>>, vector<128x512xbf16>
    %cst_106 = arith.constant dense<0.000000e+00> : vector<16x512xf32>
    %201 = tpu.matmul %199, %200, %cst_106 {dimension_numbers = #tpu.dot_dimension_numbers<[1], [0], [0], [1], [0, 0, 1, 1], [], []>} : vector<16x128xbf16>, vector<128x512xbf16>, vector<16x512xf32> -> vector<16x512xf32>
    %202 = arith.addf %197, %201 : vector<16x512xf32>
    %c0_107 = arith.constant 0 : index
    %c0_108 = arith.constant 0 : index
    %203 = vector.load %arg7[%c0_107, %c0_108] : memref<16x128xf32, #tpu.memory_space<vmem>>, vector<16x128xf32>
    %204 = vector.extract_strided_slice %202 {offsets = [0, 0], sizes = [16, 128], strides = [1, 1]} : vector<16x512xf32> to vector<16x128xf32>
    %cst_109 = arith.constant 5.000000e-01 : f32
    %205 = vector.broadcast %cst_109 : f32 to vector<16x128xf32>
    %206 = arith.mulf %205, %204 : vector<16x128xf32>
    %207 = math.tanh %206 : vector<16x128xf32>
    %cst_110 = arith.constant 5.000000e-01 : f32
    %208 = vector.broadcast %cst_110 : f32 to vector<16x128xf32>
    %209 = arith.mulf %208, %207 : vector<16x128xf32>
    %cst_111 = arith.constant 5.000000e-01 : f32
    %210 = vector.broadcast %cst_111 : f32 to vector<16x128xf32>
    %211 = arith.addf %209, %210 : vector<16x128xf32>
    %212 = vector.extract_strided_slice %202 {offsets = [0, 128], sizes = [16, 128], strides = [1, 1]} : vector<16x512xf32> to vector<16x128xf32>
    %cst_112 = arith.constant 5.000000e-01 : f32
    %213 = vector.broadcast %cst_112 : f32 to vector<16x128xf32>
    %214 = arith.mulf %213, %212 : vector<16x128xf32>
    %215 = math.tanh %214 : vector<16x128xf32>
    %cst_113 = arith.constant 5.000000e-01 : f32
    %216 = vector.broadcast %cst_113 : f32 to vector<16x128xf32>
    %217 = arith.mulf %216, %215 : vector<16x128xf32>
    %cst_114 = arith.constant 5.000000e-01 : f32
    %218 = vector.broadcast %cst_114 : f32 to vector<16x128xf32>
    %219 = arith.addf %217, %218 : vector<16x128xf32>
    %220 = vector.extract_strided_slice %202 {offsets = [0, 256], sizes = [16, 128], strides = [1, 1]} : vector<16x512xf32> to vector<16x128xf32>
    %221 = math.tanh %220 : vector<16x128xf32>
    %222 = vector.extract_strided_slice %202 {offsets = [0, 384], sizes = [16, 128], strides = [1, 1]} : vector<16x512xf32> to vector<16x128xf32>
    %cst_115 = arith.constant 5.000000e-01 : f32
    %223 = vector.broadcast %cst_115 : f32 to vector<16x128xf32>
    %224 = arith.mulf %223, %222 : vector<16x128xf32>
    %225 = math.tanh %224 : vector<16x128xf32>
    %cst_116 = arith.constant 5.000000e-01 : f32
    %226 = vector.broadcast %cst_116 : f32 to vector<16x128xf32>
    %227 = arith.mulf %226, %225 : vector<16x128xf32>
    %cst_117 = arith.constant 5.000000e-01 : f32
    %228 = vector.broadcast %cst_117 : f32 to vector<16x128xf32>
    %229 = arith.addf %227, %228 : vector<16x128xf32>
    %230 = arith.mulf %219, %203 : vector<16x128xf32>
    %231 = arith.mulf %211, %221 : vector<16x128xf32>
    %232 = arith.addf %230, %231 : vector<16x128xf32>
    %233 = math.tanh %232 : vector<16x128xf32>
    %234 = arith.mulf %229, %233 : vector<16x128xf32>
    %c0_118 = arith.constant 0 : index
    %c0_119 = arith.constant 0 : index
    %235 = vector.load %arg6[%c0_118, %c0_119] : memref<16x128xf32, #tpu.memory_space<vmem>>, vector<16x128xf32>
    tpu.vector_store %arg6[%c0_118, %c0_119], %234 {strides = array<i32>} : memref<16x128xf32, #tpu.memory_space<vmem>>, vector<16x128xf32>,
    %c0_120 = arith.constant 0 : index
    %c0_121 = arith.constant 0 : index
    %236 = vector.load %arg7[%c0_120, %c0_121] : memref<16x128xf32, #tpu.memory_space<vmem>>, vector<16x128xf32>
    tpu.vector_store %arg7[%c0_120, %c0_121], %232 {strides = array<i32>} : memref<16x128xf32, #tpu.memory_space<vmem>>, vector<16x128xf32>,
    %237 = arith.truncf %234 : vector<16x128xf32> to vector<16x128xbf16>
    %238 = arith.index_cast %195 : i32 to index
    %c0_122 = arith.constant 0 : index
    %239 = vector.load %arg5[%238, %c0_122] : memref<128x128xbf16, #tpu.memory_space<vmem>>, vector<16x128xbf16>
    tpu.vector_store %arg5[%238, %c0_122], %237 {strides = array<i32>} : memref<128x128xbf16, #tpu.memory_space<vmem>>, vector<16x128xbf16>,
    %c5_i32 = arith.constant 5 : i32
    %c16_i32_123 = arith.constant 16 : i32
    %240 = arith.muli %c5_i32, %c16_i32_123 : i32
    %241 = tpu.assume_multiple %240, 16 : i32
    %242 = arith.index_cast %241 : i32 to index
    %c0_124 = arith.constant 0 : index
    %243 = vector.load %arg8[%242, %c0_124] : memref<128x512xf32, #tpu.memory_space<vmem>>, vector<16x512xf32>
    %c0_125 = arith.constant 0 : index
    %c0_126 = arith.constant 0 : index
    %244 = vector.load %arg6[%c0_125, %c0_126] : memref<16x128xf32, #tpu.memory_space<vmem>>, vector<16x128xf32>
    %245 = arith.truncf %244 : vector<16x128xf32> to vector<16x128xbf16>
    %c0_127 = arith.constant 0 : index
    %c0_128 = arith.constant 0 : index
    %246 = vector.load %arg3[%c0_127, %c0_128] : memref<128x512xbf16, #tpu.memory_space<vmem>>, vector<128x512xbf16>
    %cst_129 = arith.constant dense<0.000000e+00> : vector<16x512xf32>
    %247 = tpu.matmul %245, %246, %cst_129 {dimension_numbers = #tpu.dot_dimension_numbers<[1], [0], [0], [1], [0, 0, 1, 1], [], []>} : vector<16x128xbf16>, vector<128x512xbf16>, vector<16x512xf32> -> vector<16x512xf32>
    %248 = arith.addf %243, %247 : vector<16x512xf32>
    %c0_130 = arith.constant 0 : index
    %c0_131 = arith.constant 0 : index
    %249 = vector.load %arg7[%c0_130, %c0_131] : memref<16x128xf32, #tpu.memory_space<vmem>>, vector<16x128xf32>
    %250 = vector.extract_strided_slice %248 {offsets = [0, 0], sizes = [16, 128], strides = [1, 1]} : vector<16x512xf32> to vector<16x128xf32>
    %cst_132 = arith.constant 5.000000e-01 : f32
    %251 = vector.broadcast %cst_132 : f32 to vector<16x128xf32>
    %252 = arith.mulf %251, %250 : vector<16x128xf32>
    %253 = math.tanh %252 : vector<16x128xf32>
    %cst_133 = arith.constant 5.000000e-01 : f32
    %254 = vector.broadcast %cst_133 : f32 to vector<16x128xf32>
    %255 = arith.mulf %254, %253 : vector<16x128xf32>
    %cst_134 = arith.constant 5.000000e-01 : f32
    %256 = vector.broadcast %cst_134 : f32 to vector<16x128xf32>
    %257 = arith.addf %255, %256 : vector<16x128xf32>
    %258 = vector.extract_strided_slice %248 {offsets = [0, 128], sizes = [16, 128], strides = [1, 1]} : vector<16x512xf32> to vector<16x128xf32>
    %cst_135 = arith.constant 5.000000e-01 : f32
    %259 = vector.broadcast %cst_135 : f32 to vector<16x128xf32>
    %260 = arith.mulf %259, %258 : vector<16x128xf32>
    %261 = math.tanh %260 : vector<16x128xf32>
    %cst_136 = arith.constant 5.000000e-01 : f32
    %262 = vector.broadcast %cst_136 : f32 to vector<16x128xf32>
    %263 = arith.mulf %262, %261 : vector<16x128xf32>
    %cst_137 = arith.constant 5.000000e-01 : f32
    %264 = vector.broadcast %cst_137 : f32 to vector<16x128xf32>
    %265 = arith.addf %263, %264 : vector<16x128xf32>
    %266 = vector.extract_strided_slice %248 {offsets = [0, 256], sizes = [16, 128], strides = [1, 1]} : vector<16x512xf32> to vector<16x128xf32>
    %267 = math.tanh %266 : vector<16x128xf32>
    %268 = vector.extract_strided_slice %248 {offsets = [0, 384], sizes = [16, 128], strides = [1, 1]} : vector<16x512xf32> to vector<16x128xf32>
    %cst_138 = arith.constant 5.000000e-01 : f32
    %269 = vector.broadcast %cst_138 : f32 to vector<16x128xf32>
    %270 = arith.mulf %269, %268 : vector<16x128xf32>
    %271 = math.tanh %270 : vector<16x128xf32>
    %cst_139 = arith.constant 5.000000e-01 : f32
    %272 = vector.broadcast %cst_139 : f32 to vector<16x128xf32>
    %273 = arith.mulf %272, %271 : vector<16x128xf32>
    %cst_140 = arith.constant 5.000000e-01 : f32
    %274 = vector.broadcast %cst_140 : f32 to vector<16x128xf32>
    %275 = arith.addf %273, %274 : vector<16x128xf32>
    %276 = arith.mulf %265, %249 : vector<16x128xf32>
    %277 = arith.mulf %257, %267 : vector<16x128xf32>
    %278 = arith.addf %276, %277 : vector<16x128xf32>
    %279 = math.tanh %278 : vector<16x128xf32>
    %280 = arith.mulf %275, %279 : vector<16x128xf32>
    %c0_141 = arith.constant 0 : index
    %c0_142 = arith.constant 0 : index
    %281 = vector.load %arg6[%c0_141, %c0_142] : memref<16x128xf32, #tpu.memory_space<vmem>>, vector<16x128xf32>
    tpu.vector_store %arg6[%c0_141, %c0_142], %280 {strides = array<i32>} : memref<16x128xf32, #tpu.memory_space<vmem>>, vector<16x128xf32>,
    %c0_143 = arith.constant 0 : index
    %c0_144 = arith.constant 0 : index
    %282 = vector.load %arg7[%c0_143, %c0_144] : memref<16x128xf32, #tpu.memory_space<vmem>>, vector<16x128xf32>
    tpu.vector_store %arg7[%c0_143, %c0_144], %278 {strides = array<i32>} : memref<16x128xf32, #tpu.memory_space<vmem>>, vector<16x128xf32>,
    %283 = arith.truncf %280 : vector<16x128xf32> to vector<16x128xbf16>
    %284 = arith.index_cast %241 : i32 to index
    %c0_145 = arith.constant 0 : index
    %285 = vector.load %arg5[%284, %c0_145] : memref<128x128xbf16, #tpu.memory_space<vmem>>, vector<16x128xbf16>
    tpu.vector_store %arg5[%284, %c0_145], %283 {strides = array<i32>} : memref<128x128xbf16, #tpu.memory_space<vmem>>, vector<16x128xbf16>,
    %c6_i32 = arith.constant 6 : i32
    %c16_i32_146 = arith.constant 16 : i32
    %286 = arith.muli %c6_i32, %c16_i32_146 : i32
    %287 = tpu.assume_multiple %286, 16 : i32
    %288 = arith.index_cast %287 : i32 to index
    %c0_147 = arith.constant 0 : index
    %289 = vector.load %arg8[%288, %c0_147] : memref<128x512xf32, #tpu.memory_space<vmem>>, vector<16x512xf32>
    %c0_148 = arith.constant 0 : index
    %c0_149 = arith.constant 0 : index
    %290 = vector.load %arg6[%c0_148, %c0_149] : memref<16x128xf32, #tpu.memory_space<vmem>>, vector<16x128xf32>
    %291 = arith.truncf %290 : vector<16x128xf32> to vector<16x128xbf16>
    %c0_150 = arith.constant 0 : index
    %c0_151 = arith.constant 0 : index
    %292 = vector.load %arg3[%c0_150, %c0_151] : memref<128x512xbf16, #tpu.memory_space<vmem>>, vector<128x512xbf16>
    %cst_152 = arith.constant dense<0.000000e+00> : vector<16x512xf32>
    %293 = tpu.matmul %291, %292, %cst_152 {dimension_numbers = #tpu.dot_dimension_numbers<[1], [0], [0], [1], [0, 0, 1, 1], [], []>} : vector<16x128xbf16>, vector<128x512xbf16>, vector<16x512xf32> -> vector<16x512xf32>
    %294 = arith.addf %289, %293 : vector<16x512xf32>
    %c0_153 = arith.constant 0 : index
    %c0_154 = arith.constant 0 : index
    %295 = vector.load %arg7[%c0_153, %c0_154] : memref<16x128xf32, #tpu.memory_space<vmem>>, vector<16x128xf32>
    %296 = vector.extract_strided_slice %294 {offsets = [0, 0], sizes = [16, 128], strides = [1, 1]} : vector<16x512xf32> to vector<16x128xf32>
    %cst_155 = arith.constant 5.000000e-01 : f32
    %297 = vector.broadcast %cst_155 : f32 to vector<16x128xf32>
    %298 = arith.mulf %297, %296 : vector<16x128xf32>
    %299 = math.tanh %298 : vector<16x128xf32>
    %cst_156 = arith.constant 5.000000e-01 : f32
    %300 = vector.broadcast %cst_156 : f32 to vector<16x128xf32>
    %301 = arith.mulf %300, %299 : vector<16x128xf32>
    %cst_157 = arith.constant 5.000000e-01 : f32
    %302 = vector.broadcast %cst_157 : f32 to vector<16x128xf32>
    %303 = arith.addf %301, %302 : vector<16x128xf32>
    %304 = vector.extract_strided_slice %294 {offsets = [0, 128], sizes = [16, 128], strides = [1, 1]} : vector<16x512xf32> to vector<16x128xf32>
    %cst_158 = arith.constant 5.000000e-01 : f32
    %305 = vector.broadcast %cst_158 : f32 to vector<16x128xf32>
    %306 = arith.mulf %305, %304 : vector<16x128xf32>
    %307 = math.tanh %306 : vector<16x128xf32>
    %cst_159 = arith.constant 5.000000e-01 : f32
    %308 = vector.broadcast %cst_159 : f32 to vector<16x128xf32>
    %309 = arith.mulf %308, %307 : vector<16x128xf32>
    %cst_160 = arith.constant 5.000000e-01 : f32
    %310 = vector.broadcast %cst_160 : f32 to vector<16x128xf32>
    %311 = arith.addf %309, %310 : vector<16x128xf32>
    %312 = vector.extract_strided_slice %294 {offsets = [0, 256], sizes = [16, 128], strides = [1, 1]} : vector<16x512xf32> to vector<16x128xf32>
    %313 = math.tanh %312 : vector<16x128xf32>
    %314 = vector.extract_strided_slice %294 {offsets = [0, 384], sizes = [16, 128], strides = [1, 1]} : vector<16x512xf32> to vector<16x128xf32>
    %cst_161 = arith.constant 5.000000e-01 : f32
    %315 = vector.broadcast %cst_161 : f32 to vector<16x128xf32>
    %316 = arith.mulf %315, %314 : vector<16x128xf32>
    %317 = math.tanh %316 : vector<16x128xf32>
    %cst_162 = arith.constant 5.000000e-01 : f32
    %318 = vector.broadcast %cst_162 : f32 to vector<16x128xf32>
    %319 = arith.mulf %318, %317 : vector<16x128xf32>
    %cst_163 = arith.constant 5.000000e-01 : f32
    %320 = vector.broadcast %cst_163 : f32 to vector<16x128xf32>
    %321 = arith.addf %319, %320 : vector<16x128xf32>
    %322 = arith.mulf %311, %295 : vector<16x128xf32>
    %323 = arith.mulf %303, %313 : vector<16x128xf32>
    %324 = arith.addf %322, %323 : vector<16x128xf32>
    %325 = math.tanh %324 : vector<16x128xf32>
    %326 = arith.mulf %321, %325 : vector<16x128xf32>
    %c0_164 = arith.constant 0 : index
    %c0_165 = arith.constant 0 : index
    %327 = vector.load %arg6[%c0_164, %c0_165] : memref<16x128xf32, #tpu.memory_space<vmem>>, vector<16x128xf32>
    tpu.vector_store %arg6[%c0_164, %c0_165], %326 {strides = array<i32>} : memref<16x128xf32, #tpu.memory_space<vmem>>, vector<16x128xf32>,
    %c0_166 = arith.constant 0 : index
    %c0_167 = arith.constant 0 : index
    %328 = vector.load %arg7[%c0_166, %c0_167] : memref<16x128xf32, #tpu.memory_space<vmem>>, vector<16x128xf32>
    tpu.vector_store %arg7[%c0_166, %c0_167], %324 {strides = array<i32>} : memref<16x128xf32, #tpu.memory_space<vmem>>, vector<16x128xf32>,
    %329 = arith.truncf %326 : vector<16x128xf32> to vector<16x128xbf16>
    %330 = arith.index_cast %287 : i32 to index
    %c0_168 = arith.constant 0 : index
    %331 = vector.load %arg5[%330, %c0_168] : memref<128x128xbf16, #tpu.memory_space<vmem>>, vector<16x128xbf16>
    tpu.vector_store %arg5[%330, %c0_168], %329 {strides = array<i32>} : memref<128x128xbf16, #tpu.memory_space<vmem>>, vector<16x128xbf16>,
    %c7_i32 = arith.constant 7 : i32
    %c16_i32_169 = arith.constant 16 : i32
    %332 = arith.muli %c7_i32, %c16_i32_169 : i32
    %333 = tpu.assume_multiple %332, 16 : i32
    %334 = arith.index_cast %333 : i32 to index
    %c0_170 = arith.constant 0 : index
    %335 = vector.load %arg8[%334, %c0_170] : memref<128x512xf32, #tpu.memory_space<vmem>>, vector<16x512xf32>
    %c0_171 = arith.constant 0 : index
    %c0_172 = arith.constant 0 : index
    %336 = vector.load %arg6[%c0_171, %c0_172] : memref<16x128xf32, #tpu.memory_space<vmem>>, vector<16x128xf32>
    %337 = arith.truncf %336 : vector<16x128xf32> to vector<16x128xbf16>
    %c0_173 = arith.constant 0 : index
    %c0_174 = arith.constant 0 : index
    %338 = vector.load %arg3[%c0_173, %c0_174] : memref<128x512xbf16, #tpu.memory_space<vmem>>, vector<128x512xbf16>
    %cst_175 = arith.constant dense<0.000000e+00> : vector<16x512xf32>
    %339 = tpu.matmul %337, %338, %cst_175 {dimension_numbers = #tpu.dot_dimension_numbers<[1], [0], [0], [1], [0, 0, 1, 1], [], []>} : vector<16x128xbf16>, vector<128x512xbf16>, vector<16x512xf32> -> vector<16x512xf32>
    %340 = arith.addf %335, %339 : vector<16x512xf32>
    %c0_176 = arith.constant 0 : index
    %c0_177 = arith.constant 0 : index
    %341 = vector.load %arg7[%c0_176, %c0_177] : memref<16x128xf32, #tpu.memory_space<vmem>>, vector<16x128xf32>
    %342 = vector.extract_strided_slice %340 {offsets = [0, 0], sizes = [16, 128], strides = [1, 1]} : vector<16x512xf32> to vector<16x128xf32>
    %cst_178 = arith.constant 5.000000e-01 : f32
    %343 = vector.broadcast %cst_178 : f32 to vector<16x128xf32>
    %344 = arith.mulf %343, %342 : vector<16x128xf32>
    %345 = math.tanh %344 : vector<16x128xf32>
    %cst_179 = arith.constant 5.000000e-01 : f32
    %346 = vector.broadcast %cst_179 : f32 to vector<16x128xf32>
    %347 = arith.mulf %346, %345 : vector<16x128xf32>
    %cst_180 = arith.constant 5.000000e-01 : f32
    %348 = vector.broadcast %cst_180 : f32 to vector<16x128xf32>
    %349 = arith.addf %347, %348 : vector<16x128xf32>
    %350 = vector.extract_strided_slice %340 {offsets = [0, 128], sizes = [16, 128], strides = [1, 1]} : vector<16x512xf32> to vector<16x128xf32>
    %cst_181 = arith.constant 5.000000e-01 : f32
    %351 = vector.broadcast %cst_181 : f32 to vector<16x128xf32>
    %352 = arith.mulf %351, %350 : vector<16x128xf32>
    %353 = math.tanh %352 : vector<16x128xf32>
    %cst_182 = arith.constant 5.000000e-01 : f32
    %354 = vector.broadcast %cst_182 : f32 to vector<16x128xf32>
    %355 = arith.mulf %354, %353 : vector<16x128xf32>
    %cst_183 = arith.constant 5.000000e-01 : f32
    %356 = vector.broadcast %cst_183 : f32 to vector<16x128xf32>
    %357 = arith.addf %355, %356 : vector<16x128xf32>
    %358 = vector.extract_strided_slice %340 {offsets = [0, 256], sizes = [16, 128], strides = [1, 1]} : vector<16x512xf32> to vector<16x128xf32>
    %359 = math.tanh %358 : vector<16x128xf32>
    %360 = vector.extract_strided_slice %340 {offsets = [0, 384], sizes = [16, 128], strides = [1, 1]} : vector<16x512xf32> to vector<16x128xf32>
    %cst_184 = arith.constant 5.000000e-01 : f32
    %361 = vector.broadcast %cst_184 : f32 to vector<16x128xf32>
    %362 = arith.mulf %361, %360 : vector<16x128xf32>
    %363 = math.tanh %362 : vector<16x128xf32>
    %cst_185 = arith.constant 5.000000e-01 : f32
    %364 = vector.broadcast %cst_185 : f32 to vector<16x128xf32>
    %365 = arith.mulf %364, %363 : vector<16x128xf32>
    %cst_186 = arith.constant 5.000000e-01 : f32
    %366 = vector.broadcast %cst_186 : f32 to vector<16x128xf32>
    %367 = arith.addf %365, %366 : vector<16x128xf32>
    %368 = arith.mulf %357, %341 : vector<16x128xf32>
    %369 = arith.mulf %349, %359 : vector<16x128xf32>
    %370 = arith.addf %368, %369 : vector<16x128xf32>
    %371 = math.tanh %370 : vector<16x128xf32>
    %372 = arith.mulf %367, %371 : vector<16x128xf32>
    %c0_187 = arith.constant 0 : index
    %c0_188 = arith.constant 0 : index
    %373 = vector.load %arg6[%c0_187, %c0_188] : memref<16x128xf32, #tpu.memory_space<vmem>>, vector<16x128xf32>
    tpu.vector_store %arg6[%c0_187, %c0_188], %372 {strides = array<i32>} : memref<16x128xf32, #tpu.memory_space<vmem>>, vector<16x128xf32>,
    %c0_189 = arith.constant 0 : index
    %c0_190 = arith.constant 0 : index
    %374 = vector.load %arg7[%c0_189, %c0_190] : memref<16x128xf32, #tpu.memory_space<vmem>>, vector<16x128xf32>
    tpu.vector_store %arg7[%c0_189, %c0_190], %370 {strides = array<i32>} : memref<16x128xf32, #tpu.memory_space<vmem>>, vector<16x128xf32>,
    %375 = arith.truncf %372 : vector<16x128xf32> to vector<16x128xbf16>
    %376 = arith.index_cast %333 : i32 to index
    %c0_191 = arith.constant 0 : index
    %377 = vector.load %arg5[%376, %c0_191] : memref<128x128xbf16, #tpu.memory_space<vmem>>, vector<16x128xbf16>
    tpu.vector_store %arg5[%376, %c0_191], %375 {strides = array<i32>} : memref<128x128xbf16, #tpu.memory_space<vmem>>, vector<16x128xbf16>,
    %c8_i32 = arith.constant 8 : i32
    return
  }
  func.func @transform_0(%arg0: i32) -> (i32, i32) {
    %c0_i32 = arith.constant 0 : i32
    %c0_i32_0 = arith.constant 0 : i32
    return %arg0, %c0_i32 : i32, i32
  }
  func.func @transform_1(%arg0: i32) -> (i32, i32) {
    %c0_i32 = arith.constant 0 : i32
    %c0_i32_0 = arith.constant 0 : i32
    %c0_i32_1 = arith.constant 0 : i32
    return %c0_i32, %c0_i32_0 : i32, i32
  }
  func.func @transform_2(%arg0: i32) -> (i32, i32) {
    %c0_i32 = arith.constant 0 : i32
    %c0_i32_0 = arith.constant 0 : i32
    %c0_i32_1 = arith.constant 0 : i32
    return %c0_i32, %c0_i32_0 : i32, i32
  }
  func.func @transform_3(%arg0: i32) -> (i32, i32) {
    %c0_i32 = arith.constant 0 : i32
    %c0_i32_0 = arith.constant 0 : i32
    %c0_i32_1 = arith.constant 0 : i32
    return %c0_i32, %c0_i32_0 : i32, i32
  }
  func.func @transform_4(%arg0: i32) -> (i32, i32) {
    %c0_i32 = arith.constant 0 : i32
    %c0_i32_0 = arith.constant 0 : i32
    return %arg0, %c0_i32 : i32, i32
  }
}

module attributes {stable_mosaic.version = 11 : i64} {
  func.func @lstm_last_fc_kernel(%arg0: i32, %arg1: memref<128x128xbf16, #tpu.memory_space<vmem>>, %arg2: memref<128x512xbf16, #tpu.memory_space<vmem>>, %arg3: memref<128x512xbf16, #tpu.memory_space<vmem>>, %arg4: memref<1x512xf32, #tpu.memory_space<vmem>>, %arg5: memref<128x128xbf16, #tpu.memory_space<vmem>>, %arg6: memref<1x128xf32, #tpu.memory_space<vmem>>, %arg7: memref<16x128xf32, #tpu.memory_space<vmem>>, %arg8: memref<16x128xf32, #tpu.memory_space<vmem>>, %arg9: memref<16x128xf32, #tpu.memory_space<vmem>>, %arg10: memref<128x512xf32, #tpu.memory_space<vmem>>) attributes {dimension_semantics = [#tpu.dimension_semantics<arbitrary>], iteration_bounds = array<i64: 1>, scalar_prefetch = 0 : i64, scratch_operands = 3 : i64, tpu.core_type = #tpu.core_type<tc>, window_params = [{transform_indices = @transform_0, window_bounds = array<i64: 128, 128>}, {pipeline_mode = #tpu.pipeline_mode<synchronous>, transform_indices = @transform_1, window_bounds = array<i64: 128, 512>}, {pipeline_mode = #tpu.pipeline_mode<synchronous>, transform_indices = @transform_2, window_bounds = array<i64: 128, 512>}, {pipeline_mode = #tpu.pipeline_mode<synchronous>, transform_indices = @transform_3, window_bounds = array<i64: 1, 512>}, {pipeline_mode = #tpu.pipeline_mode<synchronous>, transform_indices = @transform_4, window_bounds = array<i64: 128, 128>}, {pipeline_mode = #tpu.pipeline_mode<synchronous>, transform_indices = @transform_5, window_bounds = array<i64: 1, 128>}, {pipeline_mode = #tpu.pipeline_mode<synchronous>, transform_indices = @transform_6, window_bounds = array<i64: 16, 128>}]} {
    %c0_i32 = arith.constant 0 : i32
    %0 = arith.cmpi eq, %arg0, %c0_i32 : i32
    %1 = arith.extui %0 : i1 to i32
    %c0_i32_0 = arith.constant 0 : i32
    %2 = arith.cmpi ne, %1, %c0_i32_0 : i32
    scf.if %2 {
      %cst_186 = arith.constant 0.000000e+00 : f32
      %357 = vector.broadcast %cst_186 : f32 to vector<16x128xf32>
      %c0_187 = arith.constant 0 : index
      %c0_188 = arith.constant 0 : index
      %358 = vector.load %arg8[%c0_187, %c0_188] : memref<16x128xf32, #tpu.memory_space<vmem>>, vector<16x128xf32>
      tpu.vector_store %arg8[%c0_187, %c0_188], %357 {strides = array<i32>} : memref<16x128xf32, #tpu.memory_space<vmem>>, vector<16x128xf32>,
      %cst_189 = arith.constant 0.000000e+00 : f32
      %359 = vector.broadcast %cst_189 : f32 to vector<16x128xf32>
      %c0_190 = arith.constant 0 : index
      %c0_191 = arith.constant 0 : index
      %360 = vector.load %arg9[%c0_190, %c0_191] : memref<16x128xf32, #tpu.memory_space<vmem>>, vector<16x128xf32>
      tpu.vector_store %arg9[%c0_190, %c0_191], %359 {strides = array<i32>} : memref<16x128xf32, #tpu.memory_space<vmem>>, vector<16x128xf32>,
    } else {
    }
    %c0 = arith.constant 0 : index
    %c0_1 = arith.constant 0 : index
    %3 = vector.load %arg1[%c0, %c0_1] : memref<128x128xbf16, #tpu.memory_space<vmem>>, vector<128x128xbf16>
    %c0_2 = arith.constant 0 : index
    %c0_3 = arith.constant 0 : index
    %4 = vector.load %arg2[%c0_2, %c0_3] : memref<128x512xbf16, #tpu.memory_space<vmem>>, vector<128x512xbf16>
    %cst = arith.constant dense<0.000000e+00> : vector<128x512xf32>
    %5 = tpu.matmul %3, %4, %cst {dimension_numbers = #tpu.dot_dimension_numbers<[1], [0], [0], [1], [0, 0, 1, 1], [], []>} : vector<128x128xbf16>, vector<128x512xbf16>, vector<128x512xf32> -> vector<128x512xf32>
    %c0_4 = arith.constant 0 : index
    %c0_5 = arith.constant 0 : index
    %6 = vector.load %arg4[%c0_4, %c0_5] : memref<1x512xf32, #tpu.memory_space<vmem>>, vector<1x512xf32>
    %7 = vector.broadcast %6 : vector<1x512xf32> to vector<128x512xf32>
    %8 = arith.addf %5, %7 : vector<128x512xf32>
    %c0_6 = arith.constant 0 : index
    %c0_7 = arith.constant 0 : index
    %9 = vector.load %arg10[%c0_6, %c0_7] : memref<128x512xf32, #tpu.memory_space<vmem>>, vector<128x512xf32>
    tpu.vector_store %arg10[%c0_6, %c0_7], %8 {strides = array<i32>} : memref<128x512xf32, #tpu.memory_space<vmem>>, vector<128x512xf32>,
    %c0_i32_8 = arith.constant 0 : i32
    %c16_i32 = arith.constant 16 : i32
    %10 = arith.muli %c0_i32_8, %c16_i32 : i32
    %11 = tpu.assume_multiple %10, 16 : i32
    %12 = arith.index_cast %11 : i32 to index
    %c0_9 = arith.constant 0 : index
    %13 = vector.load %arg10[%12, %c0_9] : memref<128x512xf32, #tpu.memory_space<vmem>>, vector<16x512xf32>
    %c0_10 = arith.constant 0 : index
    %c0_11 = arith.constant 0 : index
    %14 = vector.load %arg8[%c0_10, %c0_11] : memref<16x128xf32, #tpu.memory_space<vmem>>, vector<16x128xf32>
    %15 = arith.truncf %14 : vector<16x128xf32> to vector<16x128xbf16>
    %c0_12 = arith.constant 0 : index
    %c0_13 = arith.constant 0 : index
    %16 = vector.load %arg3[%c0_12, %c0_13] : memref<128x512xbf16, #tpu.memory_space<vmem>>, vector<128x512xbf16>
    %cst_14 = arith.constant dense<0.000000e+00> : vector<16x512xf32>
    %17 = tpu.matmul %15, %16, %cst_14 {dimension_numbers = #tpu.dot_dimension_numbers<[1], [0], [0], [1], [0, 0, 1, 1], [], []>} : vector<16x128xbf16>, vector<128x512xbf16>, vector<16x512xf32> -> vector<16x512xf32>
    %18 = arith.addf %13, %17 : vector<16x512xf32>
    %c0_15 = arith.constant 0 : index
    %c0_16 = arith.constant 0 : index
    %19 = vector.load %arg9[%c0_15, %c0_16] : memref<16x128xf32, #tpu.memory_space<vmem>>, vector<16x128xf32>
    %20 = vector.extract_strided_slice %18 {offsets = [0, 0], sizes = [16, 128], strides = [1, 1]} : vector<16x512xf32> to vector<16x128xf32>
    %cst_17 = arith.constant 5.000000e-01 : f32
    %21 = vector.broadcast %cst_17 : f32 to vector<16x128xf32>
    %22 = arith.mulf %21, %20 : vector<16x128xf32>
    %23 = math.tanh %22 : vector<16x128xf32>
    %cst_18 = arith.constant 5.000000e-01 : f32
    %24 = vector.broadcast %cst_18 : f32 to vector<16x128xf32>
    %25 = arith.mulf %24, %23 : vector<16x128xf32>
    %cst_19 = arith.constant 5.000000e-01 : f32
    %26 = vector.broadcast %cst_19 : f32 to vector<16x128xf32>
    %27 = arith.addf %25, %26 : vector<16x128xf32>
    %28 = vector.extract_strided_slice %18 {offsets = [0, 128], sizes = [16, 128], strides = [1, 1]} : vector<16x512xf32> to vector<16x128xf32>
    %cst_20 = arith.constant 5.000000e-01 : f32
    %29 = vector.broadcast %cst_20 : f32 to vector<16x128xf32>
    %30 = arith.mulf %29, %28 : vector<16x128xf32>
    %31 = math.tanh %30 : vector<16x128xf32>
    %cst_21 = arith.constant 5.000000e-01 : f32
    %32 = vector.broadcast %cst_21 : f32 to vector<16x128xf32>
    %33 = arith.mulf %32, %31 : vector<16x128xf32>
    %cst_22 = arith.constant 5.000000e-01 : f32
    %34 = vector.broadcast %cst_22 : f32 to vector<16x128xf32>
    %35 = arith.addf %33, %34 : vector<16x128xf32>
    %36 = vector.extract_strided_slice %18 {offsets = [0, 256], sizes = [16, 128], strides = [1, 1]} : vector<16x512xf32> to vector<16x128xf32>
    %37 = math.tanh %36 : vector<16x128xf32>
    %38 = vector.extract_strided_slice %18 {offsets = [0, 384], sizes = [16, 128], strides = [1, 1]} : vector<16x512xf32> to vector<16x128xf32>
    %cst_23 = arith.constant 5.000000e-01 : f32
    %39 = vector.broadcast %cst_23 : f32 to vector<16x128xf32>
    %40 = arith.mulf %39, %38 : vector<16x128xf32>
    %41 = math.tanh %40 : vector<16x128xf32>
    %cst_24 = arith.constant 5.000000e-01 : f32
    %42 = vector.broadcast %cst_24 : f32 to vector<16x128xf32>
    %43 = arith.mulf %42, %41 : vector<16x128xf32>
    %cst_25 = arith.constant 5.000000e-01 : f32
    %44 = vector.broadcast %cst_25 : f32 to vector<16x128xf32>
    %45 = arith.addf %43, %44 : vector<16x128xf32>
    %46 = arith.mulf %35, %19 : vector<16x128xf32>
    %47 = arith.mulf %27, %37 : vector<16x128xf32>
    %48 = arith.addf %46, %47 : vector<16x128xf32>
    %49 = math.tanh %48 : vector<16x128xf32>
    %50 = arith.mulf %45, %49 : vector<16x128xf32>
    %c0_26 = arith.constant 0 : index
    %c0_27 = arith.constant 0 : index
    %51 = vector.load %arg8[%c0_26, %c0_27] : memref<16x128xf32, #tpu.memory_space<vmem>>, vector<16x128xf32>
    tpu.vector_store %arg8[%c0_26, %c0_27], %50 {strides = array<i32>} : memref<16x128xf32, #tpu.memory_space<vmem>>, vector<16x128xf32>,
    %c0_28 = arith.constant 0 : index
    %c0_29 = arith.constant 0 : index
    %52 = vector.load %arg9[%c0_28, %c0_29] : memref<16x128xf32, #tpu.memory_space<vmem>>, vector<16x128xf32>
    tpu.vector_store %arg9[%c0_28, %c0_29], %48 {strides = array<i32>} : memref<16x128xf32, #tpu.memory_space<vmem>>, vector<16x128xf32>,
    %c1_i32 = arith.constant 1 : i32
    %c16_i32_30 = arith.constant 16 : i32
    %53 = arith.muli %c1_i32, %c16_i32_30 : i32
    %54 = tpu.assume_multiple %53, 16 : i32
    %55 = arith.index_cast %54 : i32 to index
    %c0_31 = arith.constant 0 : index
    %56 = vector.load %arg10[%55, %c0_31] : memref<128x512xf32, #tpu.memory_space<vmem>>, vector<16x512xf32>
    %c0_32 = arith.constant 0 : index
    %c0_33 = arith.constant 0 : index
    %57 = vector.load %arg8[%c0_32, %c0_33] : memref<16x128xf32, #tpu.memory_space<vmem>>, vector<16x128xf32>
    %58 = arith.truncf %57 : vector<16x128xf32> to vector<16x128xbf16>
    %c0_34 = arith.constant 0 : index
    %c0_35 = arith.constant 0 : index
    %59 = vector.load %arg3[%c0_34, %c0_35] : memref<128x512xbf16, #tpu.memory_space<vmem>>, vector<128x512xbf16>
    %cst_36 = arith.constant dense<0.000000e+00> : vector<16x512xf32>
    %60 = tpu.matmul %58, %59, %cst_36 {dimension_numbers = #tpu.dot_dimension_numbers<[1], [0], [0], [1], [0, 0, 1, 1], [], []>} : vector<16x128xbf16>, vector<128x512xbf16>, vector<16x512xf32> -> vector<16x512xf32>
    %61 = arith.addf %56, %60 : vector<16x512xf32>
    %c0_37 = arith.constant 0 : index
    %c0_38 = arith.constant 0 : index
    %62 = vector.load %arg9[%c0_37, %c0_38] : memref<16x128xf32, #tpu.memory_space<vmem>>, vector<16x128xf32>
    %63 = vector.extract_strided_slice %61 {offsets = [0, 0], sizes = [16, 128], strides = [1, 1]} : vector<16x512xf32> to vector<16x128xf32>
    %cst_39 = arith.constant 5.000000e-01 : f32
    %64 = vector.broadcast %cst_39 : f32 to vector<16x128xf32>
    %65 = arith.mulf %64, %63 : vector<16x128xf32>
    %66 = math.tanh %65 : vector<16x128xf32>
    %cst_40 = arith.constant 5.000000e-01 : f32
    %67 = vector.broadcast %cst_40 : f32 to vector<16x128xf32>
    %68 = arith.mulf %67, %66 : vector<16x128xf32>
    %cst_41 = arith.constant 5.000000e-01 : f32
    %69 = vector.broadcast %cst_41 : f32 to vector<16x128xf32>
    %70 = arith.addf %68, %69 : vector<16x128xf32>
    %71 = vector.extract_strided_slice %61 {offsets = [0, 128], sizes = [16, 128], strides = [1, 1]} : vector<16x512xf32> to vector<16x128xf32>
    %cst_42 = arith.constant 5.000000e-01 : f32
    %72 = vector.broadcast %cst_42 : f32 to vector<16x128xf32>
    %73 = arith.mulf %72, %71 : vector<16x128xf32>
    %74 = math.tanh %73 : vector<16x128xf32>
    %cst_43 = arith.constant 5.000000e-01 : f32
    %75 = vector.broadcast %cst_43 : f32 to vector<16x128xf32>
    %76 = arith.mulf %75, %74 : vector<16x128xf32>
    %cst_44 = arith.constant 5.000000e-01 : f32
    %77 = vector.broadcast %cst_44 : f32 to vector<16x128xf32>
    %78 = arith.addf %76, %77 : vector<16x128xf32>
    %79 = vector.extract_strided_slice %61 {offsets = [0, 256], sizes = [16, 128], strides = [1, 1]} : vector<16x512xf32> to vector<16x128xf32>
    %80 = math.tanh %79 : vector<16x128xf32>
    %81 = vector.extract_strided_slice %61 {offsets = [0, 384], sizes = [16, 128], strides = [1, 1]} : vector<16x512xf32> to vector<16x128xf32>
    %cst_45 = arith.constant 5.000000e-01 : f32
    %82 = vector.broadcast %cst_45 : f32 to vector<16x128xf32>
    %83 = arith.mulf %82, %81 : vector<16x128xf32>
    %84 = math.tanh %83 : vector<16x128xf32>
    %cst_46 = arith.constant 5.000000e-01 : f32
    %85 = vector.broadcast %cst_46 : f32 to vector<16x128xf32>
    %86 = arith.mulf %85, %84 : vector<16x128xf32>
    %cst_47 = arith.constant 5.000000e-01 : f32
    %87 = vector.broadcast %cst_47 : f32 to vector<16x128xf32>
    %88 = arith.addf %86, %87 : vector<16x128xf32>
    %89 = arith.mulf %78, %62 : vector<16x128xf32>
    %90 = arith.mulf %70, %80 : vector<16x128xf32>
    %91 = arith.addf %89, %90 : vector<16x128xf32>
    %92 = math.tanh %91 : vector<16x128xf32>
    %93 = arith.mulf %88, %92 : vector<16x128xf32>
    %c0_48 = arith.constant 0 : index
    %c0_49 = arith.constant 0 : index
    %94 = vector.load %arg8[%c0_48, %c0_49] : memref<16x128xf32, #tpu.memory_space<vmem>>, vector<16x128xf32>
    tpu.vector_store %arg8[%c0_48, %c0_49], %93 {strides = array<i32>} : memref<16x128xf32, #tpu.memory_space<vmem>>, vector<16x128xf32>,
    %c0_50 = arith.constant 0 : index
    %c0_51 = arith.constant 0 : index
    %95 = vector.load %arg9[%c0_50, %c0_51] : memref<16x128xf32, #tpu.memory_space<vmem>>, vector<16x128xf32>
    tpu.vector_store %arg9[%c0_50, %c0_51], %91 {strides = array<i32>} : memref<16x128xf32, #tpu.memory_space<vmem>>, vector<16x128xf32>,
    %c2_i32 = arith.constant 2 : i32
    %c16_i32_52 = arith.constant 16 : i32
    %96 = arith.muli %c2_i32, %c16_i32_52 : i32
    %97 = tpu.assume_multiple %96, 16 : i32
    %98 = arith.index_cast %97 : i32 to index
    %c0_53 = arith.constant 0 : index
    %99 = vector.load %arg10[%98, %c0_53] : memref<128x512xf32, #tpu.memory_space<vmem>>, vector<16x512xf32>
    %c0_54 = arith.constant 0 : index
    %c0_55 = arith.constant 0 : index
    %100 = vector.load %arg8[%c0_54, %c0_55] : memref<16x128xf32, #tpu.memory_space<vmem>>, vector<16x128xf32>
    %101 = arith.truncf %100 : vector<16x128xf32> to vector<16x128xbf16>
    %c0_56 = arith.constant 0 : index
    %c0_57 = arith.constant 0 : index
    %102 = vector.load %arg3[%c0_56, %c0_57] : memref<128x512xbf16, #tpu.memory_space<vmem>>, vector<128x512xbf16>
    %cst_58 = arith.constant dense<0.000000e+00> : vector<16x512xf32>
    %103 = tpu.matmul %101, %102, %cst_58 {dimension_numbers = #tpu.dot_dimension_numbers<[1], [0], [0], [1], [0, 0, 1, 1], [], []>} : vector<16x128xbf16>, vector<128x512xbf16>, vector<16x512xf32> -> vector<16x512xf32>
    %104 = arith.addf %99, %103 : vector<16x512xf32>
    %c0_59 = arith.constant 0 : index
    %c0_60 = arith.constant 0 : index
    %105 = vector.load %arg9[%c0_59, %c0_60] : memref<16x128xf32, #tpu.memory_space<vmem>>, vector<16x128xf32>
    %106 = vector.extract_strided_slice %104 {offsets = [0, 0], sizes = [16, 128], strides = [1, 1]} : vector<16x512xf32> to vector<16x128xf32>
    %cst_61 = arith.constant 5.000000e-01 : f32
    %107 = vector.broadcast %cst_61 : f32 to vector<16x128xf32>
    %108 = arith.mulf %107, %106 : vector<16x128xf32>
    %109 = math.tanh %108 : vector<16x128xf32>
    %cst_62 = arith.constant 5.000000e-01 : f32
    %110 = vector.broadcast %cst_62 : f32 to vector<16x128xf32>
    %111 = arith.mulf %110, %109 : vector<16x128xf32>
    %cst_63 = arith.constant 5.000000e-01 : f32
    %112 = vector.broadcast %cst_63 : f32 to vector<16x128xf32>
    %113 = arith.addf %111, %112 : vector<16x128xf32>
    %114 = vector.extract_strided_slice %104 {offsets = [0, 128], sizes = [16, 128], strides = [1, 1]} : vector<16x512xf32> to vector<16x128xf32>
    %cst_64 = arith.constant 5.000000e-01 : f32
    %115 = vector.broadcast %cst_64 : f32 to vector<16x128xf32>
    %116 = arith.mulf %115, %114 : vector<16x128xf32>
    %117 = math.tanh %116 : vector<16x128xf32>
    %cst_65 = arith.constant 5.000000e-01 : f32
    %118 = vector.broadcast %cst_65 : f32 to vector<16x128xf32>
    %119 = arith.mulf %118, %117 : vector<16x128xf32>
    %cst_66 = arith.constant 5.000000e-01 : f32
    %120 = vector.broadcast %cst_66 : f32 to vector<16x128xf32>
    %121 = arith.addf %119, %120 : vector<16x128xf32>
    %122 = vector.extract_strided_slice %104 {offsets = [0, 256], sizes = [16, 128], strides = [1, 1]} : vector<16x512xf32> to vector<16x128xf32>
    %123 = math.tanh %122 : vector<16x128xf32>
    %124 = vector.extract_strided_slice %104 {offsets = [0, 384], sizes = [16, 128], strides = [1, 1]} : vector<16x512xf32> to vector<16x128xf32>
    %cst_67 = arith.constant 5.000000e-01 : f32
    %125 = vector.broadcast %cst_67 : f32 to vector<16x128xf32>
    %126 = arith.mulf %125, %124 : vector<16x128xf32>
    %127 = math.tanh %126 : vector<16x128xf32>
    %cst_68 = arith.constant 5.000000e-01 : f32
    %128 = vector.broadcast %cst_68 : f32 to vector<16x128xf32>
    %129 = arith.mulf %128, %127 : vector<16x128xf32>
    %cst_69 = arith.constant 5.000000e-01 : f32
    %130 = vector.broadcast %cst_69 : f32 to vector<16x128xf32>
    %131 = arith.addf %129, %130 : vector<16x128xf32>
    %132 = arith.mulf %121, %105 : vector<16x128xf32>
    %133 = arith.mulf %113, %123 : vector<16x128xf32>
    %134 = arith.addf %132, %133 : vector<16x128xf32>
    %135 = math.tanh %134 : vector<16x128xf32>
    %136 = arith.mulf %131, %135 : vector<16x128xf32>
    %c0_70 = arith.constant 0 : index
    %c0_71 = arith.constant 0 : index
    %137 = vector.load %arg8[%c0_70, %c0_71] : memref<16x128xf32, #tpu.memory_space<vmem>>, vector<16x128xf32>
    tpu.vector_store %arg8[%c0_70, %c0_71], %136 {strides = array<i32>} : memref<16x128xf32, #tpu.memory_space<vmem>>, vector<16x128xf32>,
    %c0_72 = arith.constant 0 : index
    %c0_73 = arith.constant 0 : index
    %138 = vector.load %arg9[%c0_72, %c0_73] : memref<16x128xf32, #tpu.memory_space<vmem>>, vector<16x128xf32>
    tpu.vector_store %arg9[%c0_72, %c0_73], %134 {strides = array<i32>} : memref<16x128xf32, #tpu.memory_space<vmem>>, vector<16x128xf32>,
    %c3_i32 = arith.constant 3 : i32
    %c16_i32_74 = arith.constant 16 : i32
    %139 = arith.muli %c3_i32, %c16_i32_74 : i32
    %140 = tpu.assume_multiple %139, 16 : i32
    %141 = arith.index_cast %140 : i32 to index
    %c0_75 = arith.constant 0 : index
    %142 = vector.load %arg10[%141, %c0_75] : memref<128x512xf32, #tpu.memory_space<vmem>>, vector<16x512xf32>
    %c0_76 = arith.constant 0 : index
    %c0_77 = arith.constant 0 : index
    %143 = vector.load %arg8[%c0_76, %c0_77] : memref<16x128xf32, #tpu.memory_space<vmem>>, vector<16x128xf32>
    %144 = arith.truncf %143 : vector<16x128xf32> to vector<16x128xbf16>
    %c0_78 = arith.constant 0 : index
    %c0_79 = arith.constant 0 : index
    %145 = vector.load %arg3[%c0_78, %c0_79] : memref<128x512xbf16, #tpu.memory_space<vmem>>, vector<128x512xbf16>
    %cst_80 = arith.constant dense<0.000000e+00> : vector<16x512xf32>
    %146 = tpu.matmul %144, %145, %cst_80 {dimension_numbers = #tpu.dot_dimension_numbers<[1], [0], [0], [1], [0, 0, 1, 1], [], []>} : vector<16x128xbf16>, vector<128x512xbf16>, vector<16x512xf32> -> vector<16x512xf32>
    %147 = arith.addf %142, %146 : vector<16x512xf32>
    %c0_81 = arith.constant 0 : index
    %c0_82 = arith.constant 0 : index
    %148 = vector.load %arg9[%c0_81, %c0_82] : memref<16x128xf32, #tpu.memory_space<vmem>>, vector<16x128xf32>
    %149 = vector.extract_strided_slice %147 {offsets = [0, 0], sizes = [16, 128], strides = [1, 1]} : vector<16x512xf32> to vector<16x128xf32>
    %cst_83 = arith.constant 5.000000e-01 : f32
    %150 = vector.broadcast %cst_83 : f32 to vector<16x128xf32>
    %151 = arith.mulf %150, %149 : vector<16x128xf32>
    %152 = math.tanh %151 : vector<16x128xf32>
    %cst_84 = arith.constant 5.000000e-01 : f32
    %153 = vector.broadcast %cst_84 : f32 to vector<16x128xf32>
    %154 = arith.mulf %153, %152 : vector<16x128xf32>
    %cst_85 = arith.constant 5.000000e-01 : f32
    %155 = vector.broadcast %cst_85 : f32 to vector<16x128xf32>
    %156 = arith.addf %154, %155 : vector<16x128xf32>
    %157 = vector.extract_strided_slice %147 {offsets = [0, 128], sizes = [16, 128], strides = [1, 1]} : vector<16x512xf32> to vector<16x128xf32>
    %cst_86 = arith.constant 5.000000e-01 : f32
    %158 = vector.broadcast %cst_86 : f32 to vector<16x128xf32>
    %159 = arith.mulf %158, %157 : vector<16x128xf32>
    %160 = math.tanh %159 : vector<16x128xf32>
    %cst_87 = arith.constant 5.000000e-01 : f32
    %161 = vector.broadcast %cst_87 : f32 to vector<16x128xf32>
    %162 = arith.mulf %161, %160 : vector<16x128xf32>
    %cst_88 = arith.constant 5.000000e-01 : f32
    %163 = vector.broadcast %cst_88 : f32 to vector<16x128xf32>
    %164 = arith.addf %162, %163 : vector<16x128xf32>
    %165 = vector.extract_strided_slice %147 {offsets = [0, 256], sizes = [16, 128], strides = [1, 1]} : vector<16x512xf32> to vector<16x128xf32>
    %166 = math.tanh %165 : vector<16x128xf32>
    %167 = vector.extract_strided_slice %147 {offsets = [0, 384], sizes = [16, 128], strides = [1, 1]} : vector<16x512xf32> to vector<16x128xf32>
    %cst_89 = arith.constant 5.000000e-01 : f32
    %168 = vector.broadcast %cst_89 : f32 to vector<16x128xf32>
    %169 = arith.mulf %168, %167 : vector<16x128xf32>
    %170 = math.tanh %169 : vector<16x128xf32>
    %cst_90 = arith.constant 5.000000e-01 : f32
    %171 = vector.broadcast %cst_90 : f32 to vector<16x128xf32>
    %172 = arith.mulf %171, %170 : vector<16x128xf32>
    %cst_91 = arith.constant 5.000000e-01 : f32
    %173 = vector.broadcast %cst_91 : f32 to vector<16x128xf32>
    %174 = arith.addf %172, %173 : vector<16x128xf32>
    %175 = arith.mulf %164, %148 : vector<16x128xf32>
    %176 = arith.mulf %156, %166 : vector<16x128xf32>
    %177 = arith.addf %175, %176 : vector<16x128xf32>
    %178 = math.tanh %177 : vector<16x128xf32>
    %179 = arith.mulf %174, %178 : vector<16x128xf32>
    %c0_92 = arith.constant 0 : index
    %c0_93 = arith.constant 0 : index
    %180 = vector.load %arg8[%c0_92, %c0_93] : memref<16x128xf32, #tpu.memory_space<vmem>>, vector<16x128xf32>
    tpu.vector_store %arg8[%c0_92, %c0_93], %179 {strides = array<i32>} : memref<16x128xf32, #tpu.memory_space<vmem>>, vector<16x128xf32>,
    %c0_94 = arith.constant 0 : index
    %c0_95 = arith.constant 0 : index
    %181 = vector.load %arg9[%c0_94, %c0_95] : memref<16x128xf32, #tpu.memory_space<vmem>>, vector<16x128xf32>
    tpu.vector_store %arg9[%c0_94, %c0_95], %177 {strides = array<i32>} : memref<16x128xf32, #tpu.memory_space<vmem>>, vector<16x128xf32>,
    %c4_i32 = arith.constant 4 : i32
    %c16_i32_96 = arith.constant 16 : i32
    %182 = arith.muli %c4_i32, %c16_i32_96 : i32
    %183 = tpu.assume_multiple %182, 16 : i32
    %184 = arith.index_cast %183 : i32 to index
    %c0_97 = arith.constant 0 : index
    %185 = vector.load %arg10[%184, %c0_97] : memref<128x512xf32, #tpu.memory_space<vmem>>, vector<16x512xf32>
    %c0_98 = arith.constant 0 : index
    %c0_99 = arith.constant 0 : index
    %186 = vector.load %arg8[%c0_98, %c0_99] : memref<16x128xf32, #tpu.memory_space<vmem>>, vector<16x128xf32>
    %187 = arith.truncf %186 : vector<16x128xf32> to vector<16x128xbf16>
    %c0_100 = arith.constant 0 : index
    %c0_101 = arith.constant 0 : index
    %188 = vector.load %arg3[%c0_100, %c0_101] : memref<128x512xbf16, #tpu.memory_space<vmem>>, vector<128x512xbf16>
    %cst_102 = arith.constant dense<0.000000e+00> : vector<16x512xf32>
    %189 = tpu.matmul %187, %188, %cst_102 {dimension_numbers = #tpu.dot_dimension_numbers<[1], [0], [0], [1], [0, 0, 1, 1], [], []>} : vector<16x128xbf16>, vector<128x512xbf16>, vector<16x512xf32> -> vector<16x512xf32>
    %190 = arith.addf %185, %189 : vector<16x512xf32>
    %c0_103 = arith.constant 0 : index
    %c0_104 = arith.constant 0 : index
    %191 = vector.load %arg9[%c0_103, %c0_104] : memref<16x128xf32, #tpu.memory_space<vmem>>, vector<16x128xf32>
    %192 = vector.extract_strided_slice %190 {offsets = [0, 0], sizes = [16, 128], strides = [1, 1]} : vector<16x512xf32> to vector<16x128xf32>
    %cst_105 = arith.constant 5.000000e-01 : f32
    %193 = vector.broadcast %cst_105 : f32 to vector<16x128xf32>
    %194 = arith.mulf %193, %192 : vector<16x128xf32>
    %195 = math.tanh %194 : vector<16x128xf32>
    %cst_106 = arith.constant 5.000000e-01 : f32
    %196 = vector.broadcast %cst_106 : f32 to vector<16x128xf32>
    %197 = arith.mulf %196, %195 : vector<16x128xf32>
    %cst_107 = arith.constant 5.000000e-01 : f32
    %198 = vector.broadcast %cst_107 : f32 to vector<16x128xf32>
    %199 = arith.addf %197, %198 : vector<16x128xf32>
    %200 = vector.extract_strided_slice %190 {offsets = [0, 128], sizes = [16, 128], strides = [1, 1]} : vector<16x512xf32> to vector<16x128xf32>
    %cst_108 = arith.constant 5.000000e-01 : f32
    %201 = vector.broadcast %cst_108 : f32 to vector<16x128xf32>
    %202 = arith.mulf %201, %200 : vector<16x128xf32>
    %203 = math.tanh %202 : vector<16x128xf32>
    %cst_109 = arith.constant 5.000000e-01 : f32
    %204 = vector.broadcast %cst_109 : f32 to vector<16x128xf32>
    %205 = arith.mulf %204, %203 : vector<16x128xf32>
    %cst_110 = arith.constant 5.000000e-01 : f32
    %206 = vector.broadcast %cst_110 : f32 to vector<16x128xf32>
    %207 = arith.addf %205, %206 : vector<16x128xf32>
    %208 = vector.extract_strided_slice %190 {offsets = [0, 256], sizes = [16, 128], strides = [1, 1]} : vector<16x512xf32> to vector<16x128xf32>
    %209 = math.tanh %208 : vector<16x128xf32>
    %210 = vector.extract_strided_slice %190 {offsets = [0, 384], sizes = [16, 128], strides = [1, 1]} : vector<16x512xf32> to vector<16x128xf32>
    %cst_111 = arith.constant 5.000000e-01 : f32
    %211 = vector.broadcast %cst_111 : f32 to vector<16x128xf32>
    %212 = arith.mulf %211, %210 : vector<16x128xf32>
    %213 = math.tanh %212 : vector<16x128xf32>
    %cst_112 = arith.constant 5.000000e-01 : f32
    %214 = vector.broadcast %cst_112 : f32 to vector<16x128xf32>
    %215 = arith.mulf %214, %213 : vector<16x128xf32>
    %cst_113 = arith.constant 5.000000e-01 : f32
    %216 = vector.broadcast %cst_113 : f32 to vector<16x128xf32>
    %217 = arith.addf %215, %216 : vector<16x128xf32>
    %218 = arith.mulf %207, %191 : vector<16x128xf32>
    %219 = arith.mulf %199, %209 : vector<16x128xf32>
    %220 = arith.addf %218, %219 : vector<16x128xf32>
    %221 = math.tanh %220 : vector<16x128xf32>
    %222 = arith.mulf %217, %221 : vector<16x128xf32>
    %c0_114 = arith.constant 0 : index
    %c0_115 = arith.constant 0 : index
    %223 = vector.load %arg8[%c0_114, %c0_115] : memref<16x128xf32, #tpu.memory_space<vmem>>, vector<16x128xf32>
    tpu.vector_store %arg8[%c0_114, %c0_115], %222 {strides = array<i32>} : memref<16x128xf32, #tpu.memory_space<vmem>>, vector<16x128xf32>,
    %c0_116 = arith.constant 0 : index
    %c0_117 = arith.constant 0 : index
    %224 = vector.load %arg9[%c0_116, %c0_117] : memref<16x128xf32, #tpu.memory_space<vmem>>, vector<16x128xf32>
    tpu.vector_store %arg9[%c0_116, %c0_117], %220 {strides = array<i32>} : memref<16x128xf32, #tpu.memory_space<vmem>>, vector<16x128xf32>,
    %c5_i32 = arith.constant 5 : i32
    %c16_i32_118 = arith.constant 16 : i32
    %225 = arith.muli %c5_i32, %c16_i32_118 : i32
    %226 = tpu.assume_multiple %225, 16 : i32
    %227 = arith.index_cast %226 : i32 to index
    %c0_119 = arith.constant 0 : index
    %228 = vector.load %arg10[%227, %c0_119] : memref<128x512xf32, #tpu.memory_space<vmem>>, vector<16x512xf32>
    %c0_120 = arith.constant 0 : index
    %c0_121 = arith.constant 0 : index
    %229 = vector.load %arg8[%c0_120, %c0_121] : memref<16x128xf32, #tpu.memory_space<vmem>>, vector<16x128xf32>
    %230 = arith.truncf %229 : vector<16x128xf32> to vector<16x128xbf16>
    %c0_122 = arith.constant 0 : index
    %c0_123 = arith.constant 0 : index
    %231 = vector.load %arg3[%c0_122, %c0_123] : memref<128x512xbf16, #tpu.memory_space<vmem>>, vector<128x512xbf16>
    %cst_124 = arith.constant dense<0.000000e+00> : vector<16x512xf32>
    %232 = tpu.matmul %230, %231, %cst_124 {dimension_numbers = #tpu.dot_dimension_numbers<[1], [0], [0], [1], [0, 0, 1, 1], [], []>} : vector<16x128xbf16>, vector<128x512xbf16>, vector<16x512xf32> -> vector<16x512xf32>
    %233 = arith.addf %228, %232 : vector<16x512xf32>
    %c0_125 = arith.constant 0 : index
    %c0_126 = arith.constant 0 : index
    %234 = vector.load %arg9[%c0_125, %c0_126] : memref<16x128xf32, #tpu.memory_space<vmem>>, vector<16x128xf32>
    %235 = vector.extract_strided_slice %233 {offsets = [0, 0], sizes = [16, 128], strides = [1, 1]} : vector<16x512xf32> to vector<16x128xf32>
    %cst_127 = arith.constant 5.000000e-01 : f32
    %236 = vector.broadcast %cst_127 : f32 to vector<16x128xf32>
    %237 = arith.mulf %236, %235 : vector<16x128xf32>
    %238 = math.tanh %237 : vector<16x128xf32>
    %cst_128 = arith.constant 5.000000e-01 : f32
    %239 = vector.broadcast %cst_128 : f32 to vector<16x128xf32>
    %240 = arith.mulf %239, %238 : vector<16x128xf32>
    %cst_129 = arith.constant 5.000000e-01 : f32
    %241 = vector.broadcast %cst_129 : f32 to vector<16x128xf32>
    %242 = arith.addf %240, %241 : vector<16x128xf32>
    %243 = vector.extract_strided_slice %233 {offsets = [0, 128], sizes = [16, 128], strides = [1, 1]} : vector<16x512xf32> to vector<16x128xf32>
    %cst_130 = arith.constant 5.000000e-01 : f32
    %244 = vector.broadcast %cst_130 : f32 to vector<16x128xf32>
    %245 = arith.mulf %244, %243 : vector<16x128xf32>
    %246 = math.tanh %245 : vector<16x128xf32>
    %cst_131 = arith.constant 5.000000e-01 : f32
    %247 = vector.broadcast %cst_131 : f32 to vector<16x128xf32>
    %248 = arith.mulf %247, %246 : vector<16x128xf32>
    %cst_132 = arith.constant 5.000000e-01 : f32
    %249 = vector.broadcast %cst_132 : f32 to vector<16x128xf32>
    %250 = arith.addf %248, %249 : vector<16x128xf32>
    %251 = vector.extract_strided_slice %233 {offsets = [0, 256], sizes = [16, 128], strides = [1, 1]} : vector<16x512xf32> to vector<16x128xf32>
    %252 = math.tanh %251 : vector<16x128xf32>
    %253 = vector.extract_strided_slice %233 {offsets = [0, 384], sizes = [16, 128], strides = [1, 1]} : vector<16x512xf32> to vector<16x128xf32>
    %cst_133 = arith.constant 5.000000e-01 : f32
    %254 = vector.broadcast %cst_133 : f32 to vector<16x128xf32>
    %255 = arith.mulf %254, %253 : vector<16x128xf32>
    %256 = math.tanh %255 : vector<16x128xf32>
    %cst_134 = arith.constant 5.000000e-01 : f32
    %257 = vector.broadcast %cst_134 : f32 to vector<16x128xf32>
    %258 = arith.mulf %257, %256 : vector<16x128xf32>
    %cst_135 = arith.constant 5.000000e-01 : f32
    %259 = vector.broadcast %cst_135 : f32 to vector<16x128xf32>
    %260 = arith.addf %258, %259 : vector<16x128xf32>
    %261 = arith.mulf %250, %234 : vector<16x128xf32>
    %262 = arith.mulf %242, %252 : vector<16x128xf32>
    %263 = arith.addf %261, %262 : vector<16x128xf32>
    %264 = math.tanh %263 : vector<16x128xf32>
    %265 = arith.mulf %260, %264 : vector<16x128xf32>
    %c0_136 = arith.constant 0 : index
    %c0_137 = arith.constant 0 : index
    %266 = vector.load %arg8[%c0_136, %c0_137] : memref<16x128xf32, #tpu.memory_space<vmem>>, vector<16x128xf32>
    tpu.vector_store %arg8[%c0_136, %c0_137], %265 {strides = array<i32>} : memref<16x128xf32, #tpu.memory_space<vmem>>, vector<16x128xf32>,
    %c0_138 = arith.constant 0 : index
    %c0_139 = arith.constant 0 : index
    %267 = vector.load %arg9[%c0_138, %c0_139] : memref<16x128xf32, #tpu.memory_space<vmem>>, vector<16x128xf32>
    tpu.vector_store %arg9[%c0_138, %c0_139], %263 {strides = array<i32>} : memref<16x128xf32, #tpu.memory_space<vmem>>, vector<16x128xf32>,
    %c6_i32 = arith.constant 6 : i32
    %c16_i32_140 = arith.constant 16 : i32
    %268 = arith.muli %c6_i32, %c16_i32_140 : i32
    %269 = tpu.assume_multiple %268, 16 : i32
    %270 = arith.index_cast %269 : i32 to index
    %c0_141 = arith.constant 0 : index
    %271 = vector.load %arg10[%270, %c0_141] : memref<128x512xf32, #tpu.memory_space<vmem>>, vector<16x512xf32>
    %c0_142 = arith.constant 0 : index
    %c0_143 = arith.constant 0 : index
    %272 = vector.load %arg8[%c0_142, %c0_143] : memref<16x128xf32, #tpu.memory_space<vmem>>, vector<16x128xf32>
    %273 = arith.truncf %272 : vector<16x128xf32> to vector<16x128xbf16>
    %c0_144 = arith.constant 0 : index
    %c0_145 = arith.constant 0 : index
    %274 = vector.load %arg3[%c0_144, %c0_145] : memref<128x512xbf16, #tpu.memory_space<vmem>>, vector<128x512xbf16>
    %cst_146 = arith.constant dense<0.000000e+00> : vector<16x512xf32>
    %275 = tpu.matmul %273, %274, %cst_146 {dimension_numbers = #tpu.dot_dimension_numbers<[1], [0], [0], [1], [0, 0, 1, 1], [], []>} : vector<16x128xbf16>, vector<128x512xbf16>, vector<16x512xf32> -> vector<16x512xf32>
    %276 = arith.addf %271, %275 : vector<16x512xf32>
    %c0_147 = arith.constant 0 : index
    %c0_148 = arith.constant 0 : index
    %277 = vector.load %arg9[%c0_147, %c0_148] : memref<16x128xf32, #tpu.memory_space<vmem>>, vector<16x128xf32>
    %278 = vector.extract_strided_slice %276 {offsets = [0, 0], sizes = [16, 128], strides = [1, 1]} : vector<16x512xf32> to vector<16x128xf32>
    %cst_149 = arith.constant 5.000000e-01 : f32
    %279 = vector.broadcast %cst_149 : f32 to vector<16x128xf32>
    %280 = arith.mulf %279, %278 : vector<16x128xf32>
    %281 = math.tanh %280 : vector<16x128xf32>
    %cst_150 = arith.constant 5.000000e-01 : f32
    %282 = vector.broadcast %cst_150 : f32 to vector<16x128xf32>
    %283 = arith.mulf %282, %281 : vector<16x128xf32>
    %cst_151 = arith.constant 5.000000e-01 : f32
    %284 = vector.broadcast %cst_151 : f32 to vector<16x128xf32>
    %285 = arith.addf %283, %284 : vector<16x128xf32>
    %286 = vector.extract_strided_slice %276 {offsets = [0, 128], sizes = [16, 128], strides = [1, 1]} : vector<16x512xf32> to vector<16x128xf32>
    %cst_152 = arith.constant 5.000000e-01 : f32
    %287 = vector.broadcast %cst_152 : f32 to vector<16x128xf32>
    %288 = arith.mulf %287, %286 : vector<16x128xf32>
    %289 = math.tanh %288 : vector<16x128xf32>
    %cst_153 = arith.constant 5.000000e-01 : f32
    %290 = vector.broadcast %cst_153 : f32 to vector<16x128xf32>
    %291 = arith.mulf %290, %289 : vector<16x128xf32>
    %cst_154 = arith.constant 5.000000e-01 : f32
    %292 = vector.broadcast %cst_154 : f32 to vector<16x128xf32>
    %293 = arith.addf %291, %292 : vector<16x128xf32>
    %294 = vector.extract_strided_slice %276 {offsets = [0, 256], sizes = [16, 128], strides = [1, 1]} : vector<16x512xf32> to vector<16x128xf32>
    %295 = math.tanh %294 : vector<16x128xf32>
    %296 = vector.extract_strided_slice %276 {offsets = [0, 384], sizes = [16, 128], strides = [1, 1]} : vector<16x512xf32> to vector<16x128xf32>
    %cst_155 = arith.constant 5.000000e-01 : f32
    %297 = vector.broadcast %cst_155 : f32 to vector<16x128xf32>
    %298 = arith.mulf %297, %296 : vector<16x128xf32>
    %299 = math.tanh %298 : vector<16x128xf32>
    %cst_156 = arith.constant 5.000000e-01 : f32
    %300 = vector.broadcast %cst_156 : f32 to vector<16x128xf32>
    %301 = arith.mulf %300, %299 : vector<16x128xf32>
    %cst_157 = arith.constant 5.000000e-01 : f32
    %302 = vector.broadcast %cst_157 : f32 to vector<16x128xf32>
    %303 = arith.addf %301, %302 : vector<16x128xf32>
    %304 = arith.mulf %293, %277 : vector<16x128xf32>
    %305 = arith.mulf %285, %295 : vector<16x128xf32>
    %306 = arith.addf %304, %305 : vector<16x128xf32>
    %307 = math.tanh %306 : vector<16x128xf32>
    %308 = arith.mulf %303, %307 : vector<16x128xf32>
    %c0_158 = arith.constant 0 : index
    %c0_159 = arith.constant 0 : index
    %309 = vector.load %arg8[%c0_158, %c0_159] : memref<16x128xf32, #tpu.memory_space<vmem>>, vector<16x128xf32>
    tpu.vector_store %arg8[%c0_158, %c0_159], %308 {strides = array<i32>} : memref<16x128xf32, #tpu.memory_space<vmem>>, vector<16x128xf32>,
    %c0_160 = arith.constant 0 : index
    %c0_161 = arith.constant 0 : index
    %310 = vector.load %arg9[%c0_160, %c0_161] : memref<16x128xf32, #tpu.memory_space<vmem>>, vector<16x128xf32>
    tpu.vector_store %arg9[%c0_160, %c0_161], %306 {strides = array<i32>} : memref<16x128xf32, #tpu.memory_space<vmem>>, vector<16x128xf32>,
    %c7_i32 = arith.constant 7 : i32
    %c16_i32_162 = arith.constant 16 : i32
    %311 = arith.muli %c7_i32, %c16_i32_162 : i32
    %312 = tpu.assume_multiple %311, 16 : i32
    %313 = arith.index_cast %312 : i32 to index
    %c0_163 = arith.constant 0 : index
    %314 = vector.load %arg10[%313, %c0_163] : memref<128x512xf32, #tpu.memory_space<vmem>>, vector<16x512xf32>
    %c0_164 = arith.constant 0 : index
    %c0_165 = arith.constant 0 : index
    %315 = vector.load %arg8[%c0_164, %c0_165] : memref<16x128xf32, #tpu.memory_space<vmem>>, vector<16x128xf32>
    %316 = arith.truncf %315 : vector<16x128xf32> to vector<16x128xbf16>
    %c0_166 = arith.constant 0 : index
    %c0_167 = arith.constant 0 : index
    %317 = vector.load %arg3[%c0_166, %c0_167] : memref<128x512xbf16, #tpu.memory_space<vmem>>, vector<128x512xbf16>
    %cst_168 = arith.constant dense<0.000000e+00> : vector<16x512xf32>
    %318 = tpu.matmul %316, %317, %cst_168 {dimension_numbers = #tpu.dot_dimension_numbers<[1], [0], [0], [1], [0, 0, 1, 1], [], []>} : vector<16x128xbf16>, vector<128x512xbf16>, vector<16x512xf32> -> vector<16x512xf32>
    %319 = arith.addf %314, %318 : vector<16x512xf32>
    %c0_169 = arith.constant 0 : index
    %c0_170 = arith.constant 0 : index
    %320 = vector.load %arg9[%c0_169, %c0_170] : memref<16x128xf32, #tpu.memory_space<vmem>>, vector<16x128xf32>
    %321 = vector.extract_strided_slice %319 {offsets = [0, 0], sizes = [16, 128], strides = [1, 1]} : vector<16x512xf32> to vector<16x128xf32>
    %cst_171 = arith.constant 5.000000e-01 : f32
    %322 = vector.broadcast %cst_171 : f32 to vector<16x128xf32>
    %323 = arith.mulf %322, %321 : vector<16x128xf32>
    %324 = math.tanh %323 : vector<16x128xf32>
    %cst_172 = arith.constant 5.000000e-01 : f32
    %325 = vector.broadcast %cst_172 : f32 to vector<16x128xf32>
    %326 = arith.mulf %325, %324 : vector<16x128xf32>
    %cst_173 = arith.constant 5.000000e-01 : f32
    %327 = vector.broadcast %cst_173 : f32 to vector<16x128xf32>
    %328 = arith.addf %326, %327 : vector<16x128xf32>
    %329 = vector.extract_strided_slice %319 {offsets = [0, 128], sizes = [16, 128], strides = [1, 1]} : vector<16x512xf32> to vector<16x128xf32>
    %cst_174 = arith.constant 5.000000e-01 : f32
    %330 = vector.broadcast %cst_174 : f32 to vector<16x128xf32>
    %331 = arith.mulf %330, %329 : vector<16x128xf32>
    %332 = math.tanh %331 : vector<16x128xf32>
    %cst_175 = arith.constant 5.000000e-01 : f32
    %333 = vector.broadcast %cst_175 : f32 to vector<16x128xf32>
    %334 = arith.mulf %333, %332 : vector<16x128xf32>
    %cst_176 = arith.constant 5.000000e-01 : f32
    %335 = vector.broadcast %cst_176 : f32 to vector<16x128xf32>
    %336 = arith.addf %334, %335 : vector<16x128xf32>
    %337 = vector.extract_strided_slice %319 {offsets = [0, 256], sizes = [16, 128], strides = [1, 1]} : vector<16x512xf32> to vector<16x128xf32>
    %338 = math.tanh %337 : vector<16x128xf32>
    %339 = vector.extract_strided_slice %319 {offsets = [0, 384], sizes = [16, 128], strides = [1, 1]} : vector<16x512xf32> to vector<16x128xf32>
    %cst_177 = arith.constant 5.000000e-01 : f32
    %340 = vector.broadcast %cst_177 : f32 to vector<16x128xf32>
    %341 = arith.mulf %340, %339 : vector<16x128xf32>
    %342 = math.tanh %341 : vector<16x128xf32>
    %cst_178 = arith.constant 5.000000e-01 : f32
    %343 = vector.broadcast %cst_178 : f32 to vector<16x128xf32>
    %344 = arith.mulf %343, %342 : vector<16x128xf32>
    %cst_179 = arith.constant 5.000000e-01 : f32
    %345 = vector.broadcast %cst_179 : f32 to vector<16x128xf32>
    %346 = arith.addf %344, %345 : vector<16x128xf32>
    %347 = arith.mulf %336, %320 : vector<16x128xf32>
    %348 = arith.mulf %328, %338 : vector<16x128xf32>
    %349 = arith.addf %347, %348 : vector<16x128xf32>
    %350 = math.tanh %349 : vector<16x128xf32>
    %351 = arith.mulf %346, %350 : vector<16x128xf32>
    %c0_180 = arith.constant 0 : index
    %c0_181 = arith.constant 0 : index
    %352 = vector.load %arg8[%c0_180, %c0_181] : memref<16x128xf32, #tpu.memory_space<vmem>>, vector<16x128xf32>
    tpu.vector_store %arg8[%c0_180, %c0_181], %351 {strides = array<i32>} : memref<16x128xf32, #tpu.memory_space<vmem>>, vector<16x128xf32>,
    %c0_182 = arith.constant 0 : index
    %c0_183 = arith.constant 0 : index
    %353 = vector.load %arg9[%c0_182, %c0_183] : memref<16x128xf32, #tpu.memory_space<vmem>>, vector<16x128xf32>
    tpu.vector_store %arg9[%c0_182, %c0_183], %349 {strides = array<i32>} : memref<16x128xf32, #tpu.memory_space<vmem>>, vector<16x128xf32>,
    %c8_i32 = arith.constant 8 : i32
    %c0_i32_184 = arith.constant 0 : i32
    %354 = arith.cmpi eq, %arg0, %c0_i32_184 : i32
    %355 = arith.extui %354 : i1 to i32
    %c0_i32_185 = arith.constant 0 : i32
    %356 = arith.cmpi ne, %355, %c0_i32_185 : i32
    scf.if %356 {
      %c0_186 = arith.constant 0 : index
      %c0_187 = arith.constant 0 : index
      %357 = vector.load %arg8[%c0_186, %c0_187] : memref<16x128xf32, #tpu.memory_space<vmem>>, vector<16x128xf32>
      %358 = arith.truncf %357 : vector<16x128xf32> to vector<16x128xbf16>
      %c0_188 = arith.constant 0 : index
      %c0_189 = arith.constant 0 : index
      %359 = vector.load %arg5[%c0_188, %c0_189] : memref<128x128xbf16, #tpu.memory_space<vmem>>, vector<128x128xbf16>
      %cst_190 = arith.constant dense<0.000000e+00> : vector<16x128xf32>
      %360 = tpu.matmul %358, %359, %cst_190 {dimension_numbers = #tpu.dot_dimension_numbers<[1], [0], [0], [1], [0, 0, 1, 1], [], []>} : vector<16x128xbf16>, vector<128x128xbf16>, vector<16x128xf32> -> vector<16x128xf32>
      %c0_191 = arith.constant 0 : index
      %c0_192 = arith.constant 0 : index
      %361 = vector.load %arg6[%c0_191, %c0_192] : memref<1x128xf32, #tpu.memory_space<vmem>>, vector<1x128xf32>
      %362 = vector.broadcast %361 : vector<1x128xf32> to vector<16x128xf32>
      %363 = arith.addf %360, %362 : vector<16x128xf32>
      %c0_193 = arith.constant 0 : index
      %c0_194 = arith.constant 0 : index
      %364 = vector.load %arg7[%c0_193, %c0_194] : memref<16x128xf32, #tpu.memory_space<vmem>>, vector<16x128xf32>
      tpu.vector_store %arg7[%c0_193, %c0_194], %363 {strides = array<i32>} : memref<16x128xf32, #tpu.memory_space<vmem>>, vector<16x128xf32>,
    } else {
    }
    return
  }
  func.func @transform_0(%arg0: i32) -> (i32, i32) {
    %c0_i32 = arith.constant 0 : i32
    %c0_i32_0 = arith.constant 0 : i32
    return %arg0, %c0_i32 : i32, i32
  }
  func.func @transform_1(%arg0: i32) -> (i32, i32) {
    %c0_i32 = arith.constant 0 : i32
    %c0_i32_0 = arith.constant 0 : i32
    %c0_i32_1 = arith.constant 0 : i32
    return %c0_i32, %c0_i32_0 : i32, i32
  }
  func.func @transform_2(%arg0: i32) -> (i32, i32) {
    %c0_i32 = arith.constant 0 : i32
    %c0_i32_0 = arith.constant 0 : i32
    %c0_i32_1 = arith.constant 0 : i32
    return %c0_i32, %c0_i32_0 : i32, i32
  }
  func.func @transform_3(%arg0: i32) -> (i32, i32) {
    %c0_i32 = arith.constant 0 : i32
    %c0_i32_0 = arith.constant 0 : i32
    %c0_i32_1 = arith.constant 0 : i32
    return %c0_i32, %c0_i32_0 : i32, i32
  }
  func.func @transform_4(%arg0: i32) -> (i32, i32) {
    %c0_i32 = arith.constant 0 : i32
    %c0_i32_0 = arith.constant 0 : i32
    %c0_i32_1 = arith.constant 0 : i32
    return %c0_i32, %c0_i32_0 : i32, i32
  }
  func.func @transform_5(%arg0: i32) -> (i32, i32) {
    %c0_i32 = arith.constant 0 : i32
    %c0_i32_0 = arith.constant 0 : i32
    %c0_i32_1 = arith.constant 0 : i32
    return %c0_i32, %c0_i32_0 : i32, i32
  }
  func.func @transform_6(%arg0: i32) -> (i32, i32) {
    %c0_i32 = arith.constant 0 : i32
    %c0_i32_0 = arith.constant 0 : i32
    %c0_i32_1 = arith.constant 0 : i32
    return %c0_i32, %c0_i32_0 : i32, i32
  }
}

</mosaic_0001>

<bundles_post_ra>
// kernel: lstm_forward.2
= control target key start
LH: loop header
LB: loop body
LE: loop exit
PB: predicated region body
PF: predicated region fallthrough
CT: control target
= control target key end

     0   :  { %9 = vsyncpa [#allocation6], 0  ;;  %s4559_s18 = smov [#allocation5]   ;;  %s4560_s20 = smov 256   ;;  %s5007_s0 = inlined_call_operand.vmem [shape: bf16[128,4], index: 0, kind: input, shape index: {}]   ;;  %s5008_s1 = inlined_call_operand.vmem [shape: bf16[4,512], index: 1, kind: input, shape index: {}]   ;;  %s5009_s2 = inlined_call_operand.hbm [shape: bf16[128,512], index: 2, kind: input, shape index: {}]   ;;  %s5010_s3 = inlined_call_operand.vmem [shape: f32[1,512], index: 3, kind: input, shape index: {}]   ;;  %s5011_s4 = inlined_call_operand.vmem [shape: bf16[128,128], index: 4, kind: output, shape index: {}]  }
   0x1   :  { %s18_s17 = sshll.u32 %s5009_s2, 4  ;;  %s20_s19 = sshll.u32 %s4559_s18, 4  ;;  %s19_s17 = int_to_ptr.hbm [resolvable:$true] %s18_s17  ;;  %s21_s19 = int_to_ptr.vmem [resolvable:$true] %s20_s19 }
   0x2   :  { %s4561_s21 = smov 16  }
   0x3   :  { %26 = dma.hbm_to_vmem [thread:$0]  %s19_s17, 4096, %s21_s19, [#allocation6], %s4560_s20, %s4560_s20, %s4561_s21  }
   0x4   :  { %4557 = dma.done.wait [#allocation6], 4096  }
   0x5   :  { %4558 = vsyncadd [#allocation6], 4294963200  ;;  %v58_v0 = vld [vmem:[%s5008_s1] sm:$0xff]  ;;  %v3134_v1 = vld [vmem:[#allocation5 + $0xe0] sm:$0xf]  ;;  %vm140_vm0 = vcmask 1041408  }
   0x6   :  { %110 = vst [vmem:[#allocation1] ss:$4 sm:$0xff] %v58_v0  ;;  %v4096_v2 = vld [vmem:[#allocation5 + $0xec] sm:$0xf0]  ;;  %v4094_v3 = vld [vmem:[#allocation5 + $0xe4] sm:$0xf] }
   0x7   :  { %v3136_v4 = vld [vmem:[#allocation5 + $0xf0] sm:$0xf0]  ;;  %v3142_v5 = vld [vmem:[#allocation5 + $0xe8] sm:$0xf]  ;;  %v4097_v6 = vld [vmem:[#allocation5 + $0xf4] sm:$0xf0]  ;;  %v3135_v9 = vor.u32 %v4096_v2, %v3134_v1 }
   0x8   :  { %v4095_v7 = vld [vmem:[#allocation5 + $0xec] sm:$0xf]  ;;  %v3144_v8 = vld [vmem:[#allocation5 + $0xf8] sm:$0xf0]  ;;  %v3118_v10 = vld [vmem:[#allocation5 + $0xc0] sm:$0xf]  ;;  %v3139_v16 = vor.u32 %v4094_v3, %v3136_v4  ;;  %v3143_v25 = vor.u32 %v4097_v6, %v3142_v5 }
   0x9   :  { %v4092_v11 = vld [vmem:[#allocation5 + $0xcc] sm:$0xf0]  ;;  %v4090_v12 = vld [vmem:[#allocation5 + $0xc4] sm:$0xf]  ;;  %v3120_v13 = vld [vmem:[#allocation5 + $0xd0] sm:$0xf0]  ;;  %v3147_v23 = vor.u32 %v4095_v7, %v3144_v8 }
   0xa   :  { %v4058_v20 = vld [vmem:[%s5007_s0] sm:$0xff]  ;;  %vm115_vm1 = vcmask 31744   ;;  %v4091_v26 = vld [vmem:[#allocation5 + $0xcc] sm:$0xf]  ;;  %v3119_v28 = vor.u32 %v4092_v11, %v3118_v10  ;;  %v3123_v29 = vor.u32 %v4090_v12, %v3120_v13  ;;  %v3126_v30 = vld [vmem:[#allocation5 + $0xc8] sm:$0xf] }
   0xb   :  { %v3128_v27 = vld [vmem:[#allocation5 + $0xd8] sm:$0xf0]  ;;  %v4093_v31 = vld [vmem:[#allocation5 + $0xd4] sm:$0xf0]  ;;  %v3102_v34 = vld [vmem:[#allocation5 + $0xa0] sm:$0xf] }
   0xc   :  { %v3131_v32 = vor.u32 %v4091_v26, %v3128_v27  ;;  %v3127_v33 = vor.u32 %v4093_v31, %v3126_v30  ;;  %v4088_v35 = vld [vmem:[#allocation5 + $0xac] sm:$0xf0]  ;;  %v4086_v36 = vld [vmem:[#allocation5 + $0xa4] sm:$0xf]  ;;  %v3104_v38 = vld [vmem:[#allocation5 + $0xb0] sm:$0xf0] }
   0xd   :  { %v111_v14 = vld.sshfl [vmem:[#allocation1] sm:$0xff pattern:$0x73625140]  ;;  %v112_v15 = vld.sshfl [vmem:[#allocation1 + $0x8] sm:$0xff pattern:$0x73625140]  ;;  %v3103_v37 = vor.u32 %v4088_v35, %v3102_v34  ;;  %v3107_v41 = vor.u32 %v4086_v36, %v3104_v38 }
   0xe   :  { %v141_v17 = vsel %vm140_vm0, %v111_v14, 0  ;;  %v143_v18 = vsel %vm140_vm0, %v112_v15, 0  ;;  %v113_v19 = vld.sshfl [vmem:[#allocation1 + $0x10] sm:$0xff pattern:$0x73625140]  ;;  %v4059_v46 = vld [vmem:[%s5007_s0 + $0x8] sm:$0xff] }
   0xf   :  { %156 = vmatpush.bf16.msra.mxu0 %v141_v17  ;;  %205 = vmatpush.bf16.msra.mxu1 %v143_v18  ;;  %v145_v21 = vsel %vm140_vm0, %v113_v19, 0  ;;  %v114_v22 = vld.sshfl [vmem:[#allocation1 + $0x18] sm:$0xff pattern:$0x73625140]  ;;  %v3110_v39 = vld [vmem:[#allocation5 + $0xa8] sm:$0xf] }
  0x10   :  { %254 = vmatpush.bf16.msra.mxu2 %v145_v21  ;;  %v147_v24 = vsel %vm140_vm0, %v114_v22, 0  ;;  %v4089_v40 = vld [vmem:[#allocation5 + $0xb4] sm:$0xf0]  ;;  %v4087_v42 = vld [vmem:[#allocation5 + $0xac] sm:$0xf]  ;;  %v4061_v8 = vld [vmem:[%s5007_s0 + $0x18] sm:$0xff] }
  0x11   :  { %303 = vmatpush.bf16.msra.mxu3 %v147_v24  ;;  %v3112_v43 = vld [vmem:[#allocation5 + $0xb8] sm:$0xf0]  ;;  %v3111_v45 = vor.u32 %v4089_v40, %v3110_v39  ;;  %v3086_v47 = vld [vmem:[#allocation5 + $0x80] sm:$0xf]  ;;  %v4084_v48 = vld [vmem:[#allocation5 + $0x8c] sm:$0xf0] }
  0x12   :  { %2988 = vmatmul.msk.bf16.vlgmr.msra.gmra.mxu0 %vm115_vm1, %v4058_v20  ;;  %2996 = vmatmul.msk.bf16.vlgmr.msra.gmra.mxu1 %vm115_vm1, %v4058_v20  ;;  %v3115_v44 = vor.u32 %v4087_v42, %v3112_v43  ;;  %v4082_v49 = vld [vmem:[#allocation5 + $0x84] sm:$0xf]  ;;  %v3087_v50 = vor.u32 %v4084_v48, %v3086_v47  ;;  %v3088_v51 = vld [vmem:[#allocation5 + $0x90] sm:$0xf0]  ;;  %v3094_v52 = vld [vmem:[#allocation5 + $0x88] sm:$0xf] }
  0x13   :  { %615 = vmatpush.bf16.msrb.mxu0 %v3135_v9  ;;  %629 = vmatpush.bf16.msrb.mxu1 %v3139_v16  ;;  %v4085_v53 = vld [vmem:[#allocation5 + $0x94] sm:$0xf0]  ;;  %v3091_v54 = vor.u32 %v4082_v49, %v3088_v51  ;;  %v4083_v56 = vld [vmem:[#allocation5 + $0x8c] sm:$0xf]  ;;  %v3096_v57 = vld [vmem:[#allocation5 + $0x98] sm:$0xf0] }
  0x14   :  { %3004 = vmatmul.msk.bf16.vlgmr.msra.gmra.mxu2 %vm115_vm1, %v4058_v20  ;;  %3012 = vmatmul.msk.bf16.vlgmr.msra.gmra.mxu3 %vm115_vm1, %v4058_v20  ;;  %v3095_v55 = vor.u32 %v4085_v53, %v3094_v52  ;;  %v3099_v58 = vor.u32 %v4083_v56, %v3096_v57  ;;  %v4060_v59 = vld [vmem:[%s5007_s0 + $0x10] sm:$0xff]  ;;  %v3070_v60 = vld [vmem:[#allocation5 + $0x60] sm:$0xf]  ;;  %v4080_v61 = vld [vmem:[#allocation5 + $0x6c] sm:$0xf0]  ;;  %v4562_v51 = vmov 0.0|0.0  }
  0x15   :  { %657 = vmatpush.bf16.msrb.mxu3 %v3147_v23  ;;  %643 = vmatpush.bf16.msrb.mxu2 %v3143_v25  ;;  %v4078_v62 = vld [vmem:[#allocation5 + $0x64] sm:$0xf]  ;;  %v3071_v63 = vor.u32 %v4080_v61, %v3070_v60  ;;  %v3072_v0 = vld [vmem:[#allocation5 + $0x70] sm:$0xf0]  ;;  %v3078_v1 = vld [vmem:[#allocation5 + $0x68] sm:$0xf] }
  0x16   :  { %v4081_v2 = vld [vmem:[#allocation5 + $0x74] sm:$0xf0]  ;;  %v3075_v3 = vor.u32 %v4078_v62, %v3072_v0  ;;  %v4079_v5 = vld [vmem:[#allocation5 + $0x6c] sm:$0xf]  ;;  %v3080_v6 = vld [vmem:[#allocation5 + $0x78] sm:$0xf0] }
  0x17   :  { %616 = vmatpush.bf16.msrb.mxu0 %v3119_v28  ;;  %630 = vmatpush.bf16.msrb.mxu1 %v3123_v29  ;;  %v3079_v4 = vor.u32 %v4081_v2, %v3078_v1  ;;  %v3083_v7 = vor.u32 %v4079_v5, %v3080_v6  ;;  %v3054_v9 = vld [vmem:[#allocation5 + $0x40] sm:$0xf]  ;;  %v4076_v10 = vld [vmem:[#allocation5 + $0x4c] sm:$0xf0]  ;;  %v4074_v11 = vld [vmem:[#allocation5 + $0x44] sm:$0xf] }
  0x18   :  { %v3055_v12 = vor.u32 %v4076_v10, %v3054_v9  ;;  %v3056_v13 = vld [vmem:[#allocation5 + $0x50] sm:$0xf0]  ;;  %v3062_v14 = vld [vmem:[#allocation5 + $0x48] sm:$0xf]  ;;  %v4077_v15 = vld [vmem:[#allocation5 + $0x54] sm:$0xf0] }
  0x19   :  { %658 = vmatpush.bf16.msrb.mxu3 %v3131_v32  ;;  %644 = vmatpush.bf16.msrb.mxu2 %v3127_v33  ;;  %v3059_v16 = vor.u32 %v4074_v11, %v3056_v13  ;;  %v3063_v17 = vor.u32 %v4077_v15, %v3062_v14  ;;  %v4075_v18 = vld [vmem:[#allocation5 + $0x4c] sm:$0xf]  ;;  %v3064_v19 = vld [vmem:[#allocation5 + $0x58] sm:$0xf0]  ;;  %v3038_v22 = vld [vmem:[#allocation5 + $0x20] sm:$0xf] }
  0x1a   :  { %v3067_v20 = vor.u32 %v4075_v18, %v3064_v19  ;;  %v4062_v21 = vld [vmem:[%s5007_s0 + $0x20] sm:$0xff]  ;;  %v4072_v23 = vld [vmem:[#allocation5 + $0x2c] sm:$0xf0]  ;;  %v4070_v24 = vld [vmem:[#allocation5 + $0x24] sm:$0xf] }
  0x1b   :  { %617 = vmatpush.bf16.msrb.mxu0 %v3103_v37  ;;  %631 = vmatpush.bf16.msrb.mxu1 %v3107_v41  ;;  %v3039_v25 = vor.u32 %v4072_v23, %v3038_v22  ;;  %v3040_v26 = vld [vmem:[#allocation5 + $0x30] sm:$0xf0]  ;;  %v3046_v27 = vld [vmem:[#allocation5 + $0x28] sm:$0xf]  ;;  %v4073_v28 = vld [vmem:[#allocation5 + $0x34] sm:$0xf0] }
  0x1c   :  { %v3043_v29 = vor.u32 %v4070_v24, %v3040_v26  ;;  %v3047_v30 = vor.u32 %v4073_v28, %v3046_v27  ;;  %v4071_v31 = vld [vmem:[#allocation5 + $0x2c] sm:$0xf]  ;;  %v3048_v32 = vld [vmem:[#allocation5 + $0x38] sm:$0xf0]  ;;  %v4063_v34 = vld [vmem:[%s5007_s0 + $0x28] sm:$0xff] }
  0x1d   :  { %659 = vmatpush.bf16.msrb.mxu3 %v3115_v44  ;;  %645 = vmatpush.bf16.msrb.mxu2 %v3111_v45  ;;  %v3051_v33 = vor.u32 %v4071_v31, %v3048_v32  ;;  %v3022_v35 = vld [vmem:[#allocation5] sm:$0xf]  ;;  %v4068_v36 = vld [vmem:[#allocation5 + $0xc] sm:$0xf0]  ;;  %v4066_v37 = vld [vmem:[#allocation5 + $0x4] sm:$0xf] }
  0x1e   :  { %v3023_v38 = vor.u32 %v4068_v36, %v3022_v35  ;;  %v3024_v39 = vld [vmem:[#allocation5 + $0x10] sm:$0xf0]  ;;  %v3030_v40 = vld [vmem:[#allocation5 + $0x8] sm:$0xf]  ;;  %v4069_v41 = vld [vmem:[#allocation5 + $0x14] sm:$0xf0] }
  0x1f   :  { %618 = vmatpush.bf16.msrb.mxu0 %v3087_v50  ;;  %632 = vmatpush.bf16.msrb.mxu1 %v3091_v54  ;;  %v3027_v42 = vor.u32 %v4066_v37, %v3024_v39  ;;  %v3031_v43 = vor.u32 %v4069_v41, %v3030_v40  ;;  %v4067_v44 = vld [vmem:[#allocation5 + $0xc] sm:$0xf]  ;;  %v3032_v45 = vld [vmem:[#allocation5 + $0x18] sm:$0xf0]  ;;  %v4065_v48 = vld [vmem:[%s5007_s0 + $0x38] sm:$0xff] }
  0x20   :  { %v4064_v47 = vld [vmem:[%s5007_s0 + $0x30] sm:$0xff]  ;;  %v3262_v37 = vld [vmem:[#allocation5 + $0xe0] sm:$0xf]  ;;  %v4126_v39 = vld [vmem:[#allocation5 + $0xe4] sm:$0xf] }
  0x21   :  { %646 = vmatpush.bf16.msrb.mxu2 %v3095_v55  ;;  %660 = vmatpush.bf16.msrb.mxu3 %v3099_v58 }
  0x22   :  { %2989 = vmatmul.msk.bf16.gmra.mxu0 %vm115_vm1, %v4059_v46  ;;  %2997 = vmatmul.msk.bf16.gmra.mxu1 %vm115_vm1, %v4059_v46 }
  0x23   :  { %619 = vmatpush.bf16.msrb.mxu0 %v3071_v63  ;;  %633 = vmatpush.bf16.msrb.mxu1 %v3075_v3 }
  0x24   :  { %3005 = vmatmul.msk.bf16.gmra.mxu2 %vm115_vm1, %v4059_v46  ;;  %3013 = vmatmul.msk.bf16.gmra.mxu3 %vm115_vm1, %v4059_v46  ;;  %v3035_v46 = vor.u32 %v4067_v44, %v3032_v45  ;;  %v3270_v44 = vld [vmem:[#allocation5 + $0xe8] sm:$0xf]  ;;  %v4129_v45 = vld [vmem:[#allocation5 + $0xf4] sm:$0xf0] }
  0x25   :  { %647 = vmatpush.bf16.msrb.mxu2 %v3079_v4  ;;  %661 = vmatpush.bf16.msrb.mxu3 %v3083_v7 }
  0x27   :  { %620 = vmatpush.bf16.msrb.mxu0 %v3055_v12  ;;  %634 = vmatpush.bf16.msrb.mxu1 %v3059_v16 }
  0x29   :  { %648 = vmatpush.bf16.msrb.mxu2 %v3063_v17  ;;  %662 = vmatpush.bf16.msrb.mxu3 %v3067_v20 }
  0x2b   :  { %621 = vmatpush.bf16.msrb.mxu0 %v3039_v25  ;;  %635 = vmatpush.bf16.msrb.mxu1 %v3043_v29 }
  0x2d   :  { %649 = vmatpush.bf16.msrb.mxu2 %v3047_v30  ;;  %663 = vmatpush.bf16.msrb.mxu3 %v3051_v33 }
  0x2f   :  { %622 = vmatpush.bf16.msrb.mxu0 %v3023_v38  ;;  %636 = vmatpush.bf16.msrb.mxu1 %v3027_v42  ;;  %v4128_v38 = vld [vmem:[#allocation5 + $0xec] sm:$0xf0] }
  0x30   :  { %v3263_v42 = vor.u32 %v4128_v38, %v3262_v37  ;;  %v3254_v37 = vld [vmem:[#allocation5 + $0xc8] sm:$0xf]  ;;  %v4125_v38 = vld [vmem:[#allocation5 + $0xd4] sm:$0xf0] }
  0x31   :  { %650 = vmatpush.bf16.msrb.mxu2 %v3031_v43  ;;  %664 = vmatpush.bf16.msrb.mxu3 %v3035_v46  ;;  %v3264_v43 = vld [vmem:[#allocation5 + $0xf0] sm:$0xf0] }
  0x32   :  { %2990 = vmatmul.msk.bf16.gmra.mxu0 %vm115_vm1, %v4060_v59  ;;  %2998 = vmatmul.msk.bf16.gmra.mxu1 %vm115_vm1, %v4060_v59 }
  0x33   :  { %931 = vmatpush.bf16.msra.mxu0 %v3263_v42 }
  0x34   :  { %3006 = vmatmul.msk.bf16.gmra.mxu2 %vm115_vm1, %v4060_v59  ;;  %3014 = vmatmul.msk.bf16.gmra.mxu3 %vm115_vm1, %v4060_v59 }
  0x42   :  { %2991 = vmatmul.msk.bf16.gmra.mxu0 %vm115_vm1, %v4061_v8  ;;  %2999 = vmatmul.msk.bf16.gmra.mxu1 %vm115_vm1, %v4061_v8 }
  0x44   :  { %3007 = vmatmul.msk.bf16.gmra.mxu2 %vm115_vm1, %v4061_v8  ;;  %3015 = vmatmul.msk.bf16.gmra.mxu3 %vm115_vm1, %v4061_v8 }
  0x52   :  { %2992 = vmatmul.msk.bf16.gmra.mxu0 %vm115_vm1, %v4062_v21  ;;  %3000 = vmatmul.msk.bf16.gmra.mxu1 %vm115_vm1, %v4062_v21 }
  0x54   :  { %3008 = vmatmul.msk.bf16.gmra.mxu2 %vm115_vm1, %v4062_v21  ;;  %3016 = vmatmul.msk.bf16.gmra.mxu3 %vm115_vm1, %v4062_v21 }
  0x62   :  { %2993 = vmatmul.msk.bf16.gmra.mxu0 %vm115_vm1, %v4063_v34  ;;  %3001 = vmatmul.msk.bf16.gmra.mxu1 %vm115_vm1, %v4063_v34 }
  0x64   :  { %3009 = vmatmul.msk.bf16.gmra.mxu2 %vm115_vm1, %v4063_v34  ;;  %3017 = vmatmul.msk.bf16.gmra.mxu3 %vm115_vm1, %v4063_v34 }
  0x72   :  { %2994 = vmatmul.msk.bf16.gmra.mxu0 %vm115_vm1, %v4064_v47  ;;  %3002 = vmatmul.msk.bf16.gmra.mxu1 %vm115_vm1, %v4064_v47 }
  0x74   :  { %3010 = vmatmul.msk.bf16.gmra.mxu2 %vm115_vm1, %v4064_v47  ;;  %3018 = vmatmul.msk.bf16.gmra.mxu3 %vm115_vm1, %v4064_v47  ;;  %v3267_v47 = vor.u32 %v4126_v39, %v3264_v43 }
  0x76   :  { %945 = vmatpush.bf16.msra.mxu1 %v3267_v47  ;;  %v4121_v47 = vld [vmem:[#allocation5 + $0xb4] sm:$0xf0] }
  0x82   :  { %2995 = vmatmul.msk.bf16.gmra.mxu0 %vm115_vm1, %v4065_v48  ;;  %3003 = vmatmul.msk.bf16.gmra.mxu1 %vm115_vm1, %v4065_v48 }
  0x84   :  { %3011 = vmatmul.msk.bf16.gmra.mxu2 %vm115_vm1, %v4065_v48  ;;  %3019 = vmatmul.msk.bf16.gmra.mxu3 %vm115_vm1, %v4065_v48  ;;  %v3271_v48 = vor.u32 %v4129_v45, %v3270_v44  ;;  %v3238_v45 = vld [vmem:[#allocation5 + $0xa8] sm:$0xf] }
  0x86   :  { %959 = vmatpush.bf16.msra.mxu2 %v3271_v48  ;;  %v3240_v48 = vld [vmem:[#allocation5 + $0xb8] sm:$0xf0] }
  0x8f   :  { %v4654_v49 = vpop.f32.mrf.mxu0  ;;  %v4656_v50 = vpop.f32.mrf.mxu1 }
  0x92   :  { %623 = vmatmul.bf16.vlgmr.msrb.gmra.mxu0 %v4562_v51  ;;  %637 = vmatmul.bf16.vlgmr.msrb.gmra.mxu1 %v4562_v51 }
  0x94   :  { %651 = vmatmul.bf16.vlgmr.msrb.gmra.mxu2 %v4562_v51  ;;  %665 = vmatmul.bf16.vlgmr.msrb.gmra.mxu3 %v4562_v51  ;;  %v4127_v51 = vld [vmem:[#allocation5 + $0xec] sm:$0xf] }
  0x97   :  { %v4658_v52 = vpop.f32.mrf.mxu2  ;;  %v4660_v53 = vpop.f32.mrf.mxu3 }
  0x98   :  { %v4662_v54 = vpop.f32.mrf.mxu0  ;;  %v4664_v55 = vpop.f32.mrf.mxu1 }
  0x9f   :  { %v4666_v56 = vpop.f32.mrf.mxu2  ;;  %v4668_v57 = vpop.f32.mrf.mxu3 }
  0xa0   :  { %v4670_v58 = vpop.f32.mrf.mxu0  ;;  %v4672_v59 = vpop.f32.mrf.mxu1 }
  0xa7   :  { %v4674_v60 = vpop.f32.mrf.mxu2  ;;  %v4676_v61 = vpop.f32.mrf.mxu3 }
  0xa8   :  { %v4678_v62 = vpop.f32.mrf.mxu0  ;;  %v4680_v63 = vpop.f32.mrf.mxu1 }
  0xaf   :  { %v4682_v0 = vpop.f32.mrf.mxu2  ;;  %v4684_v1 = vpop.f32.mrf.mxu3 }
  0xb0   :  { %v4686_v2 = vpop.f32.mrf.mxu0  ;;  %v4688_v3 = vpop.f32.mrf.mxu1 }
  0xb7   :  { %v4690_v4 = vpop.f32.mrf.mxu2  ;;  %v4692_v5 = vpop.f32.mrf.mxu3 }
  0xb8   :  { %v4694_v6 = vpop.f32.mrf.mxu0  ;;  %v4696_v7 = vpop.f32.mrf.mxu1 }
  0xbf   :  { %v4698_v8 = vpop.f32.mrf.mxu2  ;;  %v4700_v9 = vpop.f32.mrf.mxu3 }
  0xc0   :  { %v4702_v10 = vpop.f32.mrf.mxu0  ;;  %v4704_v11 = vpop.f32.mrf.mxu1 }
  0xc7   :  { %v4706_v12 = vpop.f32.mrf.mxu2  ;;  %v4708_v13 = vpop.f32.mrf.mxu3 }
  0xc8   :  { %v4710_v14 = vpop.f32.mrf.mxu0  ;;  %v4712_v15 = vpop.f32.mrf.mxu1 }
  0xcf   :  { %v4714_v16 = vpop.f32.mrf.mxu2  ;;  %v4716_v17 = vpop.f32.mrf.mxu3 }
  0xd0   :  { %v4718_v18 = vpop.f32.mrf.mxu0  ;;  %v4720_v19 = vpop.f32.mrf.mxu1 }
  0xd7   :  { %v4722_v20 = vpop.f32.mrf.mxu2  ;;  %v4724_v21 = vpop.f32.mrf.mxu3 }
  0xd8   :  { %v4726_v22 = vpop.f32.mrf.mxu0  ;;  %v4728_v23 = vpop.f32.mrf.mxu1 }
  0xdf   :  { %v4730_v24 = vpop.f32.mrf.mxu2  ;;  %v4732_v25 = vpop.f32.mrf.mxu3 }
  0xe0   :  { %v4734_v26 = vpop.f32.mrf.mxu0  ;;  %v4736_v27 = vpop.f32.mrf.mxu1 }
  0xe1   :  { %5012 = vst [vmem:[#allocation8_spill] sm:$0xff] %v4734_v26  ;;  %v3158_v26 = vld [vmem:[#allocation5 + $0x8] sm:$0xf] }
  0xe2   :  { %5013 = vst [vmem:[#allocation9_spill] sm:$0xff] %v4736_v27 }
  0xe7   :  { %v4738_v28 = vpop.f32.mrf.mxu2  ;;  %v4740_v29 = vpop.f32.mrf.mxu3 }
  0xe8   :  { %5014 = vst [vmem:[#allocation10_spill] sm:$0xff] %v4738_v28  ;;  %v4742_v30 = vpop.f32.mrf.mxu0  ;;  %v4744_v31 = vpop.f32.mrf.mxu1 }
  0xe9   :  { %5015 = vst [vmem:[#allocation11_spill] sm:$0xff] %v4740_v29 }
  0xea   :  { %5016 = vst [vmem:[#allocation12_spill] sm:$0xff] %v4742_v30  ;;  %v4123_v30 = vld [vmem:[#allocation5 + $0xcc] sm:$0xf] }
  0xeb   :  { %5017 = vst [vmem:[#allocation13_spill] sm:$0xff] %v4744_v31  ;;  %v3255_v31 = vor.u32 %v4125_v38, %v3254_v37  ;;  %v4114_v37 = vld [vmem:[#allocation5 + $0x84] sm:$0xf] }
  0xed   :  { %960 = vmatpush.bf16.msra.mxu2 %v3255_v31  ;;  %v3214_v31 = vld [vmem:[#allocation5 + $0x80] sm:$0xf] }
  0xef   :  { %v4746_v32 = vpop.f32.mrf.mxu2  ;;  %v4748_v33 = vpop.f32.mrf.mxu3 }
  0xf0   :  { %5018 = vst [vmem:[#allocation14_spill] sm:$0xff] %v4746_v32  ;;  %v4750_v34 = vpop.f32.mrf.mxu0  ;;  %v4752_v35 = vpop.f32.mrf.mxu1  ;;  %v4122_v32 = vld [vmem:[#allocation5 + $0xc4] sm:$0xf] }
  0xf1   :  { %5019 = vst [vmem:[#allocation15_spill] sm:$0xff] %v4748_v33  ;;  %v4124_v33 = vld [vmem:[#allocation5 + $0xcc] sm:$0xf0] }
  0xf2   :  { %5020 = vst [vmem:[#allocation16_spill] sm:$0xff] %v4750_v34  ;;  %v3272_v34 = vld [vmem:[#allocation5 + $0xf8] sm:$0xf0] }
  0xf3   :  { %5021 = vst [vmem:[#allocation17_spill] sm:$0xff] %v4752_v35  ;;  %v3275_v35 = vor.u32 %v4127_v51, %v3272_v34  ;;  %v4116_v51 = vld [vmem:[#allocation5 + $0x8c] sm:$0xf0] }
  0xf4   :  { %v3215_v38 = vor.u32 %v4116_v51, %v3214_v31  ;;  %v4113_v31 = vld [vmem:[#allocation5 + $0x74] sm:$0xf0] }
  0xf5   :  { %973 = vmatpush.bf16.msra.mxu3 %v3275_v35  ;;  %v3230_v35 = vld [vmem:[#allocation5 + $0xa0] sm:$0xf] }
  0xf7   :  { %v4754_v36 = vpop.f32.mrf.mxu2  ;;  %v4756_v40 = vpop.f32.mrf.mxu3 }
  0xf8   :  { %5022 = vst [vmem:[#allocation18_spill] sm:$0xff] %v4754_v36  ;;  %v4758_v41 = vpop.f32.mrf.mxu0  ;;  %v4760_v46 = vpop.f32.mrf.mxu1  ;;  %v3246_v36 = vld [vmem:[#allocation5 + $0xc0] sm:$0xf] }
  0xf9   :  { %5023 = vst [vmem:[#allocation19_spill] sm:$0xff] %v4756_v40  ;;  %v3247_v40 = vor.u32 %v4124_v33, %v3246_v36  ;;  %v4120_v33 = vld [vmem:[#allocation5 + $0xac] sm:$0xf0]  ;;  %v4118_v36 = vld [vmem:[#allocation5 + $0xa4] sm:$0xf] }
  0xfa   :  { %5024 = vst [vmem:[#allocation20_spill] sm:$0xff] %v4758_v41  ;;  %v3248_v41 = vld [vmem:[#allocation5 + $0xd0] sm:$0xf0] }
  0xfb   :  { %5025 = vst [vmem:[#allocation21_spill] sm:$0xff] %v4760_v46  ;;  %v3251_v29 = vor.u32 %v4122_v32, %v3248_v41  ;;  %v3256_v46 = vld [vmem:[#allocation5 + $0xd8] sm:$0xf0]  ;;  %932 = vmatpush.bf16.msra.mxu0 %v3247_v40  ;;  %v3231_v32 = vor.u32 %v4120_v33, %v3230_v35  ;;  %v3232_v41 = vld [vmem:[#allocation5 + $0xb0] sm:$0xf0] }
  0xfc   :  { %v3259_v39 = vor.u32 %v4123_v30, %v3256_v46  ;;  %v3235_v40 = vor.u32 %v4118_v36, %v3232_v41  ;;  %v3239_v30 = vor.u32 %v4121_v47, %v3238_v45  ;;  %v4119_v46 = vld [vmem:[#allocation5 + $0xac] sm:$0xf]  ;;  %v4773_v36 = vld [vmem:[%s5010_s3] sm:$0xf] }
  0xfd   :  { %946 = vmatpush.bf16.msra.mxu1 %v3251_v29  ;;  %v3243_v29 = vor.u32 %v4119_v46, %v3240_v48  ;;  %v3200_v48 = vld [vmem:[#allocation5 + $0x70] sm:$0xf0] }
  0xfe   :  { %974 = vmatpush.bf16.msra.mxu3 %v3259_v39  ;;  %961 = vmatpush.bf16.msra.mxu2 %v3239_v30  ;;  %v3216_v39 = vld [vmem:[#allocation5 + $0x90] sm:$0xf0]  ;;  %v4112_v30 = vld [vmem:[#allocation5 + $0x6c] sm:$0xf0] }
  0xff   :  { %v4762_v43 = vpop.f32.mrf.mxu2  ;;  %v4764_v34 = vpop.f32.mrf.mxu3  ;;  %933 = vmatpush.bf16.msra.mxu0 %v3231_v32  ;;  %v3219_v35 = vor.u32 %v4114_v37, %v3216_v39  ;;  %v4787_v39 = vperm.slane %v4773_v36, 1 }
 0x100   :  { %5026 = vst [vmem:[#allocation22_spill] sm:$0xff] %v4762_v43  ;;  %v4766_v42 = vpop.f32.mrf.mxu0  ;;  %v4768_v44 = vpop.f32.mrf.mxu1  ;;  %v3224_v43 = vld [vmem:[#allocation5 + $0x98] sm:$0xf0] }
 0x101   :  { %5027 = vst [vmem:[#allocation23_spill] sm:$0xff] %v4764_v34  ;;  %947 = vmatpush.bf16.msra.mxu1 %v3235_v40  ;;  %v4115_v34 = vld [vmem:[#allocation5 + $0x8c] sm:$0xf]  ;;  %v3198_v40 = vld [vmem:[#allocation5 + $0x60] sm:$0xf] }
 0x102   :  { %5028 = vst [vmem:[#allocation24_spill] sm:$0xff] %v4766_v42  ;;  %975 = vmatpush.bf16.msra.mxu3 %v3243_v29  ;;  %v3222_v42 = vld [vmem:[#allocation5 + $0x88] sm:$0xf]  ;;  %v3227_v41 = vor.u32 %v4115_v34, %v3224_v43  ;;  %v3199_v46 = vor.u32 %v4112_v30, %v3198_v40  ;;  %v3208_v43 = vld [vmem:[#allocation5 + $0x78] sm:$0xf0]  ;;  %v4784_v34 = vperm.slane %v4773_v36, 0 }
 0x103   :  { %5029 = vst [vmem:[#allocation25_spill] sm:$0xff] %v4768_v44  ;;  %v4117_v44 = vld [vmem:[#allocation5 + $0x94] sm:$0xf0]  ;;  %934 = vmatpush.bf16.msra.mxu0 %v3215_v38  ;;  %v3206_v29 = vld [vmem:[#allocation5 + $0x68] sm:$0xf] }
 0x104   :  { %v3223_v33 = vor.u32 %v4117_v44, %v3222_v42  ;;  %v4110_v42 = vld [vmem:[#allocation5 + $0x64] sm:$0xf]  ;;  %v3207_v37 = vor.u32 %v4113_v31, %v3206_v29  ;;  %v4111_v38 = vld [vmem:[#allocation5 + $0x6c] sm:$0xf] }
 0x105   :  { %948 = vmatpush.bf16.msra.mxu1 %v3219_v35  ;;  %v3203_v51 = vor.u32 %v4110_v42, %v3200_v48  ;;  %v3211_v35 = vor.u32 %v4111_v38, %v3208_v43  ;;  %v4106_v40 = vld [vmem:[#allocation5 + $0x44] sm:$0xf]  ;;  %v3190_v42 = vld [vmem:[#allocation5 + $0x48] sm:$0xf]  ;;  %v4109_v48 = vld [vmem:[#allocation5 + $0x54] sm:$0xf0] }
 0x106   :  { %962 = vmatpush.bf16.msra.mxu2 %v3223_v33  ;;  %976 = vmatpush.bf16.msra.mxu3 %v3227_v41  ;;  %v3182_v33 = vld [vmem:[#allocation5 + $0x40] sm:$0xf]  ;;  %v4108_v41 = vld [vmem:[#allocation5 + $0x4c] sm:$0xf0]  ;;  %v3191_v31 = vor.u32 %v4109_v48, %v3190_v42  ;;  %v3174_v42 = vld [vmem:[#allocation5 + $0x28] sm:$0xf] }
 0x107   :  { %v4775_v32 = vpop.f32.mrf.mxu2  ;;  %v4777_v45 = vpop.f32.mrf.mxu3  ;;  %935 = vmatpush.bf16.msra.mxu0 %v3199_v46  ;;  %v3183_v30 = vor.u32 %v4108_v41, %v3182_v33  ;;  %v3166_v43 = vld [vmem:[#allocation5 + $0x20] sm:$0xf]  ;;  %v4105_v48 = vld [vmem:[#allocation5 + $0x34] sm:$0xf0] }
 0x108   :  { %5030 = vst [vmem:[#allocation26_spill] sm:$0xff] %v4775_v32  ;;  %v4779_v47 = vpop.f32.mrf.mxu0  ;;  %v4781_v44 = vpop.f32.mrf.mxu1  ;;  %v159_v32 = vadd.f32 %v4654_v49, %v4784_v34  ;;  %v3168_v49 = vld [vmem:[#allocation5 + $0x30] sm:$0xf0] }
 0x109   :  { %5031 = vst [vmem:[#allocation27_spill] sm:$0xff] %v4777_v45  ;;  %949 = vmatpush.bf16.msra.mxu1 %v3203_v51  ;;  %v3192_v45 = vld [vmem:[#allocation5 + $0x58] sm:$0xf0]  ;;  %v208_v51 = vadd.f32 %v4656_v50, %v4787_v39 }
 0x10a   :  { %5032 = vst [vmem:[#allocation28_spill] sm:$0xff] %v4779_v47  ;;  %963 = vmatpush.bf16.msra.mxu2 %v3207_v37  ;;  %977 = vmatpush.bf16.msra.mxu3 %v3211_v35  ;;  %v4107_v47 = vld [vmem:[#allocation5 + $0x4c] sm:$0xf]  ;;  %v4102_v35 = vld [vmem:[#allocation5 + $0x24] sm:$0xf] }
 0x10b   :  { %5033 = vst [vmem:[#allocation29_spill] sm:$0xff] %v4781_v44  ;;  %v3184_v44 = vld [vmem:[#allocation5 + $0x50] sm:$0xf0]  ;;  %936 = vmatpush.bf16.msra.mxu0 %v3183_v30  ;;  %v3195_v46 = vor.u32 %v4107_v47, %v3192_v45  ;;  %v4798_v45 = vperm.slane %v4773_v36, 2  ;;  %v3171_v50 = vor.u32 %v4102_v35, %v3168_v49  ;;  %v3175_v30 = vor.u32 %v4105_v48, %v3174_v42 }
 0x10c   :  { %v3187_v29 = vor.u32 %v4106_v40, %v3184_v44  ;;  %v4104_v44 = vld [vmem:[#allocation5 + $0x2c] sm:$0xf0] }
 0x10d   :  { %v3167_v40 = vor.u32 %v4104_v44, %v3166_v43  ;;  %v4098_v43 = vld [vmem:[#allocation5 + $0x4] sm:$0xf]  ;;  %v3152_v44 = vld [vmem:[#allocation5 + $0x10] sm:$0xf0] }
 0x10e   :  { %950 = vmatpush.bf16.msra.mxu1 %v3187_v29  ;;  %964 = vmatpush.bf16.msra.mxu2 %v3191_v31  ;;  %v3155_v35 = vor.u32 %v4098_v43, %v3152_v44  ;;  %v259_v44 = vadd.f32 %v4666_v56, %v4798_v45 }
 0x10f   :  { %v4791_v28 = vpop.f32.mrf.mxu2  ;;  %v4795_v37 = vpop.f32.mrf.mxu3  ;;  %978 = vmatpush.bf16.msra.mxu3 %v3195_v46  ;;  %937 = vmatpush.bf16.msra.mxu0 %v3167_v40  ;;  %v4100_v46 = vld [vmem:[#allocation5 + $0xc] sm:$0xf0]  ;;  %v3160_v40 = vld [vmem:[#allocation5 + $0x18] sm:$0xf0] }
 0x110   :  { %5034 = vst [vmem:[#allocation30_spill] sm:$0xff] %v4791_v28  ;;  %v624_v38 = vpop.f32.mrf.mxu0  ;;  %v638_v41 = vpop.f32.mrf.mxu1  ;;  %v3176_v28 = vld [vmem:[#allocation5 + $0x38] sm:$0xf0] }
 0x111   :  { %5035 = vst [vmem:[#allocation31_spill] sm:$0xff] %v4795_v37  ;;  %v671_v33 = vadd.f32 %v624_v38, %v159_v32  ;;  %v672_v47 = vadd.f32 %v638_v41, %v208_v51  ;;  %v4103_v37 = vld [vmem:[#allocation5 + $0x2c] sm:$0xf]  ;;  %v3150_v32 = vld [vmem:[#allocation5] sm:$0xf]  ;;  %v257_v51 = vadd.f32 %v4658_v52, %v4798_v45 }
 0x112   :  { %v3179_v31 = vor.u32 %v4103_v37, %v3176_v28  ;;  %951 = vmatpush.bf16.msra.mxu1 %v3171_v50  ;;  %965 = vmatpush.bf16.msra.mxu2 %v3175_v30  ;;  %v3151_v38 = vor.u32 %v4100_v46, %v3150_v32  ;;  %v4101_v41 = vld [vmem:[#allocation5 + $0x14] sm:$0xf0]  ;;  %v4803_v28 = vperm.slane %v4773_v36, 3  ;;  %v161_v37 = vadd.f32 %v4662_v54, %v4784_v34 }
 0x113   :  { %v681_v29 = vmul.f32 0.5, %v671_v33  ;;  %v689_v27 = vmul.f32 0.5, %v672_v47  ;;  %v4099_v33 = vld [vmem:[#allocation5 + $0xc] sm:$0xf]  ;;  %v3159_v42 = vor.u32 %v4101_v41, %v3158_v26  ;;  %v210_v47 = vadd.f32 %v4664_v55, %v4787_v39 }
 0x114   :  { %979 = vmatpush.bf16.msra.mxu3 %v3179_v31  ;;  %938 = vmatpush.bf16.msra.mxu0 %v3151_v38  ;;  %v3163_v48 = vor.u32 %v4099_v33, %v3160_v40  ;;  %v306_v54 = vadd.f32 %v4660_v53, %v4803_v28 }
 0x115   :  { %4373 = vtanh.f32 %v681_v29 }
 0x116   :  { %4375 = vtanh.f32 %v689_v27  ;;  %952 = vmatpush.bf16.msra.mxu1 %v3155_v35  ;;  %966 = vmatpush.bf16.msra.mxu2 %v3159_v42  ;;  %v308_v35 = vadd.f32 %v4668_v57, %v4803_v28 }
 0x117   :  { %v652_v49 = vpop.f32.mrf.mxu2  ;;  %v666_v52 = vpop.f32.mrf.mxu3 }
 0x118   :  { %v673_v50 = vadd.f32 %v652_v49, %v257_v51  ;;  %v626_v27 = vpop.f32.mrf.mxu0  ;;  %v640_v29 = vpop.f32.mrf.mxu1  ;;  %980 = vmatpush.bf16.msra.mxu3 %v3163_v48  ;;  %v674_v55 = vadd.f32 %v666_v52, %v306_v54 }
 0x119   :  { %v675_v30 = vadd.f32 %v626_v27, %v161_v37  ;;  %v676_v36 = vadd.f32 %v640_v29, %v210_v47 }
 0x11a   :  { %4377 = vtanh.f32 %v673_v50  ;;  %v699_v48 = vmul.f32 0.5, %v674_v55 }
 0x11b   :  { %v4374_v31 = vpop.eup %4373  ;;  %v682_v32 = vmul.f32 0.5, %v675_v30  ;;  %v690_v38 = vmul.f32 0.5, %v676_v36 }
 0x11c   :  { %v4376_v26 = vpop.eup %4375  ;;  %v685_v46 = vmul.f32 0.5, %v4374_v31 }
 0x11d   :  { %v693_v43 = vmul.f32 0.5, %v4376_v26  ;;  %4379 = vtanh.f32 %v682_v32 }
 0x11e   :  { %v687_v51 = vadd.f32 0.5, %v685_v46  ;;  %4381 = vtanh.f32 %v690_v38 }
 0x11f   :  { %v695_v41 = vadd.f32 0.5, %v693_v43  ;;  %v654_v33 = vpop.f32.mrf.mxu2  ;;  %v668_v53 = vpop.f32.mrf.mxu3 }
 0x120   :  { %v4378_v40 = vpop.eup %4377  ;;  %v677_v37 = vadd.f32 %v654_v33, %v259_v44  ;;  %v678_v47 = vadd.f32 %v668_v53, %v308_v35  ;;  %v3392_v53 = vld [vmem:[#allocation5 + $0xe0] sm:$0xf] }
 0x121   :  { %v707_v49 = vmul.f32 0.0, %v695_v41  ;;  %v709_v42 = vmul.f32 %v4378_v40, %v687_v51 }
 0x122   :  { %4383 = vtanh.f32 %v677_v37  ;;  %v700_v52 = vmul.f32 0.5, %v678_v47  ;;  %v3394_v47 = vld [vmem:[#allocation5 + $0xf0] sm:$0xf0] }
 0x123   :  { %v4815_v50 = vadd.f32 %v709_v42, %v707_v49  ;;  %v4380_v56 = vpop.eup %4379  ;;  %4385 = vtanh.f32 %v699_v48  ;;  %v4160_v49 = vld [vmem:[#allocation5 + $0xec] sm:$0xf0]  ;;  %v4158_v42 = vld [vmem:[#allocation5 + $0xe4] sm:$0xf] }
 0x124   :  { %v4382_v27 = vpop.eup %4381  ;;  %v686_v30 = vmul.f32 0.5, %v4380_v56  ;;  %4387 = vtanh.f32 %v700_v52  ;;  %v3393_v48 = vor.u32 %v4160_v49, %v3392_v53  ;;  %v3400_v52 = vld [vmem:[#allocation5 + $0xe8] sm:$0xf]  ;;  %v4161_v56 = vld [vmem:[#allocation5 + $0xf4] sm:$0xf0] }
 0x125   :  { %v694_v29 = vmul.f32 0.5, %v4382_v27  ;;  %4389 = vtanh.f32 %v4815_v50  ;;  %v3397_v27 = vor.u32 %v4158_v42, %v3394_v47  ;;  %v4150_v53 = vld [vmem:[#allocation5 + $0xa4] sm:$0xf]  ;;  %v3362_v42 = vld [vmem:[#allocation5 + $0xb0] sm:$0xf0] }
 0x126   :  { %v688_v57 = vadd.f32 0.5, %v686_v30  ;;  %v3401_v30 = vor.u32 %v4161_v56, %v3400_v52  ;;  %1248 = vmatpush.bf16.msrb.mxu0 %v3393_v48  ;;  %v3368_v48 = vld [vmem:[#allocation5 + $0xa8] sm:$0xf]  ;;  %v4153_v47 = vld [vmem:[#allocation5 + $0xb4] sm:$0xf0]  ;;  %v3365_v52 = vor.u32 %v4150_v53, %v3362_v42 }
 0x127   :  { %v696_v31 = vadd.f32 0.5, %v694_v29  ;;  %v4159_v29 = vld [vmem:[#allocation5 + $0xec] sm:$0xf]  ;;  %1262 = vmatpush.bf16.msrb.mxu1 %v3397_v27  ;;  %v3369_v56 = vor.u32 %v4153_v47, %v3368_v48  ;;  %v3330_v53 = vld [vmem:[#allocation5 + $0x70] sm:$0xf0] }
 0x128   :  { %v4384_v36 = vpop.eup %4383  ;;  %1276 = vmatpush.bf16.msrb.mxu2 %v3401_v30  ;;  %v4151_v27 = vld [vmem:[#allocation5 + $0xac] sm:$0xf]  ;;  %v3370_v30 = vld [vmem:[#allocation5 + $0xb8] sm:$0xf0]  ;;  %v4145_v42 = vld [vmem:[#allocation5 + $0x74] sm:$0xf0] }
 0x129   :  { %v710_v54 = vmul.f32 %v4384_v36, %v688_v57  ;;  %v708_v32 = vmul.f32 0.0, %v696_v31  ;;  %v4386_v26 = vpop.eup %4385  ;;  %v3402_v57 = vld [vmem:[#allocation5 + $0xf8] sm:$0xf0]  ;;  %v3376_v31 = vld [vmem:[#allocation5 + $0xc0] sm:$0xf] }
 0x12a   :  { %v4388_v46 = vpop.eup %4387  ;;  %v703_v43 = vmul.f32 0.5, %v4386_v26  ;;  %v3405_v36 = vor.u32 %v4159_v29, %v3402_v57  ;;  %v3373_v29 = vor.u32 %v4151_v27, %v3370_v30  ;;  %v3344_v57 = vld [vmem:[#allocation5 + $0x80] sm:$0xf] }
 0x12b   :  { %v4818_v38 = vadd.f32 %v710_v54, %v708_v32  ;;  %v704_v55 = vmul.f32 0.5, %v4388_v46  ;;  %v4390_v44 = vpop.eup %4389  ;;  %v4156_v54 = vld [vmem:[#allocation5 + $0xcc] sm:$0xf0]  ;;  %v4154_v32 = vld [vmem:[#allocation5 + $0xc4] sm:$0xf] }
 0x12c   :  { %v705_v51 = vadd.f32 0.5, %v703_v43  ;;  %1290 = vmatpush.bf16.msrb.mxu3 %v3405_v36  ;;  %v3377_v26 = vor.u32 %v4156_v54, %v3376_v31  ;;  %v3378_v46 = vld [vmem:[#allocation5 + $0xd0] sm:$0xf0]  ;;  %v3384_v43 = vld [vmem:[#allocation5 + $0xc8] sm:$0xf] }
 0x12d   :  { %4391 = vtanh.f32 %v4818_v38  ;;  %v706_v35 = vadd.f32 0.5, %v704_v55  ;;  %v4157_v55 = vld [vmem:[#allocation5 + $0xd4] sm:$0xf0]  ;;  %v4148_v36 = vld [vmem:[#allocation5 + $0x8c] sm:$0xf0] }
 0x12e   :  { %v715_v33 = vmul.f32 %v4390_v44, %v705_v51  ;;  %v3381_v44 = vor.u32 %v4154_v32, %v3378_v46  ;;  %v3385_v51 = vor.u32 %v4157_v55, %v3384_v43  ;;  %1249 = vmatpush.bf16.msrb.mxu0 %v3377_v26  ;;  %v4146_v31 = vld [vmem:[#allocation5 + $0x84] sm:$0xf]  ;;  %v3345_v54 = vor.u32 %v4148_v36, %v3344_v57  ;;  %v3346_v32 = vld [vmem:[#allocation5 + $0x90] sm:$0xf0]  ;;  %v3352_v26 = vld [vmem:[#allocation5 + $0x88] sm:$0xf] }
 0x12f   :  { %v4149_v46 = vld [vmem:[#allocation5 + $0x94] sm:$0xf0]  ;;  %v3349_v43 = vor.u32 %v4146_v31, %v3346_v32  ;;  %v3312_v30 = vld [vmem:[#allocation5 + $0x40] sm:$0xf]  ;;  %v4138_v57 = vld [vmem:[#allocation5 + $0x44] sm:$0xf] }
 0x130   :  { %1263 = vmatpush.bf16.msrb.mxu1 %v3381_v44  ;;  %1277 = vmatpush.bf16.msrb.mxu2 %v3385_v51  ;;  %v3353_v55 = vor.u32 %v4149_v46, %v3352_v26  ;;  %v4147_v44 = vld [vmem:[#allocation5 + $0x8c] sm:$0xf]  ;;  %v3354_v51 = vld [vmem:[#allocation5 + $0x98] sm:$0xf0]  ;;  %v3314_v31 = vld [vmem:[#allocation5 + $0x50] sm:$0xf0] }
 0x131   :  { %v4141_v32 = vld [vmem:[#allocation5 + $0x54] sm:$0xf0]  ;;  %v3317_v26 = vor.u32 %v4138_v57, %v3314_v31  ;;  %v4132_v31 = vld [vmem:[#allocation5 + $0xc] sm:$0xf0] }
 0x133   :  { %v4392_v41 = vpop.eup %4391 }
 0x134   :  { %v716_v40 = vmul.f32 %v4392_v41, %v706_v35  ;;  %v4155_v35 = vld [vmem:[#allocation5 + $0xcc] sm:$0xf]  ;;  %v3386_v41 = vld [vmem:[#allocation5 + $0xd8] sm:$0xf0]  ;;  %1264 = vmatpush.bf16.msrb.mxu1 %v3365_v52  ;;  %1278 = vmatpush.bf16.msrb.mxu2 %v3369_v56 }
 0x135   :  { %v4143_v52 = vld [vmem:[#allocation5 + $0x6c] sm:$0xf]  ;;  %v3338_v56 = vld [vmem:[#allocation5 + $0x78] sm:$0xf0] }
 0x136   :  { %v4325_v37 = vpack.c.bf16 %v716_v40, %v715_v33  ;;  %v3389_v33 = vor.u32 %v4155_v35, %v3386_v41  ;;  %v3360_v40 = vld [vmem:[#allocation5 + $0xa0] sm:$0xf]  ;;  %v3357_v35 = vor.u32 %v4147_v44, %v3354_v51  ;;  %v3341_v27 = vor.u32 %v4143_v52, %v3338_v56 }
 0x137   :  { %v3328_v41 = vld [vmem:[#allocation5 + $0x60] sm:$0xf] }
 0x138   :  { %4326 = vst [vmem:[%s5011_s4] sm:$0xff] %v4325_v37   ;;  %939 = vmatmul.bf16.vlgmr.msra.gmra.mxu0 %v4325_v37  ;;  %953 = vmatmul.bf16.vlgmr.msra.gmra.mxu1 %v4325_v37  ;;  %v3296_v51 = vld [vmem:[#allocation5 + $0x20] sm:$0xf] }
 0x139   :  { %967 = vmatmul.bf16.vlgmr.msra.gmra.mxu2 %v4325_v37  ;;  %981 = vmatmul.bf16.vlgmr.msra.gmra.mxu3 %v4325_v37  ;;  %v4152_v37 = vld [vmem:[#allocation5 + $0xac] sm:$0xf0] }
 0x13a   :  { %1291 = vmatpush.bf16.msrb.mxu3 %v3389_v33  ;;  %v3361_v49 = vor.u32 %v4152_v37, %v3360_v40  ;;  %1265 = vmatpush.bf16.msrb.mxu1 %v3349_v43  ;;  %v4144_v33 = vld [vmem:[#allocation5 + $0x6c] sm:$0xf0]  ;;  %v4142_v40 = vld [vmem:[#allocation5 + $0x64] sm:$0xf]  ;;  %v4139_v43 = vld [vmem:[#allocation5 + $0x4c] sm:$0xf] }
 0x13b   :  { %1279 = vmatpush.bf16.msrb.mxu2 %v3353_v55  ;;  %v3329_v37 = vor.u32 %v4144_v33, %v3328_v41  ;;  %v3333_v48 = vor.u32 %v4142_v40, %v3330_v53  ;;  %v3322_v55 = vld [vmem:[#allocation5 + $0x58] sm:$0xf0]  ;;  %v4134_v41 = vld [vmem:[#allocation5 + $0x24] sm:$0xf]  ;;  %v164_v33 = vadd.f32 %v4670_v58, %v4784_v34  ;;  %v213_v40 = vadd.f32 %v4672_v59, %v4787_v39  ;;  %v3298_v53 = vld [vmem:[#allocation5 + $0x30] sm:$0xf0] }
 0x13c   :  { %1250 = vmatpush.bf16.msrb.mxu0 %v3361_v49  ;;  %v3336_v49 = vld [vmem:[#allocation5 + $0x68] sm:$0xf]  ;;  %v3325_v44 = vor.u32 %v4139_v43, %v3322_v55  ;;  %v3301_v52 = vor.u32 %v4134_v41, %v3298_v53  ;;  %v3280_v58 = vld [vmem:[#allocation5] sm:$0xf]  ;;  %v4130_v59 = vld [vmem:[#allocation5 + $0x4] sm:$0xf]  ;;  %v215_v53 = vadd.f32 %v4680_v63, %v4787_v39 }
 0x13d   :  { %v3337_v47 = vor.u32 %v4145_v42, %v3336_v49  ;;  %v3304_v49 = vld [vmem:[#allocation5 + $0x28] sm:$0xf]  ;;  %v4137_v42 = vld [vmem:[#allocation5 + $0x34] sm:$0xf0] }
 0x13e   :  { %1292 = vmatpush.bf16.msrb.mxu3 %v3373_v29  ;;  %1266 = vmatpush.bf16.msrb.mxu1 %v3333_v48  ;;  %v4140_v29 = vld [vmem:[#allocation5 + $0x4c] sm:$0xf0]  ;;  %v3305_v56 = vor.u32 %v4137_v42, %v3304_v49  ;;  %v3288_v43 = vld [vmem:[#allocation5 + $0x8] sm:$0xf] }
 0x13f   :  { %1280 = vmatpush.bf16.msrb.mxu2 %v3337_v47  ;;  %v3313_v36 = vor.u32 %v4140_v29, %v3312_v30  ;;  %v3306_v30 = vld [vmem:[#allocation5 + $0x38] sm:$0xf0] }
 0x140   :  { %1251 = vmatpush.bf16.msrb.mxu0 %v3345_v54  ;;  %v3320_v54 = vld [vmem:[#allocation5 + $0x48] sm:$0xf] }
 0x141   :  { %v3321_v46 = vor.u32 %v4141_v32, %v3320_v54 }
 0x142   :  { %1293 = vmatpush.bf16.msrb.mxu3 %v3357_v35  ;;  %1267 = vmatpush.bf16.msrb.mxu1 %v3317_v26  ;;  %v4136_v35 = vld [vmem:[#allocation5 + $0x2c] sm:$0xf0]  ;;  %v3281_v26 = vor.u32 %v4132_v31, %v3280_v58  ;;  %v264_v31 = vadd.f32 %v4682_v0, %v4798_v45 }
 0x143   :  { %1281 = vmatpush.bf16.msrb.mxu2 %v3321_v46  ;;  %v3282_v46 = vld [vmem:[#allocation5 + $0x10] sm:$0xf0] }
 0x144   :  { %1252 = vmatpush.bf16.msrb.mxu0 %v3329_v37  ;;  %v3297_v37 = vor.u32 %v4136_v35, %v3296_v51  ;;  %v3285_v55 = vor.u32 %v4130_v59, %v3282_v46  ;;  %v4131_v51 = vld [vmem:[#allocation5 + $0xc] sm:$0xf]  ;;  %v3290_v35 = vld [vmem:[#allocation5 + $0x18] sm:$0xf0]  ;;  %v313_v59 = vadd.f32 %v4684_v1, %v4803_v28 }
 0x146   :  { %1294 = vmatpush.bf16.msrb.mxu3 %v3341_v27  ;;  %v4135_v27 = vld [vmem:[#allocation5 + $0x2c] sm:$0xf]  ;;  %1268 = vmatpush.bf16.msrb.mxu1 %v3301_v52 }
 0x147   :  { %1282 = vmatpush.bf16.msrb.mxu2 %v3305_v56 }
 0x148   :  { %1253 = vmatpush.bf16.msrb.mxu0 %v3313_v36  ;;  %v3309_v36 = vor.u32 %v4135_v27, %v3306_v30 }
 0x14a   :  { %1295 = vmatpush.bf16.msrb.mxu3 %v3325_v44  ;;  %v4133_v44 = vld [vmem:[#allocation5 + $0x14] sm:$0xf0]  ;;  %1269 = vmatpush.bf16.msrb.mxu1 %v3285_v55 }
 0x14b   :  { %v3289_v41 = vor.u32 %v4133_v44, %v3288_v43 }
 0x14c   :  { %1254 = vmatpush.bf16.msrb.mxu0 %v3297_v37  ;;  %v166_v37 = vadd.f32 %v4678_v62, %v4784_v34 }
 0x14d   :  { %1283 = vmatpush.bf16.msrb.mxu2 %v3289_v41 }
 0x14e   :  { %1296 = vmatpush.bf16.msrb.mxu3 %v3309_v36 }
 0x150   :  { %1255 = vmatpush.bf16.msrb.mxu0 %v3281_v26 }
 0x1b5   :  { %v940_v48 = vpop.f32.mrf.mxu0  ;;  %v954_v47 = vpop.f32.mrf.mxu1 }
 0x1b6   :  { %v987_v29 = vadd.f32 %v940_v48, %v164_v33  ;;  %v988_v57 = vadd.f32 %v954_v47, %v213_v40  ;;  %v3293_v33 = vor.u32 %v4131_v51, %v3290_v35  ;;  %v262_v40 = vadd.f32 %v4674_v60, %v4798_v45 }
 0x1b7   :  { %v311_v60 = vadd.f32 %v4676_v61, %v4803_v28 }
 0x1b8   :  { %v997_v54 = vmul.f32 0.5, %v987_v29  ;;  %v1005_v32 = vmul.f32 0.5, %v988_v57  ;;  %1297 = vmatpush.bf16.msrb.mxu3 %v3293_v33 }
 0x1ba   :  { %4393 = vtanh.f32 %v997_v54 }
 0x1bb   :  { %4395 = vtanh.f32 %v1005_v32 }
 0x1bc   :  { %v968_v49 = vpop.f32.mrf.mxu2  ;;  %v982_v42 = vpop.f32.mrf.mxu3 }
 0x1bd   :  { %v989_v48 = vadd.f32 %v968_v49, %v262_v40  ;;  %v942_v47 = vpop.f32.mrf.mxu0  ;;  %v956_v52 = vpop.f32.mrf.mxu1  ;;  %v990_v58 = vadd.f32 %v982_v42, %v311_v60 }
 0x1be   :  { %v991_v56 = vadd.f32 %v942_v47, %v166_v37  ;;  %v992_v27 = vadd.f32 %v956_v52, %v215_v53 }
 0x1bf   :  { %4397 = vtanh.f32 %v989_v48  ;;  %v1015_v43 = vmul.f32 0.5, %v990_v58 }
 0x1c0   :  { %v4394_v30 = vpop.eup %4393  ;;  %v998_v29 = vmul.f32 0.5, %v991_v56  ;;  %v1006_v57 = vmul.f32 0.5, %v992_v27 }
 0x1c1   :  { %v4396_v62 = vpop.eup %4395  ;;  %v1001_v36 = vmul.f32 0.5, %v4394_v30 }
 0x1c2   :  { %v1009_v63 = vmul.f32 0.5, %v4396_v62  ;;  %4399 = vtanh.f32 %v998_v29 }
 0x1c3   :  { %v1003_v54 = vadd.f32 0.5, %v1001_v36  ;;  %4401 = vtanh.f32 %v1006_v57 }
 0x1c4   :  { %v1011_v32 = vadd.f32 0.5, %v1009_v63  ;;  %v970_v26 = vpop.f32.mrf.mxu2  ;;  %v984_v61 = vpop.f32.mrf.mxu3 }
 0x1c5   :  { %v4398_v46 = vpop.eup %4397  ;;  %v993_v55 = vadd.f32 %v970_v26, %v264_v31  ;;  %v994_v44 = vadd.f32 %v984_v61, %v313_v59  ;;  %v4192_v31 = vld [vmem:[#allocation5 + $0xec] sm:$0xf0]  ;;  %v4190_v59 = vld [vmem:[#allocation5 + $0xe4] sm:$0xf]  ;;  %v3530_v26 = vld [vmem:[#allocation5 + $0xe8] sm:$0xf] }
 0x1c6   :  { %v1023_v51 = vmul.f32 %v1011_v32, %v4815_v50  ;;  %v1025_v35 = vmul.f32 %v4398_v46, %v1003_v54  ;;  %v3524_v32 = vld [vmem:[#allocation5 + $0xf0] sm:$0xf0]  ;;  %v4193_v61 = vld [vmem:[#allocation5 + $0xf4] sm:$0xf0] }
 0x1c7   :  { %4403 = vtanh.f32 %v993_v55  ;;  %v1016_v41 = vmul.f32 0.5, %v994_v44  ;;  %v3527_v46 = vor.u32 %v4190_v59, %v3524_v32  ;;  %v4191_v55 = vld [vmem:[#allocation5 + $0xec] sm:$0xf]  ;;  %v3532_v44 = vld [vmem:[#allocation5 + $0xf8] sm:$0xf0] }
 0x1c8   :  { %v4400_v33 = vpop.eup %4399  ;;  %v4841_v40 = vadd.f32 %v1025_v35, %v1023_v51  ;;  %4405 = vtanh.f32 %v1015_v43  ;;  %v3531_v43 = vor.u32 %v4193_v61, %v3530_v26  ;;  %v3535_v51 = vor.u32 %v4191_v55, %v3532_v44  ;;  %v3506_v35 = vld [vmem:[#allocation5 + $0xc0] sm:$0xf]  ;;  %v4178_v32 = vld [vmem:[#allocation5 + $0x84] sm:$0xf]  ;;  %v3476_v61 = vld [vmem:[#allocation5 + $0x90] sm:$0xf0] }
 0x1c9   :  { %v4402_v0 = vpop.eup %4401  ;;  %v1002_v1 = vmul.f32 0.5, %v4400_v33  ;;  %4407 = vtanh.f32 %v1016_v41  ;;  %1579 = vmatpush.bf16.msra.mxu1 %v3527_v46  ;;  %v4188_v41 = vld [vmem:[#allocation5 + $0xcc] sm:$0xf0]  ;;  %v4186_v33 = vld [vmem:[#allocation5 + $0xc4] sm:$0xf]  ;;  %v3479_v55 = vor.u32 %v4178_v32, %v3476_v61 }
 0x1ca   :  { %v1010_v37 = vmul.f32 0.5, %v4402_v0  ;;  %4409 = vtanh.f32 %v4841_v40  ;;  %1593 = vmatpush.bf16.msra.mxu2 %v3531_v43  ;;  %1607 = vmatpush.bf16.msra.mxu3 %v3535_v51  ;;  %v3507_v0 = vor.u32 %v4188_v41, %v3506_v35  ;;  %v3474_v59 = vld [vmem:[#allocation5 + $0x80] sm:$0xf]  ;;  %v3482_v46 = vld [vmem:[#allocation5 + $0x88] sm:$0xf] }
 0x1cb   :  { %v1004_v53 = vadd.f32 0.5, %v1002_v1  ;;  %v3508_v1 = vld [vmem:[#allocation5 + $0xd0] sm:$0xf0]  ;;  %v4181_v43 = vld [vmem:[#allocation5 + $0x94] sm:$0xf0] }
 0x1cc   :  { %v1012_v49 = vadd.f32 0.5, %v1010_v37  ;;  %v3514_v37 = vld [vmem:[#allocation5 + $0xc8] sm:$0xf]  ;;  %v3483_v44 = vor.u32 %v4181_v43, %v3482_v46  ;;  %v4179_v51 = vld [vmem:[#allocation5 + $0x8c] sm:$0xf]  ;;  %v169_v46 = vadd.f32 %v4686_v2, %v4784_v34  ;;  %v218_v43 = vadd.f32 %v4688_v3, %v4787_v39 }
 0x1cd   :  { %v4404_v42 = vpop.eup %4403  ;;  %v3484_v35 = vld [vmem:[#allocation5 + $0x98] sm:$0xf0]  ;;  %v3426_v32 = vld [vmem:[#allocation5 + $0x20] sm:$0xf]  ;;  %v4166_v61 = vld [vmem:[#allocation5 + $0x24] sm:$0xf] }
 0x1ce   :  { %v1024_v48 = vmul.f32 %v1012_v49, %v4818_v38  ;;  %v1026_v47 = vmul.f32 %v4404_v42, %v1004_v53  ;;  %v4406_v52 = vpop.eup %4405  ;;  %v3522_v38 = vld [vmem:[#allocation5 + $0xe0] sm:$0xf]  ;;  %v4189_v53 = vld [vmem:[#allocation5 + $0xd4] sm:$0xf0]  ;;  %v3511_v49 = vor.u32 %v4186_v33, %v3508_v1  ;;  %v3487_v41 = vor.u32 %v4179_v51, %v3484_v35  ;;  %v4174_v1 = vld [vmem:[#allocation5 + $0x64] sm:$0xf] }
 0x1cf   :  { %v4408_v56 = vpop.eup %4407  ;;  %v1019_v27 = vmul.f32 0.5, %v4406_v52  ;;  %v3523_v54 = vor.u32 %v4192_v31, %v3522_v38  ;;  %v3515_v42 = vor.u32 %v4189_v53, %v3514_v37  ;;  %v3500_v38 = vld [vmem:[#allocation5 + $0xb8] sm:$0xf0]  ;;  %v3458_v33 = vld [vmem:[#allocation5 + $0x60] sm:$0xf] }
 0x1d0   :  { %v4845_v50 = vadd.f32 %v1026_v47, %v1024_v48  ;;  %v1020_v60 = vmul.f32 0.5, %v4408_v56  ;;  %v4410_v30 = vpop.eup %4409  ;;  %v4187_v48 = vld [vmem:[#allocation5 + $0xcc] sm:$0xf]  ;;  %v3516_v47 = vld [vmem:[#allocation5 + $0xd8] sm:$0xf0]  ;;  %1580 = vmatpush.bf16.msra.mxu1 %v3511_v49 }
 0x1d1   :  { %v1021_v29 = vadd.f32 0.5, %v1019_v27  ;;  %1565 = vmatpush.bf16.msra.mxu0 %v3523_v54  ;;  %v3519_v52 = vor.u32 %v4187_v48, %v3516_v47  ;;  %1594 = vmatpush.bf16.msra.mxu2 %v3515_v42  ;;  %v3490_v56 = vld [vmem:[#allocation5 + $0xa0] sm:$0xf]  ;;  %v4184_v27 = vld [vmem:[#allocation5 + $0xac] sm:$0xf0] }
 0x1d2   :  { %4411 = vtanh.f32 %v4845_v50  ;;  %v1022_v57 = vadd.f32 0.5, %v1020_v60  ;;  %v4182_v60 = vld [vmem:[#allocation5 + $0xa4] sm:$0xf]  ;;  %v4180_v54 = vld [vmem:[#allocation5 + $0x8c] sm:$0xf0] }
 0x1d3   :  { %v1031_v36 = vmul.f32 %v4410_v30, %v1021_v29  ;;  %1608 = vmatpush.bf16.msra.mxu3 %v3519_v52  ;;  %v3491_v30 = vor.u32 %v4184_v27, %v3490_v56  ;;  %v3492_v29 = vld [vmem:[#allocation5 + $0xb0] sm:$0xf0]  ;;  %v3475_v26 = vor.u32 %v4180_v54, %v3474_v59  ;;  %v3466_v49 = vld [vmem:[#allocation5 + $0x68] sm:$0xf]  ;;  %v4177_v42 = vld [vmem:[#allocation5 + $0x74] sm:$0xf0] }
 0x1d4   :  { %v3460_v53 = vld [vmem:[#allocation5 + $0x70] sm:$0xf0]  ;;  %v3467_v47 = vor.u32 %v4177_v42, %v3466_v49  ;;  %v4175_v52 = vld [vmem:[#allocation5 + $0x6c] sm:$0xf]  ;;  %v3468_v56 = vld [vmem:[#allocation5 + $0x78] sm:$0xf0] }
 0x1d5   :  { %1566 = vmatpush.bf16.msra.mxu0 %v3507_v0  ;;  %v4176_v0 = vld [vmem:[#allocation5 + $0x6c] sm:$0xf0]  ;;  %v3463_v48 = vor.u32 %v4174_v1, %v3460_v53  ;;  %v3471_v27 = vor.u32 %v4175_v52, %v3468_v56  ;;  %v3452_v59 = vld [vmem:[#allocation5 + $0x58] sm:$0xf0]  ;;  %v3434_v51 = vld [vmem:[#allocation5 + $0x28] sm:$0xf] }
 0x1d6   :  { %v3459_v37 = vor.u32 %v4176_v0, %v3458_v33  ;;  %v4169_v35 = vld [vmem:[#allocation5 + $0x34] sm:$0xf0]  ;;  %v3436_v53 = vld [vmem:[#allocation5 + $0x38] sm:$0xf0]  ;;  %v3410_v2 = vld [vmem:[#allocation5] sm:$0xf] }
 0x1d7   :  { %v3435_v1 = vor.u32 %v4169_v35, %v3434_v51  ;;  %v4162_v3 = vld [vmem:[#allocation5 + $0x4] sm:$0xf] }
 0x1d8   :  { %v4412_v62 = vpop.eup %4411 }
 0x1d9   :  { %v1032_v58 = vmul.f32 %v4412_v62, %v1022_v57  ;;  %v3498_v57 = vld [vmem:[#allocation5 + $0xa8] sm:$0xf]  ;;  %v4185_v62 = vld [vmem:[#allocation5 + $0xb4] sm:$0xf0]  ;;  %1567 = vmatpush.bf16.msra.mxu0 %v3491_v30  ;;  %v4172_v30 = vld [vmem:[#allocation5 + $0x4c] sm:$0xf0] }
 0x1db   :  { %v4330_v63 = vpack.c.bf16 %v1032_v58, %v1031_v36  ;;  %v3495_v36 = vor.u32 %v4182_v60, %v3492_v29  ;;  %v3499_v58 = vor.u32 %v4185_v62, %v3498_v57  ;;  %v3442_v60 = vld [vmem:[#allocation5 + $0x40] sm:$0xf]  ;;  %v4170_v29 = vld [vmem:[#allocation5 + $0x44] sm:$0xf]  ;;  %v3444_v62 = vld [vmem:[#allocation5 + $0x50] sm:$0xf0] }
 0x1dc   :  { %v3443_v57 = vor.u32 %v4172_v30, %v3442_v60  ;;  %v3412_v60 = vld [vmem:[#allocation5 + $0x10] sm:$0xf0]  ;;  %v3418_v30 = vld [vmem:[#allocation5 + $0x8] sm:$0xf] }
 0x1dd   :  { %4362 = vst [vmem:[%s5011_s4 + $0x8] sm:$0xff] %v4330_v63   ;;  %1256 = vmatmul.bf16.vlgmr.msrb.gmra.mxu0 %v4330_v63  ;;  %1270 = vmatmul.bf16.vlgmr.msrb.gmra.mxu1 %v4330_v63 }
 0x1de   :  { %1284 = vmatmul.bf16.vlgmr.msrb.gmra.mxu2 %v4330_v63  ;;  %1298 = vmatmul.bf16.vlgmr.msrb.gmra.mxu3 %v4330_v63  ;;  %v4183_v63 = vld [vmem:[#allocation5 + $0xac] sm:$0xf] }
 0x1df   :  { %v3503_v31 = vor.u32 %v4183_v63, %v3500_v38  ;;  %1581 = vmatpush.bf16.msra.mxu1 %v3495_v36  ;;  %1595 = vmatpush.bf16.msra.mxu2 %v3499_v58  ;;  %v3450_v36 = vld [vmem:[#allocation5 + $0x48] sm:$0xf]  ;;  %v4173_v58 = vld [vmem:[#allocation5 + $0x54] sm:$0xf0]  ;;  %v3447_v63 = vor.u32 %v4170_v29, %v3444_v62  ;;  %v3415_v29 = vor.u32 %v4162_v3, %v3412_v60  ;;  %v4163_v62 = vld [vmem:[#allocation5 + $0xc] sm:$0xf] }
 0x1e0   :  { %1568 = vmatpush.bf16.msra.mxu0 %v3475_v26  ;;  %v3451_v38 = vor.u32 %v4173_v58, %v3450_v36  ;;  %v4168_v26 = vld [vmem:[#allocation5 + $0x2c] sm:$0xf0]  ;;  %v3420_v36 = vld [vmem:[#allocation5 + $0x18] sm:$0xf0] }
 0x1e1   :  { %1609 = vmatpush.bf16.msra.mxu3 %v3503_v31  ;;  %v4171_v31 = vld [vmem:[#allocation5 + $0x4c] sm:$0xf] }
 0x1e2   :  { %v3455_v54 = vor.u32 %v4171_v31, %v3452_v59  ;;  %v171_v31 = vadd.f32 %v4694_v6, %v4784_v34  ;;  %v220_v59 = vadd.f32 %v4696_v7, %v4787_v39 }
 0x1e3   :  { %1582 = vmatpush.bf16.msra.mxu1 %v3479_v55  ;;  %1596 = vmatpush.bf16.msra.mxu2 %v3483_v44  ;;  %v3427_v55 = vor.u32 %v4168_v26, %v3426_v32  ;;  %v3428_v44 = vld [vmem:[#allocation5 + $0x30] sm:$0xf0] }
 0x1e4   :  { %1569 = vmatpush.bf16.msra.mxu0 %v3459_v37  ;;  %v3431_v0 = vor.u32 %v4166_v61, %v3428_v44  ;;  %v4167_v37 = vld [vmem:[#allocation5 + $0x2c] sm:$0xf] }
 0x1e5   :  { %1610 = vmatpush.bf16.msra.mxu3 %v3487_v41 }
 0x1e7   :  { %1583 = vmatpush.bf16.msra.mxu1 %v3463_v48  ;;  %1597 = vmatpush.bf16.msra.mxu2 %v3467_v47  ;;  %v3439_v48 = vor.u32 %v4167_v37, %v3436_v53  ;;  %v4164_v47 = vld [vmem:[#allocation5 + $0xc] sm:$0xf0] }
 0x1e8   :  { %1570 = vmatpush.bf16.msra.mxu0 %v3443_v57  ;;  %v4165_v57 = vld [vmem:[#allocation5 + $0x14] sm:$0xf0] }
 0x1e9   :  { %1611 = vmatpush.bf16.msra.mxu3 %v3471_v27  ;;  %v3411_v27 = vor.u32 %v4164_v47, %v3410_v2  ;;  %v3419_v58 = vor.u32 %v4165_v57, %v3418_v30 }
 0x1eb   :  { %1584 = vmatpush.bf16.msra.mxu1 %v3447_v63  ;;  %1598 = vmatpush.bf16.msra.mxu2 %v3451_v38  ;;  %v3423_v63 = vor.u32 %v4163_v62, %v3420_v36  ;;  %v267_v38 = vadd.f32 %v4690_v4, %v4798_v45  ;;  %v316_v4 = vadd.f32 %v4692_v5, %v4803_v28 }
 0x1ec   :  { %1571 = vmatpush.bf16.msra.mxu0 %v3427_v55 }
 0x1ed   :  { %1612 = vmatpush.bf16.msra.mxu3 %v3455_v54 }
 0x1ef   :  { %1585 = vmatpush.bf16.msra.mxu1 %v3431_v0  ;;  %1599 = vmatpush.bf16.msra.mxu2 %v3435_v1  ;;  %v269_v0 = vadd.f32 %v4698_v8, %v4798_v45  ;;  %v318_v1 = vadd.f32 %v4700_v9, %v4803_v28 }
 0x1f0   :  { %1572 = vmatpush.bf16.msra.mxu0 %v3411_v27 }
 0x1f1   :  { %1613 = vmatpush.bf16.msra.mxu3 %v3439_v48 }
 0x1f3   :  { %1586 = vmatpush.bf16.msra.mxu1 %v3415_v29  ;;  %1600 = vmatpush.bf16.msra.mxu2 %v3419_v58 }
 0x1f5   :  { %1614 = vmatpush.bf16.msra.mxu3 %v3423_v63 }
 0x25a   :  { %v1257_v41 = vpop.f32.mrf.mxu0  ;;  %v1271_v33 = vpop.f32.mrf.mxu1 }
 0x25b   :  { %v1304_v49 = vadd.f32 %v1257_v41, %v169_v46  ;;  %v1305_v42 = vadd.f32 %v1271_v33, %v218_v43 }
 0x25d   :  { %v1314_v52 = vmul.f32 0.5, %v1304_v49  ;;  %v1322_v56 = vmul.f32 0.5, %v1305_v42 }
 0x25f   :  { %4413 = vtanh.f32 %v1314_v52 }
 0x260   :  { %4415 = vtanh.f32 %v1322_v56 }
 0x261   :  { %v1285_v54 = vpop.f32.mrf.mxu2  ;;  %v1299_v32 = vpop.f32.mrf.mxu3 }
 0x262   :  { %v1306_v26 = vadd.f32 %v1285_v54, %v267_v38  ;;  %v1259_v61 = vpop.f32.mrf.mxu0  ;;  %v1273_v46 = vpop.f32.mrf.mxu1  ;;  %v1307_v33 = vadd.f32 %v1299_v32, %v316_v4  ;;  %v4224_v4 = vld [vmem:[#allocation5 + $0xec] sm:$0xf0] }
 0x263   :  { %v1308_v43 = vadd.f32 %v1259_v61, %v171_v31  ;;  %v1309_v55 = vadd.f32 %v1273_v46, %v220_v59 }
 0x264   :  { %4417 = vtanh.f32 %v1306_v26  ;;  %v1332_v48 = vmul.f32 0.5, %v1307_v33 }
 0x265   :  { %v4414_v44 = vpop.eup %4413  ;;  %v1315_v51 = vmul.f32 0.5, %v1308_v43  ;;  %v1323_v35 = vmul.f32 0.5, %v1309_v55 }
 0x266   :  { %v4416_v6 = vpop.eup %4415  ;;  %v1318_v41 = vmul.f32 0.5, %v4414_v44  ;;  %v4222_v44 = vld [vmem:[#allocation5 + $0xe4] sm:$0xf] }
 0x267   :  { %v1326_v7 = vmul.f32 0.5, %v4416_v6  ;;  %4419 = vtanh.f32 %v1315_v51  ;;  %v3660_v6 = vld [vmem:[#allocation5 + $0xe8] sm:$0xf] }
 0x268   :  { %v1320_v37 = vadd.f32 0.5, %v1318_v41  ;;  %4421 = vtanh.f32 %v1323_v35  ;;  %v3654_v35 = vld [vmem:[#allocation5 + $0xf0] sm:$0xf0]  ;;  %v4225_v41 = vld [vmem:[#allocation5 + $0xf4] sm:$0xf0] }
 0x269   :  { %v1328_v53 = vadd.f32 0.5, %v1326_v7  ;;  %v1287_v49 = vpop.f32.mrf.mxu2  ;;  %v1301_v5 = vpop.f32.mrf.mxu3  ;;  %v3657_v33 = vor.u32 %v4222_v44, %v3654_v35  ;;  %v3661_v7 = vor.u32 %v4225_v41, %v3660_v6  ;;  %v3614_v35 = vld [vmem:[#allocation5 + $0x98] sm:$0xf0]  ;;  %v3588_v41 = vld [vmem:[#allocation5 + $0x60] sm:$0xf] }
 0x26a   :  { %v4418_v42 = vpop.eup %4417  ;;  %v1310_v2 = vadd.f32 %v1287_v49, %v269_v0  ;;  %v1311_v47 = vadd.f32 %v1301_v5, %v318_v1  ;;  %v4223_v0 = vld [vmem:[#allocation5 + $0xec] sm:$0xf]  ;;  %v3662_v1 = vld [vmem:[#allocation5 + $0xf8] sm:$0xf0]  ;;  %v4220_v49 = vld [vmem:[#allocation5 + $0xcc] sm:$0xf0] }
 0x26b   :  { %v1340_v3 = vmul.f32 %v1328_v53, %v4841_v40  ;;  %v1342_v52 = vmul.f32 %v4418_v42, %v1320_v37  ;;  %v3665_v37 = vor.u32 %v4223_v0, %v3662_v1  ;;  %1896 = vmatpush.bf16.msrb.mxu1 %v3657_v33  ;;  %1910 = vmatpush.bf16.msrb.mxu2 %v3661_v7  ;;  %v3636_v53 = vld [vmem:[#allocation5 + $0xc0] sm:$0xf]  ;;  %v4218_v5 = vld [vmem:[#allocation5 + $0xc4] sm:$0xf]  ;;  %v4208_v33 = vld [vmem:[#allocation5 + $0x6c] sm:$0xf0] }
 0x26c   :  { %4423 = vtanh.f32 %v1310_v2  ;;  %v1333_v56 = vmul.f32 0.5, %v1311_v47  ;;  %v3637_v42 = vor.u32 %v4220_v49, %v3636_v53  ;;  %v3644_v2 = vld [vmem:[#allocation5 + $0xc8] sm:$0xf]  ;;  %v4221_v47 = vld [vmem:[#allocation5 + $0xd4] sm:$0xf0]  ;;  %v3589_v0 = vor.u32 %v4208_v33, %v3588_v41 }
 0x26d   :  { %v4420_v27 = vpop.eup %4419  ;;  %v4868_v60 = vadd.f32 %v1342_v52, %v1340_v3  ;;  %4425 = vtanh.f32 %v1332_v48  ;;  %1924 = vmatpush.bf16.msrb.mxu3 %v3665_v37  ;;  %v3638_v48 = vld [vmem:[#allocation5 + $0xd0] sm:$0xf0]  ;;  %v3645_v52 = vor.u32 %v4221_v47, %v3644_v2  ;;  %v4206_v7 = vld [vmem:[#allocation5 + $0x64] sm:$0xf]  ;;  %v3596_v37 = vld [vmem:[#allocation5 + $0x68] sm:$0xf] }
 0x26e   :  { %v4422_v8 = vpop.eup %4421  ;;  %v1319_v9 = vmul.f32 0.5, %v4420_v27  ;;  %4427 = vtanh.f32 %v1333_v56  ;;  %v3641_v3 = vor.u32 %v4218_v5, %v3638_v48  ;;  %v4219_v56 = vld [vmem:[#allocation5 + $0xcc] sm:$0xf]  ;;  %v3646_v27 = vld [vmem:[#allocation5 + $0xd8] sm:$0xf0] }
 0x26f   :  { %v1327_v30 = vmul.f32 0.5, %v4422_v8  ;;  %4429 = vtanh.f32 %v4868_v60  ;;  %v3649_v8 = vor.u32 %v4219_v56, %v3646_v27  ;;  %1911 = vmatpush.bf16.msrb.mxu2 %v3645_v52  ;;  %v3590_v1 = vld [vmem:[#allocation5 + $0x70] sm:$0xf0]  ;;  %v4209_v53 = vld [vmem:[#allocation5 + $0x74] sm:$0xf0] }
 0x270   :  { %v1321_v29 = vadd.f32 0.5, %v1319_v9  ;;  %1897 = vmatpush.bf16.msrb.mxu1 %v3641_v3  ;;  %v3620_v9 = vld [vmem:[#allocation5 + $0xa0] sm:$0xf]  ;;  %v3593_v49 = vor.u32 %v4206_v7, %v3590_v1  ;;  %v3597_v5 = vor.u32 %v4209_v53, %v3596_v37  ;;  %v3598_v48 = vld [vmem:[#allocation5 + $0x78] sm:$0xf0] }
 0x271   :  { %v1329_v57 = vadd.f32 0.5, %v1327_v30  ;;  %v4216_v30 = vld [vmem:[#allocation5 + $0xac] sm:$0xf0]  ;;  %1925 = vmatpush.bf16.msrb.mxu3 %v3649_v8  ;;  %v3572_v47 = vld [vmem:[#allocation5 + $0x40] sm:$0xf] }
 0x272   :  { %v4424_v62 = vpop.eup %4423  ;;  %v4204_v3 = vld [vmem:[#allocation5 + $0x4c] sm:$0xf0]  ;;  %v4202_v52 = vld [vmem:[#allocation5 + $0x44] sm:$0xf]  ;;  %v3574_v27 = vld [vmem:[#allocation5 + $0x50] sm:$0xf0] }
 0x273   :  { %v1341_v36 = vmul.f32 %v1329_v57, %v4845_v50  ;;  %v1343_v58 = vmul.f32 %v4424_v62, %v1321_v29  ;;  %v4426_v63 = vpop.eup %4425  ;;  %v3652_v50 = vld [vmem:[#allocation5 + $0xe0] sm:$0xf]  ;;  %v4214_v29 = vld [vmem:[#allocation5 + $0xa4] sm:$0xf]  ;;  %v3621_v57 = vor.u32 %v4216_v30, %v3620_v9  ;;  %v3622_v62 = vld [vmem:[#allocation5 + $0xb0] sm:$0xf0]  ;;  %v3573_v56 = vor.u32 %v4204_v3, %v3572_v47 }
 0x274   :  { %v4428_v38 = vpop.eup %4427  ;;  %v1336_v31 = vmul.f32 0.5, %v4426_v63  ;;  %v3653_v51 = vor.u32 %v4224_v4, %v3652_v50  ;;  %v3625_v63 = vor.u32 %v4214_v29, %v3622_v62  ;;  %v4213_v50 = vld [vmem:[#allocation5 + $0x94] sm:$0xf0]  ;;  %v3580_v8 = vld [vmem:[#allocation5 + $0x48] sm:$0xf]  ;;  %v3577_v30 = vor.u32 %v4202_v52, %v3574_v27 }
 0x275   :  { %v4872_v40 = vadd.f32 %v1343_v58, %v1341_v36  ;;  %v1337_v59 = vmul.f32 0.5, %v4428_v38  ;;  %v4430_v54 = vpop.eup %4429  ;;  %v3628_v36 = vld [vmem:[#allocation5 + $0xa8] sm:$0xf]  ;;  %v4217_v58 = vld [vmem:[#allocation5 + $0xb4] sm:$0xf0]  ;;  %v272_v47 = vadd.f32 %v4706_v12, %v4798_v45  ;;  %v176_v3 = vadd.f32 %v4710_v14, %v4784_v34 }
 0x276   :  { %v1338_v32 = vadd.f32 0.5, %v1336_v31  ;;  %1882 = vmatpush.bf16.msrb.mxu0 %v3653_v51  ;;  %v3629_v38 = vor.u32 %v4217_v58, %v3628_v36  ;;  %v4215_v31 = vld [vmem:[#allocation5 + $0xac] sm:$0xf]  ;;  %1898 = vmatpush.bf16.msrb.mxu1 %v3625_v63  ;;  %v4205_v9 = vld [vmem:[#allocation5 + $0x54] sm:$0xf0]  ;;  %v225_v52 = vadd.f32 %v4712_v15, %v4787_v39  ;;  %v321_v12 = vadd.f32 %v4708_v13, %v4803_v28 }
 0x277   :  { %4431 = vtanh.f32 %v4872_v40  ;;  %v1339_v26 = vadd.f32 0.5, %v1337_v59  ;;  %v3630_v59 = vld [vmem:[#allocation5 + $0xb8] sm:$0xf0]  ;;  %v4211_v51 = vld [vmem:[#allocation5 + $0x8c] sm:$0xf]  ;;  %v3581_v29 = vor.u32 %v4205_v9, %v3580_v8 }
 0x278   :  { %v1348_v46 = vmul.f32 %v4430_v54, %v1338_v32  ;;  %v3633_v54 = vor.u32 %v4215_v31, %v3630_v59  ;;  %1912 = vmatpush.bf16.msrb.mxu2 %v3629_v38  ;;  %v3604_v32 = vld [vmem:[#allocation5 + $0x80] sm:$0xf]  ;;  %v3617_v6 = vor.u32 %v4211_v51, %v3614_v35  ;;  %v3582_v62 = vld [vmem:[#allocation5 + $0x58] sm:$0xf0]  ;;  %v4200_v63 = vld [vmem:[#allocation5 + $0x2c] sm:$0xf0]  ;;  %v174_v31 = vadd.f32 %v4702_v10, %v4784_v34 }
 0x279   :  { %v3556_v58 = vld [vmem:[#allocation5 + $0x20] sm:$0xf]  ;;  %v4198_v38 = vld [vmem:[#allocation5 + $0x24] sm:$0xf]  ;;  %v223_v59 = vadd.f32 %v4704_v11, %v4787_v39  ;;  %v4196_v41 = vld [vmem:[#allocation5 + $0xc] sm:$0xf0] }
 0x27a   :  { %1883 = vmatpush.bf16.msrb.mxu0 %v3637_v42  ;;  %1926 = vmatpush.bf16.msrb.mxu3 %v3633_v54  ;;  %v4207_v42 = vld [vmem:[#allocation5 + $0x6c] sm:$0xf]  ;;  %v3557_v54 = vor.u32 %v4200_v63, %v3556_v58  ;;  %v3540_v10 = vld [vmem:[#allocation5] sm:$0xf]  ;;  %v4194_v11 = vld [vmem:[#allocation5 + $0x4] sm:$0xf] }
 0x27b   :  { %v3601_v2 = vor.u32 %v4207_v42, %v3598_v48  ;;  %v3542_v1 = vld [vmem:[#allocation5 + $0x10] sm:$0xf0]  ;;  %v3548_v37 = vld [vmem:[#allocation5 + $0x8] sm:$0xf]  ;;  %v3550_v42 = vld [vmem:[#allocation5 + $0x18] sm:$0xf0] }
 0x27c   :  { %v3545_v53 = vor.u32 %v4194_v11, %v3542_v1 }
 0x27d   :  { %v4432_v61 = vpop.eup %4431 }
 0x27e   :  { %v1349_v43 = vmul.f32 %v4432_v61, %v1339_v26  ;;  %1884 = vmatpush.bf16.msrb.mxu0 %v3621_v57  ;;  %v4212_v26 = vld [vmem:[#allocation5 + $0x8c] sm:$0xf0]  ;;  %v4210_v61 = vld [vmem:[#allocation5 + $0x84] sm:$0xf]  ;;  %1927 = vmatpush.bf16.msrb.mxu3 %v3617_v6  ;;  %v4203_v57 = vld [vmem:[#allocation5 + $0x4c] sm:$0xf] }
 0x27f   :  { %v3585_v36 = vor.u32 %v4203_v57, %v3582_v62 }
 0x280   :  { %v4335_v55 = vpack.c.bf16 %v1349_v43, %v1348_v46  ;;  %v3605_v46 = vor.u32 %v4212_v26, %v3604_v32  ;;  %v3606_v43 = vld [vmem:[#allocation5 + $0x90] sm:$0xf0]  ;;  %v3564_v26 = vld [vmem:[#allocation5 + $0x28] sm:$0xf] }
 0x281   :  { %v3609_v4 = vor.u32 %v4210_v61, %v3606_v43  ;;  %v3558_v32 = vld [vmem:[#allocation5 + $0x30] sm:$0xf0]  ;;  %v4201_v61 = vld [vmem:[#allocation5 + $0x34] sm:$0xf0] }
 0x282   :  { %4363 = vst [vmem:[%s5011_s4 + $0x10] sm:$0xff] %v4335_v55   ;;  %1573 = vmatmul.bf16.vlgmr.msra.gmra.mxu0 %v4335_v55  ;;  %1587 = vmatmul.bf16.vlgmr.msra.gmra.mxu1 %v4335_v55 }
 0x283   :  { %1601 = vmatmul.bf16.vlgmr.msra.gmra.mxu2 %v4335_v55  ;;  %1615 = vmatmul.bf16.vlgmr.msra.gmra.mxu3 %v4335_v55  ;;  %v3612_v55 = vld [vmem:[#allocation5 + $0x88] sm:$0xf] }
 0x284   :  { %v3613_v44 = vor.u32 %v4213_v50, %v3612_v55  ;;  %1885 = vmatpush.bf16.msrb.mxu0 %v3605_v46  ;;  %1899 = vmatpush.bf16.msrb.mxu1 %v3609_v4  ;;  %v3561_v55 = vor.u32 %v4198_v38, %v3558_v32  ;;  %v3565_v50 = vor.u32 %v4201_v61, %v3564_v26  ;;  %v4199_v4 = vld [vmem:[#allocation5 + $0x2c] sm:$0xf] }
 0x285   :  { %1928 = vmatpush.bf16.msrb.mxu3 %v3601_v2 }
 0x286   :  { %1913 = vmatpush.bf16.msrb.mxu2 %v3613_v44  ;;  %v3566_v44 = vld [vmem:[#allocation5 + $0x38] sm:$0xf0] }
 0x287   :  { %v3569_v6 = vor.u32 %v4199_v4, %v3566_v44 }
 0x288   :  { %1886 = vmatpush.bf16.msrb.mxu0 %v3589_v0  ;;  %1900 = vmatpush.bf16.msrb.mxu1 %v3593_v49  ;;  %v3541_v0 = vor.u32 %v4196_v41, %v3540_v10  ;;  %v4197_v49 = vld [vmem:[#allocation5 + $0x14] sm:$0xf0] }
 0x289   :  { %1929 = vmatpush.bf16.msrb.mxu3 %v3585_v36  ;;  %v3549_v48 = vor.u32 %v4197_v49, %v3548_v37 }
 0x28a   :  { %1914 = vmatpush.bf16.msrb.mxu2 %v3597_v5  ;;  %v4195_v5 = vld [vmem:[#allocation5 + $0xc] sm:$0xf] }
 0x28b   :  { %v3553_v2 = vor.u32 %v4195_v5, %v3550_v42 }
 0x28c   :  { %1887 = vmatpush.bf16.msrb.mxu0 %v3573_v56  ;;  %1901 = vmatpush.bf16.msrb.mxu1 %v3577_v30 }
 0x28d   :  { %1930 = vmatpush.bf16.msrb.mxu3 %v3569_v6 }
 0x28e   :  { %1915 = vmatpush.bf16.msrb.mxu2 %v3581_v29 }
 0x290   :  { %1888 = vmatpush.bf16.msrb.mxu0 %v3557_v54  ;;  %1902 = vmatpush.bf16.msrb.mxu1 %v3561_v55 }
 0x291   :  { %1931 = vmatpush.bf16.msrb.mxu3 %v3553_v2 }
 0x292   :  { %1916 = vmatpush.bf16.msrb.mxu2 %v3565_v50 }
 0x294   :  { %1889 = vmatpush.bf16.msrb.mxu0 %v3541_v0  ;;  %1903 = vmatpush.bf16.msrb.mxu1 %v3545_v53 }
 0x296   :  { %1917 = vmatpush.bf16.msrb.mxu2 %v3549_v48 }
 0x2ff   :  { %v1574_v46 = vpop.f32.mrf.mxu0  ;;  %v1588_v43 = vpop.f32.mrf.mxu1 }
 0x300   :  { %v1621_v51 = vadd.f32 %v1574_v46, %v174_v31  ;;  %v1622_v35 = vadd.f32 %v1588_v43, %v223_v59  ;;  %v274_v31 = vadd.f32 %v4714_v16, %v4798_v45  ;;  %v323_v59 = vadd.f32 %v4716_v17, %v4803_v28 }
 0x302   :  { %v1631_v33 = vmul.f32 0.5, %v1621_v51  ;;  %v1639_v7 = vmul.f32 0.5, %v1622_v35 }
 0x304   :  { %4433 = vtanh.f32 %v1631_v33 }
 0x305   :  { %4435 = vtanh.f32 %v1639_v7 }
 0x306   :  { %v1602_v56 = vpop.f32.mrf.mxu2  ;;  %v1616_v27 = vpop.f32.mrf.mxu3 }
 0x307   :  { %v1623_v8 = vadd.f32 %v1602_v56, %v272_v47  ;;  %v1576_v9 = vpop.f32.mrf.mxu0  ;;  %v1590_v30 = vpop.f32.mrf.mxu1  ;;  %v1624_v38 = vadd.f32 %v1616_v27, %v321_v12  ;;  %v4254_v56 = vld [vmem:[#allocation5 + $0xe4] sm:$0xf]  ;;  %v4255_v12 = vld [vmem:[#allocation5 + $0xec] sm:$0xf] }
 0x308   :  { %v1625_v29 = vadd.f32 %v1576_v9, %v176_v3  ;;  %v1626_v57 = vadd.f32 %v1590_v30, %v225_v52  ;;  %v4256_v52 = vld [vmem:[#allocation5 + $0xec] sm:$0xf0]  ;;  %v3790_v9 = vld [vmem:[#allocation5 + $0xe8] sm:$0xf]  ;;  %v4257_v30 = vld [vmem:[#allocation5 + $0xf4] sm:$0xf0] }
 0x309   :  { %4437 = vtanh.f32 %v1623_v8  ;;  %v1649_v46 = vmul.f32 0.5, %v1624_v38  ;;  %v3784_v8 = vld [vmem:[#allocation5 + $0xf0] sm:$0xf0] }
 0x30a   :  { %v4434_v62 = vpop.eup %4433  ;;  %v1632_v36 = vmul.f32 0.5, %v1625_v29  ;;  %v1640_v58 = vmul.f32 0.5, %v1626_v57  ;;  %v3787_v29 = vor.u32 %v4254_v56, %v3784_v8  ;;  %v3791_v57 = vor.u32 %v4257_v30, %v3790_v9  ;;  %v3720_v56 = vld [vmem:[#allocation5 + $0x70] sm:$0xf0]  ;;  %v4241_v8 = vld [vmem:[#allocation5 + $0x74] sm:$0xf0] }
 0x30b   :  { %v4436_v14 = vpop.eup %4435  ;;  %v1635_v63 = vmul.f32 0.5, %v4434_v62  ;;  %v3792_v62 = vld [vmem:[#allocation5 + $0xf8] sm:$0xf0] }
 0x30c   :  { %v1643_v15 = vmul.f32 0.5, %v4436_v14  ;;  %4439 = vtanh.f32 %v1632_v36  ;;  %v3795_v36 = vor.u32 %v4255_v12, %v3792_v62  ;;  %2213 = vmatpush.bf16.msra.mxu1 %v3787_v29  ;;  %2227 = vmatpush.bf16.msra.mxu2 %v3791_v57  ;;  %v4252_v14 = vld [vmem:[#allocation5 + $0xcc] sm:$0xf0]  ;;  %v4239_v29 = vld [vmem:[#allocation5 + $0x6c] sm:$0xf] }
 0x30d   :  { %v1637_v54 = vadd.f32 0.5, %v1635_v63  ;;  %4441 = vtanh.f32 %v1640_v58  ;;  %v3766_v58 = vld [vmem:[#allocation5 + $0xc0] sm:$0xf]  ;;  %v4250_v63 = vld [vmem:[#allocation5 + $0xc4] sm:$0xf] }
 0x30e   :  { %v1645_v32 = vadd.f32 0.5, %v1643_v15  ;;  %v1604_v26 = vpop.f32.mrf.mxu2  ;;  %v1618_v13 = vpop.f32.mrf.mxu3  ;;  %2241 = vmatpush.bf16.msra.mxu3 %v3795_v36  ;;  %v3767_v38 = vor.u32 %v4252_v14, %v3766_v58  ;;  %v3768_v15 = vld [vmem:[#allocation5 + $0xd0] sm:$0xf0]  ;;  %v3728_v57 = vld [vmem:[#allocation5 + $0x78] sm:$0xf0] }
 0x30f   :  { %v4438_v61 = vpop.eup %4437  ;;  %v1627_v43 = vadd.f32 %v1604_v26, %v274_v31  ;;  %v1628_v55 = vadd.f32 %v1618_v13, %v323_v59  ;;  %v3774_v31 = vld [vmem:[#allocation5 + $0xc8] sm:$0xf]  ;;  %v4253_v59 = vld [vmem:[#allocation5 + $0xd4] sm:$0xf0]  ;;  %v4251_v26 = vld [vmem:[#allocation5 + $0xcc] sm:$0xf]  ;;  %v3731_v12 = vor.u32 %v4239_v29, %v3728_v57 }
 0x310   :  { %v1657_v50 = vmul.f32 %v1645_v32, %v4868_v60  ;;  %v1659_v4 = vmul.f32 %v4438_v61, %v1637_v54  ;;  %v3771_v54 = vor.u32 %v4250_v63, %v3768_v15  ;;  %v3775_v32 = vor.u32 %v4253_v59, %v3774_v31  ;;  %v3776_v13 = vld [vmem:[#allocation5 + $0xd8] sm:$0xf0]  ;;  %v3702_v62 = vld [vmem:[#allocation5 + $0x40] sm:$0xf]  ;;  %v4236_v36 = vld [vmem:[#allocation5 + $0x4c] sm:$0xf0] }
 0x311   :  { %4443 = vtanh.f32 %v1627_v43  ;;  %v1650_v44 = vmul.f32 0.5, %v1628_v55  ;;  %v3779_v61 = vor.u32 %v4251_v26, %v3776_v13  ;;  %v4248_v43 = vld [vmem:[#allocation5 + $0xac] sm:$0xf0]  ;;  %v4246_v55 = vld [vmem:[#allocation5 + $0xa4] sm:$0xf]  ;;  %v3703_v14 = vor.u32 %v4236_v36, %v3702_v62 }
 0x312   :  { %v4440_v51 = vpop.eup %4439  ;;  %v4895_v35 = vadd.f32 %v1659_v4, %v1657_v50  ;;  %4445 = vtanh.f32 %v1649_v46  ;;  %2214 = vmatpush.bf16.msra.mxu1 %v3771_v54  ;;  %2228 = vmatpush.bf16.msra.mxu2 %v3775_v32  ;;  %v3750_v46 = vld [vmem:[#allocation5 + $0xa0] sm:$0xf]  ;;  %v3752_v4 = vld [vmem:[#allocation5 + $0xb0] sm:$0xf0]  ;;  %v4234_v58 = vld [vmem:[#allocation5 + $0x44] sm:$0xf] }
 0x313   :  { %v4442_v16 = vpop.eup %4441  ;;  %v1636_v17 = vmul.f32 0.5, %v4440_v51  ;;  %4447 = vtanh.f32 %v1650_v44  ;;  %2242 = vmatpush.bf16.msra.mxu3 %v3779_v61  ;;  %v3751_v50 = vor.u32 %v4248_v43, %v3750_v46  ;;  %v3758_v44 = vld [vmem:[#allocation5 + $0xa8] sm:$0xf]  ;;  %v4249_v51 = vld [vmem:[#allocation5 + $0xb4] sm:$0xf0]  ;;  %v179_v43 = vadd.f32 %v4718_v18, %v4784_v34 }
 0x314   :  { %v1644_v6 = vmul.f32 0.5, %v4442_v16  ;;  %4449 = vtanh.f32 %v4895_v35  ;;  %v3755_v16 = vor.u32 %v4246_v55, %v3752_v4  ;;  %v3704_v63 = vld [vmem:[#allocation5 + $0x50] sm:$0xf0]  ;;  %v4237_v15 = vld [vmem:[#allocation5 + $0x54] sm:$0xf0]  ;;  %v228_v55 = vadd.f32 %v4720_v19, %v4787_v39 }
 0x315   :  { %v1638_v10 = vadd.f32 0.5, %v1636_v17  ;;  %v3759_v17 = vor.u32 %v4249_v51, %v3758_v44  ;;  %v3707_v31 = vor.u32 %v4234_v58, %v3704_v63  ;;  %v4235_v54 = vld [vmem:[#allocation5 + $0x4c] sm:$0xf]  ;;  %v3712_v32 = vld [vmem:[#allocation5 + $0x58] sm:$0xf0] }
 0x316   :  { %v1646_v41 = vadd.f32 0.5, %v1644_v6  ;;  %v4247_v6 = vld [vmem:[#allocation5 + $0xac] sm:$0xf]  ;;  %2215 = vmatpush.bf16.msra.mxu1 %v3755_v16  ;;  %v3715_v26 = vor.u32 %v4235_v54, %v3712_v32  ;;  %v3686_v13 = vld [vmem:[#allocation5 + $0x20] sm:$0xf] }
 0x317   :  { %v4444_v11 = vpop.eup %4443  ;;  %2229 = vmatpush.bf16.msra.mxu2 %v3759_v17  ;;  %v4232_v61 = vld [vmem:[#allocation5 + $0x2c] sm:$0xf0]  ;;  %v4230_v46 = vld [vmem:[#allocation5 + $0x24] sm:$0xf]  ;;  %v3688_v4 = vld [vmem:[#allocation5 + $0x30] sm:$0xf0] }
 0x318   :  { %v1658_v33 = vmul.f32 %v1646_v41, %v4872_v40  ;;  %v1660_v7 = vmul.f32 %v4444_v11, %v1638_v10  ;;  %v4446_v0 = vpop.eup %4445  ;;  %v3782_v40 = vld [vmem:[#allocation5 + $0xe0] sm:$0xf]  ;;  %v3760_v10 = vld [vmem:[#allocation5 + $0xb8] sm:$0xf0]  ;;  %v3694_v44 = vld [vmem:[#allocation5 + $0x28] sm:$0xf] }
 0x319   :  { %v4448_v1 = vpop.eup %4447  ;;  %v1653_v37 = vmul.f32 0.5, %v4446_v0  ;;  %v3783_v27 = vor.u32 %v4256_v52, %v3782_v40  ;;  %v3763_v41 = vor.u32 %v4247_v6, %v3760_v10  ;;  %v3734_v11 = vld [vmem:[#allocation5 + $0x80] sm:$0xf]  ;;  %v4238_v40 = vld [vmem:[#allocation5 + $0x64] sm:$0xf]  ;;  %v3691_v6 = vor.u32 %v4230_v46, %v3688_v4 }
 0x31a   :  { %v4899_v60 = vadd.f32 %v1660_v7, %v1658_v33  ;;  %v1654_v53 = vmul.f32 0.5, %v4448_v1  ;;  %v4450_v49 = vpop.eup %4449  ;;  %v4244_v33 = vld [vmem:[#allocation5 + $0x8c] sm:$0xf0]  ;;  %v4242_v7 = vld [vmem:[#allocation5 + $0x84] sm:$0xf]  ;;  %v3723_v9 = vor.u32 %v4238_v40, %v3720_v56  ;;  %v277_v56 = vadd.f32 %v4722_v20, %v4798_v45 }
 0x31b   :  { %v1655_v5 = vadd.f32 0.5, %v1653_v37  ;;  %2199 = vmatpush.bf16.msra.mxu0 %v3783_v27  ;;  %2243 = vmatpush.bf16.msra.mxu3 %v3763_v41  ;;  %v3735_v0 = vor.u32 %v4244_v33, %v3734_v11  ;;  %v3736_v1 = vld [vmem:[#allocation5 + $0x90] sm:$0xf0]  ;;  %v3742_v37 = vld [vmem:[#allocation5 + $0x88] sm:$0xf]  ;;  %v326_v20 = vadd.f32 %v4724_v21, %v4803_v28 }
 0x31c   :  { %4451 = vtanh.f32 %v4899_v60  ;;  %v1656_v42 = vadd.f32 0.5, %v1654_v53  ;;  %v4245_v53 = vld [vmem:[#allocation5 + $0x94] sm:$0xf0]  ;;  %v3726_v27 = vld [vmem:[#allocation5 + $0x68] sm:$0xf] }
 0x31d   :  { %v1665_v2 = vmul.f32 %v4450_v49, %v1655_v5  ;;  %v3739_v49 = vor.u32 %v4242_v7, %v3736_v1  ;;  %v3743_v5 = vor.u32 %v4245_v53, %v3742_v37  ;;  %v3727_v30 = vor.u32 %v4241_v8, %v3726_v27  ;;  %v4233_v51 = vld [vmem:[#allocation5 + $0x34] sm:$0xf0]  ;;  %v4231_v41 = vld [vmem:[#allocation5 + $0x2c] sm:$0xf]  ;;  %v3696_v11 = vld [vmem:[#allocation5 + $0x38] sm:$0xf0] }
 0x31e   :  { %v3695_v10 = vor.u32 %v4233_v51, %v3694_v44  ;;  %v3670_v18 = vld [vmem:[#allocation5] sm:$0xf]  ;;  %v4228_v1 = vld [vmem:[#allocation5 + $0xc] sm:$0xf0]  ;;  %v4226_v19 = vld [vmem:[#allocation5 + $0x4] sm:$0xf]  ;;  %v181_v27 = vadd.f32 %v4726_v22, %v4784_v34  ;;  %v230_v8 = vadd.f32 %v4728_v23, %v4787_v39 }
 0x31f   :  { %2200 = vmatpush.bf16.msra.mxu0 %v3767_v38  ;;  %2216 = vmatpush.bf16.msra.mxu1 %v3739_v49  ;;  %v3710_v38 = vld [vmem:[#allocation5 + $0x48] sm:$0xf]  ;;  %v3671_v49 = vor.u32 %v4228_v1, %v3670_v18 }
 0x320   :  { %2230 = vmatpush.bf16.msra.mxu2 %v3743_v5  ;;  %v3711_v59 = vor.u32 %v4237_v15, %v3710_v38  ;;  %v3672_v5 = vld [vmem:[#allocation5 + $0x10] sm:$0xf0] }
 0x322   :  { %v4452_v48 = vpop.eup %4451 }
 0x323   :  { %v1666_v47 = vmul.f32 %v4452_v48, %v1656_v42  ;;  %2201 = vmatpush.bf16.msra.mxu0 %v3751_v50  ;;  %v4243_v42 = vld [vmem:[#allocation5 + $0x8c] sm:$0xf]  ;;  %v3744_v48 = vld [vmem:[#allocation5 + $0x98] sm:$0xf0]  ;;  %2217 = vmatpush.bf16.msra.mxu1 %v3723_v9  ;;  %v3687_v50 = vor.u32 %v4232_v61, %v3686_v13 }
 0x324   :  { %2231 = vmatpush.bf16.msra.mxu2 %v3727_v30 }
 0x325   :  { %v4340_v3 = vpack.c.bf16 %v1666_v47, %v1665_v2  ;;  %v3747_v2 = vor.u32 %v4243_v42, %v3744_v48  ;;  %v3718_v47 = vld [vmem:[#allocation5 + $0x60] sm:$0xf]  ;;  %v3678_v42 = vld [vmem:[#allocation5 + $0x8] sm:$0xf]  ;;  %v3675_v48 = vor.u32 %v4226_v19, %v3672_v5 }
 0x327   :  { %4364 = vst [vmem:[%s5011_s4 + $0x18] sm:$0xff] %v4340_v3   ;;  %1890 = vmatmul.bf16.vlgmr.msrb.gmra.mxu0 %v4340_v3  ;;  %1904 = vmatmul.bf16.vlgmr.msrb.gmra.mxu1 %v4340_v3 }
 0x328   :  { %1918 = vmatmul.bf16.vlgmr.msrb.gmra.mxu2 %v4340_v3  ;;  %1932 = vmatmul.bf16.vlgmr.msrb.gmra.mxu3 %v4340_v3  ;;  %v4240_v3 = vld [vmem:[#allocation5 + $0x6c] sm:$0xf0] }
 0x329   :  { %2202 = vmatpush.bf16.msra.mxu0 %v3735_v0  ;;  %2244 = vmatpush.bf16.msra.mxu3 %v3747_v2  ;;  %v3719_v52 = vor.u32 %v4240_v3, %v3718_v47  ;;  %v3699_v0 = vor.u32 %v4231_v41, %v3696_v11  ;;  %v4229_v2 = vld [vmem:[#allocation5 + $0x14] sm:$0xf0]  ;;  %v4227_v47 = vld [vmem:[#allocation5 + $0xc] sm:$0xf]  ;;  %v3680_v3 = vld [vmem:[#allocation5 + $0x18] sm:$0xf0] }
 0x32a   :  { %2218 = vmatpush.bf16.msra.mxu1 %v3707_v31  ;;  %2232 = vmatpush.bf16.msra.mxu2 %v3711_v59  ;;  %v3679_v40 = vor.u32 %v4229_v2, %v3678_v42  ;;  %v279_v31 = vadd.f32 %v4730_v24, %v4798_v45  ;;  %v328_v59 = vadd.f32 %v4732_v25, %v4803_v28  ;;  %v4286_v2 = vld [vmem:[#allocation5 + $0xe4] sm:$0xf] }
 0x32d   :  { %2203 = vmatpush.bf16.msra.mxu0 %v3719_v52  ;;  %2245 = vmatpush.bf16.msra.mxu3 %v3731_v12  ;;  %v3683_v52 = vor.u32 %v4227_v47, %v3680_v3  ;;  %v3914_v3 = vld [vmem:[#allocation5 + $0xf0] sm:$0xf0] }
 0x32e   :  { %2219 = vmatpush.bf16.msra.mxu1 %v3691_v6  ;;  %2233 = vmatpush.bf16.msra.mxu2 %v3695_v10 }
 0x331   :  { %2204 = vmatpush.bf16.msra.mxu0 %v3703_v14  ;;  %2246 = vmatpush.bf16.msra.mxu3 %v3715_v26 }
 0x332   :  { %2220 = vmatpush.bf16.msra.mxu1 %v3675_v48  ;;  %2234 = vmatpush.bf16.msra.mxu2 %v3679_v40  ;;  %v4288_v48 = vld [vmem:[#allocation5 + $0xec] sm:$0xf0]  ;;  %v3920_v40 = vld [vmem:[#allocation5 + $0xe8] sm:$0xf] }
 0x335   :  { %2205 = vmatpush.bf16.msra.mxu0 %v3687_v50  ;;  %2247 = vmatpush.bf16.msra.mxu3 %v3699_v0 }
 0x339   :  { %2206 = vmatpush.bf16.msra.mxu0 %v3671_v49  ;;  %2248 = vmatpush.bf16.msra.mxu3 %v3683_v52  ;;  %v4289_v52 = vld [vmem:[#allocation5 + $0xf4] sm:$0xf0] }
 0x3a4   :  { %v1891_v16 = vpop.f32.mrf.mxu0  ;;  %v1905_v17 = vpop.f32.mrf.mxu1 }
 0x3a5   :  { %v1938_v33 = vadd.f32 %v1891_v16, %v179_v43  ;;  %v1939_v7 = vadd.f32 %v1905_v17, %v228_v55 }
 0x3a7   :  { %v1948_v37 = vmul.f32 0.5, %v1938_v33  ;;  %v1956_v53 = vmul.f32 0.5, %v1939_v7 }
 0x3a9   :  { %4453 = vtanh.f32 %v1948_v37 }
 0x3aa   :  { %4455 = vtanh.f32 %v1956_v53 }
 0x3ab   :  { %v1919_v9 = vpop.f32.mrf.mxu2  ;;  %v1933_v30 = vpop.f32.mrf.mxu3 }
 0x3ac   :  { %v1940_v29 = vadd.f32 %v1919_v9, %v277_v56  ;;  %v1893_v57 = vpop.f32.mrf.mxu0  ;;  %v1907_v12 = vpop.f32.mrf.mxu1  ;;  %v1941_v15 = vadd.f32 %v1933_v30, %v326_v20  ;;  %v3917_v56 = vor.u32 %v4286_v2, %v3914_v3  ;;  %v3922_v9 = vld [vmem:[#allocation5 + $0xf8] sm:$0xf0]  ;;  %v3904_v20 = vld [vmem:[#allocation5 + $0xc8] sm:$0xf]  ;;  %v3832_v2 = vld [vmem:[#allocation5 + $0x40] sm:$0xf] }
 0x3ad   :  { %v1942_v62 = vadd.f32 %v1893_v57, %v181_v27  ;;  %v1943_v36 = vadd.f32 %v1907_v12, %v230_v8  ;;  %v3921_v27 = vor.u32 %v4289_v52, %v3920_v40  ;;  %v4287_v8 = vld [vmem:[#allocation5 + $0xec] sm:$0xf]  ;;  %v4284_v57 = vld [vmem:[#allocation5 + $0xcc] sm:$0xf0]  ;;  %v4282_v12 = vld [vmem:[#allocation5 + $0xc4] sm:$0xf] }
 0x3ae   :  { %4457 = vtanh.f32 %v1940_v29  ;;  %v1966_v61 = vmul.f32 0.5, %v1941_v15  ;;  %v3925_v30 = vor.u32 %v4287_v8, %v3922_v9  ;;  %2530 = vmatpush.bf16.msrb.mxu1 %v3917_v56  ;;  %v3896_v29 = vld [vmem:[#allocation5 + $0xc0] sm:$0xf]  ;;  %v4266_v3 = vld [vmem:[#allocation5 + $0x44] sm:$0xf] }
 0x3af   :  { %v4454_v58 = vpop.eup %4453  ;;  %v1949_v14 = vmul.f32 0.5, %v1942_v62  ;;  %v1957_v63 = vmul.f32 0.5, %v1943_v36  ;;  %2544 = vmatpush.bf16.msrb.mxu2 %v3921_v27  ;;  %v3897_v62 = vor.u32 %v4284_v57, %v3896_v29  ;;  %v3898_v36 = vld [vmem:[#allocation5 + $0xd0] sm:$0xf0]  ;;  %v3840_v56 = vld [vmem:[#allocation5 + $0x48] sm:$0xf] }
 0x3b0   :  { %v4456_v22 = vpop.eup %4455  ;;  %v1952_v38 = vmul.f32 0.5, %v4454_v58  ;;  %2558 = vmatpush.bf16.msrb.mxu3 %v3925_v30  ;;  %v4285_v58 = vld [vmem:[#allocation5 + $0xd4] sm:$0xf0]  ;;  %v3834_v52 = vld [vmem:[#allocation5 + $0x50] sm:$0xf0] }
 0x3b1   :  { %v1960_v23 = vmul.f32 0.5, %v4456_v22  ;;  %4459 = vtanh.f32 %v1949_v14  ;;  %v3901_v14 = vor.u32 %v4282_v12, %v3898_v36  ;;  %v4283_v22 = vld [vmem:[#allocation5 + $0xcc] sm:$0xf]  ;;  %v4269_v27 = vld [vmem:[#allocation5 + $0x54] sm:$0xf0]  ;;  %v3837_v8 = vor.u32 %v4266_v3, %v3834_v52 }
 0x3b2   :  { %v1954_v54 = vadd.f32 0.5, %v1952_v38  ;;  %4461 = vtanh.f32 %v1957_v63  ;;  %v3905_v63 = vor.u32 %v4285_v58, %v3904_v20  ;;  %v3906_v38 = vld [vmem:[#allocation5 + $0xd8] sm:$0xf0]  ;;  %v3841_v9 = vor.u32 %v4269_v27, %v3840_v56  ;;  %v4267_v30 = vld [vmem:[#allocation5 + $0x4c] sm:$0xf]  ;;  %v5036_v20 = vld [vmem:[#allocation8_spill] sm:$0xff] }
 0x3b3   :  { %v1962_v32 = vadd.f32 0.5, %v1960_v23  ;;  %v1921_v26 = vpop.f32.mrf.mxu2  ;;  %v1935_v21 = vpop.f32.mrf.mxu3  ;;  %v3909_v15 = vor.u32 %v4283_v22, %v3906_v38  ;;  %2531 = vmatpush.bf16.msrb.mxu1 %v3901_v14  ;;  %v3880_v23 = vld [vmem:[#allocation5 + $0xa0] sm:$0xf]  ;;  %v3842_v29 = vld [vmem:[#allocation5 + $0x58] sm:$0xf0]  ;;  %v184_v58 = vadd.f32 %v5036_v20, %v4784_v34  ;;  %v5037_v14 = vld [vmem:[#allocation9_spill] sm:$0xff] }
 0x3b4   :  { %v4458_v13 = vpop.eup %4457  ;;  %v1944_v46 = vadd.f32 %v1921_v26, %v279_v31  ;;  %v1945_v43 = vadd.f32 %v1935_v21, %v328_v59  ;;  %2545 = vmatpush.bf16.msrb.mxu2 %v3905_v63  ;;  %v4280_v31 = vld [vmem:[#allocation5 + $0xac] sm:$0xf0]  ;;  %v4278_v59 = vld [vmem:[#allocation5 + $0xa4] sm:$0xf]  ;;  %v3888_v26 = vld [vmem:[#allocation5 + $0xa8] sm:$0xf]  ;;  %v3845_v57 = vor.u32 %v4267_v30, %v3842_v29  ;;  %v233_v63 = vadd.f32 %v5037_v14, %v4787_v39 }
 0x3b5   :  { %v1974_v55 = vmul.f32 %v1962_v32, %v4895_v35  ;;  %v1976_v50 = vmul.f32 %v4458_v13, %v1954_v54  ;;  %2559 = vmatpush.bf16.msrb.mxu3 %v3909_v15  ;;  %v3881_v54 = vor.u32 %v4280_v31, %v3880_v23  ;;  %v3882_v32 = vld [vmem:[#allocation5 + $0xb0] sm:$0xf0]  ;;  %v4281_v21 = vld [vmem:[#allocation5 + $0xb4] sm:$0xf0]  ;;  %v3816_v12 = vld [vmem:[#allocation5 + $0x20] sm:$0xf] }
 0x3b6   :  { %4463 = vtanh.f32 %v1944_v46  ;;  %v1967_v4 = vmul.f32 0.5, %v1945_v43  ;;  %v3885_v13 = vor.u32 %v4278_v59, %v3882_v32  ;;  %v4279_v46 = vld [vmem:[#allocation5 + $0xac] sm:$0xf]  ;;  %v3890_v43 = vld [vmem:[#allocation5 + $0xb8] sm:$0xf0]  ;;  %v5042_v29 = vld [vmem:[#allocation14_spill] sm:$0xff] }
 0x3b7   :  { %v4460_v44 = vpop.eup %4459  ;;  %v4922_v51 = vadd.f32 %v1976_v50, %v1974_v55  ;;  %4465 = vtanh.f32 %v1966_v61  ;;  %v3889_v61 = vor.u32 %v4281_v21, %v3888_v26  ;;  %v3893_v55 = vor.u32 %v4279_v46, %v3890_v43  ;;  %v3864_v50 = vld [vmem:[#allocation5 + $0x80] sm:$0xf]  ;;  %v4262_v36 = vld [vmem:[#allocation5 + $0x24] sm:$0xf]  ;;  %v3818_v38 = vld [vmem:[#allocation5 + $0x30] sm:$0xf0] }
 0x3b8   :  { %v4462_v24 = vpop.eup %4461  ;;  %v1953_v25 = vmul.f32 0.5, %v4460_v44  ;;  %4467 = vtanh.f32 %v1967_v4  ;;  %2532 = vmatpush.bf16.msrb.mxu1 %v3885_v13  ;;  %v4276_v4 = vld [vmem:[#allocation5 + $0x8c] sm:$0xf0]  ;;  %v4274_v44 = vld [vmem:[#allocation5 + $0x84] sm:$0xf] }
 0x3b9   :  { %v1961_v16 = vmul.f32 0.5, %v4462_v24  ;;  %4469 = vtanh.f32 %v4922_v51  ;;  %2546 = vmatpush.bf16.msrb.mxu2 %v3889_v61  ;;  %2560 = vmatpush.bf16.msrb.mxu3 %v3893_v55  ;;  %v3865_v24 = vor.u32 %v4276_v4, %v3864_v50  ;;  %v3824_v15 = vld [vmem:[#allocation5 + $0x28] sm:$0xf]  ;;  %v4265_v23 = vld [vmem:[#allocation5 + $0x34] sm:$0xf0] }
 0x3ba   :  { %v1955_v17 = vadd.f32 0.5, %v1953_v25  ;;  %v3866_v25 = vld [vmem:[#allocation5 + $0x90] sm:$0xf0]  ;;  %v3825_v32 = vor.u32 %v4265_v23, %v3824_v15  ;;  %v4263_v26 = vld [vmem:[#allocation5 + $0x2c] sm:$0xf] }
 0x3bb   :  { %v1963_v6 = vadd.f32 0.5, %v1961_v16  ;;  %v3872_v16 = vld [vmem:[#allocation5 + $0x88] sm:$0xf]  ;;  %v3826_v21 = vld [vmem:[#allocation5 + $0x38] sm:$0xf0] }
 0x3bc   :  { %v4464_v10 = vpop.eup %4463  ;;  %v3829_v46 = vor.u32 %v4263_v26, %v3826_v21  ;;  %v3800_v43 = vld [vmem:[#allocation5] sm:$0xf]  ;;  %v4260_v55 = vld [vmem:[#allocation5 + $0xc] sm:$0xf0]  ;;  %v4258_v50 = vld [vmem:[#allocation5 + $0x4] sm:$0xf] }
 0x3bd   :  { %v1975_v41 = vmul.f32 %v1963_v6, %v4899_v60  ;;  %v1977_v11 = vmul.f32 %v4464_v10, %v1955_v17  ;;  %v4466_v33 = vpop.eup %4465  ;;  %v3912_v60 = vld [vmem:[#allocation5 + $0xe0] sm:$0xf]  ;;  %v4277_v17 = vld [vmem:[#allocation5 + $0x94] sm:$0xf0]  ;;  %v3869_v6 = vor.u32 %v4274_v44, %v3866_v25  ;;  %v3802_v25 = vld [vmem:[#allocation5 + $0x10] sm:$0xf0] }
 0x3be   :  { %v4468_v7 = vpop.eup %4467  ;;  %v1970_v0 = vmul.f32 0.5, %v4466_v33  ;;  %v3913_v47 = vor.u32 %v4288_v48, %v3912_v60  ;;  %v3873_v10 = vor.u32 %v4277_v17, %v3872_v16  ;;  %v3858_v60 = vld [vmem:[#allocation5 + $0x78] sm:$0xf0]  ;;  %v3808_v16 = vld [vmem:[#allocation5 + $0x8] sm:$0xf]  ;;  %v3805_v17 = vor.u32 %v4258_v50, %v3802_v25 }
 0x3bf   :  { %v4926_v35 = vadd.f32 %v1977_v11, %v1975_v41  ;;  %v1971_v18 = vmul.f32 0.5, %v4468_v7  ;;  %v4470_v1 = vpop.eup %4469  ;;  %v4275_v41 = vld [vmem:[#allocation5 + $0x8c] sm:$0xf]  ;;  %v3874_v11 = vld [vmem:[#allocation5 + $0x98] sm:$0xf0]  ;;  %2533 = vmatpush.bf16.msrb.mxu1 %v3869_v6 }
 0x3c0   :  { %v1972_v19 = vadd.f32 0.5, %v1970_v0  ;;  %2516 = vmatpush.bf16.msrb.mxu0 %v3913_v47  ;;  %v3877_v33 = vor.u32 %v4275_v41, %v3874_v11  ;;  %2547 = vmatpush.bf16.msrb.mxu2 %v3873_v10  ;;  %v3848_v7 = vld [vmem:[#allocation5 + $0x60] sm:$0xf]  ;;  %v4272_v0 = vld [vmem:[#allocation5 + $0x6c] sm:$0xf0] }
 0x3c1   :  { %4471 = vtanh.f32 %v4926_v35  ;;  %v1973_v37 = vadd.f32 0.5, %v1971_v18  ;;  %v4270_v18 = vld [vmem:[#allocation5 + $0x64] sm:$0xf]  ;;  %v4268_v47 = vld [vmem:[#allocation5 + $0x4c] sm:$0xf0] }
 0x3c2   :  { %v1982_v49 = vmul.f32 %v4470_v1, %v1972_v19  ;;  %2561 = vmatpush.bf16.msrb.mxu3 %v3877_v33  ;;  %v3849_v1 = vor.u32 %v4272_v0, %v3848_v7  ;;  %v3850_v19 = vld [vmem:[#allocation5 + $0x70] sm:$0xf0]  ;;  %v3833_v40 = vor.u32 %v4268_v47, %v3832_v2  ;;  %v4261_v6 = vld [vmem:[#allocation5 + $0x14] sm:$0xf0]  ;;  %v4259_v10 = vld [vmem:[#allocation5 + $0xc] sm:$0xf] }
 0x3c3   :  { %v3810_v41 = vld [vmem:[#allocation5 + $0x18] sm:$0xf0]  ;;  %v3809_v11 = vor.u32 %v4261_v6, %v3808_v16  ;;  %v5038_v7 = vld [vmem:[#allocation10_spill] sm:$0xff] }
 0x3c4   :  { %2517 = vmatpush.bf16.msrb.mxu0 %v3897_v62  ;;  %v4264_v62 = vld [vmem:[#allocation5 + $0x2c] sm:$0xf0]  ;;  %v3813_v33 = vor.u32 %v4259_v10, %v3810_v41  ;;  %v282_v0 = vadd.f32 %v5038_v7, %v4798_v45  ;;  %v5041_v47 = vld [vmem:[#allocation11_spill] sm:$0xff] }
 0x3c5   :  { %v3817_v22 = vor.u32 %v4264_v62, %v3816_v12  ;;  %v331_v3 = vadd.f32 %v5041_v47, %v4803_v28  ;;  %v5043_v12 = vld [vmem:[#allocation15_spill] sm:$0xff]  ;;  %v4320_v7 = vld [vmem:[#allocation5 + $0xec] sm:$0xf0]  ;;  %v4314_v47 = vld [vmem:[#allocation5 + $0xc4] sm:$0xf] }
 0x3c6   :  { %v333_v62 = vadd.f32 %v5043_v12, %v4803_v28  ;;  %v4312_v12 = vld [vmem:[#allocation5 + $0xac] sm:$0xf0] }
 0x3c7   :  { %v4472_v53 = vpop.eup %4471 }
 0x3c8   :  { %v1983_v5 = vmul.f32 %v4472_v53, %v1973_v37  ;;  %2518 = vmatpush.bf16.msrb.mxu0 %v3881_v54  ;;  %v3856_v37 = vld [vmem:[#allocation5 + $0x68] sm:$0xf]  ;;  %v4273_v53 = vld [vmem:[#allocation5 + $0x74] sm:$0xf0]  ;;  %v3821_v54 = vor.u32 %v4262_v36, %v3818_v38 }
 0x3ca   :  { %v4345_v42 = vpack.c.bf16 %v1983_v5, %v1982_v49  ;;  %v3853_v49 = vor.u32 %v4270_v18, %v3850_v19  ;;  %v3857_v5 = vor.u32 %v4273_v53, %v3856_v37  ;;  %v5039_v18 = vld [vmem:[#allocation12_spill] sm:$0xff]  ;;  %v5040_v19 = vld [vmem:[#allocation13_spill] sm:$0xff] }
 0x3cb   :  { %v235_v37 = vadd.f32 %v5040_v19, %v4787_v39  ;;  %v4050_v19 = vld [vmem:[#allocation5 + $0xe8] sm:$0xf] }
 0x3cc   :  { %4365 = vst [vmem:[%s5011_s4 + $0x20] sm:$0xff] %v4345_v42   ;;  %2207 = vmatmul.bf16.vlgmr.msra.gmra.mxu0 %v4345_v42  ;;  %2221 = vmatmul.bf16.vlgmr.msra.gmra.mxu1 %v4345_v42 }
 0x3cd   :  { %2235 = vmatmul.bf16.vlgmr.msra.gmra.mxu2 %v4345_v42  ;;  %2249 = vmatmul.bf16.vlgmr.msra.gmra.mxu3 %v4345_v42  ;;  %v4271_v42 = vld [vmem:[#allocation5 + $0x6c] sm:$0xf] }
 0x3ce   :  { %2519 = vmatpush.bf16.msrb.mxu0 %v3865_v24  ;;  %v3861_v48 = vor.u32 %v4271_v42, %v3858_v60  ;;  %2534 = vmatpush.bf16.msrb.mxu1 %v3853_v49  ;;  %v3801_v24 = vor.u32 %v4260_v55, %v3800_v43 }
 0x3cf   :  { %2548 = vmatpush.bf16.msrb.mxu2 %v3857_v5 }
 0x3d0   :  { %2562 = vmatpush.bf16.msrb.mxu3 %v3861_v48 }
 0x3d2   :  { %2520 = vmatpush.bf16.msrb.mxu0 %v3849_v1  ;;  %2535 = vmatpush.bf16.msrb.mxu1 %v3837_v8  ;;  %v186_v1 = vadd.f32 %v5039_v18, %v4784_v34 }
 0x3d3   :  { %2549 = vmatpush.bf16.msrb.mxu2 %v3841_v9 }
 0x3d4   :  { %2563 = vmatpush.bf16.msrb.mxu3 %v3845_v57  ;;  %v284_v57 = vadd.f32 %v5042_v29, %v4798_v45 }
 0x3d6   :  { %2521 = vmatpush.bf16.msrb.mxu0 %v3833_v40  ;;  %2536 = vmatpush.bf16.msrb.mxu1 %v3821_v54 }
 0x3d7   :  { %2550 = vmatpush.bf16.msrb.mxu2 %v3825_v32 }
 0x3d8   :  { %2564 = vmatpush.bf16.msrb.mxu3 %v3829_v46 }
 0x3da   :  { %2522 = vmatpush.bf16.msrb.mxu0 %v3817_v22  ;;  %2537 = vmatpush.bf16.msrb.mxu1 %v3805_v17 }
 0x3db   :  { %2551 = vmatpush.bf16.msrb.mxu2 %v3809_v11 }
 0x3dc   :  { %2565 = vmatpush.bf16.msrb.mxu3 %v3813_v33 }
 0x3de   :  { %2523 = vmatpush.bf16.msrb.mxu0 %v3801_v24 }
 0x449   :  { %v2208_v31 = vpop.f32.mrf.mxu0  ;;  %v2222_v59 = vpop.f32.mrf.mxu1 }
 0x44a   :  { %v2255_v13 = vadd.f32 %v2208_v31, %v184_v58  ;;  %v2256_v61 = vadd.f32 %v2222_v59, %v233_v63 }
 0x44c   :  { %v2265_v4 = vmul.f32 0.5, %v2255_v13  ;;  %v2273_v44 = vmul.f32 0.5, %v2256_v61 }
 0x44e   :  { %4473 = vtanh.f32 %v2265_v4 }
 0x44f   :  { %4475 = vtanh.f32 %v2273_v44 }
 0x450   :  { %v2236_v53 = vpop.f32.mrf.mxu2  ;;  %v2250_v49 = vpop.f32.mrf.mxu3 }
 0x451   :  { %v2257_v5 = vadd.f32 %v2236_v53, %v282_v0  ;;  %v2210_v42 = vpop.f32.mrf.mxu0  ;;  %v2224_v60 = vpop.f32.mrf.mxu1  ;;  %v2258_v9 = vadd.f32 %v2250_v49, %v331_v3  ;;  %v4318_v0 = vld [vmem:[#allocation5 + $0xe4] sm:$0xf] }
 0x452   :  { %v2259_v48 = vadd.f32 %v2210_v42, %v186_v1  ;;  %v2260_v2 = vadd.f32 %v2224_v60, %v235_v37  ;;  %v4044_v1 = vld [vmem:[#allocation5 + $0xf0] sm:$0xf0]  ;;  %v4321_v37 = vld [vmem:[#allocation5 + $0xf4] sm:$0xf0]  ;;  %v4052_v42 = vld [vmem:[#allocation5 + $0xf8] sm:$0xf0] }
 0x453   :  { %4477 = vtanh.f32 %v2257_v5  ;;  %v2283_v22 = vmul.f32 0.5, %v2258_v9  ;;  %v4047_v53 = vor.u32 %v4318_v0, %v4044_v1  ;;  %v4051_v49 = vor.u32 %v4321_v37, %v4050_v19  ;;  %v4319_v5 = vld [vmem:[#allocation5 + $0xec] sm:$0xf]  ;;  %v3962_v0 = vld [vmem:[#allocation5 + $0x40] sm:$0xf] }
 0x454   :  { %v4474_v40 = vpop.eup %4473  ;;  %v2266_v52 = vmul.f32 0.5, %v2259_v48  ;;  %v2274_v56 = vmul.f32 0.5, %v2260_v2  ;;  %v4055_v60 = vor.u32 %v4319_v5, %v4052_v42  ;;  %v4026_v48 = vld [vmem:[#allocation5 + $0xc0] sm:$0xf]  ;;  %v4316_v2 = vld [vmem:[#allocation5 + $0xcc] sm:$0xf0] }
 0x455   :  { %v4476_v27 = vpop.eup %4475  ;;  %v2269_v8 = vmul.f32 0.5, %v4474_v40  ;;  %2847 = vmatpush.bf16.msra.mxu1 %v4047_v53  ;;  %2861 = vmatpush.bf16.msra.mxu2 %v4051_v49  ;;  %v4027_v3 = vor.u32 %v4316_v2, %v4026_v48  ;;  %v4028_v40 = vld [vmem:[#allocation5 + $0xd0] sm:$0xf0]  ;;  %v4315_v9 = vld [vmem:[#allocation5 + $0xcc] sm:$0xf] }
 0x456   :  { %v2277_v30 = vmul.f32 0.5, %v4476_v27  ;;  %4479 = vtanh.f32 %v2266_v52  ;;  %2875 = vmatpush.bf16.msra.mxu3 %v4055_v60  ;;  %v4034_v52 = vld [vmem:[#allocation5 + $0xc8] sm:$0xf]  ;;  %v4031_v27 = vor.u32 %v4314_v47, %v4028_v40  ;;  %v4298_v1 = vld [vmem:[#allocation5 + $0x44] sm:$0xf] }
 0x457   :  { %v2271_v36 = vadd.f32 0.5, %v2269_v8  ;;  %4481 = vtanh.f32 %v2274_v56  ;;  %v4317_v56 = vld [vmem:[#allocation5 + $0xd4] sm:$0xf0]  ;;  %v3964_v37 = vld [vmem:[#allocation5 + $0x50] sm:$0xf0] }
 0x458   :  { %v2279_v20 = vadd.f32 0.5, %v2277_v30  ;;  %v2238_v58 = vpop.f32.mrf.mxu2  ;;  %v2252_v14 = vpop.f32.mrf.mxu3  ;;  %v4035_v8 = vor.u32 %v4317_v56, %v4034_v52  ;;  %v4036_v30 = vld [vmem:[#allocation5 + $0xd8] sm:$0xf0]  ;;  %v3970_v53 = vld [vmem:[#allocation5 + $0x48] sm:$0xf]  ;;  %v3967_v5 = vor.u32 %v4298_v1, %v3964_v37  ;;  %v5044_v52 = vld [vmem:[#allocation16_spill] sm:$0xff] }
 0x459   :  { %v4478_v63 = vpop.eup %4477  ;;  %v2261_v38 = vadd.f32 %v2238_v58, %v284_v57  ;;  %v2262_v15 = vadd.f32 %v2252_v14, %v333_v62  ;;  %v4039_v29 = vor.u32 %v4315_v9, %v4036_v30  ;;  %2848 = vmatpush.bf16.msra.mxu1 %v4031_v27  ;;  %v4010_v57 = vld [vmem:[#allocation5 + $0xa0] sm:$0xf]  ;;  %v4310_v62 = vld [vmem:[#allocation5 + $0xa4] sm:$0xf]  ;;  %v4018_v58 = vld [vmem:[#allocation5 + $0xa8] sm:$0xf]  ;;  %v189_v56 = vadd.f32 %v5044_v52, %v4784_v34 }
 0x45a   :  { %v2291_v23 = vmul.f32 %v2279_v20, %v4922_v51  ;;  %v2293_v31 = vmul.f32 %v4478_v63, %v2271_v36  ;;  %2862 = vmatpush.bf16.msra.mxu2 %v4035_v8  ;;  %v4011_v36 = vor.u32 %v4312_v12, %v4010_v57  ;;  %v4012_v20 = vld [vmem:[#allocation5 + $0xb0] sm:$0xf0]  ;;  %v4313_v14 = vld [vmem:[#allocation5 + $0xb4] sm:$0xf0]  ;;  %v4299_v60 = vld [vmem:[#allocation5 + $0x4c] sm:$0xf] }
 0x45b   :  { %4483 = vtanh.f32 %v2261_v38  ;;  %v2284_v59 = vmul.f32 0.5, %v2262_v15  ;;  %2876 = vmatpush.bf16.msra.mxu3 %v4039_v29  ;;  %v4015_v63 = vor.u32 %v4310_v62, %v4012_v20  ;;  %v4311_v38 = vld [vmem:[#allocation5 + $0xac] sm:$0xf]  ;;  %v4020_v15 = vld [vmem:[#allocation5 + $0xb8] sm:$0xf0] }
 0x45c   :  { %v4480_v54 = vpop.eup %4479  ;;  %v4949_v32 = vadd.f32 %v2293_v31, %v2291_v23  ;;  %4485 = vtanh.f32 %v2283_v22  ;;  %v4019_v22 = vor.u32 %v4313_v14, %v4018_v58  ;;  %v4023_v23 = vor.u32 %v4311_v38, %v4020_v15  ;;  %v3994_v31 = vld [vmem:[#allocation5 + $0x80] sm:$0xf]  ;;  %v4301_v49 = vld [vmem:[#allocation5 + $0x54] sm:$0xf0]  ;;  %v3972_v48 = vld [vmem:[#allocation5 + $0x58] sm:$0xf0] }
 0x45d   :  { %v4482_v26 = vpop.eup %4481  ;;  %v2270_v21 = vmul.f32 0.5, %v4480_v54  ;;  %4487 = vtanh.f32 %v2284_v59  ;;  %2849 = vmatpush.bf16.msra.mxu1 %v4015_v63  ;;  %v4308_v59 = vld [vmem:[#allocation5 + $0x8c] sm:$0xf0]  ;;  %v4306_v54 = vld [vmem:[#allocation5 + $0x84] sm:$0xf]  ;;  %v3971_v42 = vor.u32 %v4301_v49, %v3970_v53  ;;  %v3975_v2 = vor.u32 %v4299_v60, %v3972_v48  ;;  %v5045_v27 = vld [vmem:[#allocation17_spill] sm:$0xff] }
 0x45e   :  { %v2278_v13 = vmul.f32 0.5, %v4482_v26  ;;  %4489 = vtanh.f32 %v4949_v32  ;;  %2863 = vmatpush.bf16.msra.mxu2 %v4019_v22  ;;  %v3995_v26 = vor.u32 %v4308_v59, %v3994_v31  ;;  %v3946_v47 = vld [vmem:[#allocation5 + $0x20] sm:$0xf]  ;;  %v4294_v40 = vld [vmem:[#allocation5 + $0x24] sm:$0xf]  ;;  %v238_v8 = vadd.f32 %v5045_v27, %v4787_v39  ;;  %v5050_v48 = vld [vmem:[#allocation22_spill] sm:$0xff] }
 0x45f   :  { %v2272_v61 = vadd.f32 0.5, %v2270_v21  ;;  %2877 = vmatpush.bf16.msra.mxu3 %v4023_v23  ;;  %v3996_v21 = vld [vmem:[#allocation5 + $0x90] sm:$0xf0]  ;;  %v3954_v29 = vld [vmem:[#allocation5 + $0x28] sm:$0xf] }
 0x460   :  { %v2280_v46 = vadd.f32 0.5, %v2278_v13  ;;  %v4002_v13 = vld [vmem:[#allocation5 + $0x88] sm:$0xf]  ;;  %v3948_v30 = vld [vmem:[#allocation5 + $0x30] sm:$0xf0] }
 0x461   :  { %v4484_v43 = vpop.eup %4483  ;;  %v4297_v57 = vld [vmem:[#allocation5 + $0x34] sm:$0xf0]  ;;  %v4295_v58 = vld [vmem:[#allocation5 + $0x2c] sm:$0xf]  ;;  %v3956_v14 = vld [vmem:[#allocation5 + $0x38] sm:$0xf0] }
 0x462   :  { %v2292_v55 = vmul.f32 %v2280_v46, %v4926_v35  ;;  %v2294_v50 = vmul.f32 %v4484_v43, %v2272_v61  ;;  %v4486_v4 = vpop.eup %4485  ;;  %v4042_v35 = vld [vmem:[#allocation5 + $0xe0] sm:$0xf]  ;;  %v4309_v61 = vld [vmem:[#allocation5 + $0x94] sm:$0xf0]  ;;  %v3999_v46 = vor.u32 %v4306_v54, %v3996_v21  ;;  %v3955_v20 = vor.u32 %v4297_v57, %v3954_v29  ;;  %v4292_v23 = vld [vmem:[#allocation5 + $0xc] sm:$0xf0] }
 0x463   :  { %v4488_v44 = vpop.eup %4487  ;;  %v2287_v24 = vmul.f32 0.5, %v4486_v4  ;;  %v4043_v18 = vor.u32 %v4320_v7, %v4042_v35  ;;  %v4003_v43 = vor.u32 %v4309_v61, %v4002_v13  ;;  %v3988_v35 = vld [vmem:[#allocation5 + $0x78] sm:$0xf0]  ;;  %v3959_v38 = vor.u32 %v4295_v58, %v3956_v14  ;;  %v3930_v15 = vld [vmem:[#allocation5] sm:$0xf] }
 0x464   :  { %v4953_v51 = vadd.f32 %v2294_v50, %v2292_v55  ;;  %v2288_v25 = vmul.f32 0.5, %v4488_v44  ;;  %v4490_v16 = vpop.eup %4489  ;;  %v4307_v55 = vld [vmem:[#allocation5 + $0x8c] sm:$0xf]  ;;  %v4004_v50 = vld [vmem:[#allocation5 + $0x98] sm:$0xf0]  ;;  %2850 = vmatpush.bf16.msra.mxu1 %v3999_v46 }
 0x465   :  { %v2289_v17 = vadd.f32 0.5, %v2287_v24  ;;  %2833 = vmatpush.bf16.msra.mxu0 %v4043_v18  ;;  %v4007_v4 = vor.u32 %v4307_v55, %v4004_v50  ;;  %2864 = vmatpush.bf16.msra.mxu2 %v4003_v43  ;;  %v3978_v44 = vld [vmem:[#allocation5 + $0x60] sm:$0xf]  ;;  %v4304_v24 = vld [vmem:[#allocation5 + $0x6c] sm:$0xf0] }
 0x466   :  { %4491 = vtanh.f32 %v4953_v51  ;;  %v2290_v6 = vadd.f32 0.5, %v2288_v25  ;;  %v4302_v25 = vld [vmem:[#allocation5 + $0x64] sm:$0xf]  ;;  %v4300_v18 = vld [vmem:[#allocation5 + $0x4c] sm:$0xf0] }
 0x467   :  { %v2299_v41 = vmul.f32 %v4490_v16, %v2289_v17  ;;  %2878 = vmatpush.bf16.msra.mxu3 %v4007_v4  ;;  %v3979_v16 = vor.u32 %v4304_v24, %v3978_v44  ;;  %v3980_v17 = vld [vmem:[#allocation5 + $0x70] sm:$0xf0]  ;;  %v3963_v19 = vor.u32 %v4300_v18, %v3962_v0  ;;  %v4290_v31 = vld [vmem:[#allocation5 + $0x4] sm:$0xf]  ;;  %v3938_v13 = vld [vmem:[#allocation5 + $0x8] sm:$0xf] }
 0x468   :  { %v3932_v21 = vld [vmem:[#allocation5 + $0x10] sm:$0xf0]  ;;  %v4293_v46 = vld [vmem:[#allocation5 + $0x14] sm:$0xf0]  ;;  %v4291_v43 = vld [vmem:[#allocation5 + $0xc] sm:$0xf] }
 0x469   :  { %2834 = vmatpush.bf16.msra.mxu0 %v4027_v3  ;;  %v4296_v3 = vld [vmem:[#allocation5 + $0x2c] sm:$0xf0]  ;;  %v3935_v61 = vor.u32 %v4290_v31, %v3932_v21  ;;  %v3940_v55 = vld [vmem:[#allocation5 + $0x18] sm:$0xf0]  ;;  %v3939_v50 = vor.u32 %v4293_v46, %v3938_v13 }
 0x46a   :  { %v3947_v9 = vor.u32 %v4296_v3, %v3946_v47  ;;  %v3943_v4 = vor.u32 %v4291_v43, %v3940_v55  ;;  %v5046_v44 = vld [vmem:[#allocation18_spill] sm:$0xff]  ;;  %v5049_v18 = vld [vmem:[#allocation19_spill] sm:$0xff] }
 0x46b   :  { %v287_v24 = vadd.f32 %v5046_v44, %v4798_v45  ;;  %v336_v1 = vadd.f32 %v5049_v18, %v4803_v28  ;;  %v5051_v47 = vld [vmem:[#allocation23_spill] sm:$0xff]  ;;  %v5056_v18 = vld [vmem:[#allocation28_spill] sm:$0xff] }
 0x46c   :  { %v4492_v10 = vpop.eup %4491  ;;  %v338_v3 = vadd.f32 %v5051_v47, %v4803_v28 }
 0x46d   :  { %v2300_v11 = vmul.f32 %v4492_v10, %v2290_v6  ;;  %2835 = vmatpush.bf16.msra.mxu0 %v4011_v36  ;;  %v3986_v6 = vld [vmem:[#allocation5 + $0x68] sm:$0xf]  ;;  %v4305_v10 = vld [vmem:[#allocation5 + $0x74] sm:$0xf0]  ;;  %v3951_v36 = vor.u32 %v4294_v40, %v3948_v30 }
 0x46f   :  { %v4350_v33 = vpack.c.bf16 %v2300_v11, %v2299_v41  ;;  %v3983_v41 = vor.u32 %v4302_v25, %v3980_v17  ;;  %v3987_v11 = vor.u32 %v4305_v10, %v3986_v6  ;;  %v5047_v25 = vld [vmem:[#allocation20_spill] sm:$0xff]  ;;  %v5048_v17 = vld [vmem:[#allocation21_spill] sm:$0xff] }
 0x470   :  { %v240_v6 = vadd.f32 %v5048_v17, %v4787_v39 }
 0x471   :  { %4366 = vst [vmem:[%s5011_s4 + $0x28] sm:$0xff] %v4350_v33   ;;  %2524 = vmatmul.bf16.vlgmr.msrb.gmra.mxu0 %v4350_v33  ;;  %2538 = vmatmul.bf16.vlgmr.msrb.gmra.mxu1 %v4350_v33 }
 0x472   :  { %2552 = vmatmul.bf16.vlgmr.msrb.gmra.mxu2 %v4350_v33  ;;  %2566 = vmatmul.bf16.vlgmr.msrb.gmra.mxu3 %v4350_v33  ;;  %v4303_v33 = vld [vmem:[#allocation5 + $0x6c] sm:$0xf] }
 0x473   :  { %2836 = vmatpush.bf16.msra.mxu0 %v3995_v26  ;;  %v3991_v7 = vor.u32 %v4303_v33, %v3988_v35  ;;  %2851 = vmatpush.bf16.msra.mxu1 %v3983_v41  ;;  %v3931_v26 = vor.u32 %v4292_v23, %v3930_v15 }
 0x474   :  { %2865 = vmatpush.bf16.msra.mxu2 %v3987_v11 }
 0x475   :  { %2879 = vmatpush.bf16.msra.mxu3 %v3991_v7 }
 0x477   :  { %2837 = vmatpush.bf16.msra.mxu0 %v3979_v16  ;;  %2852 = vmatpush.bf16.msra.mxu1 %v3967_v5  ;;  %v191_v16 = vadd.f32 %v5047_v25, %v4784_v34 }
 0x478   :  { %2866 = vmatpush.bf16.msra.mxu2 %v3971_v42 }
 0x479   :  { %2880 = vmatpush.bf16.msra.mxu3 %v3975_v2  ;;  %v289_v2 = vadd.f32 %v5050_v48, %v4798_v45 }
 0x47b   :  { %2838 = vmatpush.bf16.msra.mxu0 %v3963_v19  ;;  %2853 = vmatpush.bf16.msra.mxu1 %v3951_v36 }
 0x47c   :  { %2867 = vmatpush.bf16.msra.mxu2 %v3955_v20 }
 0x47d   :  { %2881 = vmatpush.bf16.msra.mxu3 %v3959_v38 }
 0x47f   :  { %2839 = vmatpush.bf16.msra.mxu0 %v3947_v9  ;;  %2854 = vmatpush.bf16.msra.mxu1 %v3935_v61 }
 0x480   :  { %2868 = vmatpush.bf16.msra.mxu2 %v3939_v50 }
 0x481   :  { %2882 = vmatpush.bf16.msra.mxu3 %v3943_v4 }
 0x483   :  { %2840 = vmatpush.bf16.msra.mxu0 %v3931_v26 }
 0x4ee   :  { %v2525_v12 = vpop.f32.mrf.mxu0  ;;  %v2539_v62 = vpop.f32.mrf.mxu1 }
 0x4ef   :  { %v2572_v63 = vadd.f32 %v2525_v12, %v189_v56  ;;  %v2573_v22 = vadd.f32 %v2539_v62, %v238_v8 }
 0x4f1   :  { %v2582_v59 = vmul.f32 0.5, %v2572_v63  ;;  %v2590_v54 = vmul.f32 0.5, %v2573_v22 }
 0x4f3   :  { %4493 = vtanh.f32 %v2582_v59 }
 0x4f4   :  { %4495 = vtanh.f32 %v2590_v54 }
 0x4f5   :  { %v2553_v10 = vpop.f32.mrf.mxu2  ;;  %v2567_v41 = vpop.f32.mrf.mxu3 }
 0x4f6   :  { %v2574_v11 = vadd.f32 %v2553_v10, %v287_v24  ;;  %v2527_v33 = vpop.f32.mrf.mxu0  ;;  %v2541_v35 = vpop.f32.mrf.mxu1  ;;  %v2575_v42 = vadd.f32 %v2567_v41, %v336_v1  ;;  %v5053_v24 = vld [vmem:[#allocation25_spill] sm:$0xff]  ;;  %v196_v1 = vadd.f32 %v5056_v18, %v4784_v34 }
 0x4f7   :  { %v2576_v7 = vadd.f32 %v2527_v33, %v191_v16  ;;  %v2577_v0 = vadd.f32 %v2541_v35, %v240_v6  ;;  %v243_v25 = vadd.f32 %v5053_v24, %v4787_v39  ;;  %v5054_v33 = vld [vmem:[#allocation26_spill] sm:$0xff] }
 0x4f8   :  { %4497 = vtanh.f32 %v2574_v11  ;;  %v2600_v9 = vmul.f32 0.5, %v2575_v42  ;;  %v292_v35 = vadd.f32 %v5054_v33, %v4798_v45 }
 0x4f9   :  { %v4494_v19 = vpop.eup %4493  ;;  %v2583_v37 = vmul.f32 0.5, %v2576_v7  ;;  %v2591_v53 = vmul.f32 0.5, %v2577_v0  ;;  %v5055_v7 = vld [vmem:[#allocation27_spill] sm:$0xff] }
 0x4fa   :  { %v4496_v49 = vpop.eup %4495  ;;  %v2586_v5 = vmul.f32 0.5, %v4494_v19  ;;  %v341_v0 = vadd.f32 %v5055_v7, %v4803_v28  ;;  %v5057_v19 = vld [vmem:[#allocation29_spill] sm:$0xff] }
 0x4fb   :  { %v2594_v60 = vmul.f32 0.5, %v4496_v49  ;;  %4499 = vtanh.f32 %v2583_v37  ;;  %v245_v37 = vadd.f32 %v5057_v19, %v4787_v39  ;;  %v5058_v39 = vld [vmem:[#allocation30_spill] sm:$0xff] }
 0x4fc   :  { %v2588_v40 = vadd.f32 0.5, %v2586_v5  ;;  %4501 = vtanh.f32 %v2591_v53 }
 0x4fd   :  { %v2596_v52 = vadd.f32 0.5, %v2594_v60  ;;  %v2555_v56 = vpop.f32.mrf.mxu2  ;;  %v2569_v27 = vpop.f32.mrf.mxu3 }
 0x4fe   :  { %v4498_v8 = vpop.eup %4497  ;;  %v2578_v30 = vadd.f32 %v2555_v56, %v289_v2  ;;  %v2579_v29 = vadd.f32 %v2569_v27, %v338_v3 }
 0x4ff   :  { %v2608_v57 = vmul.f32 %v2596_v52, %v4949_v32  ;;  %v2610_v12 = vmul.f32 %v4498_v8, %v2588_v40 }
 0x500   :  { %4503 = vtanh.f32 %v2578_v30  ;;  %v2601_v62 = vmul.f32 0.5, %v2579_v29  ;;  %v5059_v30 = vld [vmem:[#allocation31_spill] sm:$0xff] }
 0x501   :  { %v4500_v36 = vpop.eup %4499  ;;  %v4976_v20 = vadd.f32 %v2610_v12, %v2608_v57  ;;  %4505 = vtanh.f32 %v2600_v9  ;;  %v294_v9 = vadd.f32 %v5058_v39, %v4798_v45  ;;  %v343_v29 = vadd.f32 %v5059_v30, %v4803_v28 }
 0x502   :  { %v4502_v58 = vpop.eup %4501  ;;  %v2587_v14 = vmul.f32 0.5, %v4500_v36  ;;  %4507 = vtanh.f32 %v2601_v62 }
 0x503   :  { %v2595_v63 = vmul.f32 0.5, %v4502_v58  ;;  %4509 = vtanh.f32 %v4976_v20 }
 0x504   :  { %v2589_v22 = vadd.f32 0.5, %v2587_v14 }
 0x505   :  { %v2597_v38 = vadd.f32 0.5, %v2595_v63 }
 0x506   :  { %v4504_v15 = vpop.eup %4503 }
 0x507   :  { %v2609_v23 = vmul.f32 %v2597_v38, %v4953_v51  ;;  %v2611_v31 = vmul.f32 %v4504_v15, %v2589_v22  ;;  %v4506_v59 = vpop.eup %4505  ;;  %v5052_v51 = vld [vmem:[#allocation24_spill] sm:$0xff] }
 0x508   :  { %v4508_v54 = vpop.eup %4507  ;;  %v2604_v26 = vmul.f32 0.5, %v4506_v59  ;;  %v194_v44 = vadd.f32 %v5052_v51, %v4784_v34 }
 0x509   :  { %v4980_v32 = vadd.f32 %v2611_v31, %v2609_v23  ;;  %v2605_v21 = vmul.f32 0.5, %v4508_v54  ;;  %v4510_v13 = vpop.eup %4509 }
 0x50a   :  { %v2606_v61 = vadd.f32 0.5, %v2604_v26 }
 0x50b   :  { %4511 = vtanh.f32 %v4980_v32  ;;  %v2607_v46 = vadd.f32 0.5, %v2605_v21 }
 0x50c   :  { %v2616_v55 = vmul.f32 %v4510_v13, %v2606_v61 }
 0x511   :  { %v4512_v43 = vpop.eup %4511 }
 0x512   :  { %v2617_v50 = vmul.f32 %v4512_v43, %v2607_v46 }
 0x514   :  { %v4355_v4 = vpack.c.bf16 %v2617_v50, %v2616_v55 }
 0x516   :  { %4367 = vst [vmem:[%s5011_s4 + $0x30] sm:$0xff] %v4355_v4   ;;  %2841 = vmatmul.bf16.vlgmr.msra.gmra.mxu0 %v4355_v4  ;;  %2855 = vmatmul.bf16.vlgmr.msra.gmra.mxu1 %v4355_v4 }
 0x517   :  { %2869 = vmatmul.bf16.vlgmr.msra.gmra.mxu2 %v4355_v4  ;;  %2883 = vmatmul.bf16.vlgmr.msra.gmra.mxu3 %v4355_v4 }
 0x593   :  { %v2842_v16 = vpop.f32.mrf.mxu0  ;;  %v2856_v17 = vpop.f32.mrf.mxu1 }
 0x594   :  { %v2889_v6 = vadd.f32 %v2842_v16, %v194_v44  ;;  %v2890_v10 = vadd.f32 %v2856_v17, %v243_v25 }
 0x596   :  { %v2899_v41 = vmul.f32 0.5, %v2889_v6  ;;  %v2907_v11 = vmul.f32 0.5, %v2890_v10 }
 0x598   :  { %4513 = vtanh.f32 %v2899_v41 }
 0x599   :  { %4515 = vtanh.f32 %v2907_v11 }
 0x59a   :  { %v2870_v53 = vpop.f32.mrf.mxu2  ;;  %v2884_v49 = vpop.f32.mrf.mxu3 }
 0x59b   :  { %v2891_v5 = vadd.f32 %v2870_v53, %v292_v35  ;;  %v2892_v42 = vadd.f32 %v2884_v49, %v341_v0  ;;  %v2844_v60 = vpop.f32.mrf.mxu0  ;;  %v2858_v48 = vpop.f32.mrf.mxu1 }
 0x59c   :  { %v2893_v2 = vadd.f32 %v2844_v60, %v196_v1  ;;  %v2894_v47 = vadd.f32 %v2858_v48, %v245_v37 }
 0x59d   :  { %4517 = vtanh.f32 %v2891_v5  ;;  %v2917_v3 = vmul.f32 0.5, %v2892_v42 }
 0x59e   :  { %v4514_v40 = vpop.eup %4513  ;;  %v2900_v52 = vmul.f32 0.5, %v2893_v2  ;;  %v2908_v56 = vmul.f32 0.5, %v2894_v47 }
 0x59f   :  { %v4516_v27 = vpop.eup %4515  ;;  %v2903_v8 = vmul.f32 0.5, %v4514_v40  ;;  %4519 = vtanh.f32 %v2917_v3 }
 0x5a0   :  { %v2911_v34 = vmul.f32 0.5, %v4516_v27  ;;  %4521 = vtanh.f32 %v2900_v52 }
 0x5a1   :  { %v2905_v57 = vadd.f32 0.5, %v2903_v8  ;;  %4523 = vtanh.f32 %v2908_v56 }
 0x5a2   :  { %v2913_v12 = vadd.f32 0.5, %v2911_v34  ;;  %v2872_v62 = vpop.f32.mrf.mxu2  ;;  %v2886_v36 = vpop.f32.mrf.mxu3 }
 0x5a3   :  { %v4518_v58 = vpop.eup %4517  ;;  %v2895_v14 = vadd.f32 %v2872_v62, %v294_v9  ;;  %v2896_v63 = vadd.f32 %v2886_v36, %v343_v29 }
 0x5a4   :  { %v2925_v22 = vmul.f32 %v2913_v12, %v4976_v20  ;;  %v2927_v38 = vmul.f32 %v4518_v58, %v2905_v57 }
 0x5a5   :  { %v4520_v15 = vpop.eup %4519  ;;  %4525 = vtanh.f32 %v2895_v14  ;;  %v2918_v23 = vmul.f32 0.5, %v2896_v63 }
 0x5a6   :  { %v4522_v31 = vpop.eup %4521  ;;  %v2929_v59 = vadd.f32 %v2927_v38, %v2925_v22  ;;  %v2921_v26 = vmul.f32 0.5, %v4520_v15 }
 0x5a7   :  { %v4524_v45 = vpop.eup %4523  ;;  %v2904_v54 = vmul.f32 0.5, %v4522_v31  ;;  %4527 = vtanh.f32 %v2918_v23 }
 0x5a8   :  { %4529 = vtanh.f32 %v2929_v59  ;;  %v2912_v28 = vmul.f32 0.5, %v4524_v45  ;;  %v2923_v20 = vadd.f32 0.5, %v2921_v26 }
 0x5a9   :  { %v2906_v21 = vadd.f32 0.5, %v2904_v54 }
 0x5aa   :  { %v2914_v13 = vadd.f32 0.5, %v2912_v28 }
 0x5ab   :  { %v4526_v61 = vpop.eup %4525 }
 0x5ac   :  { %v2926_v46 = vmul.f32 %v2914_v13, %v4980_v32  ;;  %v2928_v43 = vmul.f32 %v4526_v61, %v2906_v21 }
 0x5ad   :  { %v4528_v55 = vpop.eup %4527 }
 0x5ae   :  { %v4530_v50 = vpop.eup %4529  ;;  %v2930_v4 = vadd.f32 %v2928_v43, %v2926_v46  ;;  %v2922_v44 = vmul.f32 0.5, %v4528_v55 }
 0x5af   :  { %v2933_v51 = vmul.f32 %v4530_v50, %v2923_v20 }
 0x5b0   :  { %4531 = vtanh.f32 %v2930_v4  ;;  %v2924_v24 = vadd.f32 0.5, %v2922_v44 }
 0x5b6   :  { %v4532_v25 = vpop.eup %4531 }
 0x5b7   :  { %v2934_v16 = vmul.f32 %v4532_v25, %v2924_v24 }
 0x5b9   :  { %v4360_v17 = vpack.c.bf16 %v2934_v16, %v2933_v51 }
 0x5bb   :  { %4368 = vst [vmem:[%s5011_s4 + $0x38] sm:$0xff] %v4360_v17  }
 0x5bc   :  { %2948 = vsyncpa [#allocation6], 1 }

// kernel: lstm_forward.3
= control target key start
LH: loop header
LB: loop body
LE: loop exit
PB: predicated region body
PF: predicated region fallthrough
CT: control target
= control target key end

     0   :  { %11 = vsyncpa [#allocation6], 0  ;;  %s5358_s0 = inlined_call_operand.vmem [shape: bf16[128,128], index: 0, kind: input, shape index: {}]   ;;  %s5359_s1 = inlined_call_operand.hbm [shape: bf16[128,512], index: 1, kind: input, shape index: {}]   ;;  %s5360_s2 = inlined_call_operand.hbm [shape: bf16[128,512], index: 2, kind: input, shape index: {}]   ;;  %s5361_s3 = inlined_call_operand.vmem [shape: f32[1,512], index: 3, kind: input, shape index: {}]   ;;  %s5362_s4 = inlined_call_operand.vmem [shape: bf16[128,128], index: 4, kind: input, shape index: {}]   ;;  %s5363_s5 = inlined_call_operand.vmem [shape: f32[1,128], index: 5, kind: input, shape index: {}]   ;;  %s5364_s6 = inlined_call_operand.vmem [shape: f32[16,128], index: 6, kind: output, shape index: {}]  }
   0x1   :  { %s19_s23 = sshll.u32 %s5359_s1, 4  ;;  %s20_s23 = int_to_ptr.hbm [resolvable:$true] %s19_s23 }
   0x2   :  { %12 = vsyncpa [#allocation8], 0  ;;  %s4926_s24 = smov [#allocation5]   ;;  %s32_s28 = sshll.u32 %s5360_s2, 4  ;;  %s33_s28 = int_to_ptr.hbm [resolvable:$true] %s32_s28 }
   0x3   :  { %s21_s25 = sshll.u32 %s4926_s24, 4  ;;  %s4927_s29 = smov 256   ;;  %s22_s25 = int_to_ptr.vmem [resolvable:$true] %s21_s25 }
   0x4   :  { %s4928_s30 = smov 16   ;;  %s4929_s7 = smov [#allocation7]  }
   0x5   :  { %27 = dma.hbm_to_vmem [thread:$0]  %s20_s23, 4096, %s22_s25, [#allocation6], %s4927_s29, %s4927_s29, %s4928_s30  }
   0x6   :  { %s34_s8 = sshll.u32 %s4929_s7, 4  ;;  %s35_s8 = int_to_ptr.vmem [resolvable:$true] %s34_s8 }
   0x7   :  { %40 = dma.hbm_to_vmem [thread:$0]  %s33_s28, 4096, %s35_s8, [#allocation8], %s4927_s29, %s4927_s29, %s4928_s30  }
   0x8   :  { %4922 = dma.done.wait [#allocation6], 4096  }
   0x9   :  { %4923 = vsyncadd [#allocation6], 4294963200 }
   0xa   :  { %4924 = dma.done.wait [#allocation8], 4096  }
   0xb   :  { %4925 = vsyncadd [#allocation8], 4294963200  ;;  %v3334_v0 = vld [vmem:[#allocation5 + $0xe0] sm:$0xf]  ;;  %v4442_v1 = vld [vmem:[#allocation5 + $0xec] sm:$0xf0] }
   0xc   :  { %v4440_v2 = vld [vmem:[#allocation5 + $0xe4] sm:$0xf]  ;;  %v3335_v3 = vor.u32 %v4442_v1, %v3334_v0  ;;  %v3336_v4 = vld [vmem:[#allocation5 + $0xf0] sm:$0xf0]  ;;  %v3342_v5 = vld [vmem:[#allocation5 + $0xe8] sm:$0xf] }
   0xd   :  { %v4443_v6 = vld [vmem:[#allocation5 + $0xf4] sm:$0xf0]  ;;  %v3339_v7 = vor.u32 %v4440_v2, %v3336_v4  ;;  %v4441_v9 = vld [vmem:[#allocation5 + $0xec] sm:$0xf]  ;;  %v3344_v10 = vld [vmem:[#allocation5 + $0xf8] sm:$0xf0] }
   0xe   :  { %v3343_v8 = vor.u32 %v4443_v6, %v3342_v5  ;;  %v3318_v11 = vld [vmem:[#allocation5 + $0xc0] sm:$0xf]  ;;  %329 = vmatpush.bf16.msra.mxu0 %v3335_v3  ;;  %v3347_v12 = vor.u32 %v4441_v9, %v3344_v10  ;;  %v4438_v13 = vld [vmem:[#allocation5 + $0xcc] sm:$0xf0]  ;;  %v4436_v14 = vld [vmem:[#allocation5 + $0xc4] sm:$0xf] }
   0xf   :  { %v3320_v15 = vld [vmem:[#allocation5 + $0xd0] sm:$0xf0]  ;;  %378 = vmatpush.bf16.msra.mxu1 %v3339_v7  ;;  %v3319_v16 = vor.u32 %v4438_v13, %v3318_v11  ;;  %v3326_v18 = vld [vmem:[#allocation5 + $0xc8] sm:$0xf]  ;;  %v4439_v19 = vld [vmem:[#allocation5 + $0xd4] sm:$0xf0] }
  0x10   :  { %427 = vmatpush.bf16.msra.mxu2 %v3343_v8  ;;  %v3323_v17 = vor.u32 %v4436_v14, %v3320_v15  ;;  %v4437_v20 = vld [vmem:[#allocation5 + $0xcc] sm:$0xf]  ;;  %476 = vmatpush.bf16.msra.mxu3 %v3347_v12  ;;  %v3327_v21 = vor.u32 %v4439_v19, %v3326_v18  ;;  %v3328_v22 = vld [vmem:[#allocation5 + $0xd8] sm:$0xf0]  ;;  %v3302_v23 = vld [vmem:[#allocation5 + $0xa0] sm:$0xf] }
  0x11   :  { %v4434_v24 = vld [vmem:[#allocation5 + $0xac] sm:$0xf0]  ;;  %v3331_v25 = vor.u32 %v4437_v20, %v3328_v22  ;;  %v4432_v26 = vld [vmem:[#allocation5 + $0xa4] sm:$0xf]  ;;  %v3304_v27 = vld [vmem:[#allocation5 + $0xb0] sm:$0xf0] }
  0x12   :  { %v3310_v28 = vld [vmem:[#allocation5 + $0xa8] sm:$0xf]  ;;  %330 = vmatpush.bf16.msra.mxu0 %v3319_v16  ;;  %v3303_v29 = vor.u32 %v4434_v24, %v3302_v23  ;;  %v4435_v30 = vld [vmem:[#allocation5 + $0xb4] sm:$0xf0]  ;;  %v4433_v31 = vld [vmem:[#allocation5 + $0xac] sm:$0xf]  ;;  %v3307_v33 = vor.u32 %v4432_v26, %v3304_v27 }
  0x13   :  { %v3312_v32 = vld [vmem:[#allocation5 + $0xb8] sm:$0xf0]  ;;  %379 = vmatpush.bf16.msra.mxu1 %v3323_v17  ;;  %v3311_v34 = vor.u32 %v4435_v30, %v3310_v28  ;;  %v3286_v35 = vld [vmem:[#allocation5 + $0x80] sm:$0xf]  ;;  %v4430_v36 = vld [vmem:[#allocation5 + $0x8c] sm:$0xf0] }
  0x14   :  { %428 = vmatpush.bf16.msra.mxu2 %v3327_v21  ;;  %v4428_v37 = vld [vmem:[#allocation5 + $0x84] sm:$0xf]  ;;  %477 = vmatpush.bf16.msra.mxu3 %v3331_v25  ;;  %v3315_v38 = vor.u32 %v4433_v31, %v3312_v32  ;;  %v3288_v39 = vld [vmem:[#allocation5 + $0x90] sm:$0xf0]  ;;  %v3294_v40 = vld [vmem:[#allocation5 + $0x88] sm:$0xf]  ;;  %v3287_v44 = vor.u32 %v4430_v36, %v3286_v35 }
  0x15   :  { %v4431_v41 = vld [vmem:[#allocation5 + $0x94] sm:$0xf0]  ;;  %v4429_v42 = vld [vmem:[#allocation5 + $0x8c] sm:$0xf]  ;;  %v3296_v43 = vld [vmem:[#allocation5 + $0x98] sm:$0xf0]  ;;  %v3291_v45 = vor.u32 %v4428_v37, %v3288_v39 }
  0x16   :  { %331 = vmatpush.bf16.msra.mxu0 %v3303_v29  ;;  %v3295_v46 = vor.u32 %v4431_v41, %v3294_v40  ;;  %v3270_v47 = vld [vmem:[#allocation5 + $0x60] sm:$0xf]  ;;  %v4426_v48 = vld [vmem:[#allocation5 + $0x6c] sm:$0xf0]  ;;  %v4424_v49 = vld [vmem:[#allocation5 + $0x64] sm:$0xf]  ;;  %v3299_v50 = vor.u32 %v4429_v42, %v3296_v43 }
  0x17   :  { %380 = vmatpush.bf16.msra.mxu1 %v3307_v33  ;;  %v3272_v51 = vld [vmem:[#allocation5 + $0x70] sm:$0xf0]  ;;  %v3278_v52 = vld [vmem:[#allocation5 + $0x68] sm:$0xf]  ;;  %v4427_v53 = vld [vmem:[#allocation5 + $0x74] sm:$0xf0]  ;;  %v3271_v56 = vor.u32 %v4426_v48, %v3270_v47 }
  0x18   :  { %429 = vmatpush.bf16.msra.mxu2 %v3311_v34  ;;  %478 = vmatpush.bf16.msra.mxu3 %v3315_v38  ;;  %v4425_v54 = vld [vmem:[#allocation5 + $0x6c] sm:$0xf]  ;;  %v3280_v55 = vld [vmem:[#allocation5 + $0x78] sm:$0xf0]  ;;  %v3275_v57 = vor.u32 %v4424_v49, %v3272_v51  ;;  %v3279_v58 = vor.u32 %v4427_v53, %v3278_v52  ;;  %v3254_v59 = vld [vmem:[#allocation5 + $0x40] sm:$0xf] }
  0x19   :  { %v4422_v60 = vld [vmem:[#allocation5 + $0x4c] sm:$0xf0]  ;;  %v4420_v61 = vld [vmem:[#allocation5 + $0x44] sm:$0xf]  ;;  %v3283_v62 = vor.u32 %v4425_v54, %v3280_v55  ;;  %v3256_v63 = vld [vmem:[#allocation5 + $0x50] sm:$0xf0] }
  0x1a   :  { %332 = vmatpush.bf16.msra.mxu0 %v3287_v44  ;;  %v3262_v0 = vld [vmem:[#allocation5 + $0x48] sm:$0xf]  ;;  %v4423_v1 = vld [vmem:[#allocation5 + $0x54] sm:$0xf0]  ;;  %v4421_v2 = vld [vmem:[#allocation5 + $0x4c] sm:$0xf]  ;;  %v3255_v4 = vor.u32 %v4422_v60, %v3254_v59  ;;  %v3259_v5 = vor.u32 %v4420_v61, %v3256_v63 }
  0x1b   :  { %381 = vmatpush.bf16.msra.mxu1 %v3291_v45  ;;  %v3264_v3 = vld [vmem:[#allocation5 + $0x58] sm:$0xf0]  ;;  %v3263_v6 = vor.u32 %v4423_v1, %v3262_v0  ;;  %v3238_v7 = vld [vmem:[#allocation5 + $0x20] sm:$0xf]  ;;  %v4418_v8 = vld [vmem:[#allocation5 + $0x2c] sm:$0xf0] }
  0x1c   :  { %430 = vmatpush.bf16.msra.mxu2 %v3295_v46  ;;  %479 = vmatpush.bf16.msra.mxu3 %v3299_v50  ;;  %v4416_v9 = vld [vmem:[#allocation5 + $0x24] sm:$0xf]  ;;  %v3267_v10 = vor.u32 %v4421_v2, %v3264_v3  ;;  %v3240_v11 = vld [vmem:[#allocation5 + $0x30] sm:$0xf0]  ;;  %v3246_v12 = vld [vmem:[#allocation5 + $0x28] sm:$0xf]  ;;  %v3239_v16 = vor.u32 %v4418_v8, %v3238_v7 }
  0x1d   :  { %v4419_v13 = vld [vmem:[#allocation5 + $0x34] sm:$0xf0]  ;;  %v4417_v14 = vld [vmem:[#allocation5 + $0x2c] sm:$0xf]  ;;  %v3248_v15 = vld [vmem:[#allocation5 + $0x38] sm:$0xf0]  ;;  %v3243_v18 = vor.u32 %v4416_v9, %v3240_v11 }
  0x1e   :  { %333 = vmatpush.bf16.msra.mxu0 %v3271_v56  ;;  %v3222_v17 = vld [vmem:[#allocation5] sm:$0xf]  ;;  %v3247_v19 = vor.u32 %v4419_v13, %v3246_v12  ;;  %v4414_v20 = vld [vmem:[#allocation5 + $0xc] sm:$0xf0]  ;;  %v4412_v21 = vld [vmem:[#allocation5 + $0x4] sm:$0xf]  ;;  %v3251_v23 = vor.u32 %v4417_v14, %v3248_v15 }
  0x1f   :  { %382 = vmatpush.bf16.msra.mxu1 %v3275_v57  ;;  %v3224_v22 = vld [vmem:[#allocation5 + $0x10] sm:$0xf0]  ;;  %v3230_v24 = vld [vmem:[#allocation5 + $0x8] sm:$0xf]  ;;  %v4415_v25 = vld [vmem:[#allocation5 + $0x14] sm:$0xf0]  ;;  %v3223_v30 = vor.u32 %v4414_v20, %v3222_v17 }
  0x20   :  { %431 = vmatpush.bf16.msra.mxu2 %v3279_v58  ;;  %480 = vmatpush.bf16.msra.mxu3 %v3283_v62  ;;  %v4413_v26 = vld [vmem:[#allocation5 + $0xc] sm:$0xf]  ;;  %v3232_v27 = vld [vmem:[#allocation5 + $0x18] sm:$0xf0]  ;;  %v3462_v28 = vld [vmem:[#allocation7 + $0xe0] sm:$0xf]  ;;  %v3227_v33 = vor.u32 %v4412_v21, %v3224_v22  ;;  %v3231_v34 = vor.u32 %v4415_v25, %v3230_v24 }
  0x21   :  { %v4474_v29 = vld [vmem:[#allocation7 + $0xec] sm:$0xf0]  ;;  %v4472_v31 = vld [vmem:[#allocation7 + $0xe4] sm:$0xf]  ;;  %v3464_v32 = vld [vmem:[#allocation7 + $0xf0] sm:$0xf0]  ;;  %v3235_v36 = vor.u32 %v4413_v26, %v3232_v27 }
  0x22   :  { %334 = vmatpush.bf16.msra.mxu0 %v3255_v4  ;;  %v4404_v35 = vld [vmem:[%s5358_s0] sm:$0xff]  ;;  %v3463_v37 = vor.u32 %v4474_v29, %v3462_v28  ;;  %v3470_v38 = vld [vmem:[#allocation7 + $0xe8] sm:$0xf]  ;;  %v4475_v39 = vld [vmem:[#allocation7 + $0xf4] sm:$0xf0]  ;;  %v3467_v41 = vor.u32 %v4472_v31, %v3464_v32 }
  0x23   :  { %383 = vmatpush.bf16.msra.mxu1 %v3259_v5  ;;  %v4473_v40 = vld [vmem:[#allocation7 + $0xec] sm:$0xf]  ;;  %v3472_v42 = vld [vmem:[#allocation7 + $0xf8] sm:$0xf0]  ;;  %v3446_v43 = vld [vmem:[#allocation7 + $0xc0] sm:$0xf]  ;;  %v3471_v47 = vor.u32 %v4475_v39, %v3470_v38 }
  0x24   :  { %432 = vmatpush.bf16.msra.mxu2 %v3263_v6  ;;  %481 = vmatpush.bf16.msra.mxu3 %v3267_v10  ;;  %v4470_v44 = vld [vmem:[#allocation7 + $0xcc] sm:$0xf0]  ;;  %v4468_v45 = vld [vmem:[#allocation7 + $0xc4] sm:$0xf]  ;;  %v3448_v46 = vld [vmem:[#allocation7 + $0xd0] sm:$0xf0]  ;;  %v3475_v48 = vor.u32 %v4473_v40, %v3472_v42 }
  0x25   :  { %v3447_v49 = vor.u32 %v4470_v44, %v3446_v43  ;;  %v3454_v50 = vld [vmem:[#allocation7 + $0xc8] sm:$0xf]  ;;  %v4471_v51 = vld [vmem:[#allocation7 + $0xd4] sm:$0xf0]  ;;  %v3451_v52 = vor.u32 %v4468_v45, %v3448_v46  ;;  %v4469_v53 = vld [vmem:[#allocation7 + $0xcc] sm:$0xf] }
  0x26   :  { %335 = vmatpush.bf16.msra.mxu0 %v3239_v16  ;;  %v3456_v54 = vld [vmem:[#allocation7 + $0xd8] sm:$0xf0]  ;;  %v3455_v55 = vor.u32 %v4471_v51, %v3454_v50  ;;  %v3430_v56 = vld [vmem:[#allocation7 + $0xa0] sm:$0xf]  ;;  %v4466_v57 = vld [vmem:[#allocation7 + $0xac] sm:$0xf0] }
  0x27   :  { %384 = vmatpush.bf16.msra.mxu1 %v3243_v18  ;;  %v4464_v58 = vld [vmem:[#allocation7 + $0xa4] sm:$0xf]  ;;  %v3459_v59 = vor.u32 %v4469_v53, %v3456_v54  ;;  %v3431_v60 = vor.u32 %v4466_v57, %v3430_v56  ;;  %v3432_v61 = vld [vmem:[#allocation7 + $0xb0] sm:$0xf0]  ;;  %v3438_v62 = vld [vmem:[#allocation7 + $0xa8] sm:$0xf] }
  0x28   :  { %433 = vmatpush.bf16.msra.mxu2 %v3247_v19  ;;  %482 = vmatpush.bf16.msra.mxu3 %v3251_v23  ;;  %v4467_v63 = vld [vmem:[#allocation7 + $0xb4] sm:$0xf0]  ;;  %v3435_v0 = vor.u32 %v4464_v58, %v3432_v61  ;;  %v4465_v1 = vld [vmem:[#allocation7 + $0xac] sm:$0xf]  ;;  %v3440_v2 = vld [vmem:[#allocation7 + $0xb8] sm:$0xf0] }
  0x29   :  { %v3439_v3 = vor.u32 %v4467_v63, %v3438_v62  ;;  %v3443_v4 = vor.u32 %v4465_v1, %v3440_v2  ;;  %v4405_v5 = vld [vmem:[%s5358_s0 + $0x8] sm:$0xff]  ;;  %v3414_v6 = vld [vmem:[#allocation7 + $0x80] sm:$0xf]  ;;  %v4462_v7 = vld [vmem:[#allocation7 + $0x8c] sm:$0xf0] }
  0x2a   :  { %336 = vmatpush.bf16.msra.mxu0 %v3223_v30  ;;  %v4460_v8 = vld [vmem:[#allocation7 + $0x84] sm:$0xf]  ;;  %v3415_v9 = vor.u32 %v4462_v7, %v3414_v6  ;;  %v3416_v10 = vld [vmem:[#allocation7 + $0x90] sm:$0xf0]  ;;  %v3422_v11 = vld [vmem:[#allocation7 + $0x88] sm:$0xf] }
  0x2b   :  { %385 = vmatpush.bf16.msra.mxu1 %v3227_v33  ;;  %v4463_v12 = vld [vmem:[#allocation7 + $0x94] sm:$0xf0]  ;;  %v3419_v13 = vor.u32 %v4460_v8, %v3416_v10  ;;  %v4461_v15 = vld [vmem:[#allocation7 + $0x8c] sm:$0xf]  ;;  %v3424_v16 = vld [vmem:[#allocation7 + $0x98] sm:$0xf0] }
  0x2c   :  { %434 = vmatpush.bf16.msra.mxu2 %v3231_v34  ;;  %483 = vmatpush.bf16.msra.mxu3 %v3235_v36  ;;  %v3423_v14 = vor.u32 %v4463_v12, %v3422_v11  ;;  %v3427_v17 = vor.u32 %v4461_v15, %v3424_v16  ;;  %v4406_v18 = vld [vmem:[%s5358_s0 + $0x10] sm:$0xff]  ;;  %v3398_v19 = vld [vmem:[#allocation7 + $0x60] sm:$0xf]  ;;  %v4456_v21 = vld [vmem:[#allocation7 + $0x64] sm:$0xf]  ;;  %v4930_v10 = vmov 0.0|0.0  }
  0x2d   :  { %337 = vmatmul.bf16.vlgmr.msra.gmra.mxu0 %v4404_v35  ;;  %v4458_v20 = vld [vmem:[#allocation7 + $0x6c] sm:$0xf0]  ;;  %v3400_v23 = vld [vmem:[#allocation7 + $0x70] sm:$0xf0]  ;;  %v3406_v24 = vld [vmem:[#allocation7 + $0x68] sm:$0xf] }
  0x2e   :  { %795 = vmatpush.bf16.msrb.mxu0 %v3463_v37  ;;  %386 = vmatmul.bf16.vlgmr.msra.gmra.mxu1 %v4404_v35  ;;  %v3399_v22 = vor.u32 %v4458_v20, %v3398_v19  ;;  %v4459_v25 = vld [vmem:[#allocation7 + $0x74] sm:$0xf0]  ;;  %v3403_v26 = vor.u32 %v4456_v21, %v3400_v23  ;;  %v4457_v28 = vld [vmem:[#allocation7 + $0x6c] sm:$0xf]  ;;  %v3408_v29 = vld [vmem:[#allocation7 + $0x78] sm:$0xf0] }
  0x2f   :  { %809 = vmatpush.bf16.msrb.mxu1 %v3467_v41  ;;  %435 = vmatmul.bf16.vlgmr.msra.gmra.mxu2 %v4404_v35  ;;  %v3407_v27 = vor.u32 %v4459_v25, %v3406_v24  ;;  %v3411_v30 = vor.u32 %v4457_v28, %v3408_v29  ;;  %v4407_v31 = vld [vmem:[%s5358_s0 + $0x18] sm:$0xff]  ;;  %v3382_v32 = vld [vmem:[#allocation7 + $0x40] sm:$0xf]  ;;  %v4454_v33 = vld [vmem:[#allocation7 + $0x4c] sm:$0xf0] }
  0x30   :  { %484 = vmatmul.bf16.vlgmr.msra.gmra.mxu3 %v4404_v35  ;;  %823 = vmatpush.bf16.msrb.mxu2 %v3471_v47  ;;  %v4452_v34 = vld [vmem:[#allocation7 + $0x44] sm:$0xf]  ;;  %v3383_v35 = vor.u32 %v4454_v33, %v3382_v32  ;;  %v3384_v36 = vld [vmem:[#allocation7 + $0x50] sm:$0xf0]  ;;  %v3390_v37 = vld [vmem:[#allocation7 + $0x48] sm:$0xf] }
  0x31   :  { %837 = vmatpush.bf16.msrb.mxu3 %v3475_v48  ;;  %v4455_v38 = vld [vmem:[#allocation7 + $0x54] sm:$0xf0]  ;;  %v3387_v39 = vor.u32 %v4452_v34, %v3384_v36  ;;  %v4453_v41 = vld [vmem:[#allocation7 + $0x4c] sm:$0xf]  ;;  %v3392_v42 = vld [vmem:[#allocation7 + $0x58] sm:$0xf0] }
  0x32   :  { %796 = vmatpush.bf16.msrb.mxu0 %v3447_v49  ;;  %v3391_v40 = vor.u32 %v4455_v38, %v3390_v37  ;;  %v3395_v43 = vor.u32 %v4453_v41, %v3392_v42  ;;  %v4408_v44 = vld [vmem:[%s5358_s0 + $0x20] sm:$0xff]  ;;  %v4450_v46 = vld [vmem:[#allocation7 + $0x2c] sm:$0xf0]  ;;  %v3368_v49 = vld [vmem:[#allocation7 + $0x30] sm:$0xf0] }
  0x33   :  { %810 = vmatpush.bf16.msrb.mxu1 %v3451_v52  ;;  %v3366_v45 = vld [vmem:[#allocation7 + $0x20] sm:$0xf]  ;;  %v4448_v47 = vld [vmem:[#allocation7 + $0x24] sm:$0xf]  ;;  %v3374_v50 = vld [vmem:[#allocation7 + $0x28] sm:$0xf] }
  0x34   :  { %824 = vmatpush.bf16.msrb.mxu2 %v3455_v55  ;;  %v3367_v48 = vor.u32 %v4450_v46, %v3366_v45  ;;  %v4451_v51 = vld [vmem:[#allocation7 + $0x34] sm:$0xf0]  ;;  %v3371_v52 = vor.u32 %v4448_v47, %v3368_v49  ;;  %v4449_v54 = vld [vmem:[#allocation7 + $0x2c] sm:$0xf]  ;;  %v3376_v55 = vld [vmem:[#allocation7 + $0x38] sm:$0xf0] }
  0x35   :  { %838 = vmatpush.bf16.msrb.mxu3 %v3459_v59  ;;  %v3375_v53 = vor.u32 %v4451_v51, %v3374_v50  ;;  %v3379_v56 = vor.u32 %v4449_v54, %v3376_v55  ;;  %v4409_v57 = vld [vmem:[%s5358_s0 + $0x28] sm:$0xff]  ;;  %v3350_v58 = vld [vmem:[#allocation7] sm:$0xf]  ;;  %v4446_v59 = vld [vmem:[#allocation7 + $0xc] sm:$0xf0] }
  0x36   :  { %797 = vmatpush.bf16.msrb.mxu0 %v3431_v60  ;;  %v4444_v60 = vld [vmem:[#allocation7 + $0x4] sm:$0xf]  ;;  %v3351_v61 = vor.u32 %v4446_v59, %v3350_v58  ;;  %v3352_v62 = vld [vmem:[#allocation7 + $0x10] sm:$0xf0]  ;;  %v3358_v63 = vld [vmem:[#allocation7 + $0x8] sm:$0xf] }
  0x37   :  { %811 = vmatpush.bf16.msrb.mxu1 %v3435_v0  ;;  %v4447_v0 = vld [vmem:[#allocation7 + $0x14] sm:$0xf0]  ;;  %v3355_v1 = vor.u32 %v4444_v60, %v3352_v62  ;;  %v4410_v6 = vld [vmem:[%s5358_s0 + $0x30] sm:$0xff]  ;;  %v3590_v60 = vld [vmem:[#allocation7 + $0xe0] sm:$0xf] }
  0x38   :  { %825 = vmatpush.bf16.msrb.mxu2 %v3439_v3  ;;  %v3359_v2 = vor.u32 %v4447_v0, %v3358_v63  ;;  %v4445_v3 = vld [vmem:[#allocation7 + $0xc] sm:$0xf]  ;;  %v4411_v7 = vld [vmem:[%s5358_s0 + $0x38] sm:$0xff]  ;;  %v4504_v62 = vld [vmem:[#allocation7 + $0xe4] sm:$0xf] }
  0x39   :  { %839 = vmatpush.bf16.msrb.mxu3 %v3443_v4  ;;  %v3360_v4 = vld [vmem:[#allocation7 + $0x18] sm:$0xf0] }
  0x3a   :  { %798 = vmatpush.bf16.msrb.mxu0 %v3415_v9 }
  0x3b   :  { %812 = vmatpush.bf16.msrb.mxu1 %v3419_v13 }
  0x3c   :  { %826 = vmatpush.bf16.msrb.mxu2 %v3423_v14 }
  0x3d   :  { %342 = vmatmul.bf16.gmra.mxu0 %v4405_v5  ;;  %840 = vmatpush.bf16.msrb.mxu3 %v3427_v17 }
  0x3e   :  { %391 = vmatmul.bf16.gmra.mxu1 %v4405_v5  ;;  %799 = vmatpush.bf16.msrb.mxu0 %v3399_v22 }
  0x3f   :  { %440 = vmatmul.bf16.gmra.mxu2 %v4405_v5  ;;  %813 = vmatpush.bf16.msrb.mxu1 %v3403_v26 }
  0x40   :  { %489 = vmatmul.bf16.gmra.mxu3 %v4405_v5  ;;  %827 = vmatpush.bf16.msrb.mxu2 %v3407_v27  ;;  %v3363_v5 = vor.u32 %v4445_v3, %v3360_v4  ;;  %v3598_v3 = vld [vmem:[#allocation7 + $0xe8] sm:$0xf]  ;;  %v4507_v4 = vld [vmem:[#allocation7 + $0xf4] sm:$0xf0] }
  0x41   :  { %841 = vmatpush.bf16.msrb.mxu3 %v3411_v30 }
  0x42   :  { %800 = vmatpush.bf16.msrb.mxu0 %v3383_v35 }
  0x43   :  { %814 = vmatpush.bf16.msrb.mxu1 %v3387_v39 }
  0x44   :  { %828 = vmatpush.bf16.msrb.mxu2 %v3391_v40 }
  0x45   :  { %842 = vmatpush.bf16.msrb.mxu3 %v3395_v43 }
  0x46   :  { %801 = vmatpush.bf16.msrb.mxu0 %v3367_v48 }
  0x47   :  { %815 = vmatpush.bf16.msrb.mxu1 %v3371_v52 }
  0x48   :  { %829 = vmatpush.bf16.msrb.mxu2 %v3375_v53 }
  0x49   :  { %843 = vmatpush.bf16.msrb.mxu3 %v3379_v56 }
  0x4a   :  { %802 = vmatpush.bf16.msrb.mxu0 %v3351_v61  ;;  %v4506_v61 = vld [vmem:[#allocation7 + $0xec] sm:$0xf0] }
  0x4b   :  { %816 = vmatpush.bf16.msrb.mxu1 %v3355_v1  ;;  %v3591_v1 = vor.u32 %v4506_v61, %v3590_v60  ;;  %v3582_v60 = vld [vmem:[#allocation7 + $0xc8] sm:$0xf]  ;;  %v4503_v61 = vld [vmem:[#allocation7 + $0xd4] sm:$0xf0] }
  0x4c   :  { %830 = vmatpush.bf16.msrb.mxu2 %v3359_v2  ;;  %v3592_v2 = vld [vmem:[#allocation7 + $0xf0] sm:$0xf0] }
  0x4d   :  { %347 = vmatmul.bf16.gmra.mxu0 %v4406_v18  ;;  %844 = vmatpush.bf16.msrb.mxu3 %v3363_v5 }
  0x4e   :  { %396 = vmatmul.bf16.gmra.mxu1 %v4406_v18  ;;  %1107 = vmatpush.bf16.msra.mxu0 %v3591_v1 }
  0x4f   :  { %445 = vmatmul.bf16.gmra.mxu2 %v4406_v18 }
  0x50   :  { %494 = vmatmul.bf16.gmra.mxu3 %v4406_v18 }
  0x5d   :  { %352 = vmatmul.bf16.gmra.mxu0 %v4407_v31 }
  0x5e   :  { %401 = vmatmul.bf16.gmra.mxu1 %v4407_v31 }
  0x5f   :  { %450 = vmatmul.bf16.gmra.mxu2 %v4407_v31 }
  0x60   :  { %499 = vmatmul.bf16.gmra.mxu3 %v4407_v31 }
  0x6d   :  { %357 = vmatmul.bf16.gmra.mxu0 %v4408_v44 }
  0x6e   :  { %406 = vmatmul.bf16.gmra.mxu1 %v4408_v44 }
  0x6f   :  { %455 = vmatmul.bf16.gmra.mxu2 %v4408_v44 }
  0x70   :  { %504 = vmatmul.bf16.gmra.mxu3 %v4408_v44 }
  0x7d   :  { %362 = vmatmul.bf16.gmra.mxu0 %v4409_v57 }
  0x7e   :  { %411 = vmatmul.bf16.gmra.mxu1 %v4409_v57 }
  0x7f   :  { %460 = vmatmul.bf16.gmra.mxu2 %v4409_v57 }
  0x80   :  { %509 = vmatmul.bf16.gmra.mxu3 %v4409_v57 }
  0x8d   :  { %367 = vmatmul.bf16.gmra.mxu0 %v4410_v6 }
  0x8e   :  { %416 = vmatmul.bf16.gmra.mxu1 %v4410_v6 }
  0x8f   :  { %465 = vmatmul.bf16.gmra.mxu2 %v4410_v6 }
  0x90   :  { %514 = vmatmul.bf16.gmra.mxu3 %v4410_v6  ;;  %v3595_v6 = vor.u32 %v4504_v62, %v3592_v2 }
  0x92   :  { %1121 = vmatpush.bf16.msra.mxu1 %v3595_v6  ;;  %v4499_v6 = vld [vmem:[#allocation7 + $0xb4] sm:$0xf0] }
  0x9d   :  { %372 = vmatmul.bf16.gmra.mxu0 %v4411_v7 }
  0x9e   :  { %421 = vmatmul.bf16.gmra.mxu1 %v4411_v7 }
  0x9f   :  { %470 = vmatmul.bf16.gmra.mxu2 %v4411_v7 }
  0xa0   :  { %519 = vmatmul.bf16.gmra.mxu3 %v4411_v7  ;;  %v3599_v7 = vor.u32 %v4507_v4, %v3598_v3  ;;  %v3566_v4 = vld [vmem:[#allocation7 + $0xa8] sm:$0xf] }
  0xa2   :  { %1135 = vmatpush.bf16.msra.mxu2 %v3599_v7  ;;  %v3568_v7 = vld [vmem:[#allocation7 + $0xb8] sm:$0xf0] }
  0xaa   :  { %v4996_v8 = vpop.f32.mrf.mxu0 }
  0xab   :  { %v4998_v9 = vpop.f32.mrf.mxu1 }
  0xad   :  { %803 = vmatmul.bf16.vlgmr.msrb.gmra.mxu0 %v4930_v10 }
  0xae   :  { %817 = vmatmul.bf16.vlgmr.msrb.gmra.mxu1 %v4930_v10 }
  0xaf   :  { %831 = vmatmul.bf16.vlgmr.msrb.gmra.mxu2 %v4930_v10 }
  0xb0   :  { %845 = vmatmul.bf16.vlgmr.msrb.gmra.mxu3 %v4930_v10  ;;  %v4505_v10 = vld [vmem:[#allocation7 + $0xec] sm:$0xf] }
  0xb2   :  { %v5000_v11 = vpop.f32.mrf.mxu2  ;;  %v5004_v13 = vpop.f32.mrf.mxu0 }
  0xb3   :  { %v5002_v12 = vpop.f32.mrf.mxu3  ;;  %v5006_v14 = vpop.f32.mrf.mxu1 }
  0xba   :  { %v5008_v15 = vpop.f32.mrf.mxu2  ;;  %v5012_v17 = vpop.f32.mrf.mxu0 }
  0xbb   :  { %v5010_v16 = vpop.f32.mrf.mxu3  ;;  %v5014_v18 = vpop.f32.mrf.mxu1 }
  0xc2   :  { %v5016_v19 = vpop.f32.mrf.mxu2  ;;  %v5020_v21 = vpop.f32.mrf.mxu0 }
  0xc3   :  { %v5018_v20 = vpop.f32.mrf.mxu3  ;;  %v5022_v22 = vpop.f32.mrf.mxu1 }
  0xca   :  { %v5024_v23 = vpop.f32.mrf.mxu2  ;;  %v5028_v25 = vpop.f32.mrf.mxu0 }
  0xcb   :  { %v5026_v24 = vpop.f32.mrf.mxu3  ;;  %v5030_v26 = vpop.f32.mrf.mxu1 }
  0xd2   :  { %v5032_v27 = vpop.f32.mrf.mxu2  ;;  %v5036_v29 = vpop.f32.mrf.mxu0 }
  0xd3   :  { %v5034_v28 = vpop.f32.mrf.mxu3  ;;  %v5038_v30 = vpop.f32.mrf.mxu1 }
  0xda   :  { %v5040_v31 = vpop.f32.mrf.mxu2  ;;  %v5044_v33 = vpop.f32.mrf.mxu0 }
  0xdb   :  { %v5042_v32 = vpop.f32.mrf.mxu3  ;;  %v5046_v34 = vpop.f32.mrf.mxu1 }
  0xe2   :  { %v5048_v35 = vpop.f32.mrf.mxu2  ;;  %v5052_v37 = vpop.f32.mrf.mxu0 }
  0xe3   :  { %v5050_v36 = vpop.f32.mrf.mxu3  ;;  %v5054_v38 = vpop.f32.mrf.mxu1 }
  0xea   :  { %v5056_v39 = vpop.f32.mrf.mxu2  ;;  %v5060_v41 = vpop.f32.mrf.mxu0 }
  0xeb   :  { %v5058_v40 = vpop.f32.mrf.mxu3  ;;  %v5062_v42 = vpop.f32.mrf.mxu1 }
  0xf2   :  { %v5064_v43 = vpop.f32.mrf.mxu2  ;;  %v5068_v45 = vpop.f32.mrf.mxu0 }
  0xf3   :  { %v5066_v44 = vpop.f32.mrf.mxu3  ;;  %v5070_v46 = vpop.f32.mrf.mxu1 }
  0xfa   :  { %v5072_v47 = vpop.f32.mrf.mxu2  ;;  %v5076_v49 = vpop.f32.mrf.mxu0 }
  0xfb   :  { %v5074_v48 = vpop.f32.mrf.mxu3  ;;  %5365 = vst [vmem:[#allocation11_spill] sm:$0xff] %v5076_v49  ;;  %v5078_v50 = vpop.f32.mrf.mxu1  ;;  %v3486_v49 = vld [vmem:[#allocation7 + $0x8] sm:$0xf] }
  0xfc   :  { %5366 = vst [vmem:[#allocation12_spill] sm:$0xff] %v5078_v50 }
 0x102   :  { %v5080_v51 = vpop.f32.mrf.mxu2  ;;  %v5084_v53 = vpop.f32.mrf.mxu0 }
 0x103   :  { %5367 = vst [vmem:[#allocation13_spill] sm:$0xff] %v5080_v51  ;;  %v5082_v52 = vpop.f32.mrf.mxu3  ;;  %v5086_v54 = vpop.f32.mrf.mxu1 }
 0x104   :  { %5368 = vst [vmem:[#allocation14_spill] sm:$0xff] %v5082_v52 }
 0x105   :  { %5369 = vst [vmem:[#allocation15_spill] sm:$0xff] %v5084_v53  ;;  %v4501_v53 = vld [vmem:[#allocation7 + $0xcc] sm:$0xf] }
 0x106   :  { %5370 = vst [vmem:[#allocation16_spill] sm:$0xff] %v5086_v54  ;;  %v3583_v54 = vor.u32 %v4503_v61, %v3582_v60  ;;  %v4492_v60 = vld [vmem:[#allocation7 + $0x84] sm:$0xf] }
 0x108   :  { %1136 = vmatpush.bf16.msra.mxu2 %v3583_v54  ;;  %v3542_v54 = vld [vmem:[#allocation7 + $0x80] sm:$0xf] }
 0x10a   :  { %v5088_v55 = vpop.f32.mrf.mxu2  ;;  %v5092_v57 = vpop.f32.mrf.mxu0 }
 0x10b   :  { %5371 = vst [vmem:[#allocation17_spill] sm:$0xff] %v5088_v55  ;;  %v5090_v56 = vpop.f32.mrf.mxu3  ;;  %v5094_v58 = vpop.f32.mrf.mxu1  ;;  %v4500_v55 = vld [vmem:[#allocation7 + $0xc4] sm:$0xf] }
 0x10c   :  { %5372 = vst [vmem:[#allocation18_spill] sm:$0xff] %v5090_v56  ;;  %v4502_v56 = vld [vmem:[#allocation7 + $0xcc] sm:$0xf0] }
 0x10d   :  { %5373 = vst [vmem:[#allocation19_spill] sm:$0xff] %v5092_v57  ;;  %v3600_v57 = vld [vmem:[#allocation7 + $0xf8] sm:$0xf0] }
 0x10e   :  { %5374 = vst [vmem:[#allocation20_spill] sm:$0xff] %v5094_v58  ;;  %v3603_v58 = vor.u32 %v4505_v10, %v3600_v57  ;;  %v4494_v10 = vld [vmem:[#allocation7 + $0x8c] sm:$0xf0] }
 0x10f   :  { %v3543_v61 = vor.u32 %v4494_v10, %v3542_v54  ;;  %v4491_v54 = vld [vmem:[#allocation7 + $0x74] sm:$0xf0] }
 0x110   :  { %1149 = vmatpush.bf16.msra.mxu3 %v3603_v58  ;;  %v3558_v58 = vld [vmem:[#allocation7 + $0xa0] sm:$0xf] }
 0x112   :  { %v5096_v59 = vpop.f32.mrf.mxu2  ;;  %v5100_v0 = vpop.f32.mrf.mxu0 }
 0x113   :  { %5375 = vst [vmem:[#allocation21_spill] sm:$0xff] %v5096_v59  ;;  %v5098_v63 = vpop.f32.mrf.mxu3  ;;  %v5102_v5 = vpop.f32.mrf.mxu1  ;;  %v3574_v59 = vld [vmem:[#allocation7 + $0xc0] sm:$0xf] }
 0x114   :  { %5376 = vst [vmem:[#allocation22_spill] sm:$0xff] %v5098_v63  ;;  %v3575_v63 = vor.u32 %v4502_v56, %v3574_v59  ;;  %v4498_v56 = vld [vmem:[#allocation7 + $0xac] sm:$0xf0]  ;;  %v4496_v59 = vld [vmem:[#allocation7 + $0xa4] sm:$0xf] }
 0x115   :  { %5377 = vst [vmem:[#allocation23_spill] sm:$0xff] %v5100_v0  ;;  %v3576_v0 = vld [vmem:[#allocation7 + $0xd0] sm:$0xf0] }
 0x116   :  { %5378 = vst [vmem:[#allocation24_spill] sm:$0xff] %v5102_v5  ;;  %v3579_v52 = vor.u32 %v4500_v55, %v3576_v0  ;;  %v3584_v5 = vld [vmem:[#allocation7 + $0xd8] sm:$0xf0]  ;;  %1108 = vmatpush.bf16.msra.mxu0 %v3575_v63  ;;  %v3559_v55 = vor.u32 %v4498_v56, %v3558_v58  ;;  %v3560_v0 = vld [vmem:[#allocation7 + $0xb0] sm:$0xf0] }
 0x117   :  { %v3587_v62 = vor.u32 %v4501_v53, %v3584_v5  ;;  %v3563_v63 = vor.u32 %v4496_v59, %v3560_v0  ;;  %v3567_v53 = vor.u32 %v4499_v6, %v3566_v4  ;;  %v4497_v5 = vld [vmem:[#allocation7 + $0xac] sm:$0xf]  ;;  %v5115_v59 = vld [vmem:[%s5361_s3] sm:$0xf] }
 0x118   :  { %1122 = vmatpush.bf16.msra.mxu1 %v3579_v52  ;;  %v3571_v52 = vor.u32 %v4497_v5, %v3568_v7  ;;  %v3528_v7 = vld [vmem:[#allocation7 + $0x70] sm:$0xf0] }
 0x119   :  { %1150 = vmatpush.bf16.msra.mxu3 %v3587_v62  ;;  %1137 = vmatpush.bf16.msra.mxu2 %v3567_v53  ;;  %v3544_v62 = vld [vmem:[#allocation7 + $0x90] sm:$0xf0]  ;;  %v4490_v53 = vld [vmem:[#allocation7 + $0x6c] sm:$0xf0] }
 0x11a   :  { %v5104_v2 = vpop.f32.mrf.mxu2  ;;  %v5108_v1 = vpop.f32.mrf.mxu0  ;;  %1109 = vmatpush.bf16.msra.mxu0 %v3559_v55  ;;  %v3547_v58 = vor.u32 %v4492_v60, %v3544_v62  ;;  %v5129_v62 = vperm.slane %v5115_v59, 1 }
 0x11b   :  { %5379 = vst [vmem:[#allocation25_spill] sm:$0xff] %v5104_v2  ;;  %v5106_v57 = vpop.f32.mrf.mxu3  ;;  %v5110_v3 = vpop.f32.mrf.mxu1  ;;  %v3552_v2 = vld [vmem:[#allocation7 + $0x98] sm:$0xf0] }
 0x11c   :  { %5380 = vst [vmem:[#allocation26_spill] sm:$0xff] %v5106_v57  ;;  %1123 = vmatpush.bf16.msra.mxu1 %v3563_v63  ;;  %v4493_v57 = vld [vmem:[#allocation7 + $0x8c] sm:$0xf]  ;;  %v3526_v63 = vld [vmem:[#allocation7 + $0x60] sm:$0xf] }
 0x11d   :  { %5381 = vst [vmem:[#allocation27_spill] sm:$0xff] %v5108_v1  ;;  %1151 = vmatpush.bf16.msra.mxu3 %v3571_v52  ;;  %v3550_v1 = vld [vmem:[#allocation7 + $0x88] sm:$0xf]  ;;  %v3555_v0 = vor.u32 %v4493_v57, %v3552_v2  ;;  %v3527_v5 = vor.u32 %v4490_v53, %v3526_v63  ;;  %v3536_v2 = vld [vmem:[#allocation7 + $0x78] sm:$0xf0]  ;;  %v5126_v57 = vperm.slane %v5115_v59, 0 }
 0x11e   :  { %5382 = vst [vmem:[#allocation28_spill] sm:$0xff] %v5110_v3  ;;  %v4495_v3 = vld [vmem:[#allocation7 + $0x94] sm:$0xf0]  ;;  %1110 = vmatpush.bf16.msra.mxu0 %v3543_v61  ;;  %v3534_v52 = vld [vmem:[#allocation7 + $0x68] sm:$0xf] }
 0x11f   :  { %v3551_v56 = vor.u32 %v4495_v3, %v3550_v1  ;;  %v4488_v1 = vld [vmem:[#allocation7 + $0x64] sm:$0xf]  ;;  %v3535_v60 = vor.u32 %v4491_v54, %v3534_v52  ;;  %v4489_v61 = vld [vmem:[#allocation7 + $0x6c] sm:$0xf] }
 0x120   :  { %1124 = vmatpush.bf16.msra.mxu1 %v3547_v58  ;;  %v3531_v10 = vor.u32 %v4488_v1, %v3528_v7  ;;  %v3539_v58 = vor.u32 %v4489_v61, %v3536_v2  ;;  %v4484_v63 = vld [vmem:[#allocation7 + $0x44] sm:$0xf]  ;;  %v3518_v1 = vld [vmem:[#allocation7 + $0x48] sm:$0xf]  ;;  %v4487_v7 = vld [vmem:[#allocation7 + $0x54] sm:$0xf0] }
 0x121   :  { %1138 = vmatpush.bf16.msra.mxu2 %v3551_v56  ;;  %1152 = vmatpush.bf16.msra.mxu3 %v3555_v0  ;;  %v3510_v56 = vld [vmem:[#allocation7 + $0x40] sm:$0xf]  ;;  %v4486_v0 = vld [vmem:[#allocation7 + $0x4c] sm:$0xf0]  ;;  %v3519_v54 = vor.u32 %v4487_v7, %v3518_v1  ;;  %v3502_v1 = vld [vmem:[#allocation7 + $0x28] sm:$0xf] }
 0x122   :  { %v5117_v55 = vpop.f32.mrf.mxu2  ;;  %v5121_v6 = vpop.f32.mrf.mxu0  ;;  %1111 = vmatpush.bf16.msra.mxu0 %v3527_v5  ;;  %v3511_v53 = vor.u32 %v4486_v0, %v3510_v56  ;;  %v3494_v2 = vld [vmem:[#allocation7 + $0x20] sm:$0xf]  ;;  %v4483_v7 = vld [vmem:[#allocation7 + $0x34] sm:$0xf0] }
 0x123   :  { %5383 = vst [vmem:[#allocation29_spill] sm:$0xff] %v5117_v55  ;;  %v5119_v4 = vpop.f32.mrf.mxu3  ;;  %v5123_v3 = vpop.f32.mrf.mxu1  ;;  %v339_v55 = vadd.f32 %v4996_v8, %v5126_v57  ;;  %v3496_v8 = vld [vmem:[#allocation7 + $0x30] sm:$0xf0] }
 0x124   :  { %5384 = vst [vmem:[#allocation30_spill] sm:$0xff] %v5119_v4  ;;  %1125 = vmatpush.bf16.msra.mxu1 %v3531_v10  ;;  %v3520_v4 = vld [vmem:[#allocation7 + $0x58] sm:$0xf0]  ;;  %v388_v10 = vadd.f32 %v4998_v9, %v5129_v62 }
 0x125   :  { %5385 = vst [vmem:[#allocation31_spill] sm:$0xff] %v5121_v6  ;;  %1139 = vmatpush.bf16.msra.mxu2 %v3535_v60  ;;  %1153 = vmatpush.bf16.msra.mxu3 %v3539_v58  ;;  %v4485_v6 = vld [vmem:[#allocation7 + $0x4c] sm:$0xf]  ;;  %v4480_v58 = vld [vmem:[#allocation7 + $0x24] sm:$0xf] }
 0x126   :  { %5386 = vst [vmem:[#allocation32_spill] sm:$0xff] %v5123_v3  ;;  %v3512_v3 = vld [vmem:[#allocation7 + $0x50] sm:$0xf0]  ;;  %1112 = vmatpush.bf16.msra.mxu0 %v3511_v53  ;;  %v3523_v5 = vor.u32 %v4485_v6, %v3520_v4  ;;  %v5140_v4 = vperm.slane %v5115_v59, 2  ;;  %v3499_v9 = vor.u32 %v4480_v58, %v3496_v8  ;;  %v3503_v53 = vor.u32 %v4483_v7, %v3502_v1 }
 0x127   :  { %v3515_v52 = vor.u32 %v4484_v63, %v3512_v3  ;;  %v4482_v3 = vld [vmem:[#allocation7 + $0x2c] sm:$0xf0] }
 0x128   :  { %v3495_v63 = vor.u32 %v4482_v3, %v3494_v2  ;;  %v4476_v2 = vld [vmem:[#allocation7 + $0x4] sm:$0xf]  ;;  %v3480_v3 = vld [vmem:[#allocation7 + $0x10] sm:$0xf0] }
 0x129   :  { %1126 = vmatpush.bf16.msra.mxu1 %v3515_v52  ;;  %1140 = vmatpush.bf16.msra.mxu2 %v3519_v54  ;;  %v3483_v58 = vor.u32 %v4476_v2, %v3480_v3  ;;  %v439_v3 = vadd.f32 %v5008_v15, %v5140_v4 }
 0x12a   :  { %v5133_v51 = vpop.f32.mrf.mxu2  ;;  %v804_v61 = vpop.f32.mrf.mxu0  ;;  %1154 = vmatpush.bf16.msra.mxu3 %v3523_v5  ;;  %1113 = vmatpush.bf16.msra.mxu0 %v3495_v63  ;;  %v4478_v5 = vld [vmem:[#allocation7 + $0xc] sm:$0xf0]  ;;  %v3488_v63 = vld [vmem:[#allocation7 + $0x18] sm:$0xf0] }
 0x12b   :  { %5387 = vst [vmem:[#allocation33_spill] sm:$0xff] %v5133_v51  ;;  %v5137_v60 = vpop.f32.mrf.mxu3  ;;  %v851_v56 = vadd.f32 %v804_v61, %v339_v55  ;;  %v818_v0 = vpop.f32.mrf.mxu1  ;;  %v3504_v51 = vld [vmem:[#allocation7 + $0x38] sm:$0xf0]  ;;  %v3478_v55 = vld [vmem:[#allocation7] sm:$0xf] }
 0x12c   :  { %5388 = vst [vmem:[#allocation34_spill] sm:$0xff] %v5137_v60  ;;  %v852_v6 = vadd.f32 %v818_v0, %v388_v10  ;;  %v4481_v60 = vld [vmem:[#allocation7 + $0x2c] sm:$0xf]  ;;  %v3479_v61 = vor.u32 %v4478_v5, %v3478_v55  ;;  %v437_v10 = vadd.f32 %v5000_v11, %v5140_v4  ;;  %v4479_v0 = vld [vmem:[#allocation7 + $0x14] sm:$0xf0] }
 0x12d   :  { %v861_v52 = vmul.f32 0.5, %v851_v56  ;;  %v3507_v54 = vor.u32 %v4481_v60, %v3504_v51  ;;  %1127 = vmatpush.bf16.msra.mxu1 %v3499_v9  ;;  %1141 = vmatpush.bf16.msra.mxu2 %v3503_v53  ;;  %v4477_v56 = vld [vmem:[#allocation7 + $0xc] sm:$0xf]  ;;  %v5145_v51 = vperm.slane %v5115_v59, 3  ;;  %v341_v60 = vadd.f32 %v5004_v13, %v5126_v57 }
 0x12e   :  { %v869_v50 = vmul.f32 0.5, %v852_v6  ;;  %1114 = vmatpush.bf16.msra.mxu0 %v3479_v61  ;;  %v3487_v1 = vor.u32 %v4479_v0, %v3486_v49  ;;  %v3491_v7 = vor.u32 %v4477_v56, %v3488_v63  ;;  %v390_v6 = vadd.f32 %v5006_v14, %v5129_v62 }
 0x12f   :  { %4714 = vtanh.f32 %v861_v52  ;;  %1155 = vmatpush.bf16.msra.mxu3 %v3507_v54  ;;  %v486_v13 = vadd.f32 %v5002_v12, %v5145_v51 }
 0x130   :  { %4716 = vtanh.f32 %v869_v50 }
 0x131   :  { %1128 = vmatpush.bf16.msra.mxu1 %v3483_v58  ;;  %1142 = vmatpush.bf16.msra.mxu2 %v3487_v1  ;;  %v488_v58 = vadd.f32 %v5010_v16, %v5145_v51 }
 0x132   :  { %v832_v8 = vpop.f32.mrf.mxu2  ;;  %v806_v50 = vpop.f32.mrf.mxu0 }
 0x133   :  { %v853_v9 = vadd.f32 %v832_v8, %v437_v10  ;;  %v846_v11 = vpop.f32.mrf.mxu3  ;;  %v855_v53 = vadd.f32 %v806_v50, %v341_v60  ;;  %v820_v52 = vpop.f32.mrf.mxu1  ;;  %1156 = vmatpush.bf16.msra.mxu3 %v3491_v7 }
 0x134   :  { %v856_v59 = vadd.f32 %v820_v52, %v390_v6  ;;  %v854_v14 = vadd.f32 %v846_v11, %v486_v13 }
 0x135   :  { %4718 = vtanh.f32 %v853_v9  ;;  %v4715_v54 = vpop.eup %4714  ;;  %v862_v55 = vmul.f32 0.5, %v855_v53 }
 0x136   :  { %v4717_v49 = vpop.eup %4716  ;;  %v865_v5 = vmul.f32 0.5, %v4715_v54  ;;  %v870_v61 = vmul.f32 0.5, %v856_v59  ;;  %v879_v7 = vmul.f32 0.5, %v854_v14 }
 0x137   :  { %v873_v2 = vmul.f32 0.5, %v4717_v49  ;;  %4720 = vtanh.f32 %v862_v55 }
 0x138   :  { %v867_v10 = vadd.f32 0.5, %v865_v5  ;;  %4722 = vtanh.f32 %v870_v61 }
 0x139   :  { %v875_v0 = vadd.f32 0.5, %v873_v2 }
 0x13a   :  { %v834_v56 = vpop.f32.mrf.mxu2 }
 0x13b   :  { %v4719_v63 = vpop.eup %4718  ;;  %v857_v60 = vadd.f32 %v834_v56, %v439_v3  ;;  %v848_v12 = vpop.f32.mrf.mxu3  ;;  %v887_v8 = vmul.f32 0.0, %v875_v0 }
 0x13c   :  { %v889_v1 = vmul.f32 %v4719_v63, %v867_v10  ;;  %v858_v6 = vadd.f32 %v848_v12, %v488_v58  ;;  %v3718_v12 = vld [vmem:[#allocation7 + $0xe0] sm:$0xf] }
 0x13d   :  { %4724 = vtanh.f32 %v857_v60  ;;  %v4721_v15 = vpop.eup %4720 }
 0x13e   :  { %v5157_v9 = vadd.f32 %v889_v1, %v887_v8  ;;  %v880_v11 = vmul.f32 0.5, %v858_v6  ;;  %v4723_v50 = vpop.eup %4722  ;;  %4726 = vtanh.f32 %v879_v7  ;;  %v866_v53 = vmul.f32 0.5, %v4721_v15  ;;  %v4538_v8 = vld [vmem:[#allocation7 + $0xec] sm:$0xf0]  ;;  %v4536_v1 = vld [vmem:[#allocation7 + $0xe4] sm:$0xf] }
 0x13f   :  { %v874_v52 = vmul.f32 0.5, %v4723_v50  ;;  %v3719_v7 = vor.u32 %v4538_v8, %v3718_v12  ;;  %v3720_v6 = vld [vmem:[#allocation7 + $0xf0] sm:$0xf0]  ;;  %v4539_v15 = vld [vmem:[#allocation7 + $0xf4] sm:$0xf0] }
 0x140   :  { %4728 = vtanh.f32 %v880_v11  ;;  %v868_v16 = vadd.f32 0.5, %v866_v53  ;;  %v3726_v11 = vld [vmem:[#allocation7 + $0xe8] sm:$0xf]  ;;  %v3723_v50 = vor.u32 %v4536_v1, %v3720_v6  ;;  %v4528_v12 = vld [vmem:[#allocation7 + $0xa4] sm:$0xf] }
 0x141   :  { %v876_v54 = vadd.f32 0.5, %v874_v52  ;;  %4730 = vtanh.f32 %v5157_v9  ;;  %v3727_v53 = vor.u32 %v4539_v15, %v3726_v11  ;;  %v4537_v52 = vld [vmem:[#allocation7 + $0xec] sm:$0xf]  ;;  %1419 = vmatpush.bf16.msrb.mxu0 %v3719_v7  ;;  %v3688_v1 = vld [vmem:[#allocation7 + $0xb0] sm:$0xf0] }
 0x142   :  { %1433 = vmatpush.bf16.msrb.mxu1 %v3723_v50  ;;  %v3694_v7 = vld [vmem:[#allocation7 + $0xa8] sm:$0xf]  ;;  %v4531_v6 = vld [vmem:[#allocation7 + $0xb4] sm:$0xf0]  ;;  %v3691_v11 = vor.u32 %v4528_v12, %v3688_v1  ;;  %v4529_v50 = vld [vmem:[#allocation7 + $0xac] sm:$0xf] }
 0x143   :  { %v4725_v59 = vpop.eup %4724  ;;  %v888_v55 = vmul.f32 0.0, %v876_v54  ;;  %1447 = vmatpush.bf16.msrb.mxu2 %v3727_v53  ;;  %v3702_v54 = vld [vmem:[#allocation7 + $0xc0] sm:$0xf]  ;;  %v3695_v15 = vor.u32 %v4531_v6, %v3694_v7  ;;  %v3696_v53 = vld [vmem:[#allocation7 + $0xb8] sm:$0xf0] }
 0x144   :  { %v890_v13 = vmul.f32 %v4725_v59, %v868_v16  ;;  %v4727_v49 = vpop.eup %4726  ;;  %v3728_v16 = vld [vmem:[#allocation7 + $0xf8] sm:$0xf0]  ;;  %v3656_v12 = vld [vmem:[#allocation7 + $0x70] sm:$0xf0]  ;;  %v4523_v1 = vld [vmem:[#allocation7 + $0x74] sm:$0xf0] }
 0x145   :  { %v883_v2 = vmul.f32 0.5, %v4727_v49  ;;  %v3731_v59 = vor.u32 %v4537_v52, %v3728_v16  ;;  %v3699_v52 = vor.u32 %v4529_v50, %v3696_v53  ;;  %v3670_v16 = vld [vmem:[#allocation7 + $0x80] sm:$0xf] }
 0x146   :  { %v4729_v5 = vpop.eup %4728  ;;  %v5160_v61 = vadd.f32 %v890_v13, %v888_v55  ;;  %v4534_v13 = vld [vmem:[#allocation7 + $0xcc] sm:$0xf0]  ;;  %v4532_v55 = vld [vmem:[#allocation7 + $0xc4] sm:$0xf]  ;;  %v3638_v53 = vld [vmem:[#allocation7 + $0x40] sm:$0xf] }
 0x147   :  { %v884_v14 = vmul.f32 0.5, %v4729_v5  ;;  %v4731_v3 = vpop.eup %4730  ;;  %v885_v10 = vadd.f32 0.5, %v883_v2  ;;  %1461 = vmatpush.bf16.msrb.mxu3 %v3731_v59  ;;  %v3703_v49 = vor.u32 %v4534_v13, %v3702_v54  ;;  %v3704_v5 = vld [vmem:[#allocation7 + $0xd0] sm:$0xf0]  ;;  %v3710_v2 = vld [vmem:[#allocation7 + $0xc8] sm:$0xf] }
 0x148   :  { %4732 = vtanh.f32 %v5160_v61  ;;  %v4526_v59 = vld [vmem:[#allocation7 + $0x8c] sm:$0xf0]  ;;  %v4524_v54 = vld [vmem:[#allocation7 + $0x84] sm:$0xf] }
 0x149   :  { %v886_v58 = vadd.f32 0.5, %v884_v14  ;;  %v895_v56 = vmul.f32 %v4731_v3, %v885_v10  ;;  %v4535_v14 = vld [vmem:[#allocation7 + $0xd4] sm:$0xf0]  ;;  %v3707_v3 = vor.u32 %v4532_v55, %v3704_v5  ;;  %1420 = vmatpush.bf16.msrb.mxu0 %v3703_v49  ;;  %v3671_v13 = vor.u32 %v4526_v59, %v3670_v16  ;;  %v3672_v55 = vld [vmem:[#allocation7 + $0x90] sm:$0xf0] }
 0x14a   :  { %v3711_v10 = vor.u32 %v4535_v14, %v3710_v2  ;;  %v3678_v49 = vld [vmem:[#allocation7 + $0x88] sm:$0xf]  ;;  %v4527_v5 = vld [vmem:[#allocation7 + $0x94] sm:$0xf0]  ;;  %v3675_v2 = vor.u32 %v4524_v54, %v3672_v55  ;;  %v4516_v16 = vld [vmem:[#allocation7 + $0x44] sm:$0xf] }
 0x14b   :  { %1434 = vmatpush.bf16.msrb.mxu1 %v3707_v3  ;;  %v3679_v14 = vor.u32 %v4527_v5, %v3678_v49  ;;  %v4525_v3 = vld [vmem:[#allocation7 + $0x8c] sm:$0xf]  ;;  %v3640_v54 = vld [vmem:[#allocation7 + $0x50] sm:$0xf0]  ;;  %v4519_v55 = vld [vmem:[#allocation7 + $0x54] sm:$0xf0] }
 0x14c   :  { %1448 = vmatpush.bf16.msrb.mxu2 %v3711_v10  ;;  %v3680_v10 = vld [vmem:[#allocation7 + $0x98] sm:$0xf0]  ;;  %v3643_v49 = vor.u32 %v4516_v16, %v3640_v54  ;;  %v4510_v54 = vld [vmem:[#allocation7 + $0xc] sm:$0xf0] }
 0x14e   :  { %v4733_v0 = vpop.eup %4732 }
 0x14f   :  { %v896_v63 = vmul.f32 %v4733_v0, %v886_v58  ;;  %v4533_v58 = vld [vmem:[#allocation7 + $0xcc] sm:$0xf]  ;;  %v3712_v0 = vld [vmem:[#allocation7 + $0xd8] sm:$0xf0]  ;;  %1435 = vmatpush.bf16.msrb.mxu1 %v3691_v11 }
 0x150   :  { %1449 = vmatpush.bf16.msrb.mxu2 %v3695_v15  ;;  %v4521_v11 = vld [vmem:[#allocation7 + $0x6c] sm:$0xf]  ;;  %v3664_v15 = vld [vmem:[#allocation7 + $0x78] sm:$0xf0] }
 0x151   :  { %v914_v60 = vpack.c.bf16 %v896_v63, %v895_v56  ;;  %v3715_v56 = vor.u32 %v4533_v58, %v3712_v0  ;;  %v3686_v63 = vld [vmem:[#allocation7 + $0xa0] sm:$0xf]  ;;  %v3683_v58 = vor.u32 %v4525_v3, %v3680_v10  ;;  %v3667_v50 = vor.u32 %v4521_v11, %v3664_v15 }
 0x152   :  { %v3654_v0 = vld [vmem:[#allocation7 + $0x60] sm:$0xf] }
 0x153   :  { %1115 = vmatmul.bf16.vlgmr.msra.gmra.mxu0 %v914_v60  ;;  %1129 = vmatmul.bf16.vlgmr.msra.gmra.mxu1 %v914_v60  ;;  %v3622_v10 = vld [vmem:[#allocation7 + $0x20] sm:$0xf] }
 0x154   :  { %1143 = vmatmul.bf16.vlgmr.msra.gmra.mxu2 %v914_v60  ;;  %1157 = vmatmul.bf16.vlgmr.msra.gmra.mxu3 %v914_v60  ;;  %v4530_v60 = vld [vmem:[#allocation7 + $0xac] sm:$0xf0] }
 0x155   :  { %1462 = vmatpush.bf16.msrb.mxu3 %v3715_v56  ;;  %v3687_v8 = vor.u32 %v4530_v60, %v3686_v63  ;;  %1436 = vmatpush.bf16.msrb.mxu1 %v3675_v2  ;;  %v4522_v56 = vld [vmem:[#allocation7 + $0x6c] sm:$0xf0]  ;;  %v4520_v63 = vld [vmem:[#allocation7 + $0x64] sm:$0xf]  ;;  %v4517_v2 = vld [vmem:[#allocation7 + $0x4c] sm:$0xf] }
 0x156   :  { %1450 = vmatpush.bf16.msrb.mxu2 %v3679_v14  ;;  %v3655_v60 = vor.u32 %v4522_v56, %v3654_v0  ;;  %v3659_v7 = vor.u32 %v4520_v63, %v3656_v12  ;;  %v3648_v14 = vld [vmem:[#allocation7 + $0x58] sm:$0xf0]  ;;  %v4512_v0 = vld [vmem:[#allocation7 + $0x24] sm:$0xf]  ;;  %v344_v56 = vadd.f32 %v5012_v17, %v5126_v57  ;;  %v393_v63 = vadd.f32 %v5014_v18, %v5129_v62  ;;  %v3624_v12 = vld [vmem:[#allocation7 + $0x30] sm:$0xf0] }
 0x157   :  { %1421 = vmatpush.bf16.msrb.mxu0 %v3687_v8  ;;  %v3662_v8 = vld [vmem:[#allocation7 + $0x68] sm:$0xf]  ;;  %v3651_v3 = vor.u32 %v4517_v2, %v3648_v14  ;;  %v3627_v11 = vor.u32 %v4512_v0, %v3624_v12  ;;  %v3606_v17 = vld [vmem:[#allocation7] sm:$0xf]  ;;  %v4508_v18 = vld [vmem:[#allocation7 + $0x4] sm:$0xf]  ;;  %v395_v12 = vadd.f32 %v5022_v22, %v5129_v62 }
 0x158   :  { %v3663_v6 = vor.u32 %v4523_v1, %v3662_v8  ;;  %v3630_v8 = vld [vmem:[#allocation7 + $0x28] sm:$0xf]  ;;  %v4515_v1 = vld [vmem:[#allocation7 + $0x34] sm:$0xf0] }
 0x159   :  { %1463 = vmatpush.bf16.msrb.mxu3 %v3699_v52  ;;  %1437 = vmatpush.bf16.msrb.mxu1 %v3659_v7  ;;  %v4518_v52 = vld [vmem:[#allocation7 + $0x4c] sm:$0xf0]  ;;  %v3631_v15 = vor.u32 %v4515_v1, %v3630_v8  ;;  %v3614_v2 = vld [vmem:[#allocation7 + $0x8] sm:$0xf] }
 0x15a   :  { %1451 = vmatpush.bf16.msrb.mxu2 %v3663_v6  ;;  %v3639_v59 = vor.u32 %v4518_v52, %v3638_v53  ;;  %v3632_v53 = vld [vmem:[#allocation7 + $0x38] sm:$0xf0] }
 0x15b   :  { %1422 = vmatpush.bf16.msrb.mxu0 %v3671_v13  ;;  %v3646_v13 = vld [vmem:[#allocation7 + $0x48] sm:$0xf] }
 0x15c   :  { %v3647_v5 = vor.u32 %v4519_v55, %v3646_v13 }
 0x15d   :  { %1464 = vmatpush.bf16.msrb.mxu3 %v3683_v58  ;;  %1438 = vmatpush.bf16.msrb.mxu1 %v3643_v49  ;;  %v4514_v58 = vld [vmem:[#allocation7 + $0x2c] sm:$0xf0]  ;;  %v3607_v49 = vor.u32 %v4510_v54, %v3606_v17  ;;  %v444_v54 = vadd.f32 %v5024_v23, %v5140_v4 }
 0x15e   :  { %1452 = vmatpush.bf16.msrb.mxu2 %v3647_v5  ;;  %v3608_v5 = vld [vmem:[#allocation7 + $0x10] sm:$0xf0] }
 0x15f   :  { %1423 = vmatpush.bf16.msrb.mxu0 %v3655_v60  ;;  %v3623_v60 = vor.u32 %v4514_v58, %v3622_v10  ;;  %v3611_v14 = vor.u32 %v4508_v18, %v3608_v5  ;;  %v4509_v10 = vld [vmem:[#allocation7 + $0xc] sm:$0xf]  ;;  %v3616_v58 = vld [vmem:[#allocation7 + $0x18] sm:$0xf0]  ;;  %v493_v18 = vadd.f32 %v5026_v24, %v5145_v51 }
 0x161   :  { %1465 = vmatpush.bf16.msrb.mxu3 %v3667_v50  ;;  %v4513_v50 = vld [vmem:[#allocation7 + $0x2c] sm:$0xf]  ;;  %1439 = vmatpush.bf16.msrb.mxu1 %v3627_v11 }
 0x162   :  { %1453 = vmatpush.bf16.msrb.mxu2 %v3631_v15 }
 0x163   :  { %1424 = vmatpush.bf16.msrb.mxu0 %v3639_v59  ;;  %v3635_v59 = vor.u32 %v4513_v50, %v3632_v53 }
 0x165   :  { %1466 = vmatpush.bf16.msrb.mxu3 %v3651_v3  ;;  %v4511_v3 = vld [vmem:[#allocation7 + $0x14] sm:$0xf0]  ;;  %1440 = vmatpush.bf16.msrb.mxu1 %v3611_v14 }
 0x166   :  { %v3615_v0 = vor.u32 %v4511_v3, %v3614_v2 }
 0x167   :  { %1425 = vmatpush.bf16.msrb.mxu0 %v3623_v60  ;;  %v346_v60 = vadd.f32 %v5020_v21, %v5126_v57 }
 0x168   :  { %1454 = vmatpush.bf16.msrb.mxu2 %v3615_v0 }
 0x169   :  { %1467 = vmatpush.bf16.msrb.mxu3 %v3635_v59 }
 0x16b   :  { %1426 = vmatpush.bf16.msrb.mxu0 %v3607_v49 }
 0x1d0   :  { %v1116_v7 = vpop.f32.mrf.mxu0  ;;  %v1130_v6 = vpop.f32.mrf.mxu1 }
 0x1d1   :  { %v1163_v52 = vadd.f32 %v1116_v7, %v344_v56  ;;  %v1164_v16 = vadd.f32 %v1130_v6, %v393_v63  ;;  %v3619_v56 = vor.u32 %v4509_v10, %v3616_v58  ;;  %v442_v63 = vadd.f32 %v5016_v19, %v5140_v4 }
 0x1d2   :  { %v491_v19 = vadd.f32 %v5018_v20, %v5145_v51 }
 0x1d3   :  { %v1173_v13 = vmul.f32 0.5, %v1163_v52  ;;  %v1181_v55 = vmul.f32 0.5, %v1164_v16  ;;  %1468 = vmatpush.bf16.msrb.mxu3 %v3619_v56 }
 0x1d5   :  { %4734 = vtanh.f32 %v1173_v13 }
 0x1d6   :  { %4736 = vtanh.f32 %v1181_v55 }
 0x1d7   :  { %v1144_v8 = vpop.f32.mrf.mxu2  ;;  %v1158_v1 = vpop.f32.mrf.mxu3 }
 0x1d8   :  { %v1165_v7 = vadd.f32 %v1144_v8, %v442_v63  ;;  %v1118_v6 = vpop.f32.mrf.mxu0  ;;  %v1132_v11 = vpop.f32.mrf.mxu1  ;;  %v1166_v17 = vadd.f32 %v1158_v1, %v491_v19 }
 0x1d9   :  { %v1167_v15 = vadd.f32 %v1118_v6, %v346_v60  ;;  %v1168_v50 = vadd.f32 %v1132_v11, %v395_v12 }
 0x1da   :  { %4738 = vtanh.f32 %v1165_v7  ;;  %v1191_v2 = vmul.f32 0.5, %v1166_v17 }
 0x1db   :  { %v4735_v53 = vpop.eup %4734  ;;  %v1174_v52 = vmul.f32 0.5, %v1167_v15  ;;  %v1182_v16 = vmul.f32 0.5, %v1168_v50 }
 0x1dc   :  { %v4737_v21 = vpop.eup %4736  ;;  %v1177_v59 = vmul.f32 0.5, %v4735_v53 }
 0x1dd   :  { %v1185_v22 = vmul.f32 0.5, %v4737_v21  ;;  %4740 = vtanh.f32 %v1174_v52 }
 0x1de   :  { %v1179_v13 = vadd.f32 0.5, %v1177_v59  ;;  %4742 = vtanh.f32 %v1182_v16 }
 0x1df   :  { %v1187_v55 = vadd.f32 0.5, %v1185_v22  ;;  %v1146_v49 = vpop.f32.mrf.mxu2  ;;  %v1160_v20 = vpop.f32.mrf.mxu3 }
 0x1e0   :  { %v4739_v5 = vpop.eup %4738  ;;  %v1169_v14 = vadd.f32 %v1146_v49, %v444_v54  ;;  %v1170_v3 = vadd.f32 %v1160_v20, %v493_v18  ;;  %v4570_v54 = vld [vmem:[#allocation7 + $0xec] sm:$0xf0]  ;;  %v4568_v18 = vld [vmem:[#allocation7 + $0xe4] sm:$0xf]  ;;  %v3854_v49 = vld [vmem:[#allocation7 + $0xe8] sm:$0xf] }
 0x1e1   :  { %v1199_v10 = vmul.f32 %v1187_v55, %v5157_v9  ;;  %v1201_v58 = vmul.f32 %v4739_v5, %v1179_v13  ;;  %v3848_v55 = vld [vmem:[#allocation7 + $0xf0] sm:$0xf0]  ;;  %v4571_v20 = vld [vmem:[#allocation7 + $0xf4] sm:$0xf0] }
 0x1e2   :  { %4744 = vtanh.f32 %v1169_v14  ;;  %v1192_v0 = vmul.f32 0.5, %v1170_v3  ;;  %v3851_v5 = vor.u32 %v4568_v18, %v3848_v55  ;;  %v4569_v14 = vld [vmem:[#allocation7 + $0xec] sm:$0xf]  ;;  %v3856_v3 = vld [vmem:[#allocation7 + $0xf8] sm:$0xf0] }
 0x1e3   :  { %v4741_v56 = vpop.eup %4740  ;;  %v5180_v63 = vadd.f32 %v1201_v58, %v1199_v10  ;;  %4746 = vtanh.f32 %v1191_v2  ;;  %v3855_v2 = vor.u32 %v4571_v20, %v3854_v49  ;;  %v3859_v10 = vor.u32 %v4569_v14, %v3856_v3  ;;  %v3830_v58 = vld [vmem:[#allocation7 + $0xc0] sm:$0xf]  ;;  %v4556_v55 = vld [vmem:[#allocation7 + $0x84] sm:$0xf]  ;;  %v3800_v20 = vld [vmem:[#allocation7 + $0x90] sm:$0xf0] }
 0x1e4   :  { %v4743_v23 = vpop.eup %4742  ;;  %v1178_v24 = vmul.f32 0.5, %v4741_v56  ;;  %4748 = vtanh.f32 %v1192_v0  ;;  %1745 = vmatpush.bf16.msra.mxu1 %v3851_v5  ;;  %v4566_v0 = vld [vmem:[#allocation7 + $0xcc] sm:$0xf0]  ;;  %v4564_v56 = vld [vmem:[#allocation7 + $0xc4] sm:$0xf]  ;;  %v3803_v14 = vor.u32 %v4556_v55, %v3800_v20 }
 0x1e5   :  { %v1186_v60 = vmul.f32 0.5, %v4743_v23  ;;  %4750 = vtanh.f32 %v5180_v63  ;;  %1759 = vmatpush.bf16.msra.mxu2 %v3855_v2  ;;  %1773 = vmatpush.bf16.msra.mxu3 %v3859_v10  ;;  %v3831_v23 = vor.u32 %v4566_v0, %v3830_v58  ;;  %v3798_v18 = vld [vmem:[#allocation7 + $0x80] sm:$0xf]  ;;  %v3806_v5 = vld [vmem:[#allocation7 + $0x88] sm:$0xf] }
 0x1e6   :  { %v1180_v12 = vadd.f32 0.5, %v1178_v24  ;;  %v3832_v24 = vld [vmem:[#allocation7 + $0xd0] sm:$0xf0]  ;;  %v4559_v2 = vld [vmem:[#allocation7 + $0x94] sm:$0xf0] }
 0x1e7   :  { %v1188_v8 = vadd.f32 0.5, %v1186_v60  ;;  %v3838_v60 = vld [vmem:[#allocation7 + $0xc8] sm:$0xf]  ;;  %v3807_v3 = vor.u32 %v4559_v2, %v3806_v5  ;;  %v4557_v10 = vld [vmem:[#allocation7 + $0x8c] sm:$0xf]  ;;  %v349_v5 = vadd.f32 %v5028_v25, %v5126_v57  ;;  %v398_v2 = vadd.f32 %v5030_v26, %v5129_v62 }
 0x1e8   :  { %v4745_v1 = vpop.eup %4744  ;;  %v3808_v58 = vld [vmem:[#allocation7 + $0x98] sm:$0xf0]  ;;  %v3750_v55 = vld [vmem:[#allocation7 + $0x20] sm:$0xf]  ;;  %v4544_v20 = vld [vmem:[#allocation7 + $0x24] sm:$0xf] }
 0x1e9   :  { %v1200_v7 = vmul.f32 %v1188_v8, %v5160_v61  ;;  %v1202_v6 = vmul.f32 %v4745_v1, %v1180_v12  ;;  %v4747_v11 = vpop.eup %4746  ;;  %v3846_v61 = vld [vmem:[#allocation7 + $0xe0] sm:$0xf]  ;;  %v4567_v12 = vld [vmem:[#allocation7 + $0xd4] sm:$0xf0]  ;;  %v3835_v8 = vor.u32 %v4564_v56, %v3832_v24  ;;  %v3811_v0 = vor.u32 %v4557_v10, %v3808_v58  ;;  %v4552_v24 = vld [vmem:[#allocation7 + $0x64] sm:$0xf] }
 0x1ea   :  { %v4749_v15 = vpop.eup %4748  ;;  %v1195_v50 = vmul.f32 0.5, %v4747_v11  ;;  %v3847_v13 = vor.u32 %v4570_v54, %v3846_v61  ;;  %v3839_v1 = vor.u32 %v4567_v12, %v3838_v60  ;;  %v3824_v61 = vld [vmem:[#allocation7 + $0xb8] sm:$0xf0]  ;;  %v3782_v56 = vld [vmem:[#allocation7 + $0x60] sm:$0xf] }
 0x1eb   :  { %v5184_v9 = vadd.f32 %v1202_v6, %v1200_v7  ;;  %v1196_v19 = vmul.f32 0.5, %v4749_v15  ;;  %v4751_v53 = vpop.eup %4750  ;;  %v4565_v7 = vld [vmem:[#allocation7 + $0xcc] sm:$0xf]  ;;  %v3840_v6 = vld [vmem:[#allocation7 + $0xd8] sm:$0xf0]  ;;  %1746 = vmatpush.bf16.msra.mxu1 %v3835_v8 }
 0x1ec   :  { %v1197_v52 = vadd.f32 0.5, %v1195_v50  ;;  %1731 = vmatpush.bf16.msra.mxu0 %v3847_v13  ;;  %v3843_v11 = vor.u32 %v4565_v7, %v3840_v6  ;;  %1760 = vmatpush.bf16.msra.mxu2 %v3839_v1  ;;  %v3814_v15 = vld [vmem:[#allocation7 + $0xa0] sm:$0xf]  ;;  %v4562_v50 = vld [vmem:[#allocation7 + $0xac] sm:$0xf0] }
 0x1ed   :  { %4752 = vtanh.f32 %v5184_v9  ;;  %v1198_v16 = vadd.f32 0.5, %v1196_v19  ;;  %v4560_v19 = vld [vmem:[#allocation7 + $0xa4] sm:$0xf]  ;;  %v4558_v13 = vld [vmem:[#allocation7 + $0x8c] sm:$0xf0] }
 0x1ee   :  { %v1207_v59 = vmul.f32 %v4751_v53, %v1197_v52  ;;  %1774 = vmatpush.bf16.msra.mxu3 %v3843_v11  ;;  %v3815_v53 = vor.u32 %v4562_v50, %v3814_v15  ;;  %v3816_v52 = vld [vmem:[#allocation7 + $0xb0] sm:$0xf0]  ;;  %v3799_v49 = vor.u32 %v4558_v13, %v3798_v18  ;;  %v3790_v8 = vld [vmem:[#allocation7 + $0x68] sm:$0xf]  ;;  %v4555_v1 = vld [vmem:[#allocation7 + $0x74] sm:$0xf0] }
 0x1ef   :  { %v3784_v12 = vld [vmem:[#allocation7 + $0x70] sm:$0xf0]  ;;  %v3791_v6 = vor.u32 %v4555_v1, %v3790_v8  ;;  %v4553_v11 = vld [vmem:[#allocation7 + $0x6c] sm:$0xf]  ;;  %v3792_v15 = vld [vmem:[#allocation7 + $0x78] sm:$0xf0] }
 0x1f0   :  { %1732 = vmatpush.bf16.msra.mxu0 %v3831_v23  ;;  %v4554_v23 = vld [vmem:[#allocation7 + $0x6c] sm:$0xf0]  ;;  %v3787_v7 = vor.u32 %v4552_v24, %v3784_v12  ;;  %v3795_v50 = vor.u32 %v4553_v11, %v3792_v15  ;;  %v3776_v18 = vld [vmem:[#allocation7 + $0x58] sm:$0xf0]  ;;  %v3758_v10 = vld [vmem:[#allocation7 + $0x28] sm:$0xf] }
 0x1f1   :  { %v3783_v60 = vor.u32 %v4554_v23, %v3782_v56  ;;  %v4547_v58 = vld [vmem:[#allocation7 + $0x34] sm:$0xf0]  ;;  %v3760_v12 = vld [vmem:[#allocation7 + $0x38] sm:$0xf0]  ;;  %v3734_v25 = vld [vmem:[#allocation7] sm:$0xf] }
 0x1f2   :  { %v3759_v24 = vor.u32 %v4547_v58, %v3758_v10  ;;  %v4540_v26 = vld [vmem:[#allocation7 + $0x4] sm:$0xf] }
 0x1f3   :  { %v4753_v21 = vpop.eup %4752 }
 0x1f4   :  { %v1208_v17 = vmul.f32 %v4753_v21, %v1198_v16  ;;  %v3822_v16 = vld [vmem:[#allocation7 + $0xa8] sm:$0xf]  ;;  %v4563_v21 = vld [vmem:[#allocation7 + $0xb4] sm:$0xf0]  ;;  %1733 = vmatpush.bf16.msra.mxu0 %v3815_v53  ;;  %v4550_v53 = vld [vmem:[#allocation7 + $0x4c] sm:$0xf0] }
 0x1f6   :  { %v1226_v22 = vpack.c.bf16 %v1208_v17, %v1207_v59  ;;  %v3819_v59 = vor.u32 %v4560_v19, %v3816_v52  ;;  %v3823_v17 = vor.u32 %v4563_v21, %v3822_v16  ;;  %v3766_v19 = vld [vmem:[#allocation7 + $0x40] sm:$0xf]  ;;  %v4548_v52 = vld [vmem:[#allocation7 + $0x44] sm:$0xf]  ;;  %v3768_v21 = vld [vmem:[#allocation7 + $0x50] sm:$0xf0] }
 0x1f7   :  { %v3767_v16 = vor.u32 %v4550_v53, %v3766_v19  ;;  %v3736_v19 = vld [vmem:[#allocation7 + $0x10] sm:$0xf0]  ;;  %v3742_v53 = vld [vmem:[#allocation7 + $0x8] sm:$0xf] }
 0x1f8   :  { %1427 = vmatmul.bf16.vlgmr.msrb.gmra.mxu0 %v1226_v22  ;;  %1441 = vmatmul.bf16.vlgmr.msrb.gmra.mxu1 %v1226_v22 }
 0x1f9   :  { %1455 = vmatmul.bf16.vlgmr.msrb.gmra.mxu2 %v1226_v22  ;;  %1469 = vmatmul.bf16.vlgmr.msrb.gmra.mxu3 %v1226_v22  ;;  %v4561_v22 = vld [vmem:[#allocation7 + $0xac] sm:$0xf] }
 0x1fa   :  { %v3827_v54 = vor.u32 %v4561_v22, %v3824_v61  ;;  %1747 = vmatpush.bf16.msra.mxu1 %v3819_v59  ;;  %1761 = vmatpush.bf16.msra.mxu2 %v3823_v17  ;;  %v3774_v59 = vld [vmem:[#allocation7 + $0x48] sm:$0xf]  ;;  %v4551_v17 = vld [vmem:[#allocation7 + $0x54] sm:$0xf0]  ;;  %v3771_v22 = vor.u32 %v4548_v52, %v3768_v21  ;;  %v3739_v52 = vor.u32 %v4540_v26, %v3736_v19  ;;  %v4541_v21 = vld [vmem:[#allocation7 + $0xc] sm:$0xf] }
 0x1fb   :  { %1734 = vmatpush.bf16.msra.mxu0 %v3799_v49  ;;  %v3775_v61 = vor.u32 %v4551_v17, %v3774_v59  ;;  %v4546_v49 = vld [vmem:[#allocation7 + $0x2c] sm:$0xf0]  ;;  %v3744_v59 = vld [vmem:[#allocation7 + $0x18] sm:$0xf0] }
 0x1fc   :  { %1775 = vmatpush.bf16.msra.mxu3 %v3827_v54  ;;  %v4549_v54 = vld [vmem:[#allocation7 + $0x4c] sm:$0xf] }
 0x1fd   :  { %v3779_v13 = vor.u32 %v4549_v54, %v3776_v18  ;;  %v351_v54 = vadd.f32 %v5036_v29, %v5126_v57  ;;  %v400_v18 = vadd.f32 %v5038_v30, %v5129_v62 }
 0x1fe   :  { %1748 = vmatpush.bf16.msra.mxu1 %v3803_v14  ;;  %1762 = vmatpush.bf16.msra.mxu2 %v3807_v3  ;;  %v3751_v14 = vor.u32 %v4546_v49, %v3750_v55  ;;  %v3752_v3 = vld [vmem:[#allocation7 + $0x30] sm:$0xf0] }
 0x1ff   :  { %1735 = vmatpush.bf16.msra.mxu0 %v3783_v60  ;;  %v3755_v23 = vor.u32 %v4544_v20, %v3752_v3  ;;  %v4545_v60 = vld [vmem:[#allocation7 + $0x2c] sm:$0xf] }
 0x200   :  { %1776 = vmatpush.bf16.msra.mxu3 %v3811_v0 }
 0x202   :  { %1749 = vmatpush.bf16.msra.mxu1 %v3787_v7  ;;  %1763 = vmatpush.bf16.msra.mxu2 %v3791_v6  ;;  %v3763_v7 = vor.u32 %v4545_v60, %v3760_v12  ;;  %v4542_v6 = vld [vmem:[#allocation7 + $0xc] sm:$0xf0] }
 0x203   :  { %1736 = vmatpush.bf16.msra.mxu0 %v3767_v16  ;;  %v4543_v16 = vld [vmem:[#allocation7 + $0x14] sm:$0xf0] }
 0x204   :  { %1777 = vmatpush.bf16.msra.mxu3 %v3795_v50  ;;  %v3735_v50 = vor.u32 %v4542_v6, %v3734_v25  ;;  %v3743_v17 = vor.u32 %v4543_v16, %v3742_v53 }
 0x206   :  { %1750 = vmatpush.bf16.msra.mxu1 %v3771_v22  ;;  %1764 = vmatpush.bf16.msra.mxu2 %v3775_v61  ;;  %v3747_v22 = vor.u32 %v4541_v21, %v3744_v59  ;;  %v447_v61 = vadd.f32 %v5032_v27, %v5140_v4  ;;  %v496_v27 = vadd.f32 %v5034_v28, %v5145_v51 }
 0x207   :  { %1737 = vmatpush.bf16.msra.mxu0 %v3751_v14 }
 0x208   :  { %1778 = vmatpush.bf16.msra.mxu3 %v3779_v13 }
 0x20a   :  { %1751 = vmatpush.bf16.msra.mxu1 %v3755_v23  ;;  %1765 = vmatpush.bf16.msra.mxu2 %v3759_v24  ;;  %v449_v23 = vadd.f32 %v5040_v31, %v5140_v4  ;;  %v498_v24 = vadd.f32 %v5042_v32, %v5145_v51 }
 0x20b   :  { %1738 = vmatpush.bf16.msra.mxu0 %v3735_v50 }
 0x20c   :  { %1779 = vmatpush.bf16.msra.mxu3 %v3763_v7 }
 0x20e   :  { %1752 = vmatpush.bf16.msra.mxu1 %v3739_v52  ;;  %1766 = vmatpush.bf16.msra.mxu2 %v3743_v17 }
 0x210   :  { %1780 = vmatpush.bf16.msra.mxu3 %v3747_v22 }
 0x275   :  { %v1428_v0 = vpop.f32.mrf.mxu0  ;;  %v1442_v56 = vpop.f32.mrf.mxu1 }
 0x276   :  { %v1475_v8 = vadd.f32 %v1428_v0, %v349_v5  ;;  %v1476_v1 = vadd.f32 %v1442_v56, %v398_v2 }
 0x278   :  { %v1485_v11 = vmul.f32 0.5, %v1475_v8  ;;  %v1493_v15 = vmul.f32 0.5, %v1476_v1 }
 0x27a   :  { %4754 = vtanh.f32 %v1485_v11 }
 0x27b   :  { %4756 = vtanh.f32 %v1493_v15 }
 0x27c   :  { %v1456_v13 = vpop.f32.mrf.mxu2  ;;  %v1470_v55 = vpop.f32.mrf.mxu3 }
 0x27d   :  { %v1477_v49 = vadd.f32 %v1456_v13, %v447_v61  ;;  %v1430_v20 = vpop.f32.mrf.mxu0  ;;  %v1444_v5 = vpop.f32.mrf.mxu1  ;;  %v1478_v56 = vadd.f32 %v1470_v55, %v496_v27  ;;  %v4602_v27 = vld [vmem:[#allocation7 + $0xec] sm:$0xf0] }
 0x27e   :  { %v1479_v2 = vadd.f32 %v1430_v20, %v351_v54  ;;  %v1480_v14 = vadd.f32 %v1444_v5, %v400_v18 }
 0x27f   :  { %4758 = vtanh.f32 %v1477_v49  ;;  %v1503_v7 = vmul.f32 0.5, %v1478_v56 }
 0x280   :  { %v4755_v3 = vpop.eup %4754  ;;  %v1486_v10 = vmul.f32 0.5, %v1479_v2  ;;  %v1494_v58 = vmul.f32 0.5, %v1480_v14 }
 0x281   :  { %v4757_v29 = vpop.eup %4756  ;;  %v1489_v0 = vmul.f32 0.5, %v4755_v3  ;;  %v4600_v3 = vld [vmem:[#allocation7 + $0xe4] sm:$0xf] }
 0x282   :  { %v1497_v30 = vmul.f32 0.5, %v4757_v29  ;;  %4760 = vtanh.f32 %v1486_v10  ;;  %v3982_v29 = vld [vmem:[#allocation7 + $0xe8] sm:$0xf] }
 0x283   :  { %v1491_v60 = vadd.f32 0.5, %v1489_v0  ;;  %4762 = vtanh.f32 %v1494_v58  ;;  %v3976_v58 = vld [vmem:[#allocation7 + $0xf0] sm:$0xf0]  ;;  %v4603_v0 = vld [vmem:[#allocation7 + $0xf4] sm:$0xf0] }
 0x284   :  { %v1499_v12 = vadd.f32 0.5, %v1497_v30  ;;  %v1458_v8 = vpop.f32.mrf.mxu2  ;;  %v1472_v28 = vpop.f32.mrf.mxu3  ;;  %v3979_v56 = vor.u32 %v4600_v3, %v3976_v58  ;;  %v3983_v30 = vor.u32 %v4603_v0, %v3982_v29  ;;  %v3936_v58 = vld [vmem:[#allocation7 + $0x98] sm:$0xf0]  ;;  %v3910_v0 = vld [vmem:[#allocation7 + $0x60] sm:$0xf] }
 0x285   :  { %v4759_v1 = vpop.eup %4758  ;;  %v1481_v25 = vadd.f32 %v1458_v8, %v449_v23  ;;  %v1482_v6 = vadd.f32 %v1472_v28, %v498_v24  ;;  %v4601_v23 = vld [vmem:[#allocation7 + $0xec] sm:$0xf]  ;;  %v3984_v24 = vld [vmem:[#allocation7 + $0xf8] sm:$0xf0]  ;;  %v4598_v8 = vld [vmem:[#allocation7 + $0xcc] sm:$0xf0] }
 0x286   :  { %v1511_v26 = vmul.f32 %v1499_v12, %v5180_v63  ;;  %v1513_v11 = vmul.f32 %v4759_v1, %v1491_v60  ;;  %v3987_v60 = vor.u32 %v4601_v23, %v3984_v24  ;;  %2057 = vmatpush.bf16.msrb.mxu1 %v3979_v56  ;;  %2071 = vmatpush.bf16.msrb.mxu2 %v3983_v30  ;;  %v3958_v12 = vld [vmem:[#allocation7 + $0xc0] sm:$0xf]  ;;  %v4596_v28 = vld [vmem:[#allocation7 + $0xc4] sm:$0xf]  ;;  %v4586_v56 = vld [vmem:[#allocation7 + $0x6c] sm:$0xf0] }
 0x287   :  { %4764 = vtanh.f32 %v1481_v25  ;;  %v1504_v15 = vmul.f32 0.5, %v1482_v6  ;;  %v3959_v1 = vor.u32 %v4598_v8, %v3958_v12  ;;  %v3966_v25 = vld [vmem:[#allocation7 + $0xc8] sm:$0xf]  ;;  %v4599_v6 = vld [vmem:[#allocation7 + $0xd4] sm:$0xf0]  ;;  %v3911_v23 = vor.u32 %v4586_v56, %v3910_v0 }
 0x288   :  { %v4761_v50 = vpop.eup %4760  ;;  %v5204_v19 = vadd.f32 %v1513_v11, %v1511_v26  ;;  %4766 = vtanh.f32 %v1503_v7  ;;  %2085 = vmatpush.bf16.msrb.mxu3 %v3987_v60  ;;  %v3960_v7 = vld [vmem:[#allocation7 + $0xd0] sm:$0xf0]  ;;  %v3967_v11 = vor.u32 %v4599_v6, %v3966_v25  ;;  %v4584_v30 = vld [vmem:[#allocation7 + $0x64] sm:$0xf]  ;;  %v3918_v60 = vld [vmem:[#allocation7 + $0x68] sm:$0xf] }
 0x289   :  { %v4763_v31 = vpop.eup %4762  ;;  %v1490_v32 = vmul.f32 0.5, %v4761_v50  ;;  %4768 = vtanh.f32 %v1504_v15  ;;  %v3963_v26 = vor.u32 %v4596_v28, %v3960_v7  ;;  %v4597_v15 = vld [vmem:[#allocation7 + $0xcc] sm:$0xf]  ;;  %v3968_v50 = vld [vmem:[#allocation7 + $0xd8] sm:$0xf0] }
 0x28a   :  { %v1498_v53 = vmul.f32 0.5, %v4763_v31  ;;  %4770 = vtanh.f32 %v5204_v19  ;;  %v3971_v31 = vor.u32 %v4597_v15, %v3968_v50  ;;  %2072 = vmatpush.bf16.msrb.mxu2 %v3967_v11  ;;  %v3912_v24 = vld [vmem:[#allocation7 + $0x70] sm:$0xf0]  ;;  %v4587_v12 = vld [vmem:[#allocation7 + $0x74] sm:$0xf0] }
 0x28b   :  { %v1492_v52 = vadd.f32 0.5, %v1490_v32  ;;  %2058 = vmatpush.bf16.msrb.mxu1 %v3963_v26  ;;  %v3942_v32 = vld [vmem:[#allocation7 + $0xa0] sm:$0xf]  ;;  %v3915_v8 = vor.u32 %v4584_v30, %v3912_v24  ;;  %v3919_v28 = vor.u32 %v4587_v12, %v3918_v60  ;;  %v3920_v7 = vld [vmem:[#allocation7 + $0x78] sm:$0xf0] }
 0x28c   :  { %v1500_v16 = vadd.f32 0.5, %v1498_v53  ;;  %v4594_v53 = vld [vmem:[#allocation7 + $0xac] sm:$0xf0]  ;;  %2086 = vmatpush.bf16.msrb.mxu3 %v3971_v31  ;;  %v3894_v6 = vld [vmem:[#allocation7 + $0x40] sm:$0xf] }
 0x28d   :  { %v4765_v21 = vpop.eup %4764  ;;  %v4582_v26 = vld [vmem:[#allocation7 + $0x4c] sm:$0xf0]  ;;  %v4580_v11 = vld [vmem:[#allocation7 + $0x44] sm:$0xf]  ;;  %v3896_v50 = vld [vmem:[#allocation7 + $0x50] sm:$0xf0] }
 0x28e   :  { %v1512_v59 = vmul.f32 %v1500_v16, %v5184_v9  ;;  %v1514_v17 = vmul.f32 %v4765_v21, %v1492_v52  ;;  %v4767_v22 = vpop.eup %4766  ;;  %v3974_v9 = vld [vmem:[#allocation7 + $0xe0] sm:$0xf]  ;;  %v4592_v52 = vld [vmem:[#allocation7 + $0xa4] sm:$0xf]  ;;  %v3943_v16 = vor.u32 %v4594_v53, %v3942_v32  ;;  %v3944_v21 = vld [vmem:[#allocation7 + $0xb0] sm:$0xf0]  ;;  %v3895_v15 = vor.u32 %v4582_v26, %v3894_v6 }
 0x28f   :  { %v4769_v61 = vpop.eup %4768  ;;  %v1507_v54 = vmul.f32 0.5, %v4767_v22  ;;  %v3975_v10 = vor.u32 %v4602_v27, %v3974_v9  ;;  %v3947_v22 = vor.u32 %v4592_v52, %v3944_v21  ;;  %v4591_v9 = vld [vmem:[#allocation7 + $0x94] sm:$0xf0]  ;;  %v3902_v31 = vld [vmem:[#allocation7 + $0x48] sm:$0xf]  ;;  %v3899_v53 = vor.u32 %v4580_v11, %v3896_v50 }
 0x290   :  { %v5208_v63 = vadd.f32 %v1514_v17, %v1512_v59  ;;  %v1508_v18 = vmul.f32 0.5, %v4769_v61  ;;  %v4771_v13 = vpop.eup %4770  ;;  %v3950_v59 = vld [vmem:[#allocation7 + $0xa8] sm:$0xf]  ;;  %v4595_v17 = vld [vmem:[#allocation7 + $0xb4] sm:$0xf0]  ;;  %v452_v6 = vadd.f32 %v5048_v35, %v5140_v4  ;;  %v356_v26 = vadd.f32 %v5052_v37, %v5126_v57 }
 0x291   :  { %v1509_v55 = vadd.f32 0.5, %v1507_v54  ;;  %2043 = vmatpush.bf16.msrb.mxu0 %v3975_v10  ;;  %v3951_v61 = vor.u32 %v4595_v17, %v3950_v59  ;;  %v4593_v54 = vld [vmem:[#allocation7 + $0xac] sm:$0xf]  ;;  %2059 = vmatpush.bf16.msrb.mxu1 %v3947_v22  ;;  %v4583_v32 = vld [vmem:[#allocation7 + $0x54] sm:$0xf0]  ;;  %v405_v11 = vadd.f32 %v5054_v38, %v5129_v62  ;;  %v501_v35 = vadd.f32 %v5050_v36, %v5145_v51 }
 0x292   :  { %4772 = vtanh.f32 %v5208_v63  ;;  %v1510_v49 = vadd.f32 0.5, %v1508_v18  ;;  %v3952_v18 = vld [vmem:[#allocation7 + $0xb8] sm:$0xf0]  ;;  %v4589_v10 = vld [vmem:[#allocation7 + $0x8c] sm:$0xf]  ;;  %v3903_v52 = vor.u32 %v4583_v32, %v3902_v31 }
 0x293   :  { %v1519_v5 = vmul.f32 %v4771_v13, %v1509_v55  ;;  %v3955_v13 = vor.u32 %v4593_v54, %v3952_v18  ;;  %2073 = vmatpush.bf16.msrb.mxu2 %v3951_v61  ;;  %v3926_v55 = vld [vmem:[#allocation7 + $0x80] sm:$0xf]  ;;  %v3939_v29 = vor.u32 %v4589_v10, %v3936_v58  ;;  %v3904_v21 = vld [vmem:[#allocation7 + $0x58] sm:$0xf0]  ;;  %v4578_v22 = vld [vmem:[#allocation7 + $0x2c] sm:$0xf0]  ;;  %v354_v54 = vadd.f32 %v5044_v33, %v5126_v57 }
 0x294   :  { %v3878_v17 = vld [vmem:[#allocation7 + $0x20] sm:$0xf]  ;;  %v4576_v61 = vld [vmem:[#allocation7 + $0x24] sm:$0xf]  ;;  %v403_v18 = vadd.f32 %v5046_v34, %v5129_v62  ;;  %v4574_v0 = vld [vmem:[#allocation7 + $0xc] sm:$0xf0] }
 0x295   :  { %2044 = vmatpush.bf16.msrb.mxu0 %v3959_v1  ;;  %2087 = vmatpush.bf16.msrb.mxu3 %v3955_v13  ;;  %v4585_v1 = vld [vmem:[#allocation7 + $0x6c] sm:$0xf]  ;;  %v3879_v13 = vor.u32 %v4578_v22, %v3878_v17  ;;  %v3862_v33 = vld [vmem:[#allocation7] sm:$0xf]  ;;  %v4572_v34 = vld [vmem:[#allocation7 + $0x4] sm:$0xf] }
 0x296   :  { %v3923_v25 = vor.u32 %v4585_v1, %v3920_v7  ;;  %v3864_v24 = vld [vmem:[#allocation7 + $0x10] sm:$0xf0]  ;;  %v3870_v60 = vld [vmem:[#allocation7 + $0x8] sm:$0xf]  ;;  %v3872_v1 = vld [vmem:[#allocation7 + $0x18] sm:$0xf0] }
 0x297   :  { %v3867_v12 = vor.u32 %v4572_v34, %v3864_v24 }
 0x298   :  { %v4773_v20 = vpop.eup %4772 }
 0x299   :  { %v1520_v2 = vmul.f32 %v4773_v20, %v1510_v49  ;;  %2045 = vmatpush.bf16.msrb.mxu0 %v3943_v16  ;;  %v4590_v49 = vld [vmem:[#allocation7 + $0x8c] sm:$0xf0]  ;;  %v4588_v20 = vld [vmem:[#allocation7 + $0x84] sm:$0xf]  ;;  %2088 = vmatpush.bf16.msrb.mxu3 %v3939_v29  ;;  %v4581_v16 = vld [vmem:[#allocation7 + $0x4c] sm:$0xf] }
 0x29a   :  { %v3907_v59 = vor.u32 %v4581_v16, %v3904_v21 }
 0x29b   :  { %v1538_v14 = vpack.c.bf16 %v1520_v2, %v1519_v5  ;;  %v3927_v5 = vor.u32 %v4590_v49, %v3926_v55  ;;  %v3928_v2 = vld [vmem:[#allocation7 + $0x90] sm:$0xf0]  ;;  %v3886_v49 = vld [vmem:[#allocation7 + $0x28] sm:$0xf] }
 0x29c   :  { %v3931_v27 = vor.u32 %v4588_v20, %v3928_v2  ;;  %v3880_v55 = vld [vmem:[#allocation7 + $0x30] sm:$0xf0]  ;;  %v4579_v20 = vld [vmem:[#allocation7 + $0x34] sm:$0xf0] }
 0x29d   :  { %1739 = vmatmul.bf16.vlgmr.msra.gmra.mxu0 %v1538_v14  ;;  %1753 = vmatmul.bf16.vlgmr.msra.gmra.mxu1 %v1538_v14 }
 0x29e   :  { %1767 = vmatmul.bf16.vlgmr.msra.gmra.mxu2 %v1538_v14  ;;  %1781 = vmatmul.bf16.vlgmr.msra.gmra.mxu3 %v1538_v14  ;;  %v3934_v14 = vld [vmem:[#allocation7 + $0x88] sm:$0xf] }
 0x29f   :  { %v3935_v3 = vor.u32 %v4591_v9, %v3934_v14  ;;  %2046 = vmatpush.bf16.msrb.mxu0 %v3927_v5  ;;  %2060 = vmatpush.bf16.msrb.mxu1 %v3931_v27  ;;  %v3883_v14 = vor.u32 %v4576_v61, %v3880_v55  ;;  %v3887_v9 = vor.u32 %v4579_v20, %v3886_v49  ;;  %v4577_v27 = vld [vmem:[#allocation7 + $0x2c] sm:$0xf] }
 0x2a0   :  { %2089 = vmatpush.bf16.msrb.mxu3 %v3923_v25 }
 0x2a1   :  { %2074 = vmatpush.bf16.msrb.mxu2 %v3935_v3  ;;  %v3888_v3 = vld [vmem:[#allocation7 + $0x38] sm:$0xf0] }
 0x2a2   :  { %v3891_v29 = vor.u32 %v4577_v27, %v3888_v3 }
 0x2a3   :  { %2047 = vmatpush.bf16.msrb.mxu0 %v3911_v23  ;;  %2061 = vmatpush.bf16.msrb.mxu1 %v3915_v8  ;;  %v3863_v23 = vor.u32 %v4574_v0, %v3862_v33  ;;  %v4575_v8 = vld [vmem:[#allocation7 + $0x14] sm:$0xf0] }
 0x2a4   :  { %2090 = vmatpush.bf16.msrb.mxu3 %v3907_v59  ;;  %v3871_v7 = vor.u32 %v4575_v8, %v3870_v60 }
 0x2a5   :  { %2075 = vmatpush.bf16.msrb.mxu2 %v3919_v28  ;;  %v4573_v28 = vld [vmem:[#allocation7 + $0xc] sm:$0xf] }
 0x2a6   :  { %v3875_v25 = vor.u32 %v4573_v28, %v3872_v1 }
 0x2a7   :  { %2048 = vmatpush.bf16.msrb.mxu0 %v3895_v15  ;;  %2062 = vmatpush.bf16.msrb.mxu1 %v3899_v53 }
 0x2a8   :  { %2091 = vmatpush.bf16.msrb.mxu3 %v3891_v29 }
 0x2a9   :  { %2076 = vmatpush.bf16.msrb.mxu2 %v3903_v52 }
 0x2ab   :  { %2049 = vmatpush.bf16.msrb.mxu0 %v3879_v13  ;;  %2063 = vmatpush.bf16.msrb.mxu1 %v3883_v14 }
 0x2ac   :  { %2092 = vmatpush.bf16.msrb.mxu3 %v3875_v25 }
 0x2ad   :  { %2077 = vmatpush.bf16.msrb.mxu2 %v3887_v9 }
 0x2af   :  { %2050 = vmatpush.bf16.msrb.mxu0 %v3863_v23  ;;  %2064 = vmatpush.bf16.msrb.mxu1 %v3867_v12 }
 0x2b1   :  { %2078 = vmatpush.bf16.msrb.mxu2 %v3871_v7 }
 0x31a   :  { %v1740_v5 = vpop.f32.mrf.mxu0  ;;  %v1754_v2 = vpop.f32.mrf.mxu1 }
 0x31b   :  { %v1787_v10 = vadd.f32 %v1740_v5, %v354_v54  ;;  %v1788_v58 = vadd.f32 %v1754_v2, %v403_v18  ;;  %v454_v54 = vadd.f32 %v5056_v39, %v5140_v4  ;;  %v503_v18 = vadd.f32 %v5058_v40, %v5145_v51 }
 0x31d   :  { %v1797_v56 = vmul.f32 0.5, %v1787_v10  ;;  %v1805_v30 = vmul.f32 0.5, %v1788_v58 }
 0x31f   :  { %4774 = vtanh.f32 %v1797_v56 }
 0x320   :  { %4776 = vtanh.f32 %v1805_v30 }
 0x321   :  { %v1768_v15 = vpop.f32.mrf.mxu2  ;;  %v1782_v50 = vpop.f32.mrf.mxu3 }
 0x322   :  { %v1789_v31 = vadd.f32 %v1768_v15, %v452_v6  ;;  %v1742_v32 = vpop.f32.mrf.mxu0  ;;  %v1756_v53 = vpop.f32.mrf.mxu1  ;;  %v1790_v61 = vadd.f32 %v1782_v50, %v501_v35  ;;  %v4632_v15 = vld [vmem:[#allocation7 + $0xe4] sm:$0xf]  ;;  %v4633_v35 = vld [vmem:[#allocation7 + $0xec] sm:$0xf] }
 0x323   :  { %v1791_v52 = vadd.f32 %v1742_v32, %v356_v26  ;;  %v1792_v16 = vadd.f32 %v1756_v53, %v405_v11  ;;  %v4634_v11 = vld [vmem:[#allocation7 + $0xec] sm:$0xf0]  ;;  %v4110_v32 = vld [vmem:[#allocation7 + $0xe8] sm:$0xf]  ;;  %v4635_v53 = vld [vmem:[#allocation7 + $0xf4] sm:$0xf0] }
 0x324   :  { %4778 = vtanh.f32 %v1789_v31  ;;  %v1815_v5 = vmul.f32 0.5, %v1790_v61  ;;  %v4104_v31 = vld [vmem:[#allocation7 + $0xf0] sm:$0xf0] }
 0x325   :  { %v4775_v21 = vpop.eup %4774  ;;  %v1798_v59 = vmul.f32 0.5, %v1791_v52  ;;  %v1806_v17 = vmul.f32 0.5, %v1792_v16  ;;  %v4107_v52 = vor.u32 %v4632_v15, %v4104_v31  ;;  %v4111_v16 = vor.u32 %v4635_v53, %v4110_v32  ;;  %v4040_v15 = vld [vmem:[#allocation7 + $0x70] sm:$0xf0]  ;;  %v4619_v31 = vld [vmem:[#allocation7 + $0x74] sm:$0xf0] }
 0x326   :  { %v4777_v37 = vpop.eup %4776  ;;  %v1801_v22 = vmul.f32 0.5, %v4775_v21  ;;  %v4112_v21 = vld [vmem:[#allocation7 + $0xf8] sm:$0xf0] }
 0x327   :  { %v1809_v38 = vmul.f32 0.5, %v4777_v37  ;;  %4780 = vtanh.f32 %v1798_v59  ;;  %v4115_v59 = vor.u32 %v4633_v35, %v4112_v21  ;;  %2369 = vmatpush.bf16.msra.mxu1 %v4107_v52  ;;  %2383 = vmatpush.bf16.msra.mxu2 %v4111_v16  ;;  %v4630_v37 = vld [vmem:[#allocation7 + $0xcc] sm:$0xf0]  ;;  %v4617_v52 = vld [vmem:[#allocation7 + $0x6c] sm:$0xf] }
 0x328   :  { %v1803_v13 = vadd.f32 0.5, %v1801_v22  ;;  %4782 = vtanh.f32 %v1806_v17  ;;  %v4086_v17 = vld [vmem:[#allocation7 + $0xc0] sm:$0xf]  ;;  %v4628_v22 = vld [vmem:[#allocation7 + $0xc4] sm:$0xf] }
 0x329   :  { %v1811_v55 = vadd.f32 0.5, %v1809_v38  ;;  %v1770_v49 = vpop.f32.mrf.mxu2  ;;  %v1784_v36 = vpop.f32.mrf.mxu3  ;;  %2397 = vmatpush.bf16.msra.mxu3 %v4115_v59  ;;  %v4087_v61 = vor.u32 %v4630_v37, %v4086_v17  ;;  %v4088_v38 = vld [vmem:[#allocation7 + $0xd0] sm:$0xf0]  ;;  %v4048_v16 = vld [vmem:[#allocation7 + $0x78] sm:$0xf0] }
 0x32a   :  { %v4779_v20 = vpop.eup %4778  ;;  %v1793_v2 = vadd.f32 %v1770_v49, %v454_v54  ;;  %v1794_v14 = vadd.f32 %v1784_v36, %v503_v18  ;;  %v4094_v54 = vld [vmem:[#allocation7 + $0xc8] sm:$0xf]  ;;  %v4631_v18 = vld [vmem:[#allocation7 + $0xd4] sm:$0xf0]  ;;  %v4629_v49 = vld [vmem:[#allocation7 + $0xcc] sm:$0xf]  ;;  %v4051_v35 = vor.u32 %v4617_v52, %v4048_v16 }
 0x32b   :  { %v1823_v9 = vmul.f32 %v1811_v55, %v5204_v19  ;;  %v1825_v27 = vmul.f32 %v4779_v20, %v1803_v13  ;;  %v4091_v13 = vor.u32 %v4628_v22, %v4088_v38  ;;  %v4095_v55 = vor.u32 %v4631_v18, %v4094_v54  ;;  %v4096_v36 = vld [vmem:[#allocation7 + $0xd8] sm:$0xf0]  ;;  %v4022_v21 = vld [vmem:[#allocation7 + $0x40] sm:$0xf]  ;;  %v4614_v59 = vld [vmem:[#allocation7 + $0x4c] sm:$0xf0] }
 0x32c   :  { %4784 = vtanh.f32 %v1793_v2  ;;  %v1816_v3 = vmul.f32 0.5, %v1794_v14  ;;  %v4099_v20 = vor.u32 %v4629_v49, %v4096_v36  ;;  %v4626_v2 = vld [vmem:[#allocation7 + $0xac] sm:$0xf0]  ;;  %v4624_v14 = vld [vmem:[#allocation7 + $0xa4] sm:$0xf]  ;;  %v4023_v37 = vor.u32 %v4614_v59, %v4022_v21 }
 0x32d   :  { %v4781_v10 = vpop.eup %4780  ;;  %v5228_v58 = vadd.f32 %v1825_v27, %v1823_v9  ;;  %4786 = vtanh.f32 %v1815_v5  ;;  %2370 = vmatpush.bf16.msra.mxu1 %v4091_v13  ;;  %2384 = vmatpush.bf16.msra.mxu2 %v4095_v55  ;;  %v4070_v5 = vld [vmem:[#allocation7 + $0xa0] sm:$0xf]  ;;  %v4072_v27 = vld [vmem:[#allocation7 + $0xb0] sm:$0xf0]  ;;  %v4612_v17 = vld [vmem:[#allocation7 + $0x44] sm:$0xf] }
 0x32e   :  { %v4783_v39 = vpop.eup %4782  ;;  %v1802_v40 = vmul.f32 0.5, %v4781_v10  ;;  %4788 = vtanh.f32 %v1816_v3  ;;  %2398 = vmatpush.bf16.msra.mxu3 %v4099_v20  ;;  %v4071_v9 = vor.u32 %v4626_v2, %v4070_v5  ;;  %v4078_v3 = vld [vmem:[#allocation7 + $0xa8] sm:$0xf]  ;;  %v4627_v10 = vld [vmem:[#allocation7 + $0xb4] sm:$0xf0]  ;;  %v359_v2 = vadd.f32 %v5060_v41, %v5126_v57 }
 0x32f   :  { %v1810_v29 = vmul.f32 0.5, %v4783_v39  ;;  %4790 = vtanh.f32 %v5228_v58  ;;  %v4075_v39 = vor.u32 %v4624_v14, %v4072_v27  ;;  %v4024_v22 = vld [vmem:[#allocation7 + $0x50] sm:$0xf0]  ;;  %v4615_v38 = vld [vmem:[#allocation7 + $0x54] sm:$0xf0]  ;;  %v408_v14 = vadd.f32 %v5062_v42, %v5129_v62 }
 0x330   :  { %v1804_v33 = vadd.f32 0.5, %v1802_v40  ;;  %v4079_v40 = vor.u32 %v4627_v10, %v4078_v3  ;;  %v4027_v54 = vor.u32 %v4612_v17, %v4024_v22  ;;  %v4613_v13 = vld [vmem:[#allocation7 + $0x4c] sm:$0xf]  ;;  %v4032_v55 = vld [vmem:[#allocation7 + $0x58] sm:$0xf0] }
 0x331   :  { %v1812_v0 = vadd.f32 0.5, %v1810_v29  ;;  %v4625_v29 = vld [vmem:[#allocation7 + $0xac] sm:$0xf]  ;;  %2371 = vmatpush.bf16.msra.mxu1 %v4075_v39  ;;  %v4035_v49 = vor.u32 %v4613_v13, %v4032_v55  ;;  %v4006_v36 = vld [vmem:[#allocation7 + $0x20] sm:$0xf] }
 0x332   :  { %v4785_v34 = vpop.eup %4784  ;;  %2385 = vmatpush.bf16.msra.mxu2 %v4079_v40  ;;  %v4610_v20 = vld [vmem:[#allocation7 + $0x2c] sm:$0xf0]  ;;  %v4608_v5 = vld [vmem:[#allocation7 + $0x24] sm:$0xf]  ;;  %v4008_v27 = vld [vmem:[#allocation7 + $0x30] sm:$0xf0] }
 0x333   :  { %v1824_v56 = vmul.f32 %v1812_v0, %v5208_v63  ;;  %v1826_v30 = vmul.f32 %v4785_v34, %v1804_v33  ;;  %v4787_v23 = vpop.eup %4786  ;;  %v4102_v63 = vld [vmem:[#allocation7 + $0xe0] sm:$0xf]  ;;  %v4080_v33 = vld [vmem:[#allocation7 + $0xb8] sm:$0xf0]  ;;  %v4014_v3 = vld [vmem:[#allocation7 + $0x28] sm:$0xf] }
 0x334   :  { %v4789_v24 = vpop.eup %4788  ;;  %v1819_v60 = vmul.f32 0.5, %v4787_v23  ;;  %v4103_v50 = vor.u32 %v4634_v11, %v4102_v63  ;;  %v4083_v0 = vor.u32 %v4625_v29, %v4080_v33  ;;  %v4054_v34 = vld [vmem:[#allocation7 + $0x80] sm:$0xf]  ;;  %v4616_v63 = vld [vmem:[#allocation7 + $0x64] sm:$0xf]  ;;  %v4011_v29 = vor.u32 %v4608_v5, %v4008_v27 }
 0x335   :  { %v5232_v19 = vadd.f32 %v1826_v30, %v1824_v56  ;;  %v1820_v12 = vmul.f32 0.5, %v4789_v24  ;;  %v4791_v8 = vpop.eup %4790  ;;  %v4622_v56 = vld [vmem:[#allocation7 + $0x8c] sm:$0xf0]  ;;  %v4620_v30 = vld [vmem:[#allocation7 + $0x84] sm:$0xf]  ;;  %v4043_v32 = vor.u32 %v4616_v63, %v4040_v15  ;;  %v457_v15 = vadd.f32 %v5064_v43, %v5140_v4 }
 0x336   :  { %v1821_v28 = vadd.f32 0.5, %v1819_v60  ;;  %2355 = vmatpush.bf16.msra.mxu0 %v4103_v50  ;;  %2399 = vmatpush.bf16.msra.mxu3 %v4083_v0  ;;  %v4055_v23 = vor.u32 %v4622_v56, %v4054_v34  ;;  %v4056_v24 = vld [vmem:[#allocation7 + $0x90] sm:$0xf0]  ;;  %v4062_v60 = vld [vmem:[#allocation7 + $0x88] sm:$0xf]  ;;  %v506_v43 = vadd.f32 %v5066_v44, %v5145_v51 }
 0x337   :  { %4792 = vtanh.f32 %v5232_v19  ;;  %v1822_v1 = vadd.f32 0.5, %v1820_v12  ;;  %v4623_v12 = vld [vmem:[#allocation7 + $0x94] sm:$0xf0]  ;;  %v4046_v50 = vld [vmem:[#allocation7 + $0x68] sm:$0xf] }
 0x338   :  { %v1831_v25 = vmul.f32 %v4791_v8, %v1821_v28  ;;  %v4059_v8 = vor.u32 %v4620_v30, %v4056_v24  ;;  %v4063_v28 = vor.u32 %v4623_v12, %v4062_v60  ;;  %v4047_v53 = vor.u32 %v4619_v31, %v4046_v50  ;;  %v4611_v10 = vld [vmem:[#allocation7 + $0x34] sm:$0xf0]  ;;  %v4609_v0 = vld [vmem:[#allocation7 + $0x2c] sm:$0xf]  ;;  %v4016_v34 = vld [vmem:[#allocation7 + $0x38] sm:$0xf0] }
 0x339   :  { %v4015_v33 = vor.u32 %v4611_v10, %v4014_v3  ;;  %v3990_v41 = vld [vmem:[#allocation7] sm:$0xf]  ;;  %v4606_v24 = vld [vmem:[#allocation7 + $0xc] sm:$0xf0]  ;;  %v4604_v42 = vld [vmem:[#allocation7 + $0x4] sm:$0xf]  ;;  %v361_v50 = vadd.f32 %v5068_v45, %v5126_v57  ;;  %v410_v31 = vadd.f32 %v5070_v46, %v5129_v62 }
 0x33a   :  { %2356 = vmatpush.bf16.msra.mxu0 %v4087_v61  ;;  %2372 = vmatpush.bf16.msra.mxu1 %v4059_v8  ;;  %v4030_v61 = vld [vmem:[#allocation7 + $0x48] sm:$0xf]  ;;  %v3991_v8 = vor.u32 %v4606_v24, %v3990_v41 }
 0x33b   :  { %2386 = vmatpush.bf16.msra.mxu2 %v4063_v28  ;;  %v4031_v18 = vor.u32 %v4615_v38, %v4030_v61  ;;  %v3992_v28 = vld [vmem:[#allocation7 + $0x10] sm:$0xf0] }
 0x33d   :  { %v4793_v7 = vpop.eup %4792 }
 0x33e   :  { %v1832_v6 = vmul.f32 %v4793_v7, %v1822_v1  ;;  %2357 = vmatpush.bf16.msra.mxu0 %v4071_v9  ;;  %v4621_v1 = vld [vmem:[#allocation7 + $0x8c] sm:$0xf]  ;;  %v4064_v7 = vld [vmem:[#allocation7 + $0x98] sm:$0xf0]  ;;  %2373 = vmatpush.bf16.msra.mxu1 %v4043_v32  ;;  %v4007_v9 = vor.u32 %v4610_v20, %v4006_v36 }
 0x33f   :  { %2387 = vmatpush.bf16.msra.mxu2 %v4047_v53 }
 0x340   :  { %v1850_v26 = vpack.c.bf16 %v1832_v6, %v1831_v25  ;;  %v4067_v25 = vor.u32 %v4621_v1, %v4064_v7  ;;  %v4038_v6 = vld [vmem:[#allocation7 + $0x60] sm:$0xf]  ;;  %v3998_v1 = vld [vmem:[#allocation7 + $0x8] sm:$0xf]  ;;  %v3995_v7 = vor.u32 %v4604_v42, %v3992_v28 }
 0x342   :  { %2051 = vmatmul.bf16.vlgmr.msrb.gmra.mxu0 %v1850_v26  ;;  %2065 = vmatmul.bf16.vlgmr.msrb.gmra.mxu1 %v1850_v26 }
 0x343   :  { %2079 = vmatmul.bf16.vlgmr.msrb.gmra.mxu2 %v1850_v26  ;;  %2093 = vmatmul.bf16.vlgmr.msrb.gmra.mxu3 %v1850_v26  ;;  %v4618_v26 = vld [vmem:[#allocation7 + $0x6c] sm:$0xf0] }
 0x344   :  { %2358 = vmatpush.bf16.msra.mxu0 %v4055_v23  ;;  %2400 = vmatpush.bf16.msra.mxu3 %v4067_v25  ;;  %v4039_v11 = vor.u32 %v4618_v26, %v4038_v6  ;;  %v4019_v23 = vor.u32 %v4609_v0, %v4016_v34  ;;  %v4607_v25 = vld [vmem:[#allocation7 + $0x14] sm:$0xf0]  ;;  %v4605_v6 = vld [vmem:[#allocation7 + $0xc] sm:$0xf]  ;;  %v4000_v26 = vld [vmem:[#allocation7 + $0x18] sm:$0xf0] }
 0x345   :  { %2374 = vmatpush.bf16.msra.mxu1 %v4027_v54  ;;  %2388 = vmatpush.bf16.msra.mxu2 %v4031_v18  ;;  %v3999_v63 = vor.u32 %v4607_v25, %v3998_v1  ;;  %v459_v54 = vadd.f32 %v5072_v47, %v5140_v4  ;;  %v508_v18 = vadd.f32 %v5074_v48, %v5145_v51  ;;  %v4664_v25 = vld [vmem:[#allocation7 + $0xe4] sm:$0xf] }
 0x348   :  { %2359 = vmatpush.bf16.msra.mxu0 %v4039_v11  ;;  %2401 = vmatpush.bf16.msra.mxu3 %v4051_v35  ;;  %v4003_v11 = vor.u32 %v4605_v6, %v4000_v26  ;;  %v4232_v26 = vld [vmem:[#allocation7 + $0xf0] sm:$0xf0] }
 0x349   :  { %2375 = vmatpush.bf16.msra.mxu1 %v4011_v29  ;;  %2389 = vmatpush.bf16.msra.mxu2 %v4015_v33 }
 0x34c   :  { %2360 = vmatpush.bf16.msra.mxu0 %v4023_v37  ;;  %2402 = vmatpush.bf16.msra.mxu3 %v4035_v49 }
 0x34d   :  { %2376 = vmatpush.bf16.msra.mxu1 %v3995_v7  ;;  %2390 = vmatpush.bf16.msra.mxu2 %v3999_v63  ;;  %v4666_v7 = vld [vmem:[#allocation7 + $0xec] sm:$0xf0]  ;;  %v4238_v63 = vld [vmem:[#allocation7 + $0xe8] sm:$0xf] }
 0x350   :  { %2361 = vmatpush.bf16.msra.mxu0 %v4007_v9  ;;  %2403 = vmatpush.bf16.msra.mxu3 %v4019_v23 }
 0x354   :  { %2362 = vmatpush.bf16.msra.mxu0 %v3991_v8  ;;  %2404 = vmatpush.bf16.msra.mxu3 %v4003_v11  ;;  %v4667_v11 = vld [vmem:[#allocation7 + $0xf4] sm:$0xf0] }
 0x3bf   :  { %v2052_v39 = vpop.f32.mrf.mxu0  ;;  %v2066_v40 = vpop.f32.mrf.mxu1 }
 0x3c0   :  { %v2099_v56 = vadd.f32 %v2052_v39, %v359_v2  ;;  %v2100_v30 = vadd.f32 %v2066_v40, %v408_v14 }
 0x3c2   :  { %v2109_v60 = vmul.f32 0.5, %v2099_v56  ;;  %v2117_v12 = vmul.f32 0.5, %v2100_v30 }
 0x3c4   :  { %4794 = vtanh.f32 %v2109_v60 }
 0x3c5   :  { %4796 = vtanh.f32 %v2117_v12 }
 0x3c6   :  { %v2080_v32 = vpop.f32.mrf.mxu2  ;;  %v2094_v53 = vpop.f32.mrf.mxu3 }
 0x3c7   :  { %v2101_v52 = vadd.f32 %v2080_v32, %v457_v15  ;;  %v2054_v16 = vpop.f32.mrf.mxu0  ;;  %v2068_v35 = vpop.f32.mrf.mxu1  ;;  %v2102_v38 = vadd.f32 %v2094_v53, %v506_v43  ;;  %v4235_v15 = vor.u32 %v4664_v25, %v4232_v26  ;;  %v4240_v32 = vld [vmem:[#allocation7 + $0xf8] sm:$0xf0]  ;;  %v4222_v43 = vld [vmem:[#allocation7 + $0xc8] sm:$0xf]  ;;  %v4150_v25 = vld [vmem:[#allocation7 + $0x40] sm:$0xf] }
 0x3c8   :  { %v2103_v21 = vadd.f32 %v2054_v16, %v361_v50  ;;  %v2104_v59 = vadd.f32 %v2068_v35, %v410_v31  ;;  %v4239_v50 = vor.u32 %v4667_v11, %v4238_v63  ;;  %v4665_v31 = vld [vmem:[#allocation7 + $0xec] sm:$0xf]  ;;  %v4662_v16 = vld [vmem:[#allocation7 + $0xcc] sm:$0xf0]  ;;  %v4660_v35 = vld [vmem:[#allocation7 + $0xc4] sm:$0xf] }
 0x3c9   :  { %4798 = vtanh.f32 %v2101_v52  ;;  %v2127_v20 = vmul.f32 0.5, %v2102_v38  ;;  %v4243_v53 = vor.u32 %v4665_v31, %v4240_v32  ;;  %2681 = vmatpush.bf16.msrb.mxu1 %v4235_v15  ;;  %v4214_v52 = vld [vmem:[#allocation7 + $0xc0] sm:$0xf]  ;;  %v4644_v26 = vld [vmem:[#allocation7 + $0x44] sm:$0xf] }
 0x3ca   :  { %v4795_v17 = vpop.eup %4794  ;;  %v2110_v37 = vmul.f32 0.5, %v2103_v21  ;;  %v2118_v22 = vmul.f32 0.5, %v2104_v59  ;;  %2695 = vmatpush.bf16.msrb.mxu2 %v4239_v50  ;;  %v4215_v21 = vor.u32 %v4662_v16, %v4214_v52  ;;  %v4216_v59 = vld [vmem:[#allocation7 + $0xd0] sm:$0xf0]  ;;  %v4158_v15 = vld [vmem:[#allocation7 + $0x48] sm:$0xf] }
 0x3cb   :  { %v4797_v45 = vpop.eup %4796  ;;  %v2113_v61 = vmul.f32 0.5, %v4795_v17  ;;  %2709 = vmatpush.bf16.msrb.mxu3 %v4243_v53  ;;  %v4663_v17 = vld [vmem:[#allocation7 + $0xd4] sm:$0xf0]  ;;  %v4152_v11 = vld [vmem:[#allocation7 + $0x50] sm:$0xf0] }
 0x3cc   :  { %v2121_v46 = vmul.f32 0.5, %v4797_v45  ;;  %4800 = vtanh.f32 %v2110_v37  ;;  %v4219_v37 = vor.u32 %v4660_v35, %v4216_v59  ;;  %v4661_v45 = vld [vmem:[#allocation7 + $0xcc] sm:$0xf]  ;;  %v4647_v50 = vld [vmem:[#allocation7 + $0x54] sm:$0xf0]  ;;  %v4155_v31 = vor.u32 %v4644_v26, %v4152_v11 }
 0x3cd   :  { %v2115_v13 = vadd.f32 0.5, %v2113_v61  ;;  %4802 = vtanh.f32 %v2118_v22  ;;  %v4223_v22 = vor.u32 %v4663_v17, %v4222_v43  ;;  %v4224_v61 = vld [vmem:[#allocation7 + $0xd8] sm:$0xf0]  ;;  %v4159_v32 = vor.u32 %v4647_v50, %v4158_v15  ;;  %v4645_v53 = vld [vmem:[#allocation7 + $0x4c] sm:$0xf]  ;;  %v5389_v43 = vld [vmem:[#allocation11_spill] sm:$0xff] }
 0x3ce   :  { %v2123_v55 = vadd.f32 0.5, %v2121_v46  ;;  %v2082_v49 = vpop.f32.mrf.mxu2  ;;  %v2096_v44 = vpop.f32.mrf.mxu3  ;;  %v4227_v38 = vor.u32 %v4661_v45, %v4224_v61  ;;  %2682 = vmatpush.bf16.msrb.mxu1 %v4219_v37  ;;  %v4198_v46 = vld [vmem:[#allocation7 + $0xa0] sm:$0xf]  ;;  %v4160_v52 = vld [vmem:[#allocation7 + $0x58] sm:$0xf0]  ;;  %v364_v17 = vadd.f32 %v5389_v43, %v5126_v57  ;;  %v5390_v37 = vld [vmem:[#allocation12_spill] sm:$0xff] }
 0x3cf   :  { %v4799_v36 = vpop.eup %4798  ;;  %v2105_v5 = vadd.f32 %v2082_v49, %v459_v54  ;;  %v2106_v2 = vadd.f32 %v2096_v44, %v508_v18  ;;  %2696 = vmatpush.bf16.msrb.mxu2 %v4223_v22  ;;  %v4658_v54 = vld [vmem:[#allocation7 + $0xac] sm:$0xf0]  ;;  %v4656_v18 = vld [vmem:[#allocation7 + $0xa4] sm:$0xf]  ;;  %v4206_v49 = vld [vmem:[#allocation7 + $0xa8] sm:$0xf]  ;;  %v4163_v16 = vor.u32 %v4645_v53, %v4160_v52  ;;  %v413_v22 = vadd.f32 %v5390_v37, %v5129_v62 }
 0x3d0   :  { %v2135_v14 = vmul.f32 %v2123_v55, %v5228_v58  ;;  %v2137_v9 = vmul.f32 %v4799_v36, %v2115_v13  ;;  %2710 = vmatpush.bf16.msrb.mxu3 %v4227_v38  ;;  %v4199_v13 = vor.u32 %v4658_v54, %v4198_v46  ;;  %v4200_v55 = vld [vmem:[#allocation7 + $0xb0] sm:$0xf0]  ;;  %v4659_v44 = vld [vmem:[#allocation7 + $0xb4] sm:$0xf0]  ;;  %v4134_v35 = vld [vmem:[#allocation7 + $0x20] sm:$0xf] }
 0x3d1   :  { %4804 = vtanh.f32 %v2105_v5  ;;  %v2128_v27 = vmul.f32 0.5, %v2106_v2  ;;  %v4203_v36 = vor.u32 %v4656_v18, %v4200_v55  ;;  %v4657_v5 = vld [vmem:[#allocation7 + $0xac] sm:$0xf]  ;;  %v4208_v2 = vld [vmem:[#allocation7 + $0xb8] sm:$0xf0]  ;;  %v5395_v52 = vld [vmem:[#allocation17_spill] sm:$0xff] }
 0x3d2   :  { %v4801_v3 = vpop.eup %4800  ;;  %v5252_v10 = vadd.f32 %v2137_v9, %v2135_v14  ;;  %4806 = vtanh.f32 %v2127_v20  ;;  %v4207_v20 = vor.u32 %v4659_v44, %v4206_v49  ;;  %v4211_v14 = vor.u32 %v4657_v5, %v4208_v2  ;;  %v4182_v9 = vld [vmem:[#allocation7 + $0x80] sm:$0xf]  ;;  %v4640_v59 = vld [vmem:[#allocation7 + $0x24] sm:$0xf]  ;;  %v4136_v61 = vld [vmem:[#allocation7 + $0x30] sm:$0xf0] }
 0x3d3   :  { %v4803_v47 = vpop.eup %4802  ;;  %v2114_v48 = vmul.f32 0.5, %v4801_v3  ;;  %4808 = vtanh.f32 %v2128_v27  ;;  %2683 = vmatpush.bf16.msrb.mxu1 %v4203_v36  ;;  %v4654_v27 = vld [vmem:[#allocation7 + $0x8c] sm:$0xf0]  ;;  %v4652_v3 = vld [vmem:[#allocation7 + $0x84] sm:$0xf] }
 0x3d4   :  { %v2122_v39 = vmul.f32 0.5, %v4803_v47  ;;  %4810 = vtanh.f32 %v5252_v10  ;;  %2697 = vmatpush.bf16.msrb.mxu2 %v4207_v20  ;;  %2711 = vmatpush.bf16.msrb.mxu3 %v4211_v14  ;;  %v4183_v47 = vor.u32 %v4654_v27, %v4182_v9  ;;  %v4142_v38 = vld [vmem:[#allocation7 + $0x28] sm:$0xf]  ;;  %v4643_v46 = vld [vmem:[#allocation7 + $0x34] sm:$0xf0] }
 0x3d5   :  { %v2116_v40 = vadd.f32 0.5, %v2114_v48  ;;  %v4184_v48 = vld [vmem:[#allocation7 + $0x90] sm:$0xf0]  ;;  %v4143_v55 = vor.u32 %v4643_v46, %v4142_v38  ;;  %v4641_v49 = vld [vmem:[#allocation7 + $0x2c] sm:$0xf] }
 0x3d6   :  { %v2124_v29 = vadd.f32 0.5, %v2122_v39  ;;  %v4190_v39 = vld [vmem:[#allocation7 + $0x88] sm:$0xf]  ;;  %v4144_v44 = vld [vmem:[#allocation7 + $0x38] sm:$0xf0] }
 0x3d7   :  { %v4805_v33 = vpop.eup %4804  ;;  %v4147_v5 = vor.u32 %v4641_v49, %v4144_v44  ;;  %v4118_v2 = vld [vmem:[#allocation7] sm:$0xf]  ;;  %v4638_v14 = vld [vmem:[#allocation7 + $0xc] sm:$0xf0]  ;;  %v4636_v9 = vld [vmem:[#allocation7 + $0x4] sm:$0xf] }
 0x3d8   :  { %v2136_v0 = vmul.f32 %v2124_v29, %v5232_v19  ;;  %v2138_v34 = vmul.f32 %v4805_v33, %v2116_v40  ;;  %v4807_v56 = vpop.eup %4806  ;;  %v4230_v19 = vld [vmem:[#allocation7 + $0xe0] sm:$0xf]  ;;  %v4655_v40 = vld [vmem:[#allocation7 + $0x94] sm:$0xf0]  ;;  %v4187_v29 = vor.u32 %v4652_v3, %v4184_v48  ;;  %v4120_v48 = vld [vmem:[#allocation7 + $0x10] sm:$0xf0] }
 0x3d9   :  { %v4809_v30 = vpop.eup %4808  ;;  %v2131_v23 = vmul.f32 0.5, %v4807_v56  ;;  %v4231_v6 = vor.u32 %v4666_v7, %v4230_v19  ;;  %v4191_v33 = vor.u32 %v4655_v40, %v4190_v39  ;;  %v4176_v19 = vld [vmem:[#allocation7 + $0x78] sm:$0xf0]  ;;  %v4126_v39 = vld [vmem:[#allocation7 + $0x8] sm:$0xf]  ;;  %v4123_v40 = vor.u32 %v4636_v9, %v4120_v48 }
 0x3da   :  { %v5256_v58 = vadd.f32 %v2138_v34, %v2136_v0  ;;  %v2132_v41 = vmul.f32 0.5, %v4809_v30  ;;  %v4811_v24 = vpop.eup %4810  ;;  %v4653_v0 = vld [vmem:[#allocation7 + $0x8c] sm:$0xf]  ;;  %v4192_v34 = vld [vmem:[#allocation7 + $0x98] sm:$0xf0]  ;;  %2684 = vmatpush.bf16.msrb.mxu1 %v4187_v29 }
 0x3db   :  { %v2133_v42 = vadd.f32 0.5, %v2131_v23  ;;  %2667 = vmatpush.bf16.msrb.mxu0 %v4231_v6  ;;  %v4195_v56 = vor.u32 %v4653_v0, %v4192_v34  ;;  %2698 = vmatpush.bf16.msrb.mxu2 %v4191_v33  ;;  %v4166_v30 = vld [vmem:[#allocation7 + $0x60] sm:$0xf]  ;;  %v4650_v23 = vld [vmem:[#allocation7 + $0x6c] sm:$0xf0] }
 0x3dc   :  { %4812 = vtanh.f32 %v5256_v58  ;;  %v2134_v60 = vadd.f32 0.5, %v2132_v41  ;;  %v4648_v41 = vld [vmem:[#allocation7 + $0x64] sm:$0xf]  ;;  %v4646_v6 = vld [vmem:[#allocation7 + $0x4c] sm:$0xf0] }
 0x3dd   :  { %v2143_v8 = vmul.f32 %v4811_v24, %v2133_v42  ;;  %2712 = vmatpush.bf16.msrb.mxu3 %v4195_v56  ;;  %v4167_v24 = vor.u32 %v4650_v23, %v4166_v30  ;;  %v4168_v42 = vld [vmem:[#allocation7 + $0x70] sm:$0xf0]  ;;  %v4151_v63 = vor.u32 %v4646_v6, %v4150_v25  ;;  %v4639_v29 = vld [vmem:[#allocation7 + $0x14] sm:$0xf0]  ;;  %v4637_v33 = vld [vmem:[#allocation7 + $0xc] sm:$0xf] }
 0x3de   :  { %v4128_v0 = vld [vmem:[#allocation7 + $0x18] sm:$0xf0]  ;;  %v4127_v34 = vor.u32 %v4639_v29, %v4126_v39  ;;  %v5391_v30 = vld [vmem:[#allocation13_spill] sm:$0xff] }
 0x3df   :  { %2668 = vmatpush.bf16.msrb.mxu0 %v4215_v21  ;;  %v4642_v21 = vld [vmem:[#allocation7 + $0x2c] sm:$0xf0]  ;;  %v4131_v56 = vor.u32 %v4637_v33, %v4128_v0  ;;  %v462_v23 = vadd.f32 %v5391_v30, %v5140_v4  ;;  %v5394_v6 = vld [vmem:[#allocation14_spill] sm:$0xff] }
 0x3e0   :  { %v4135_v45 = vor.u32 %v4642_v21, %v4134_v35  ;;  %v511_v26 = vadd.f32 %v5394_v6, %v5145_v51  ;;  %v5396_v35 = vld [vmem:[#allocation18_spill] sm:$0xff]  ;;  %v4698_v30 = vld [vmem:[#allocation7 + $0xec] sm:$0xf0]  ;;  %v4692_v6 = vld [vmem:[#allocation7 + $0xc4] sm:$0xf] }
 0x3e1   :  { %v513_v21 = vadd.f32 %v5396_v35, %v5145_v51  ;;  %v4690_v35 = vld [vmem:[#allocation7 + $0xac] sm:$0xf0] }
 0x3e2   :  { %v4813_v12 = vpop.eup %4812 }
 0x3e3   :  { %v2144_v28 = vmul.f32 %v4813_v12, %v2134_v60  ;;  %2669 = vmatpush.bf16.msrb.mxu0 %v4199_v13  ;;  %v4174_v60 = vld [vmem:[#allocation7 + $0x68] sm:$0xf]  ;;  %v4651_v12 = vld [vmem:[#allocation7 + $0x74] sm:$0xf0]  ;;  %v4139_v13 = vor.u32 %v4640_v59, %v4136_v61 }
 0x3e5   :  { %v2162_v1 = vpack.c.bf16 %v2144_v28, %v2143_v8  ;;  %v4171_v8 = vor.u32 %v4648_v41, %v4168_v42  ;;  %v4175_v28 = vor.u32 %v4651_v12, %v4174_v60  ;;  %v5392_v41 = vld [vmem:[#allocation15_spill] sm:$0xff]  ;;  %v5393_v42 = vld [vmem:[#allocation16_spill] sm:$0xff] }
 0x3e6   :  { %v415_v60 = vadd.f32 %v5393_v42, %v5129_v62  ;;  %v4366_v42 = vld [vmem:[#allocation7 + $0xe8] sm:$0xf] }
 0x3e7   :  { %2363 = vmatmul.bf16.vlgmr.msra.gmra.mxu0 %v2162_v1  ;;  %2377 = vmatmul.bf16.vlgmr.msra.gmra.mxu1 %v2162_v1 }
 0x3e8   :  { %2391 = vmatmul.bf16.vlgmr.msra.gmra.mxu2 %v2162_v1  ;;  %2405 = vmatmul.bf16.vlgmr.msra.gmra.mxu3 %v2162_v1  ;;  %v4649_v1 = vld [vmem:[#allocation7 + $0x6c] sm:$0xf] }
 0x3e9   :  { %2670 = vmatpush.bf16.msrb.mxu0 %v4183_v47  ;;  %v4179_v7 = vor.u32 %v4649_v1, %v4176_v19  ;;  %2685 = vmatpush.bf16.msrb.mxu1 %v4171_v8  ;;  %v4119_v47 = vor.u32 %v4638_v14, %v4118_v2 }
 0x3ea   :  { %2699 = vmatpush.bf16.msrb.mxu2 %v4175_v28 }
 0x3eb   :  { %2713 = vmatpush.bf16.msrb.mxu3 %v4179_v7 }
 0x3ed   :  { %2671 = vmatpush.bf16.msrb.mxu0 %v4167_v24  ;;  %2686 = vmatpush.bf16.msrb.mxu1 %v4155_v31  ;;  %v366_v24 = vadd.f32 %v5392_v41, %v5126_v57 }
 0x3ee   :  { %2700 = vmatpush.bf16.msrb.mxu2 %v4159_v32 }
 0x3ef   :  { %2714 = vmatpush.bf16.msrb.mxu3 %v4163_v16  ;;  %v464_v16 = vadd.f32 %v5395_v52, %v5140_v4 }
 0x3f1   :  { %2672 = vmatpush.bf16.msrb.mxu0 %v4151_v63  ;;  %2687 = vmatpush.bf16.msrb.mxu1 %v4139_v13 }
 0x3f2   :  { %2701 = vmatpush.bf16.msrb.mxu2 %v4143_v55 }
 0x3f3   :  { %2715 = vmatpush.bf16.msrb.mxu3 %v4147_v5 }
 0x3f5   :  { %2673 = vmatpush.bf16.msrb.mxu0 %v4135_v45  ;;  %2688 = vmatpush.bf16.msrb.mxu1 %v4123_v40 }
 0x3f6   :  { %2702 = vmatpush.bf16.msrb.mxu2 %v4127_v34 }
 0x3f7   :  { %2716 = vmatpush.bf16.msrb.mxu3 %v4131_v56 }
 0x3f9   :  { %2674 = vmatpush.bf16.msrb.mxu0 %v4119_v47 }
 0x464   :  { %v2364_v54 = vpop.f32.mrf.mxu0  ;;  %v2378_v18 = vpop.f32.mrf.mxu1 }
 0x465   :  { %v2411_v36 = vadd.f32 %v2364_v54, %v364_v17  ;;  %v2412_v20 = vadd.f32 %v2378_v18, %v413_v22 }
 0x467   :  { %v2421_v27 = vmul.f32 0.5, %v2411_v36  ;;  %v2429_v3 = vmul.f32 0.5, %v2412_v20 }
 0x469   :  { %4814 = vtanh.f32 %v2421_v27 }
 0x46a   :  { %4816 = vtanh.f32 %v2429_v3 }
 0x46b   :  { %v2392_v12 = vpop.f32.mrf.mxu2  ;;  %v2406_v8 = vpop.f32.mrf.mxu3 }
 0x46c   :  { %v2413_v28 = vadd.f32 %v2392_v12, %v462_v23  ;;  %v2366_v1 = vpop.f32.mrf.mxu0  ;;  %v2380_v19 = vpop.f32.mrf.mxu1  ;;  %v2414_v32 = vadd.f32 %v2406_v8, %v511_v26  ;;  %v4696_v23 = vld [vmem:[#allocation7 + $0xe4] sm:$0xf] }
 0x46d   :  { %v2415_v7 = vadd.f32 %v2366_v1, %v366_v24  ;;  %v2416_v25 = vadd.f32 %v2380_v19, %v415_v60  ;;  %v4360_v24 = vld [vmem:[#allocation7 + $0xf0] sm:$0xf0]  ;;  %v4699_v60 = vld [vmem:[#allocation7 + $0xf4] sm:$0xf0]  ;;  %v4368_v1 = vld [vmem:[#allocation7 + $0xf8] sm:$0xf0] }
 0x46e   :  { %4818 = vtanh.f32 %v2413_v28  ;;  %v2439_v45 = vmul.f32 0.5, %v2414_v32  ;;  %v4363_v12 = vor.u32 %v4696_v23, %v4360_v24  ;;  %v4367_v8 = vor.u32 %v4699_v60, %v4366_v42  ;;  %v4697_v28 = vld [vmem:[#allocation7 + $0xec] sm:$0xf]  ;;  %v4278_v23 = vld [vmem:[#allocation7 + $0x40] sm:$0xf] }
 0x46f   :  { %v4815_v63 = vpop.eup %4814  ;;  %v2422_v11 = vmul.f32 0.5, %v2415_v7  ;;  %v2430_v15 = vmul.f32 0.5, %v2416_v25  ;;  %v4371_v19 = vor.u32 %v4697_v28, %v4368_v1  ;;  %v4342_v7 = vld [vmem:[#allocation7 + $0xc0] sm:$0xf]  ;;  %v4694_v25 = vld [vmem:[#allocation7 + $0xcc] sm:$0xf0] }
 0x470   :  { %v4817_v50 = vpop.eup %4816  ;;  %v2425_v31 = vmul.f32 0.5, %v4815_v63  ;;  %2993 = vmatpush.bf16.msra.mxu1 %v4363_v12  ;;  %3007 = vmatpush.bf16.msra.mxu2 %v4367_v8  ;;  %v4343_v26 = vor.u32 %v4694_v25, %v4342_v7  ;;  %v4344_v63 = vld [vmem:[#allocation7 + $0xd0] sm:$0xf0]  ;;  %v4693_v32 = vld [vmem:[#allocation7 + $0xcc] sm:$0xf] }
 0x471   :  { %v2433_v53 = vmul.f32 0.5, %v4817_v50  ;;  %4820 = vtanh.f32 %v2422_v11  ;;  %3021 = vmatpush.bf16.msra.mxu3 %v4371_v19  ;;  %v4350_v11 = vld [vmem:[#allocation7 + $0xc8] sm:$0xf]  ;;  %v4347_v50 = vor.u32 %v4692_v6, %v4344_v63  ;;  %v4676_v24 = vld [vmem:[#allocation7 + $0x44] sm:$0xf] }
 0x472   :  { %v2427_v59 = vadd.f32 0.5, %v2425_v31  ;;  %4822 = vtanh.f32 %v2430_v15  ;;  %v4695_v15 = vld [vmem:[#allocation7 + $0xd4] sm:$0xf0]  ;;  %v4280_v60 = vld [vmem:[#allocation7 + $0x50] sm:$0xf0] }
 0x473   :  { %v2435_v43 = vadd.f32 0.5, %v2433_v53  ;;  %v2394_v17 = vpop.f32.mrf.mxu2  ;;  %v2408_v37 = vpop.f32.mrf.mxu3  ;;  %v4351_v31 = vor.u32 %v4695_v15, %v4350_v11  ;;  %v4352_v53 = vld [vmem:[#allocation7 + $0xd8] sm:$0xf0]  ;;  %v4286_v12 = vld [vmem:[#allocation7 + $0x48] sm:$0xf]  ;;  %v4283_v28 = vor.u32 %v4676_v24, %v4280_v60  ;;  %v5397_v11 = vld [vmem:[#allocation19_spill] sm:$0xff] }
 0x474   :  { %v4819_v22 = vpop.eup %4818  ;;  %v2417_v61 = vadd.f32 %v2394_v17, %v464_v16  ;;  %v2418_v38 = vadd.f32 %v2408_v37, %v513_v21  ;;  %v4355_v52 = vor.u32 %v4693_v32, %v4352_v53  ;;  %2994 = vmatpush.bf16.msra.mxu1 %v4347_v50  ;;  %v4326_v16 = vld [vmem:[#allocation7 + $0xa0] sm:$0xf]  ;;  %v4688_v21 = vld [vmem:[#allocation7 + $0xa4] sm:$0xf]  ;;  %v4334_v17 = vld [vmem:[#allocation7 + $0xa8] sm:$0xf]  ;;  %v369_v15 = vadd.f32 %v5397_v11, %v5126_v57 }
 0x475   :  { %v2447_v46 = vmul.f32 %v2435_v43, %v5252_v10  ;;  %v2449_v54 = vmul.f32 %v4819_v22, %v2427_v59  ;;  %3008 = vmatpush.bf16.msra.mxu2 %v4351_v31  ;;  %v4327_v59 = vor.u32 %v4690_v35, %v4326_v16  ;;  %v4328_v43 = vld [vmem:[#allocation7 + $0xb0] sm:$0xf0]  ;;  %v4691_v37 = vld [vmem:[#allocation7 + $0xb4] sm:$0xf0]  ;;  %v4677_v19 = vld [vmem:[#allocation7 + $0x4c] sm:$0xf] }
 0x476   :  { %4824 = vtanh.f32 %v2417_v61  ;;  %v2440_v18 = vmul.f32 0.5, %v2418_v38  ;;  %3022 = vmatpush.bf16.msra.mxu3 %v4355_v52  ;;  %v4331_v22 = vor.u32 %v4688_v21, %v4328_v43  ;;  %v4689_v61 = vld [vmem:[#allocation7 + $0xac] sm:$0xf]  ;;  %v4336_v38 = vld [vmem:[#allocation7 + $0xb8] sm:$0xf0] }
 0x477   :  { %v4821_v13 = vpop.eup %4820  ;;  %v5276_v55 = vadd.f32 %v2449_v54, %v2447_v46  ;;  %4826 = vtanh.f32 %v2439_v45  ;;  %v4335_v45 = vor.u32 %v4691_v37, %v4334_v17  ;;  %v4339_v46 = vor.u32 %v4689_v61, %v4336_v38  ;;  %v4310_v54 = vld [vmem:[#allocation7 + $0x80] sm:$0xf]  ;;  %v4679_v8 = vld [vmem:[#allocation7 + $0x54] sm:$0xf0]  ;;  %v4288_v7 = vld [vmem:[#allocation7 + $0x58] sm:$0xf0] }
 0x478   :  { %v4823_v49 = vpop.eup %4822  ;;  %v2426_v44 = vmul.f32 0.5, %v4821_v13  ;;  %4828 = vtanh.f32 %v2440_v18  ;;  %2995 = vmatpush.bf16.msra.mxu1 %v4331_v22  ;;  %v4686_v18 = vld [vmem:[#allocation7 + $0x8c] sm:$0xf0]  ;;  %v4684_v13 = vld [vmem:[#allocation7 + $0x84] sm:$0xf]  ;;  %v4287_v1 = vor.u32 %v4679_v8, %v4286_v12  ;;  %v4291_v25 = vor.u32 %v4677_v19, %v4288_v7  ;;  %v5398_v50 = vld [vmem:[#allocation20_spill] sm:$0xff] }
 0x479   :  { %v2434_v36 = vmul.f32 0.5, %v4823_v49  ;;  %4830 = vtanh.f32 %v5276_v55  ;;  %3009 = vmatpush.bf16.msra.mxu2 %v4335_v45  ;;  %v4311_v49 = vor.u32 %v4686_v18, %v4310_v54  ;;  %v4262_v6 = vld [vmem:[#allocation7 + $0x20] sm:$0xf]  ;;  %v4672_v63 = vld [vmem:[#allocation7 + $0x24] sm:$0xf]  ;;  %v418_v31 = vadd.f32 %v5398_v50, %v5129_v62  ;;  %v5403_v7 = vld [vmem:[#allocation25_spill] sm:$0xff] }
 0x47a   :  { %v2428_v20 = vadd.f32 0.5, %v2426_v44  ;;  %3023 = vmatpush.bf16.msra.mxu3 %v4339_v46  ;;  %v4312_v44 = vld [vmem:[#allocation7 + $0x90] sm:$0xf0]  ;;  %v4270_v52 = vld [vmem:[#allocation7 + $0x28] sm:$0xf] }
 0x47b   :  { %v2436_v5 = vadd.f32 0.5, %v2434_v36  ;;  %v4318_v36 = vld [vmem:[#allocation7 + $0x88] sm:$0xf]  ;;  %v4264_v53 = vld [vmem:[#allocation7 + $0x30] sm:$0xf0] }
 0x47c   :  { %v4825_v2 = vpop.eup %4824  ;;  %v4675_v16 = vld [vmem:[#allocation7 + $0x34] sm:$0xf0]  ;;  %v4673_v17 = vld [vmem:[#allocation7 + $0x2c] sm:$0xf]  ;;  %v4272_v37 = vld [vmem:[#allocation7 + $0x38] sm:$0xf0] }
 0x47d   :  { %v2448_v14 = vmul.f32 %v2436_v5, %v5256_v58  ;;  %v2450_v9 = vmul.f32 %v4825_v2, %v2428_v20  ;;  %v4827_v27 = vpop.eup %4826  ;;  %v4358_v58 = vld [vmem:[#allocation7 + $0xe0] sm:$0xf]  ;;  %v4687_v20 = vld [vmem:[#allocation7 + $0x94] sm:$0xf0]  ;;  %v4315_v5 = vor.u32 %v4684_v13, %v4312_v44  ;;  %v4271_v43 = vor.u32 %v4675_v16, %v4270_v52  ;;  %v4670_v46 = vld [vmem:[#allocation7 + $0xc] sm:$0xf0] }
 0x47e   :  { %v4829_v3 = vpop.eup %4828  ;;  %v2443_v47 = vmul.f32 0.5, %v4827_v27  ;;  %v4359_v41 = vor.u32 %v4698_v30, %v4358_v58  ;;  %v4319_v2 = vor.u32 %v4687_v20, %v4318_v36  ;;  %v4304_v58 = vld [vmem:[#allocation7 + $0x78] sm:$0xf0]  ;;  %v4275_v61 = vor.u32 %v4673_v17, %v4272_v37  ;;  %v4246_v38 = vld [vmem:[#allocation7] sm:$0xf] }
 0x47f   :  { %v5280_v10 = vadd.f32 %v2450_v9, %v2448_v14  ;;  %v2444_v48 = vmul.f32 0.5, %v4829_v3  ;;  %v4831_v39 = vpop.eup %4830  ;;  %v4685_v14 = vld [vmem:[#allocation7 + $0x8c] sm:$0xf]  ;;  %v4320_v9 = vld [vmem:[#allocation7 + $0x98] sm:$0xf0]  ;;  %2996 = vmatpush.bf16.msra.mxu1 %v4315_v5 }
 0x480   :  { %v2445_v40 = vadd.f32 0.5, %v2443_v47  ;;  %2979 = vmatpush.bf16.msra.mxu0 %v4359_v41  ;;  %v4323_v27 = vor.u32 %v4685_v14, %v4320_v9  ;;  %3010 = vmatpush.bf16.msra.mxu2 %v4319_v2  ;;  %v4294_v3 = vld [vmem:[#allocation7 + $0x60] sm:$0xf]  ;;  %v4682_v47 = vld [vmem:[#allocation7 + $0x6c] sm:$0xf0] }
 0x481   :  { %4832 = vtanh.f32 %v5280_v10  ;;  %v2446_v29 = vadd.f32 0.5, %v2444_v48  ;;  %v4680_v48 = vld [vmem:[#allocation7 + $0x64] sm:$0xf]  ;;  %v4678_v41 = vld [vmem:[#allocation7 + $0x4c] sm:$0xf0] }
 0x482   :  { %v2455_v0 = vmul.f32 %v4831_v39, %v2445_v40  ;;  %3024 = vmatpush.bf16.msra.mxu3 %v4323_v27  ;;  %v4295_v39 = vor.u32 %v4682_v47, %v4294_v3  ;;  %v4296_v40 = vld [vmem:[#allocation7 + $0x70] sm:$0xf0]  ;;  %v4279_v42 = vor.u32 %v4678_v41, %v4278_v23  ;;  %v4668_v54 = vld [vmem:[#allocation7 + $0x4] sm:$0xf]  ;;  %v4254_v36 = vld [vmem:[#allocation7 + $0x8] sm:$0xf] }
 0x483   :  { %v4248_v44 = vld [vmem:[#allocation7 + $0x10] sm:$0xf0]  ;;  %v4671_v5 = vld [vmem:[#allocation7 + $0x14] sm:$0xf0]  ;;  %v4669_v2 = vld [vmem:[#allocation7 + $0xc] sm:$0xf] }
 0x484   :  { %2980 = vmatpush.bf16.msra.mxu0 %v4343_v26  ;;  %v4674_v26 = vld [vmem:[#allocation7 + $0x2c] sm:$0xf0]  ;;  %v4251_v20 = vor.u32 %v4668_v54, %v4248_v44  ;;  %v4256_v14 = vld [vmem:[#allocation7 + $0x18] sm:$0xf0]  ;;  %v4255_v9 = vor.u32 %v4671_v5, %v4254_v36 }
 0x485   :  { %v4263_v32 = vor.u32 %v4674_v26, %v4262_v6  ;;  %v4259_v27 = vor.u32 %v4669_v2, %v4256_v14  ;;  %v5399_v3 = vld [vmem:[#allocation21_spill] sm:$0xff]  ;;  %v5402_v41 = vld [vmem:[#allocation22_spill] sm:$0xff] }
 0x486   :  { %v467_v47 = vadd.f32 %v5399_v3, %v5140_v4  ;;  %v516_v24 = vadd.f32 %v5402_v41, %v5145_v51  ;;  %v5404_v6 = vld [vmem:[#allocation26_spill] sm:$0xff]  ;;  %v4706_v3 = vld [vmem:[%s5362_s4 + $0x30] sm:$0xff] }
 0x487   :  { %v4833_v33 = vpop.eup %4832  ;;  %v518_v26 = vadd.f32 %v5404_v6, %v5145_v51 }
 0x488   :  { %v2456_v34 = vmul.f32 %v4833_v33, %v2446_v29  ;;  %2981 = vmatpush.bf16.msra.mxu0 %v4327_v59  ;;  %v4302_v29 = vld [vmem:[#allocation7 + $0x68] sm:$0xf]  ;;  %v4683_v33 = vld [vmem:[#allocation7 + $0x74] sm:$0xf0]  ;;  %v4267_v59 = vor.u32 %v4672_v63, %v4264_v53 }
 0x48a   :  { %v2474_v56 = vpack.c.bf16 %v2456_v34, %v2455_v0  ;;  %v4299_v0 = vor.u32 %v4680_v48, %v4296_v40  ;;  %v4303_v34 = vor.u32 %v4683_v33, %v4302_v29  ;;  %v5400_v48 = vld [vmem:[#allocation23_spill] sm:$0xff]  ;;  %v5401_v40 = vld [vmem:[#allocation24_spill] sm:$0xff] }
 0x48b   :  { %v420_v29 = vadd.f32 %v5401_v40, %v5129_v62  ;;  %v4702_v40 = vld [vmem:[%s5362_s4 + $0x10] sm:$0xff] }
 0x48c   :  { %2675 = vmatmul.bf16.vlgmr.msrb.gmra.mxu0 %v2474_v56  ;;  %2689 = vmatmul.bf16.vlgmr.msrb.gmra.mxu1 %v2474_v56 }
 0x48d   :  { %2703 = vmatmul.bf16.vlgmr.msrb.gmra.mxu2 %v2474_v56  ;;  %2717 = vmatmul.bf16.vlgmr.msrb.gmra.mxu3 %v2474_v56  ;;  %v4681_v56 = vld [vmem:[#allocation7 + $0x6c] sm:$0xf] }
 0x48e   :  { %2982 = vmatpush.bf16.msra.mxu0 %v4311_v49  ;;  %v4307_v30 = vor.u32 %v4681_v56, %v4304_v58  ;;  %2997 = vmatpush.bf16.msra.mxu1 %v4299_v0  ;;  %v4247_v49 = vor.u32 %v4670_v46, %v4246_v38 }
 0x48f   :  { %3011 = vmatpush.bf16.msra.mxu2 %v4303_v34 }
 0x490   :  { %3025 = vmatpush.bf16.msra.mxu3 %v4307_v30 }
 0x492   :  { %2983 = vmatpush.bf16.msra.mxu0 %v4295_v39  ;;  %2998 = vmatpush.bf16.msra.mxu1 %v4283_v28  ;;  %v371_v39 = vadd.f32 %v5400_v48, %v5126_v57  ;;  %v4704_v48 = vld [vmem:[%s5362_s4 + $0x20] sm:$0xff] }
 0x493   :  { %3012 = vmatpush.bf16.msra.mxu2 %v4287_v1 }
 0x494   :  { %3026 = vmatpush.bf16.msra.mxu3 %v4291_v25  ;;  %v469_v25 = vadd.f32 %v5403_v7, %v5140_v4 }
 0x496   :  { %2984 = vmatpush.bf16.msra.mxu0 %v4279_v42  ;;  %2999 = vmatpush.bf16.msra.mxu1 %v4267_v59 }
 0x497   :  { %3013 = vmatpush.bf16.msra.mxu2 %v4271_v43 }
 0x498   :  { %3027 = vmatpush.bf16.msra.mxu3 %v4275_v61 }
 0x49a   :  { %2985 = vmatpush.bf16.msra.mxu0 %v4263_v32  ;;  %3000 = vmatpush.bf16.msra.mxu1 %v4251_v20 }
 0x49b   :  { %3014 = vmatpush.bf16.msra.mxu2 %v4255_v9 }
 0x49c   :  { %3028 = vmatpush.bf16.msra.mxu3 %v4259_v27 }
 0x49e   :  { %2986 = vmatpush.bf16.msra.mxu0 %v4247_v49 }
 0x509   :  { %v2676_v35 = vpop.f32.mrf.mxu0  ;;  %v2690_v21 = vpop.f32.mrf.mxu1 }
 0x50a   :  { %v2723_v22 = vadd.f32 %v2676_v35, %v369_v15  ;;  %v2724_v45 = vadd.f32 %v2690_v21, %v418_v31 }
 0x50c   :  { %v2733_v18 = vmul.f32 0.5, %v2723_v22  ;;  %v2741_v13 = vmul.f32 0.5, %v2724_v45 }
 0x50e   :  { %4834 = vtanh.f32 %v2733_v18 }
 0x50f   :  { %4836 = vtanh.f32 %v2741_v13 }
 0x510   :  { %v2704_v33 = vpop.f32.mrf.mxu2  ;;  %v2718_v0 = vpop.f32.mrf.mxu3 }
 0x511   :  { %v2725_v34 = vadd.f32 %v2704_v33, %v467_v47  ;;  %v2678_v56 = vpop.f32.mrf.mxu0  ;;  %v2692_v58 = vpop.f32.mrf.mxu1  ;;  %v2726_v1 = vadd.f32 %v2718_v0, %v516_v24  ;;  %v4705_v47 = vld [vmem:[%s5362_s4 + $0x28] sm:$0xff] }
 0x512   :  { %v2727_v30 = vadd.f32 %v2678_v56, %v371_v39  ;;  %v2728_v23 = vadd.f32 %v2692_v58, %v420_v29  ;;  %v4703_v39 = vld [vmem:[%s5362_s4 + $0x18] sm:$0xff]  ;;  %v5405_v29 = vld [vmem:[#allocation27_spill] sm:$0xff]  ;;  %v5406_v0 = vld [vmem:[#allocation28_spill] sm:$0xff] }
 0x513   :  { %4838 = vtanh.f32 %v2725_v34  ;;  %v2751_v32 = vmul.f32 0.5, %v2726_v1  ;;  %v374_v33 = vadd.f32 %v5405_v29, %v5126_v57  ;;  %v423_v34 = vadd.f32 %v5406_v0, %v5129_v62  ;;  %v4701_v56 = vld [vmem:[%s5362_s4 + $0x8] sm:$0xff] }
 0x514   :  { %v4835_v42 = vpop.eup %4834  ;;  %v2734_v60 = vmul.f32 0.5, %v2727_v30  ;;  %v2742_v12 = vmul.f32 0.5, %v2728_v23 }
 0x515   :  { %v4837_v8 = vpop.eup %4836  ;;  %v2737_v28 = vmul.f32 0.5, %v4835_v42 }
 0x516   :  { %v2745_v19 = vmul.f32 0.5, %v4837_v8  ;;  %4840 = vtanh.f32 %v2734_v60  ;;  %v4700_v60 = vld [vmem:[%s5362_s4] sm:$0xff] }
 0x517   :  { %v2739_v63 = vadd.f32 0.5, %v2737_v28  ;;  %4842 = vtanh.f32 %v2742_v12  ;;  %v5407_v12 = vld [vmem:[#allocation29_spill] sm:$0xff]  ;;  %v5408_v28 = vld [vmem:[#allocation30_spill] sm:$0xff] }
 0x518   :  { %v2747_v11 = vadd.f32 0.5, %v2745_v19  ;;  %v2706_v15 = vpop.f32.mrf.mxu2  ;;  %v2720_v50 = vpop.f32.mrf.mxu3  ;;  %v472_v8 = vadd.f32 %v5407_v12, %v5140_v4  ;;  %v521_v1 = vadd.f32 %v5408_v28, %v5145_v51  ;;  %v5409_v19 = vld [vmem:[#allocation31_spill] sm:$0xff] }
 0x519   :  { %v4839_v31 = vpop.eup %4838  ;;  %v2729_v53 = vadd.f32 %v2706_v15, %v469_v25  ;;  %v2730_v52 = vadd.f32 %v2720_v50, %v518_v26  ;;  %v376_v7 = vadd.f32 %v5409_v19, %v5126_v57  ;;  %v5410_v25 = vld [vmem:[#allocation32_spill] sm:$0xff] }
 0x51a   :  { %v2759_v16 = vmul.f32 %v2747_v11, %v5276_v55  ;;  %v2761_v35 = vmul.f32 %v4839_v31, %v2739_v63  ;;  %v425_v6 = vadd.f32 %v5410_v25, %v5129_v62  ;;  %v5411_v62 = vld [vmem:[#allocation33_spill] sm:$0xff] }
 0x51b   :  { %4844 = vtanh.f32 %v2729_v53  ;;  %v2752_v21 = vmul.f32 0.5, %v2730_v52 }
 0x51c   :  { %v4841_v59 = vpop.eup %4840  ;;  %v5300_v43 = vadd.f32 %v2761_v35, %v2759_v16  ;;  %4846 = vtanh.f32 %v2751_v32 }
 0x51d   :  { %v4843_v17 = vpop.eup %4842  ;;  %v2738_v37 = vmul.f32 0.5, %v4841_v59  ;;  %4848 = vtanh.f32 %v2752_v21 }
 0x51e   :  { %v2746_v22 = vmul.f32 0.5, %v4843_v17  ;;  %4850 = vtanh.f32 %v5300_v43 }
 0x51f   :  { %v2740_v45 = vadd.f32 0.5, %v2738_v37  ;;  %v474_v37 = vadd.f32 %v5411_v62, %v5140_v4 }
 0x520   :  { %v2748_v61 = vadd.f32 0.5, %v2746_v22  ;;  %v5412_v22 = vld [vmem:[#allocation34_spill] sm:$0xff] }
 0x521   :  { %v4845_v38 = vpop.eup %4844 }
 0x522   :  { %v2760_v46 = vmul.f32 %v2748_v61, %v5280_v10  ;;  %v2762_v54 = vmul.f32 %v4845_v38, %v2740_v45  ;;  %v4847_v18 = vpop.eup %4846  ;;  %v4707_v10 = vld [vmem:[%s5362_s4 + $0x38] sm:$0xff]  ;;  %v523_v45 = vadd.f32 %v5412_v22, %v5145_v51 }
 0x523   :  { %v4849_v13 = vpop.eup %4848  ;;  %v2755_v49 = vmul.f32 0.5, %v4847_v18  ;;  %3159 = vmatpush.bf16.msrb.mxu0 %v4707_v10 }
 0x524   :  { %v5304_v55 = vadd.f32 %v2762_v54, %v2760_v46  ;;  %v2756_v44 = vmul.f32 0.5, %v4849_v13  ;;  %v4851_v36 = vpop.eup %4850 }
 0x525   :  { %v2757_v20 = vadd.f32 0.5, %v2755_v49 }
 0x526   :  { %4852 = vtanh.f32 %v5304_v55  ;;  %v2758_v5 = vadd.f32 0.5, %v2756_v44 }
 0x527   :  { %v2767_v14 = vmul.f32 %v4851_v36, %v2757_v20  ;;  %3160 = vmatpush.bf16.msrb.mxu0 %v4706_v3 }
 0x52b   :  { %3161 = vmatpush.bf16.msrb.mxu0 %v4705_v47 }
 0x52c   :  { %v4853_v2 = vpop.eup %4852 }
 0x52d   :  { %v2768_v9 = vmul.f32 %v4853_v2, %v2758_v5 }
 0x52f   :  { %v2786_v27 = vpack.c.bf16 %v2768_v9, %v2767_v14  ;;  %3162 = vmatpush.bf16.msrb.mxu0 %v4704_v48 }
 0x531   :  { %2987 = vmatmul.bf16.vlgmr.msra.gmra.mxu0 %v2786_v27  ;;  %3001 = vmatmul.bf16.vlgmr.msra.gmra.mxu1 %v2786_v27 }
 0x532   :  { %3015 = vmatmul.bf16.vlgmr.msra.gmra.mxu2 %v2786_v27  ;;  %3029 = vmatmul.bf16.vlgmr.msra.gmra.mxu3 %v2786_v27 }
 0x533   :  { %3163 = vmatpush.bf16.msrb.mxu0 %v4703_v39 }
 0x537   :  { %3164 = vmatpush.bf16.msrb.mxu0 %v4702_v40 }
 0x53b   :  { %3165 = vmatpush.bf16.msrb.mxu0 %v4701_v56 }
 0x53f   :  { %3166 = vmatpush.bf16.msrb.mxu0 %v4700_v60 }
 0x5ae   :  { %v2988_v58 = vpop.f32.mrf.mxu0  ;;  %v3002_v30 = vpop.f32.mrf.mxu1 }
 0x5af   :  { %v3035_v23 = vadd.f32 %v2988_v58, %v374_v33  ;;  %v3036_v41 = vadd.f32 %v3002_v30, %v423_v34 }
 0x5b1   :  { %v3045_v24 = vmul.f32 0.5, %v3035_v23  ;;  %v3053_v42 = vmul.f32 0.5, %v3036_v41  ;;  %v4713_v41 = vld [vmem:[%s5363_s5] ss:$0 sm:$0xff] }
 0x5b3   :  { %4854 = vtanh.f32 %v3045_v24 }
 0x5b4   :  { %4856 = vtanh.f32 %v3053_v42 }
 0x5b5   :  { %v3016_v26 = vpop.f32.mrf.mxu2  ;;  %v3030_v63 = vpop.f32.mrf.mxu3 }
 0x5b6   :  { %v3037_v11 = vadd.f32 %v3016_v26, %v472_v8  ;;  %v3038_v15 = vadd.f32 %v3030_v63, %v521_v1  ;;  %v2990_v50 = vpop.f32.mrf.mxu0  ;;  %v3004_v31 = vpop.f32.mrf.mxu1 }
 0x5b7   :  { %v3039_v32 = vadd.f32 %v2990_v50, %v376_v7  ;;  %v3040_v53 = vadd.f32 %v3004_v31, %v425_v6 }
 0x5b8   :  { %4858 = vtanh.f32 %v3037_v11  ;;  %v3063_v52 = vmul.f32 0.5, %v3038_v15 }
 0x5b9   :  { %v4855_v16 = vpop.eup %4854  ;;  %v3046_v35 = vmul.f32 0.5, %v3039_v32  ;;  %v3054_v21 = vmul.f32 0.5, %v3040_v53 }
 0x5ba   :  { %v4857_v59 = vpop.eup %4856  ;;  %v3049_v17 = vmul.f32 0.5, %v4855_v16  ;;  %4860 = vtanh.f32 %v3063_v52 }
 0x5bb   :  { %v3057_v57 = vmul.f32 0.5, %v4857_v59  ;;  %4862 = vtanh.f32 %v3046_v35 }
 0x5bc   :  { %v3051_v61 = vadd.f32 0.5, %v3049_v17  ;;  %4864 = vtanh.f32 %v3054_v21 }
 0x5bd   :  { %v3059_v38 = vadd.f32 0.5, %v3057_v57  ;;  %v3018_v46 = vpop.f32.mrf.mxu2  ;;  %v3032_v54 = vpop.f32.mrf.mxu3 }
 0x5be   :  { %v4859_v18 = vpop.eup %4858  ;;  %v3041_v13 = vadd.f32 %v3018_v46, %v474_v37  ;;  %v3042_v49 = vadd.f32 %v3032_v54, %v523_v45 }
 0x5bf   :  { %v3071_v44 = vmul.f32 %v3059_v38, %v5300_v43  ;;  %v3073_v36 = vmul.f32 %v4859_v18, %v3051_v61 }
 0x5c0   :  { %v4861_v20 = vpop.eup %4860  ;;  %4866 = vtanh.f32 %v3041_v13  ;;  %v3064_v5 = vmul.f32 0.5, %v3042_v49 }
 0x5c1   :  { %v4863_v2 = vpop.eup %4862  ;;  %v3075_v14 = vadd.f32 %v3073_v36, %v3071_v44  ;;  %v3067_v27 = vmul.f32 0.5, %v4861_v20 }
 0x5c2   :  { %v4865_v4 = vpop.eup %4864  ;;  %v3050_v9 = vmul.f32 0.5, %v4863_v2  ;;  %4868 = vtanh.f32 %v3064_v5 }
 0x5c3   :  { %4870 = vtanh.f32 %v3075_v14  ;;  %v3058_v51 = vmul.f32 0.5, %v4865_v4  ;;  %v3069_v43 = vadd.f32 0.5, %v3067_v27 }
 0x5c4   :  { %v3052_v10 = vadd.f32 0.5, %v3050_v9 }
 0x5c5   :  { %v3060_v3 = vadd.f32 0.5, %v3058_v51 }
 0x5c6   :  { %v4867_v47 = vpop.eup %4866 }
 0x5c7   :  { %v3072_v48 = vmul.f32 %v3060_v3, %v5304_v55  ;;  %v3074_v39 = vmul.f32 %v4867_v47, %v3052_v10 }
 0x5c8   :  { %v4869_v40 = vpop.eup %4868 }
 0x5c9   :  { %v4871_v29 = vpop.eup %4870  ;;  %v3076_v33 = vadd.f32 %v3074_v39, %v3072_v48  ;;  %v3068_v34 = vmul.f32 0.5, %v4869_v40 }
 0x5ca   :  { %v3079_v0 = vmul.f32 %v4871_v29, %v3069_v43 }
 0x5cb   :  { %4872 = vtanh.f32 %v3076_v33  ;;  %v3070_v56 = vadd.f32 0.5, %v3068_v34 }
 0x5d1   :  { %v4873_v58 = vpop.eup %4872 }
 0x5d2   :  { %v3080_v30 = vmul.f32 %v4873_v58, %v3070_v56 }
 0x5d4   :  { %v3090_v23 = vpack.c.bf16 %v3080_v30, %v3079_v0 }
 0x5d6   :  { %3167 = vmatmul.bf16.vlgmr.msrb.gmra.mxu0 %v3090_v23 }
 0x653   :  { %v3168_v24 = vpop.f32.mrf.mxu0 }
 0x654   :  { %v3169_v42 = vadd.f32 %v4713_v41, %v3168_v24 }
 0x656   :  { %3173 = vst [vmem:[%s5364_s6] sm:$0xff] %v3169_v42 }
 0x65b   :  { %v3170_v55 = vpop.f32.mrf.mxu0 }
 0x65c   :  { %v3171_v60 = vadd.f32 %v4713_v41, %v3170_v55 }
 0x65e   :  { %3174 = vst [vmem:[%s5364_s6 + $0x8] sm:$0xff] %v3171_v60 }
 0x65f   :  { %3179 = vsyncpa [#allocation6], 1 }
 0x660   :  { %3180 = vsyncpa [#allocation8], 1 }

</bundles_post_ra>
